<compile_context>
chip_gen: v5e
topology: v5e:2x2
jax: 0.10.0
libtpu: 0.0.40
codegen_flags: <defaults>
</compile_context>

<pallas_src>
import numpy as np
import jax
import jax.numpy as jnp
from jax import lax
from jax.experimental import pallas as pl
from jax.experimental.pallas import tpu as pltpu

VOCAB = "abcdefghijklmnopqrstuvwxyz012345"  # 32 symbols


# ----------------------------- Pallas kernels -----------------------------

def _det_kernel(xp_ref, w1_ref, b1_ref, w2_ref, b2_ref, heat_ref):
    """3x3 conv -> relu -> 1x1 conv -> sigmoid over one padded page.

    xp_ref:   (1, C, H+2, Wp+2) bf16 padded page (VMEM)
    w1_ref:   (9*C*M,) f32 conv weights, flat order (dy, dx, c, m)   (SMEM)
    b1_ref:   (M,) f32   w2_ref: (M,) f32   b2_ref: (1,) f32         (SMEM)
    heat_ref: (1, H, Wp) f32 heatmap, Wp % 128 == 0 -> lane-dense stores
    """
    _, C, _Hp, _Wp2 = xp_ref.shape
    _, H, Wp = heat_ref.shape
    M = b1_ref.shape[0]

    # Per-output-channel accumulators, pre-biased (M * 2 vregs at (16, 128)).
    accs = [jnp.full((H, Wp), b1_ref[m], jnp.float32) for m in range(M)]

    # Direct convolution: 9 taps x C channels of (SMEM scalar) * shifted slab
    # FMAs on the VPU -- no im2col, no MXU underutilisation at K=27 / M=8.
    for c in range(C):
        plane = xp_ref[0, c].astype(jnp.float32)            # (H+2, Wp+2) f32
        for dy in range(3):
            for dx in range(3):
                tap = (dy * 3 + dx) * C + c
                slab = plane[dy:dy + H, dx:dx + Wp]          # (H, Wp)
                for m in range(M):
                    accs[m] = accs[m] + w1_ref[tap * M + m] * slab

    # 1x1 conv as a VPU weighted sum over the M channels.
    logits = jnp.full((H, Wp), b2_ref[0], jnp.float32)
    for m in range(M):
        logits = logits + w2_ref[m] * jnp.maximum(accs[m], 0.0)
    heat_ref[0] = jax.nn.sigmoid(logits)                     # full-lane store


def _reco_kernel(x_ref, wrt_ref, br_ref, idx_ref, logc_ref):
    """Crop gather + linear classifier + softmax + argmax, fused per page.

    x_ref:    (1, C, H, W) f32 page (VMEM)
    wrt_ref:  (V, F) bf16 classifier weights (transposed), F = C * (H // 2)
    br_ref:   (V, 1) f32 bias
    idx_ref:  (1, 1, 4*T) int32 per-timestep argmax over the vocab (T = W//2)
    logc_ref: (1, 1, 4)   f32 per-crop sum of log(max prob)  (word log-conf)
    """
    _, C, H, W = x_ref.shape
    gh, gw = H // 2, W // 2
    V = wrt_ref.shape[0]

    x = x_ref[0]                                             # (C, H, W)
    idx_parts, logc_parts = [], []
    for gy in range(2):
        for gx in range(2):
            crop = x[:, gy * gh:(gy + 1) * gh, gx * gw:(gx + 1) * gw]  # (C,gh,gw)
            # Sequence over the crop width, features = column pixels (c, h).
            # Transposed (F, T) layout keeps timesteps on the lane axis so the
            # softmax/argmax are cheap sublane reduces and outputs come out
            # lane-major; bf16 operands, f32 accumulation on the MXU.
            feats_t = crop.reshape(C * gh, gw).astype(jnp.bfloat16)     # (F, T)
            logits = jnp.dot(wrt_ref[...], feats_t,
                             preferred_element_type=jnp.float32)        # (V, T)
            logits = logits + br_ref[...]
            m = jnp.max(logits, axis=0, keepdims=True)                  # (1, T)
            z = jnp.sum(jnp.exp(logits - m), axis=0, keepdims=True)     # (1, T)
            maxp = pl.reciprocal(z, approx=True)        # max softmax prob = 1/Z
            iota_v = lax.broadcasted_iota(jnp.int32, logits.shape, 0)   # (V, T)
            idx = jnp.min(jnp.where(logits == m, iota_v, V),
                          axis=0, keepdims=True)                        # (1, T)
            idx_parts.append(idx)
            logc_parts.append(jnp.sum(jnp.log(maxp), axis=1, keepdims=True))
    idx_ref[0] = jnp.concatenate(idx_parts, axis=1)                     # (1,4*T)
    logc_ref[0] = jnp.concatenate(logc_parts, axis=1)                   # (1, 4)


def det_pallas(xpad, w1_flat, b1, w2, b2):
    B, C, Hp, Wp2 = xpad.shape
    H, Wp = Hp - 2, Wp2 - 2
    smem = pl.BlockSpec(memory_space=pltpu.MemorySpace.SMEM)
    return pl.pallas_call(
        _det_kernel,
        out_shape=jax.ShapeDtypeStruct((B, H, Wp), jnp.float32),
        grid=(B,),
        in_specs=[
            pl.BlockSpec((1, C, Hp, Wp2), lambda b: (b, 0, 0, 0)),
            smem, smem, smem, smem,
        ],
        out_specs=pl.BlockSpec((1, H, Wp), lambda b: (b, 0, 0)),
        # pages shard across the 2 TensorCores on v7x; harmless on v5e/v6e
        compiler_params=pltpu.CompilerParams(dimension_semantics=("parallel",)),
    )(xpad, w1_flat, b1, w2, b2)


def reco_pallas(x, wrt, br):
    B, C, H, W = x.shape
    gw = W // 2
    V, F = wrt.shape
    assert F == C * (H // 2)
    return pl.pallas_call(
        _reco_kernel,
        out_shape=(jax.ShapeDtypeStruct((B, 1, 4 * gw), jnp.int32),
                   jax.ShapeDtypeStruct((B, 1, 4), jnp.float32)),
        grid=(B,),
        in_specs=[
            pl.BlockSpec((1, C, H, W), lambda b: (b, 0, 0, 0)),
            pl.BlockSpec((V, F), lambda b: (0, 0)),
            pl.BlockSpec((V, 1), lambda b: (0, 0)),
        ],
        out_specs=(pl.BlockSpec((1, 1, 4 * gw), lambda b: (b, 0, 0)),
                   pl.BlockSpec((1, 1, 4), lambda b: (b, 0, 0))),
        compiler_params=pltpu.CompilerParams(dimension_semantics=("parallel",)),
    )(x, wrt, br)


# --------------------------- predictor modules -----------------------------

class DetectionPredictor:
    """Tiny conv-net text detector: 3x3 conv -> relu -> 1x1 conv -> sigmoid."""

    def __init__(self, key, cin=3, cmid=8):
        k1, k2 = jax.random.split(key)
        self.cin, self.cmid = cin, cmid
        w1 = (0.1 * jax.random.normal(k1, (3, 3, cin, cmid))).astype(jnp.float32)
        self.w1_flat = w1.reshape(-1)            # flat (dy, dx, c, m) for SMEM
        self.b1 = jnp.zeros((cmid,), jnp.float32)
        self.w2 = (0.1 * jax.random.normal(k2, (cmid,))).astype(jnp.float32)
        self.b2 = jnp.zeros((1,), jnp.float32)

    def eval(self):
        return self

    def __call__(self, x_nchw):
        B, C, H, W = x_nchw.shape
        # Pad width to a multiple of 128 (lane-dense heat stores) + 1px halo
        # for the 3x3 conv; bf16 halves HBM traffic, VPU math stays f32.
        wpad = ((max(W, 128) + 127) // 128) * 128
        xpad = jnp.pad(x_nchw.astype(jnp.bfloat16),
                       ((0, 0), (0, 0), (1, 1), (1, wpad + 1 - W)))
        heat = det_pallas(xpad, self.w1_flat, self.b1, self.w2, self.b2)
        return heat[:, :, :W]                                 # (B, H, W)


class RecognitionPredictor:
    """Per-crop character classifier: linear + softmax over the vocab.

    The 2x2 static-grid crop extraction, feature gathering, argmax and
    per-word log-probability reduction are fused into the Pallas kernel.
    """

    def __init__(self, key, feat_dim=24, vocab_size=len(VOCAB)):
        k1, _ = jax.random.split(key)
        # Stored transposed (V, F), bf16 for the MXU (f32 accumulation).
        self.wr_t = (0.1 * jax.random.normal(k1, (vocab_size, feat_dim))
                     ).astype(jnp.bfloat16)
        self.br = jnp.zeros((vocab_size, 1), jnp.float32)

    def eval(self):
        return self

    def __call__(self, x_nchw):
        return reco_pallas(x_nchw, self.wr_t, self.br)


class OCRPredictor:
    """JAX/Pallas re-implementation of doctr's OCRPredictor forward pass."""

    def __init__(self, det_predictor, reco_predictor, assume_straight_pages=True,
                 straighten_pages=False, preserve_aspect_ratio=False,
                 symmetric_pad=True):
        self.det_predictor = det_predictor.eval()
        self.reco_predictor = reco_predictor.eval()
        self.assume_straight_pages = assume_straight_pages
        self.straighten_pages = straighten_pages
        self.preserve_aspect_ratio = preserve_aspect_ratio
        self.symmetric_pad = symmetric_pad
        self._debug = {}

    def __call__(self, pages):
        return self.forward(pages)

    def forward(self, pages):
        if any(p.ndim != 3 for p in pages):
            raise ValueError("incorrect input shape: all pages are expected to "
                             "be multi-channel 2D images.")
        # pages are channels-first (torch convention): (C, H, W)
        origin_page_shapes = [tuple(p.shape[-2:]) for p in pages]

        if self.straighten_pages:
            # TODO(synk): estimate_orientation / rotate_image are CV geometric
            # ops with no Pallas equivalent; skipped (straighten_pages=False).
            pass

        x = jnp.stack([jnp.asarray(p, jnp.float32) for p in pages])  # (B,C,H,W)
        B, C, H, W = x.shape
        gh, gw = H // 2, W // 2

        # --- detection (Pallas kernel) ---
        heat = self.det_predictor(x)                                  # (B,H,W)
        # _remove_padding: identity when preserve_aspect_ratio=False.
        # loc_preds: fixed 2x2 grid of boxes, confidence = mean heat per region
        conf = heat.reshape(B, 2, gh, 2, gw).mean(axis=(2, 4))        # (B,2,2)

        # --- recognition (Pallas kernel), dispatched BEFORE any host sync so
        #     the detection read-back overlaps it ---
        idx_dev, logc_dev = self.reco_predictor(x)  # (B,1,4*gw) i32, (B,1,4) f32

        self._debug = {"heat": heat, "idx": idx_dev, "logconf": logc_dev}

        # host transfers (both kernels are already in flight)
        conf_np = np.asarray(conf)
        idx_np = np.asarray(idx_dev)[:, 0, :]                         # (B,4*gw)
        logc_np = np.asarray(logc_dev)[:, 0, :]                       # (B,4)

        loc_preds = []
        for b in range(B):
            page_boxes = []
            for gy in range(2):
                for gx in range(2):
                    page_boxes.append([gx * 0.5, gy * 0.5, (gx + 1) * 0.5,
                                       (gy + 1) * 0.5, float(conf_np[b, gy, gx])])
            loc_preds.append(np.asarray(page_boxes, np.float32))      # (4, 5)

        # decode words; confidence accumulated in log space (no underflow)
        T = gw
        word_preds = []
        for b in range(B):
            for k in range(4):
                chars = idx_np[b, k * T:(k + 1) * T]
                word_preds.append(("".join(VOCAB[int(i)] for i in chars),
                                   float(np.exp(logc_np[b, k]))))

        # _process_predictions
        boxes = [lp[:, :4] for lp in loc_preds]
        text_preds = [word_preds[b * 4:(b + 1) * 4] for b in range(B)]

        # doc_builder
        out = {
            "pages": [
                {
                    "page_idx": b,
                    "dimensions": origin_page_shapes[b],
                    "words": [
                        {"value": w, "confidence": c,
                         "geometry": boxes[b][i].tolist()}
                        for i, (w, c) in enumerate(text_preds[b])
                    ],
                }
                for b in range(B)
            ]
        }
        return out, boxes, text_preds


# --------------------------------- main ------------------------------------

if __name__ == "__main__":
    key = jax.random.PRNGKey(0)
    k_det, k_reco, k_pages = jax.random.split(key, 3)

    # 2 pages, channels-first (torch-like): (C=3, H=16, W=16)
    pages = [jax.random.uniform(k, (3, 16, 16), dtype=jnp.float32)
             for k in jax.random.split(k_pages, 2)]

    det = DetectionPredictor(k_det, cin=3, cmid=8)
    reco = RecognitionPredictor(k_reco, feat_dim=8 * 3, vocab_size=len(VOCAB))
    predictor = OCRPredictor(det, reco)

    out, boxes, text_preds = predictor(pages)

    jax.block_until_ready(predictor._debug["heat"])
    jax.block_until_ready(predictor._debug["idx"])
    jax.block_until_ready(predictor._debug["logconf"])

    assert len(out["pages"]) == 2
    assert len(boxes) == 2 and boxes[0].shape == (4, 4)
    assert len(text_preds) == 2 and len(text_preds[0]) == 4
    assert all(len(w) == 8 and set(w) <= set(VOCAB)
               for page in text_preds for w, _ in page)
    assert all(0.0 < c <= 1.01 for page in text_preds for _, c in page)

    print("KERNEL_OK")
</pallas_src>

<mosaic_0001>
module attributes {stable_mosaic.version = 11 : i64} {
  func.func @_det_kernel(%arg0: i32, %arg1: memref<1x3x18x130xbf16, #tpu.memory_space<vmem>>, %arg2: memref<216xf32, #tpu.memory_space<smem>>, %arg3: memref<8xf32, #tpu.memory_space<smem>>, %arg4: memref<8xf32, #tpu.memory_space<smem>>, %arg5: memref<1xf32, #tpu.memory_space<smem>>, %arg6: memref<1x16x128xf32, #tpu.memory_space<vmem>>) attributes {dimension_semantics = [#tpu.dimension_semantics<parallel>], iteration_bounds = array<i64: 2>, scalar_prefetch = 0 : i64, scratch_operands = 0 : i64, tpu.core_type = #tpu.core_type<tc>, window_params = [{transform_indices = @transform_0, window_bounds = array<i64: 1, 3, 18, 130>}, {transform_indices = @transform_1, window_bounds = array<i64: 216>}, {transform_indices = @transform_2, window_bounds = array<i64: 8>}, {transform_indices = @transform_3, window_bounds = array<i64: 8>}, {transform_indices = @transform_4, window_bounds = array<i64: 1>}, {transform_indices = @transform_5, window_bounds = array<i64: 1, 16, 128>}]} {
    %c0 = arith.constant 0 : index
    %0 = memref.load %arg3[%c0] : memref<8xf32, #tpu.memory_space<smem>>
    %1 = vector.broadcast %0 : f32 to vector<16x128xf32>
    %c1 = arith.constant 1 : index
    %2 = memref.load %arg3[%c1] : memref<8xf32, #tpu.memory_space<smem>>
    %3 = vector.broadcast %2 : f32 to vector<16x128xf32>
    %c2 = arith.constant 2 : index
    %4 = memref.load %arg3[%c2] : memref<8xf32, #tpu.memory_space<smem>>
    %5 = vector.broadcast %4 : f32 to vector<16x128xf32>
    %c3 = arith.constant 3 : index
    %6 = memref.load %arg3[%c3] : memref<8xf32, #tpu.memory_space<smem>>
    %7 = vector.broadcast %6 : f32 to vector<16x128xf32>
    %c4 = arith.constant 4 : index
    %8 = memref.load %arg3[%c4] : memref<8xf32, #tpu.memory_space<smem>>
    %9 = vector.broadcast %8 : f32 to vector<16x128xf32>
    %c5 = arith.constant 5 : index
    %10 = memref.load %arg3[%c5] : memref<8xf32, #tpu.memory_space<smem>>
    %11 = vector.broadcast %10 : f32 to vector<16x128xf32>
    %c6 = arith.constant 6 : index
    %12 = memref.load %arg3[%c6] : memref<8xf32, #tpu.memory_space<smem>>
    %13 = vector.broadcast %12 : f32 to vector<16x128xf32>
    %c7 = arith.constant 7 : index
    %14 = memref.load %arg3[%c7] : memref<8xf32, #tpu.memory_space<smem>>
    %15 = vector.broadcast %14 : f32 to vector<16x128xf32>
    %c0_0 = arith.constant 0 : index
    %c0_1 = arith.constant 0 : index
    %c0_2 = arith.constant 0 : index
    %c0_3 = arith.constant 0 : index
    %16 = vector.load %arg1[%c0_0, %c0_1, %c0_2, %c0_3] : memref<1x3x18x130xbf16, #tpu.memory_space<vmem>>, vector<1x1x18x130xbf16>
    %17 = vector.shape_cast %16 : vector<1x1x18x130xbf16> to vector<18x130xbf16>
    %18 = arith.extf %17 : vector<18x130xbf16> to vector<18x130xf32>
    %19 = vector.extract_strided_slice %18 {offsets = [0, 0], sizes = [16, 128], strides = [1, 1]} : vector<18x130xf32> to vector<16x128xf32>
    %c0_4 = arith.constant 0 : index
    %20 = memref.load %arg2[%c0_4] : memref<216xf32, #tpu.memory_space<smem>>
    %21 = vector.broadcast %20 : f32 to vector<16x128xf32>
    %22 = arith.mulf %21, %19 : vector<16x128xf32>
    %23 = arith.addf %1, %22 : vector<16x128xf32>
    %c1_5 = arith.constant 1 : index
    %24 = memref.load %arg2[%c1_5] : memref<216xf32, #tpu.memory_space<smem>>
    %25 = vector.broadcast %24 : f32 to vector<16x128xf32>
    %26 = arith.mulf %25, %19 : vector<16x128xf32>
    %27 = arith.addf %3, %26 : vector<16x128xf32>
    %c2_6 = arith.constant 2 : index
    %28 = memref.load %arg2[%c2_6] : memref<216xf32, #tpu.memory_space<smem>>
    %29 = vector.broadcast %28 : f32 to vector<16x128xf32>
    %30 = arith.mulf %29, %19 : vector<16x128xf32>
    %31 = arith.addf %5, %30 : vector<16x128xf32>
    %c3_7 = arith.constant 3 : index
    %32 = memref.load %arg2[%c3_7] : memref<216xf32, #tpu.memory_space<smem>>
    %33 = vector.broadcast %32 : f32 to vector<16x128xf32>
    %34 = arith.mulf %33, %19 : vector<16x128xf32>
    %35 = arith.addf %7, %34 : vector<16x128xf32>
    %c4_8 = arith.constant 4 : index
    %36 = memref.load %arg2[%c4_8] : memref<216xf32, #tpu.memory_space<smem>>
    %37 = vector.broadcast %36 : f32 to vector<16x128xf32>
    %38 = arith.mulf %37, %19 : vector<16x128xf32>
    %39 = arith.addf %9, %38 : vector<16x128xf32>
    %c5_9 = arith.constant 5 : index
    %40 = memref.load %arg2[%c5_9] : memref<216xf32, #tpu.memory_space<smem>>
    %41 = vector.broadcast %40 : f32 to vector<16x128xf32>
    %42 = arith.mulf %41, %19 : vector<16x128xf32>
    %43 = arith.addf %11, %42 : vector<16x128xf32>
    %c6_10 = arith.constant 6 : index
    %44 = memref.load %arg2[%c6_10] : memref<216xf32, #tpu.memory_space<smem>>
    %45 = vector.broadcast %44 : f32 to vector<16x128xf32>
    %46 = arith.mulf %45, %19 : vector<16x128xf32>
    %47 = arith.addf %13, %46 : vector<16x128xf32>
    %c7_11 = arith.constant 7 : index
    %48 = memref.load %arg2[%c7_11] : memref<216xf32, #tpu.memory_space<smem>>
    %49 = vector.broadcast %48 : f32 to vector<16x128xf32>
    %50 = arith.mulf %49, %19 : vector<16x128xf32>
    %51 = arith.addf %15, %50 : vector<16x128xf32>
    %52 = vector.extract_strided_slice %18 {offsets = [0, 1], sizes = [16, 128], strides = [1, 1]} : vector<18x130xf32> to vector<16x128xf32>
    %c24 = arith.constant 24 : index
    %53 = memref.load %arg2[%c24] : memref<216xf32, #tpu.memory_space<smem>>
    %54 = vector.broadcast %53 : f32 to vector<16x128xf32>
    %55 = arith.mulf %54, %52 : vector<16x128xf32>
    %56 = arith.addf %23, %55 : vector<16x128xf32>
    %c25 = arith.constant 25 : index
    %57 = memref.load %arg2[%c25] : memref<216xf32, #tpu.memory_space<smem>>
    %58 = vector.broadcast %57 : f32 to vector<16x128xf32>
    %59 = arith.mulf %58, %52 : vector<16x128xf32>
    %60 = arith.addf %27, %59 : vector<16x128xf32>
    %c26 = arith.constant 26 : index
    %61 = memref.load %arg2[%c26] : memref<216xf32, #tpu.memory_space<smem>>
    %62 = vector.broadcast %61 : f32 to vector<16x128xf32>
    %63 = arith.mulf %62, %52 : vector<16x128xf32>
    %64 = arith.addf %31, %63 : vector<16x128xf32>
    %c27 = arith.constant 27 : index
    %65 = memref.load %arg2[%c27] : memref<216xf32, #tpu.memory_space<smem>>
    %66 = vector.broadcast %65 : f32 to vector<16x128xf32>
    %67 = arith.mulf %66, %52 : vector<16x128xf32>
    %68 = arith.addf %35, %67 : vector<16x128xf32>
    %c28 = arith.constant 28 : index
    %69 = memref.load %arg2[%c28] : memref<216xf32, #tpu.memory_space<smem>>
    %70 = vector.broadcast %69 : f32 to vector<16x128xf32>
    %71 = arith.mulf %70, %52 : vector<16x128xf32>
    %72 = arith.addf %39, %71 : vector<16x128xf32>
    %c29 = arith.constant 29 : index
    %73 = memref.load %arg2[%c29] : memref<216xf32, #tpu.memory_space<smem>>
    %74 = vector.broadcast %73 : f32 to vector<16x128xf32>
    %75 = arith.mulf %74, %52 : vector<16x128xf32>
    %76 = arith.addf %43, %75 : vector<16x128xf32>
    %c30 = arith.constant 30 : index
    %77 = memref.load %arg2[%c30] : memref<216xf32, #tpu.memory_space<smem>>
    %78 = vector.broadcast %77 : f32 to vector<16x128xf32>
    %79 = arith.mulf %78, %52 : vector<16x128xf32>
    %80 = arith.addf %47, %79 : vector<16x128xf32>
    %c31 = arith.constant 31 : index
    %81 = memref.load %arg2[%c31] : memref<216xf32, #tpu.memory_space<smem>>
    %82 = vector.broadcast %81 : f32 to vector<16x128xf32>
    %83 = arith.mulf %82, %52 : vector<16x128xf32>
    %84 = arith.addf %51, %83 : vector<16x128xf32>
    %85 = vector.extract_strided_slice %18 {offsets = [0, 2], sizes = [16, 128], strides = [1, 1]} : vector<18x130xf32> to vector<16x128xf32>
    %c48 = arith.constant 48 : index
    %86 = memref.load %arg2[%c48] : memref<216xf32, #tpu.memory_space<smem>>
    %87 = vector.broadcast %86 : f32 to vector<16x128xf32>
    %88 = arith.mulf %87, %85 : vector<16x128xf32>
    %89 = arith.addf %56, %88 : vector<16x128xf32>
    %c49 = arith.constant 49 : index
    %90 = memref.load %arg2[%c49] : memref<216xf32, #tpu.memory_space<smem>>
    %91 = vector.broadcast %90 : f32 to vector<16x128xf32>
    %92 = arith.mulf %91, %85 : vector<16x128xf32>
    %93 = arith.addf %60, %92 : vector<16x128xf32>
    %c50 = arith.constant 50 : index
    %94 = memref.load %arg2[%c50] : memref<216xf32, #tpu.memory_space<smem>>
    %95 = vector.broadcast %94 : f32 to vector<16x128xf32>
    %96 = arith.mulf %95, %85 : vector<16x128xf32>
    %97 = arith.addf %64, %96 : vector<16x128xf32>
    %c51 = arith.constant 51 : index
    %98 = memref.load %arg2[%c51] : memref<216xf32, #tpu.memory_space<smem>>
    %99 = vector.broadcast %98 : f32 to vector<16x128xf32>
    %100 = arith.mulf %99, %85 : vector<16x128xf32>
    %101 = arith.addf %68, %100 : vector<16x128xf32>
    %c52 = arith.constant 52 : index
    %102 = memref.load %arg2[%c52] : memref<216xf32, #tpu.memory_space<smem>>
    %103 = vector.broadcast %102 : f32 to vector<16x128xf32>
    %104 = arith.mulf %103, %85 : vector<16x128xf32>
    %105 = arith.addf %72, %104 : vector<16x128xf32>
    %c53 = arith.constant 53 : index
    %106 = memref.load %arg2[%c53] : memref<216xf32, #tpu.memory_space<smem>>
    %107 = vector.broadcast %106 : f32 to vector<16x128xf32>
    %108 = arith.mulf %107, %85 : vector<16x128xf32>
    %109 = arith.addf %76, %108 : vector<16x128xf32>
    %c54 = arith.constant 54 : index
    %110 = memref.load %arg2[%c54] : memref<216xf32, #tpu.memory_space<smem>>
    %111 = vector.broadcast %110 : f32 to vector<16x128xf32>
    %112 = arith.mulf %111, %85 : vector<16x128xf32>
    %113 = arith.addf %80, %112 : vector<16x128xf32>
    %c55 = arith.constant 55 : index
    %114 = memref.load %arg2[%c55] : memref<216xf32, #tpu.memory_space<smem>>
    %115 = vector.broadcast %114 : f32 to vector<16x128xf32>
    %116 = arith.mulf %115, %85 : vector<16x128xf32>
    %117 = arith.addf %84, %116 : vector<16x128xf32>
    %118 = vector.extract_strided_slice %18 {offsets = [1, 0], sizes = [16, 128], strides = [1, 1]} : vector<18x130xf32> to vector<16x128xf32>
    %c72 = arith.constant 72 : index
    %119 = memref.load %arg2[%c72] : memref<216xf32, #tpu.memory_space<smem>>
    %120 = vector.broadcast %119 : f32 to vector<16x128xf32>
    %121 = arith.mulf %120, %118 : vector<16x128xf32>
    %122 = arith.addf %89, %121 : vector<16x128xf32>
    %c73 = arith.constant 73 : index
    %123 = memref.load %arg2[%c73] : memref<216xf32, #tpu.memory_space<smem>>
    %124 = vector.broadcast %123 : f32 to vector<16x128xf32>
    %125 = arith.mulf %124, %118 : vector<16x128xf32>
    %126 = arith.addf %93, %125 : vector<16x128xf32>
    %c74 = arith.constant 74 : index
    %127 = memref.load %arg2[%c74] : memref<216xf32, #tpu.memory_space<smem>>
    %128 = vector.broadcast %127 : f32 to vector<16x128xf32>
    %129 = arith.mulf %128, %118 : vector<16x128xf32>
    %130 = arith.addf %97, %129 : vector<16x128xf32>
    %c75 = arith.constant 75 : index
    %131 = memref.load %arg2[%c75] : memref<216xf32, #tpu.memory_space<smem>>
    %132 = vector.broadcast %131 : f32 to vector<16x128xf32>
    %133 = arith.mulf %132, %118 : vector<16x128xf32>
    %134 = arith.addf %101, %133 : vector<16x128xf32>
    %c76 = arith.constant 76 : index
    %135 = memref.load %arg2[%c76] : memref<216xf32, #tpu.memory_space<smem>>
    %136 = vector.broadcast %135 : f32 to vector<16x128xf32>
    %137 = arith.mulf %136, %118 : vector<16x128xf32>
    %138 = arith.addf %105, %137 : vector<16x128xf32>
    %c77 = arith.constant 77 : index
    %139 = memref.load %arg2[%c77] : memref<216xf32, #tpu.memory_space<smem>>
    %140 = vector.broadcast %139 : f32 to vector<16x128xf32>
    %141 = arith.mulf %140, %118 : vector<16x128xf32>
    %142 = arith.addf %109, %141 : vector<16x128xf32>
    %c78 = arith.constant 78 : index
    %143 = memref.load %arg2[%c78] : memref<216xf32, #tpu.memory_space<smem>>
    %144 = vector.broadcast %143 : f32 to vector<16x128xf32>
    %145 = arith.mulf %144, %118 : vector<16x128xf32>
    %146 = arith.addf %113, %145 : vector<16x128xf32>
    %c79 = arith.constant 79 : index
    %147 = memref.load %arg2[%c79] : memref<216xf32, #tpu.memory_space<smem>>
    %148 = vector.broadcast %147 : f32 to vector<16x128xf32>
    %149 = arith.mulf %148, %118 : vector<16x128xf32>
    %150 = arith.addf %117, %149 : vector<16x128xf32>
    %151 = vector.extract_strided_slice %18 {offsets = [1, 1], sizes = [16, 128], strides = [1, 1]} : vector<18x130xf32> to vector<16x128xf32>
    %c96 = arith.constant 96 : index
    %152 = memref.load %arg2[%c96] : memref<216xf32, #tpu.memory_space<smem>>
    %153 = vector.broadcast %152 : f32 to vector<16x128xf32>
    %154 = arith.mulf %153, %151 : vector<16x128xf32>
    %155 = arith.addf %122, %154 : vector<16x128xf32>
    %c97 = arith.constant 97 : index
    %156 = memref.load %arg2[%c97] : memref<216xf32, #tpu.memory_space<smem>>
    %157 = vector.broadcast %156 : f32 to vector<16x128xf32>
    %158 = arith.mulf %157, %151 : vector<16x128xf32>
    %159 = arith.addf %126, %158 : vector<16x128xf32>
    %c98 = arith.constant 98 : index
    %160 = memref.load %arg2[%c98] : memref<216xf32, #tpu.memory_space<smem>>
    %161 = vector.broadcast %160 : f32 to vector<16x128xf32>
    %162 = arith.mulf %161, %151 : vector<16x128xf32>
    %163 = arith.addf %130, %162 : vector<16x128xf32>
    %c99 = arith.constant 99 : index
    %164 = memref.load %arg2[%c99] : memref<216xf32, #tpu.memory_space<smem>>
    %165 = vector.broadcast %164 : f32 to vector<16x128xf32>
    %166 = arith.mulf %165, %151 : vector<16x128xf32>
    %167 = arith.addf %134, %166 : vector<16x128xf32>
    %c100 = arith.constant 100 : index
    %168 = memref.load %arg2[%c100] : memref<216xf32, #tpu.memory_space<smem>>
    %169 = vector.broadcast %168 : f32 to vector<16x128xf32>
    %170 = arith.mulf %169, %151 : vector<16x128xf32>
    %171 = arith.addf %138, %170 : vector<16x128xf32>
    %c101 = arith.constant 101 : index
    %172 = memref.load %arg2[%c101] : memref<216xf32, #tpu.memory_space<smem>>
    %173 = vector.broadcast %172 : f32 to vector<16x128xf32>
    %174 = arith.mulf %173, %151 : vector<16x128xf32>
    %175 = arith.addf %142, %174 : vector<16x128xf32>
    %c102 = arith.constant 102 : index
    %176 = memref.load %arg2[%c102] : memref<216xf32, #tpu.memory_space<smem>>
    %177 = vector.broadcast %176 : f32 to vector<16x128xf32>
    %178 = arith.mulf %177, %151 : vector<16x128xf32>
    %179 = arith.addf %146, %178 : vector<16x128xf32>
    %c103 = arith.constant 103 : index
    %180 = memref.load %arg2[%c103] : memref<216xf32, #tpu.memory_space<smem>>
    %181 = vector.broadcast %180 : f32 to vector<16x128xf32>
    %182 = arith.mulf %181, %151 : vector<16x128xf32>
    %183 = arith.addf %150, %182 : vector<16x128xf32>
    %184 = vector.extract_strided_slice %18 {offsets = [1, 2], sizes = [16, 128], strides = [1, 1]} : vector<18x130xf32> to vector<16x128xf32>
    %c120 = arith.constant 120 : index
    %185 = memref.load %arg2[%c120] : memref<216xf32, #tpu.memory_space<smem>>
    %186 = vector.broadcast %185 : f32 to vector<16x128xf32>
    %187 = arith.mulf %186, %184 : vector<16x128xf32>
    %188 = arith.addf %155, %187 : vector<16x128xf32>
    %c121 = arith.constant 121 : index
    %189 = memref.load %arg2[%c121] : memref<216xf32, #tpu.memory_space<smem>>
    %190 = vector.broadcast %189 : f32 to vector<16x128xf32>
    %191 = arith.mulf %190, %184 : vector<16x128xf32>
    %192 = arith.addf %159, %191 : vector<16x128xf32>
    %c122 = arith.constant 122 : index
    %193 = memref.load %arg2[%c122] : memref<216xf32, #tpu.memory_space<smem>>
    %194 = vector.broadcast %193 : f32 to vector<16x128xf32>
    %195 = arith.mulf %194, %184 : vector<16x128xf32>
    %196 = arith.addf %163, %195 : vector<16x128xf32>
    %c123 = arith.constant 123 : index
    %197 = memref.load %arg2[%c123] : memref<216xf32, #tpu.memory_space<smem>>
    %198 = vector.broadcast %197 : f32 to vector<16x128xf32>
    %199 = arith.mulf %198, %184 : vector<16x128xf32>
    %200 = arith.addf %167, %199 : vector<16x128xf32>
    %c124 = arith.constant 124 : index
    %201 = memref.load %arg2[%c124] : memref<216xf32, #tpu.memory_space<smem>>
    %202 = vector.broadcast %201 : f32 to vector<16x128xf32>
    %203 = arith.mulf %202, %184 : vector<16x128xf32>
    %204 = arith.addf %171, %203 : vector<16x128xf32>
    %c125 = arith.constant 125 : index
    %205 = memref.load %arg2[%c125] : memref<216xf32, #tpu.memory_space<smem>>
    %206 = vector.broadcast %205 : f32 to vector<16x128xf32>
    %207 = arith.mulf %206, %184 : vector<16x128xf32>
    %208 = arith.addf %175, %207 : vector<16x128xf32>
    %c126 = arith.constant 126 : index
    %209 = memref.load %arg2[%c126] : memref<216xf32, #tpu.memory_space<smem>>
    %210 = vector.broadcast %209 : f32 to vector<16x128xf32>
    %211 = arith.mulf %210, %184 : vector<16x128xf32>
    %212 = arith.addf %179, %211 : vector<16x128xf32>
    %c127 = arith.constant 127 : index
    %213 = memref.load %arg2[%c127] : memref<216xf32, #tpu.memory_space<smem>>
    %214 = vector.broadcast %213 : f32 to vector<16x128xf32>
    %215 = arith.mulf %214, %184 : vector<16x128xf32>
    %216 = arith.addf %183, %215 : vector<16x128xf32>
    %217 = vector.extract_strided_slice %18 {offsets = [2, 0], sizes = [16, 128], strides = [1, 1]} : vector<18x130xf32> to vector<16x128xf32>
    %c144 = arith.constant 144 : index
    %218 = memref.load %arg2[%c144] : memref<216xf32, #tpu.memory_space<smem>>
    %219 = vector.broadcast %218 : f32 to vector<16x128xf32>
    %220 = arith.mulf %219, %217 : vector<16x128xf32>
    %221 = arith.addf %188, %220 : vector<16x128xf32>
    %c145 = arith.constant 145 : index
    %222 = memref.load %arg2[%c145] : memref<216xf32, #tpu.memory_space<smem>>
    %223 = vector.broadcast %222 : f32 to vector<16x128xf32>
    %224 = arith.mulf %223, %217 : vector<16x128xf32>
    %225 = arith.addf %192, %224 : vector<16x128xf32>
    %c146 = arith.constant 146 : index
    %226 = memref.load %arg2[%c146] : memref<216xf32, #tpu.memory_space<smem>>
    %227 = vector.broadcast %226 : f32 to vector<16x128xf32>
    %228 = arith.mulf %227, %217 : vector<16x128xf32>
    %229 = arith.addf %196, %228 : vector<16x128xf32>
    %c147 = arith.constant 147 : index
    %230 = memref.load %arg2[%c147] : memref<216xf32, #tpu.memory_space<smem>>
    %231 = vector.broadcast %230 : f32 to vector<16x128xf32>
    %232 = arith.mulf %231, %217 : vector<16x128xf32>
    %233 = arith.addf %200, %232 : vector<16x128xf32>
    %c148 = arith.constant 148 : index
    %234 = memref.load %arg2[%c148] : memref<216xf32, #tpu.memory_space<smem>>
    %235 = vector.broadcast %234 : f32 to vector<16x128xf32>
    %236 = arith.mulf %235, %217 : vector<16x128xf32>
    %237 = arith.addf %204, %236 : vector<16x128xf32>
    %c149 = arith.constant 149 : index
    %238 = memref.load %arg2[%c149] : memref<216xf32, #tpu.memory_space<smem>>
    %239 = vector.broadcast %238 : f32 to vector<16x128xf32>
    %240 = arith.mulf %239, %217 : vector<16x128xf32>
    %241 = arith.addf %208, %240 : vector<16x128xf32>
    %c150 = arith.constant 150 : index
    %242 = memref.load %arg2[%c150] : memref<216xf32, #tpu.memory_space<smem>>
    %243 = vector.broadcast %242 : f32 to vector<16x128xf32>
    %244 = arith.mulf %243, %217 : vector<16x128xf32>
    %245 = arith.addf %212, %244 : vector<16x128xf32>
    %c151 = arith.constant 151 : index
    %246 = memref.load %arg2[%c151] : memref<216xf32, #tpu.memory_space<smem>>
    %247 = vector.broadcast %246 : f32 to vector<16x128xf32>
    %248 = arith.mulf %247, %217 : vector<16x128xf32>
    %249 = arith.addf %216, %248 : vector<16x128xf32>
    %250 = vector.extract_strided_slice %18 {offsets = [2, 1], sizes = [16, 128], strides = [1, 1]} : vector<18x130xf32> to vector<16x128xf32>
    %c168 = arith.constant 168 : index
    %251 = memref.load %arg2[%c168] : memref<216xf32, #tpu.memory_space<smem>>
    %252 = vector.broadcast %251 : f32 to vector<16x128xf32>
    %253 = arith.mulf %252, %250 : vector<16x128xf32>
    %254 = arith.addf %221, %253 : vector<16x128xf32>
    %c169 = arith.constant 169 : index
    %255 = memref.load %arg2[%c169] : memref<216xf32, #tpu.memory_space<smem>>
    %256 = vector.broadcast %255 : f32 to vector<16x128xf32>
    %257 = arith.mulf %256, %250 : vector<16x128xf32>
    %258 = arith.addf %225, %257 : vector<16x128xf32>
    %c170 = arith.constant 170 : index
    %259 = memref.load %arg2[%c170] : memref<216xf32, #tpu.memory_space<smem>>
    %260 = vector.broadcast %259 : f32 to vector<16x128xf32>
    %261 = arith.mulf %260, %250 : vector<16x128xf32>
    %262 = arith.addf %229, %261 : vector<16x128xf32>
    %c171 = arith.constant 171 : index
    %263 = memref.load %arg2[%c171] : memref<216xf32, #tpu.memory_space<smem>>
    %264 = vector.broadcast %263 : f32 to vector<16x128xf32>
    %265 = arith.mulf %264, %250 : vector<16x128xf32>
    %266 = arith.addf %233, %265 : vector<16x128xf32>
    %c172 = arith.constant 172 : index
    %267 = memref.load %arg2[%c172] : memref<216xf32, #tpu.memory_space<smem>>
    %268 = vector.broadcast %267 : f32 to vector<16x128xf32>
    %269 = arith.mulf %268, %250 : vector<16x128xf32>
    %270 = arith.addf %237, %269 : vector<16x128xf32>
    %c173 = arith.constant 173 : index
    %271 = memref.load %arg2[%c173] : memref<216xf32, #tpu.memory_space<smem>>
    %272 = vector.broadcast %271 : f32 to vector<16x128xf32>
    %273 = arith.mulf %272, %250 : vector<16x128xf32>
    %274 = arith.addf %241, %273 : vector<16x128xf32>
    %c174 = arith.constant 174 : index
    %275 = memref.load %arg2[%c174] : memref<216xf32, #tpu.memory_space<smem>>
    %276 = vector.broadcast %275 : f32 to vector<16x128xf32>
    %277 = arith.mulf %276, %250 : vector<16x128xf32>
    %278 = arith.addf %245, %277 : vector<16x128xf32>
    %c175 = arith.constant 175 : index
    %279 = memref.load %arg2[%c175] : memref<216xf32, #tpu.memory_space<smem>>
    %280 = vector.broadcast %279 : f32 to vector<16x128xf32>
    %281 = arith.mulf %280, %250 : vector<16x128xf32>
    %282 = arith.addf %249, %281 : vector<16x128xf32>
    %283 = vector.extract_strided_slice %18 {offsets = [2, 2], sizes = [16, 128], strides = [1, 1]} : vector<18x130xf32> to vector<16x128xf32>
    %c192 = arith.constant 192 : index
    %284 = memref.load %arg2[%c192] : memref<216xf32, #tpu.memory_space<smem>>
    %285 = vector.broadcast %284 : f32 to vector<16x128xf32>
    %286 = arith.mulf %285, %283 : vector<16x128xf32>
    %287 = arith.addf %254, %286 : vector<16x128xf32>
    %c193 = arith.constant 193 : index
    %288 = memref.load %arg2[%c193] : memref<216xf32, #tpu.memory_space<smem>>
    %289 = vector.broadcast %288 : f32 to vector<16x128xf32>
    %290 = arith.mulf %289, %283 : vector<16x128xf32>
    %291 = arith.addf %258, %290 : vector<16x128xf32>
    %c194 = arith.constant 194 : index
    %292 = memref.load %arg2[%c194] : memref<216xf32, #tpu.memory_space<smem>>
    %293 = vector.broadcast %292 : f32 to vector<16x128xf32>
    %294 = arith.mulf %293, %283 : vector<16x128xf32>
    %295 = arith.addf %262, %294 : vector<16x128xf32>
    %c195 = arith.constant 195 : index
    %296 = memref.load %arg2[%c195] : memref<216xf32, #tpu.memory_space<smem>>
    %297 = vector.broadcast %296 : f32 to vector<16x128xf32>
    %298 = arith.mulf %297, %283 : vector<16x128xf32>
    %299 = arith.addf %266, %298 : vector<16x128xf32>
    %c196 = arith.constant 196 : index
    %300 = memref.load %arg2[%c196] : memref<216xf32, #tpu.memory_space<smem>>
    %301 = vector.broadcast %300 : f32 to vector<16x128xf32>
    %302 = arith.mulf %301, %283 : vector<16x128xf32>
    %303 = arith.addf %270, %302 : vector<16x128xf32>
    %c197 = arith.constant 197 : index
    %304 = memref.load %arg2[%c197] : memref<216xf32, #tpu.memory_space<smem>>
    %305 = vector.broadcast %304 : f32 to vector<16x128xf32>
    %306 = arith.mulf %305, %283 : vector<16x128xf32>
    %307 = arith.addf %274, %306 : vector<16x128xf32>
    %c198 = arith.constant 198 : index
    %308 = memref.load %arg2[%c198] : memref<216xf32, #tpu.memory_space<smem>>
    %309 = vector.broadcast %308 : f32 to vector<16x128xf32>
    %310 = arith.mulf %309, %283 : vector<16x128xf32>
    %311 = arith.addf %278, %310 : vector<16x128xf32>
    %c199 = arith.constant 199 : index
    %312 = memref.load %arg2[%c199] : memref<216xf32, #tpu.memory_space<smem>>
    %313 = vector.broadcast %312 : f32 to vector<16x128xf32>
    %314 = arith.mulf %313, %283 : vector<16x128xf32>
    %315 = arith.addf %282, %314 : vector<16x128xf32>
    %c0_12 = arith.constant 0 : index
    %c1_13 = arith.constant 1 : index
    %c0_14 = arith.constant 0 : index
    %c0_15 = arith.constant 0 : index
    %316 = vector.load %arg1[%c0_12, %c1_13, %c0_14, %c0_15] : memref<1x3x18x130xbf16, #tpu.memory_space<vmem>>, vector<1x1x18x130xbf16>
    %317 = vector.shape_cast %316 : vector<1x1x18x130xbf16> to vector<18x130xbf16>
    %318 = arith.extf %317 : vector<18x130xbf16> to vector<18x130xf32>
    %319 = vector.extract_strided_slice %318 {offsets = [0, 0], sizes = [16, 128], strides = [1, 1]} : vector<18x130xf32> to vector<16x128xf32>
    %c8 = arith.constant 8 : index
    %320 = memref.load %arg2[%c8] : memref<216xf32, #tpu.memory_space<smem>>
    %321 = vector.broadcast %320 : f32 to vector<16x128xf32>
    %322 = arith.mulf %321, %319 : vector<16x128xf32>
    %323 = arith.addf %287, %322 : vector<16x128xf32>
    %c9 = arith.constant 9 : index
    %324 = memref.load %arg2[%c9] : memref<216xf32, #tpu.memory_space<smem>>
    %325 = vector.broadcast %324 : f32 to vector<16x128xf32>
    %326 = arith.mulf %325, %319 : vector<16x128xf32>
    %327 = arith.addf %291, %326 : vector<16x128xf32>
    %c10 = arith.constant 10 : index
    %328 = memref.load %arg2[%c10] : memref<216xf32, #tpu.memory_space<smem>>
    %329 = vector.broadcast %328 : f32 to vector<16x128xf32>
    %330 = arith.mulf %329, %319 : vector<16x128xf32>
    %331 = arith.addf %295, %330 : vector<16x128xf32>
    %c11 = arith.constant 11 : index
    %332 = memref.load %arg2[%c11] : memref<216xf32, #tpu.memory_space<smem>>
    %333 = vector.broadcast %332 : f32 to vector<16x128xf32>
    %334 = arith.mulf %333, %319 : vector<16x128xf32>
    %335 = arith.addf %299, %334 : vector<16x128xf32>
    %c12 = arith.constant 12 : index
    %336 = memref.load %arg2[%c12] : memref<216xf32, #tpu.memory_space<smem>>
    %337 = vector.broadcast %336 : f32 to vector<16x128xf32>
    %338 = arith.mulf %337, %319 : vector<16x128xf32>
    %339 = arith.addf %303, %338 : vector<16x128xf32>
    %c13 = arith.constant 13 : index
    %340 = memref.load %arg2[%c13] : memref<216xf32, #tpu.memory_space<smem>>
    %341 = vector.broadcast %340 : f32 to vector<16x128xf32>
    %342 = arith.mulf %341, %319 : vector<16x128xf32>
    %343 = arith.addf %307, %342 : vector<16x128xf32>
    %c14 = arith.constant 14 : index
    %344 = memref.load %arg2[%c14] : memref<216xf32, #tpu.memory_space<smem>>
    %345 = vector.broadcast %344 : f32 to vector<16x128xf32>
    %346 = arith.mulf %345, %319 : vector<16x128xf32>
    %347 = arith.addf %311, %346 : vector<16x128xf32>
    %c15 = arith.constant 15 : index
    %348 = memref.load %arg2[%c15] : memref<216xf32, #tpu.memory_space<smem>>
    %349 = vector.broadcast %348 : f32 to vector<16x128xf32>
    %350 = arith.mulf %349, %319 : vector<16x128xf32>
    %351 = arith.addf %315, %350 : vector<16x128xf32>
    %352 = vector.extract_strided_slice %318 {offsets = [0, 1], sizes = [16, 128], strides = [1, 1]} : vector<18x130xf32> to vector<16x128xf32>
    %c32 = arith.constant 32 : index
    %353 = memref.load %arg2[%c32] : memref<216xf32, #tpu.memory_space<smem>>
    %354 = vector.broadcast %353 : f32 to vector<16x128xf32>
    %355 = arith.mulf %354, %352 : vector<16x128xf32>
    %356 = arith.addf %323, %355 : vector<16x128xf32>
    %c33 = arith.constant 33 : index
    %357 = memref.load %arg2[%c33] : memref<216xf32, #tpu.memory_space<smem>>
    %358 = vector.broadcast %357 : f32 to vector<16x128xf32>
    %359 = arith.mulf %358, %352 : vector<16x128xf32>
    %360 = arith.addf %327, %359 : vector<16x128xf32>
    %c34 = arith.constant 34 : index
    %361 = memref.load %arg2[%c34] : memref<216xf32, #tpu.memory_space<smem>>
    %362 = vector.broadcast %361 : f32 to vector<16x128xf32>
    %363 = arith.mulf %362, %352 : vector<16x128xf32>
    %364 = arith.addf %331, %363 : vector<16x128xf32>
    %c35 = arith.constant 35 : index
    %365 = memref.load %arg2[%c35] : memref<216xf32, #tpu.memory_space<smem>>
    %366 = vector.broadcast %365 : f32 to vector<16x128xf32>
    %367 = arith.mulf %366, %352 : vector<16x128xf32>
    %368 = arith.addf %335, %367 : vector<16x128xf32>
    %c36 = arith.constant 36 : index
    %369 = memref.load %arg2[%c36] : memref<216xf32, #tpu.memory_space<smem>>
    %370 = vector.broadcast %369 : f32 to vector<16x128xf32>
    %371 = arith.mulf %370, %352 : vector<16x128xf32>
    %372 = arith.addf %339, %371 : vector<16x128xf32>
    %c37 = arith.constant 37 : index
    %373 = memref.load %arg2[%c37] : memref<216xf32, #tpu.memory_space<smem>>
    %374 = vector.broadcast %373 : f32 to vector<16x128xf32>
    %375 = arith.mulf %374, %352 : vector<16x128xf32>
    %376 = arith.addf %343, %375 : vector<16x128xf32>
    %c38 = arith.constant 38 : index
    %377 = memref.load %arg2[%c38] : memref<216xf32, #tpu.memory_space<smem>>
    %378 = vector.broadcast %377 : f32 to vector<16x128xf32>
    %379 = arith.mulf %378, %352 : vector<16x128xf32>
    %380 = arith.addf %347, %379 : vector<16x128xf32>
    %c39 = arith.constant 39 : index
    %381 = memref.load %arg2[%c39] : memref<216xf32, #tpu.memory_space<smem>>
    %382 = vector.broadcast %381 : f32 to vector<16x128xf32>
    %383 = arith.mulf %382, %352 : vector<16x128xf32>
    %384 = arith.addf %351, %383 : vector<16x128xf32>
    %385 = vector.extract_strided_slice %318 {offsets = [0, 2], sizes = [16, 128], strides = [1, 1]} : vector<18x130xf32> to vector<16x128xf32>
    %c56 = arith.constant 56 : index
    %386 = memref.load %arg2[%c56] : memref<216xf32, #tpu.memory_space<smem>>
    %387 = vector.broadcast %386 : f32 to vector<16x128xf32>
    %388 = arith.mulf %387, %385 : vector<16x128xf32>
    %389 = arith.addf %356, %388 : vector<16x128xf32>
    %c57 = arith.constant 57 : index
    %390 = memref.load %arg2[%c57] : memref<216xf32, #tpu.memory_space<smem>>
    %391 = vector.broadcast %390 : f32 to vector<16x128xf32>
    %392 = arith.mulf %391, %385 : vector<16x128xf32>
    %393 = arith.addf %360, %392 : vector<16x128xf32>
    %c58 = arith.constant 58 : index
    %394 = memref.load %arg2[%c58] : memref<216xf32, #tpu.memory_space<smem>>
    %395 = vector.broadcast %394 : f32 to vector<16x128xf32>
    %396 = arith.mulf %395, %385 : vector<16x128xf32>
    %397 = arith.addf %364, %396 : vector<16x128xf32>
    %c59 = arith.constant 59 : index
    %398 = memref.load %arg2[%c59] : memref<216xf32, #tpu.memory_space<smem>>
    %399 = vector.broadcast %398 : f32 to vector<16x128xf32>
    %400 = arith.mulf %399, %385 : vector<16x128xf32>
    %401 = arith.addf %368, %400 : vector<16x128xf32>
    %c60 = arith.constant 60 : index
    %402 = memref.load %arg2[%c60] : memref<216xf32, #tpu.memory_space<smem>>
    %403 = vector.broadcast %402 : f32 to vector<16x128xf32>
    %404 = arith.mulf %403, %385 : vector<16x128xf32>
    %405 = arith.addf %372, %404 : vector<16x128xf32>
    %c61 = arith.constant 61 : index
    %406 = memref.load %arg2[%c61] : memref<216xf32, #tpu.memory_space<smem>>
    %407 = vector.broadcast %406 : f32 to vector<16x128xf32>
    %408 = arith.mulf %407, %385 : vector<16x128xf32>
    %409 = arith.addf %376, %408 : vector<16x128xf32>
    %c62 = arith.constant 62 : index
    %410 = memref.load %arg2[%c62] : memref<216xf32, #tpu.memory_space<smem>>
    %411 = vector.broadcast %410 : f32 to vector<16x128xf32>
    %412 = arith.mulf %411, %385 : vector<16x128xf32>
    %413 = arith.addf %380, %412 : vector<16x128xf32>
    %c63 = arith.constant 63 : index
    %414 = memref.load %arg2[%c63] : memref<216xf32, #tpu.memory_space<smem>>
    %415 = vector.broadcast %414 : f32 to vector<16x128xf32>
    %416 = arith.mulf %415, %385 : vector<16x128xf32>
    %417 = arith.addf %384, %416 : vector<16x128xf32>
    %418 = vector.extract_strided_slice %318 {offsets = [1, 0], sizes = [16, 128], strides = [1, 1]} : vector<18x130xf32> to vector<16x128xf32>
    %c80 = arith.constant 80 : index
    %419 = memref.load %arg2[%c80] : memref<216xf32, #tpu.memory_space<smem>>
    %420 = vector.broadcast %419 : f32 to vector<16x128xf32>
    %421 = arith.mulf %420, %418 : vector<16x128xf32>
    %422 = arith.addf %389, %421 : vector<16x128xf32>
    %c81 = arith.constant 81 : index
    %423 = memref.load %arg2[%c81] : memref<216xf32, #tpu.memory_space<smem>>
    %424 = vector.broadcast %423 : f32 to vector<16x128xf32>
    %425 = arith.mulf %424, %418 : vector<16x128xf32>
    %426 = arith.addf %393, %425 : vector<16x128xf32>
    %c82 = arith.constant 82 : index
    %427 = memref.load %arg2[%c82] : memref<216xf32, #tpu.memory_space<smem>>
    %428 = vector.broadcast %427 : f32 to vector<16x128xf32>
    %429 = arith.mulf %428, %418 : vector<16x128xf32>
    %430 = arith.addf %397, %429 : vector<16x128xf32>
    %c83 = arith.constant 83 : index
    %431 = memref.load %arg2[%c83] : memref<216xf32, #tpu.memory_space<smem>>
    %432 = vector.broadcast %431 : f32 to vector<16x128xf32>
    %433 = arith.mulf %432, %418 : vector<16x128xf32>
    %434 = arith.addf %401, %433 : vector<16x128xf32>
    %c84 = arith.constant 84 : index
    %435 = memref.load %arg2[%c84] : memref<216xf32, #tpu.memory_space<smem>>
    %436 = vector.broadcast %435 : f32 to vector<16x128xf32>
    %437 = arith.mulf %436, %418 : vector<16x128xf32>
    %438 = arith.addf %405, %437 : vector<16x128xf32>
    %c85 = arith.constant 85 : index
    %439 = memref.load %arg2[%c85] : memref<216xf32, #tpu.memory_space<smem>>
    %440 = vector.broadcast %439 : f32 to vector<16x128xf32>
    %441 = arith.mulf %440, %418 : vector<16x128xf32>
    %442 = arith.addf %409, %441 : vector<16x128xf32>
    %c86 = arith.constant 86 : index
    %443 = memref.load %arg2[%c86] : memref<216xf32, #tpu.memory_space<smem>>
    %444 = vector.broadcast %443 : f32 to vector<16x128xf32>
    %445 = arith.mulf %444, %418 : vector<16x128xf32>
    %446 = arith.addf %413, %445 : vector<16x128xf32>
    %c87 = arith.constant 87 : index
    %447 = memref.load %arg2[%c87] : memref<216xf32, #tpu.memory_space<smem>>
    %448 = vector.broadcast %447 : f32 to vector<16x128xf32>
    %449 = arith.mulf %448, %418 : vector<16x128xf32>
    %450 = arith.addf %417, %449 : vector<16x128xf32>
    %451 = vector.extract_strided_slice %318 {offsets = [1, 1], sizes = [16, 128], strides = [1, 1]} : vector<18x130xf32> to vector<16x128xf32>
    %c104 = arith.constant 104 : index
    %452 = memref.load %arg2[%c104] : memref<216xf32, #tpu.memory_space<smem>>
    %453 = vector.broadcast %452 : f32 to vector<16x128xf32>
    %454 = arith.mulf %453, %451 : vector<16x128xf32>
    %455 = arith.addf %422, %454 : vector<16x128xf32>
    %c105 = arith.constant 105 : index
    %456 = memref.load %arg2[%c105] : memref<216xf32, #tpu.memory_space<smem>>
    %457 = vector.broadcast %456 : f32 to vector<16x128xf32>
    %458 = arith.mulf %457, %451 : vector<16x128xf32>
    %459 = arith.addf %426, %458 : vector<16x128xf32>
    %c106 = arith.constant 106 : index
    %460 = memref.load %arg2[%c106] : memref<216xf32, #tpu.memory_space<smem>>
    %461 = vector.broadcast %460 : f32 to vector<16x128xf32>
    %462 = arith.mulf %461, %451 : vector<16x128xf32>
    %463 = arith.addf %430, %462 : vector<16x128xf32>
    %c107 = arith.constant 107 : index
    %464 = memref.load %arg2[%c107] : memref<216xf32, #tpu.memory_space<smem>>
    %465 = vector.broadcast %464 : f32 to vector<16x128xf32>
    %466 = arith.mulf %465, %451 : vector<16x128xf32>
    %467 = arith.addf %434, %466 : vector<16x128xf32>
    %c108 = arith.constant 108 : index
    %468 = memref.load %arg2[%c108] : memref<216xf32, #tpu.memory_space<smem>>
    %469 = vector.broadcast %468 : f32 to vector<16x128xf32>
    %470 = arith.mulf %469, %451 : vector<16x128xf32>
    %471 = arith.addf %438, %470 : vector<16x128xf32>
    %c109 = arith.constant 109 : index
    %472 = memref.load %arg2[%c109] : memref<216xf32, #tpu.memory_space<smem>>
    %473 = vector.broadcast %472 : f32 to vector<16x128xf32>
    %474 = arith.mulf %473, %451 : vector<16x128xf32>
    %475 = arith.addf %442, %474 : vector<16x128xf32>
    %c110 = arith.constant 110 : index
    %476 = memref.load %arg2[%c110] : memref<216xf32, #tpu.memory_space<smem>>
    %477 = vector.broadcast %476 : f32 to vector<16x128xf32>
    %478 = arith.mulf %477, %451 : vector<16x128xf32>
    %479 = arith.addf %446, %478 : vector<16x128xf32>
    %c111 = arith.constant 111 : index
    %480 = memref.load %arg2[%c111] : memref<216xf32, #tpu.memory_space<smem>>
    %481 = vector.broadcast %480 : f32 to vector<16x128xf32>
    %482 = arith.mulf %481, %451 : vector<16x128xf32>
    %483 = arith.addf %450, %482 : vector<16x128xf32>
    %484 = vector.extract_strided_slice %318 {offsets = [1, 2], sizes = [16, 128], strides = [1, 1]} : vector<18x130xf32> to vector<16x128xf32>
    %c128 = arith.constant 128 : index
    %485 = memref.load %arg2[%c128] : memref<216xf32, #tpu.memory_space<smem>>
    %486 = vector.broadcast %485 : f32 to vector<16x128xf32>
    %487 = arith.mulf %486, %484 : vector<16x128xf32>
    %488 = arith.addf %455, %487 : vector<16x128xf32>
    %c129 = arith.constant 129 : index
    %489 = memref.load %arg2[%c129] : memref<216xf32, #tpu.memory_space<smem>>
    %490 = vector.broadcast %489 : f32 to vector<16x128xf32>
    %491 = arith.mulf %490, %484 : vector<16x128xf32>
    %492 = arith.addf %459, %491 : vector<16x128xf32>
    %c130 = arith.constant 130 : index
    %493 = memref.load %arg2[%c130] : memref<216xf32, #tpu.memory_space<smem>>
    %494 = vector.broadcast %493 : f32 to vector<16x128xf32>
    %495 = arith.mulf %494, %484 : vector<16x128xf32>
    %496 = arith.addf %463, %495 : vector<16x128xf32>
    %c131 = arith.constant 131 : index
    %497 = memref.load %arg2[%c131] : memref<216xf32, #tpu.memory_space<smem>>
    %498 = vector.broadcast %497 : f32 to vector<16x128xf32>
    %499 = arith.mulf %498, %484 : vector<16x128xf32>
    %500 = arith.addf %467, %499 : vector<16x128xf32>
    %c132 = arith.constant 132 : index
    %501 = memref.load %arg2[%c132] : memref<216xf32, #tpu.memory_space<smem>>
    %502 = vector.broadcast %501 : f32 to vector<16x128xf32>
    %503 = arith.mulf %502, %484 : vector<16x128xf32>
    %504 = arith.addf %471, %503 : vector<16x128xf32>
    %c133 = arith.constant 133 : index
    %505 = memref.load %arg2[%c133] : memref<216xf32, #tpu.memory_space<smem>>
    %506 = vector.broadcast %505 : f32 to vector<16x128xf32>
    %507 = arith.mulf %506, %484 : vector<16x128xf32>
    %508 = arith.addf %475, %507 : vector<16x128xf32>
    %c134 = arith.constant 134 : index
    %509 = memref.load %arg2[%c134] : memref<216xf32, #tpu.memory_space<smem>>
    %510 = vector.broadcast %509 : f32 to vector<16x128xf32>
    %511 = arith.mulf %510, %484 : vector<16x128xf32>
    %512 = arith.addf %479, %511 : vector<16x128xf32>
    %c135 = arith.constant 135 : index
    %513 = memref.load %arg2[%c135] : memref<216xf32, #tpu.memory_space<smem>>
    %514 = vector.broadcast %513 : f32 to vector<16x128xf32>
    %515 = arith.mulf %514, %484 : vector<16x128xf32>
    %516 = arith.addf %483, %515 : vector<16x128xf32>
    %517 = vector.extract_strided_slice %318 {offsets = [2, 0], sizes = [16, 128], strides = [1, 1]} : vector<18x130xf32> to vector<16x128xf32>
    %c152 = arith.constant 152 : index
    %518 = memref.load %arg2[%c152] : memref<216xf32, #tpu.memory_space<smem>>
    %519 = vector.broadcast %518 : f32 to vector<16x128xf32>
    %520 = arith.mulf %519, %517 : vector<16x128xf32>
    %521 = arith.addf %488, %520 : vector<16x128xf32>
    %c153 = arith.constant 153 : index
    %522 = memref.load %arg2[%c153] : memref<216xf32, #tpu.memory_space<smem>>
    %523 = vector.broadcast %522 : f32 to vector<16x128xf32>
    %524 = arith.mulf %523, %517 : vector<16x128xf32>
    %525 = arith.addf %492, %524 : vector<16x128xf32>
    %c154 = arith.constant 154 : index
    %526 = memref.load %arg2[%c154] : memref<216xf32, #tpu.memory_space<smem>>
    %527 = vector.broadcast %526 : f32 to vector<16x128xf32>
    %528 = arith.mulf %527, %517 : vector<16x128xf32>
    %529 = arith.addf %496, %528 : vector<16x128xf32>
    %c155 = arith.constant 155 : index
    %530 = memref.load %arg2[%c155] : memref<216xf32, #tpu.memory_space<smem>>
    %531 = vector.broadcast %530 : f32 to vector<16x128xf32>
    %532 = arith.mulf %531, %517 : vector<16x128xf32>
    %533 = arith.addf %500, %532 : vector<16x128xf32>
    %c156 = arith.constant 156 : index
    %534 = memref.load %arg2[%c156] : memref<216xf32, #tpu.memory_space<smem>>
    %535 = vector.broadcast %534 : f32 to vector<16x128xf32>
    %536 = arith.mulf %535, %517 : vector<16x128xf32>
    %537 = arith.addf %504, %536 : vector<16x128xf32>
    %c157 = arith.constant 157 : index
    %538 = memref.load %arg2[%c157] : memref<216xf32, #tpu.memory_space<smem>>
    %539 = vector.broadcast %538 : f32 to vector<16x128xf32>
    %540 = arith.mulf %539, %517 : vector<16x128xf32>
    %541 = arith.addf %508, %540 : vector<16x128xf32>
    %c158 = arith.constant 158 : index
    %542 = memref.load %arg2[%c158] : memref<216xf32, #tpu.memory_space<smem>>
    %543 = vector.broadcast %542 : f32 to vector<16x128xf32>
    %544 = arith.mulf %543, %517 : vector<16x128xf32>
    %545 = arith.addf %512, %544 : vector<16x128xf32>
    %c159 = arith.constant 159 : index
    %546 = memref.load %arg2[%c159] : memref<216xf32, #tpu.memory_space<smem>>
    %547 = vector.broadcast %546 : f32 to vector<16x128xf32>
    %548 = arith.mulf %547, %517 : vector<16x128xf32>
    %549 = arith.addf %516, %548 : vector<16x128xf32>
    %550 = vector.extract_strided_slice %318 {offsets = [2, 1], sizes = [16, 128], strides = [1, 1]} : vector<18x130xf32> to vector<16x128xf32>
    %c176 = arith.constant 176 : index
    %551 = memref.load %arg2[%c176] : memref<216xf32, #tpu.memory_space<smem>>
    %552 = vector.broadcast %551 : f32 to vector<16x128xf32>
    %553 = arith.mulf %552, %550 : vector<16x128xf32>
    %554 = arith.addf %521, %553 : vector<16x128xf32>
    %c177 = arith.constant 177 : index
    %555 = memref.load %arg2[%c177] : memref<216xf32, #tpu.memory_space<smem>>
    %556 = vector.broadcast %555 : f32 to vector<16x128xf32>
    %557 = arith.mulf %556, %550 : vector<16x128xf32>
    %558 = arith.addf %525, %557 : vector<16x128xf32>
    %c178 = arith.constant 178 : index
    %559 = memref.load %arg2[%c178] : memref<216xf32, #tpu.memory_space<smem>>
    %560 = vector.broadcast %559 : f32 to vector<16x128xf32>
    %561 = arith.mulf %560, %550 : vector<16x128xf32>
    %562 = arith.addf %529, %561 : vector<16x128xf32>
    %c179 = arith.constant 179 : index
    %563 = memref.load %arg2[%c179] : memref<216xf32, #tpu.memory_space<smem>>
    %564 = vector.broadcast %563 : f32 to vector<16x128xf32>
    %565 = arith.mulf %564, %550 : vector<16x128xf32>
    %566 = arith.addf %533, %565 : vector<16x128xf32>
    %c180 = arith.constant 180 : index
    %567 = memref.load %arg2[%c180] : memref<216xf32, #tpu.memory_space<smem>>
    %568 = vector.broadcast %567 : f32 to vector<16x128xf32>
    %569 = arith.mulf %568, %550 : vector<16x128xf32>
    %570 = arith.addf %537, %569 : vector<16x128xf32>
    %c181 = arith.constant 181 : index
    %571 = memref.load %arg2[%c181] : memref<216xf32, #tpu.memory_space<smem>>
    %572 = vector.broadcast %571 : f32 to vector<16x128xf32>
    %573 = arith.mulf %572, %550 : vector<16x128xf32>
    %574 = arith.addf %541, %573 : vector<16x128xf32>
    %c182 = arith.constant 182 : index
    %575 = memref.load %arg2[%c182] : memref<216xf32, #tpu.memory_space<smem>>
    %576 = vector.broadcast %575 : f32 to vector<16x128xf32>
    %577 = arith.mulf %576, %550 : vector<16x128xf32>
    %578 = arith.addf %545, %577 : vector<16x128xf32>
    %c183 = arith.constant 183 : index
    %579 = memref.load %arg2[%c183] : memref<216xf32, #tpu.memory_space<smem>>
    %580 = vector.broadcast %579 : f32 to vector<16x128xf32>
    %581 = arith.mulf %580, %550 : vector<16x128xf32>
    %582 = arith.addf %549, %581 : vector<16x128xf32>
    %583 = vector.extract_strided_slice %318 {offsets = [2, 2], sizes = [16, 128], strides = [1, 1]} : vector<18x130xf32> to vector<16x128xf32>
    %c200 = arith.constant 200 : index
    %584 = memref.load %arg2[%c200] : memref<216xf32, #tpu.memory_space<smem>>
    %585 = vector.broadcast %584 : f32 to vector<16x128xf32>
    %586 = arith.mulf %585, %583 : vector<16x128xf32>
    %587 = arith.addf %554, %586 : vector<16x128xf32>
    %c201 = arith.constant 201 : index
    %588 = memref.load %arg2[%c201] : memref<216xf32, #tpu.memory_space<smem>>
    %589 = vector.broadcast %588 : f32 to vector<16x128xf32>
    %590 = arith.mulf %589, %583 : vector<16x128xf32>
    %591 = arith.addf %558, %590 : vector<16x128xf32>
    %c202 = arith.constant 202 : index
    %592 = memref.load %arg2[%c202] : memref<216xf32, #tpu.memory_space<smem>>
    %593 = vector.broadcast %592 : f32 to vector<16x128xf32>
    %594 = arith.mulf %593, %583 : vector<16x128xf32>
    %595 = arith.addf %562, %594 : vector<16x128xf32>
    %c203 = arith.constant 203 : index
    %596 = memref.load %arg2[%c203] : memref<216xf32, #tpu.memory_space<smem>>
    %597 = vector.broadcast %596 : f32 to vector<16x128xf32>
    %598 = arith.mulf %597, %583 : vector<16x128xf32>
    %599 = arith.addf %566, %598 : vector<16x128xf32>
    %c204 = arith.constant 204 : index
    %600 = memref.load %arg2[%c204] : memref<216xf32, #tpu.memory_space<smem>>
    %601 = vector.broadcast %600 : f32 to vector<16x128xf32>
    %602 = arith.mulf %601, %583 : vector<16x128xf32>
    %603 = arith.addf %570, %602 : vector<16x128xf32>
    %c205 = arith.constant 205 : index
    %604 = memref.load %arg2[%c205] : memref<216xf32, #tpu.memory_space<smem>>
    %605 = vector.broadcast %604 : f32 to vector<16x128xf32>
    %606 = arith.mulf %605, %583 : vector<16x128xf32>
    %607 = arith.addf %574, %606 : vector<16x128xf32>
    %c206 = arith.constant 206 : index
    %608 = memref.load %arg2[%c206] : memref<216xf32, #tpu.memory_space<smem>>
    %609 = vector.broadcast %608 : f32 to vector<16x128xf32>
    %610 = arith.mulf %609, %583 : vector<16x128xf32>
    %611 = arith.addf %578, %610 : vector<16x128xf32>
    %c207 = arith.constant 207 : index
    %612 = memref.load %arg2[%c207] : memref<216xf32, #tpu.memory_space<smem>>
    %613 = vector.broadcast %612 : f32 to vector<16x128xf32>
    %614 = arith.mulf %613, %583 : vector<16x128xf32>
    %615 = arith.addf %582, %614 : vector<16x128xf32>
    %c0_16 = arith.constant 0 : index
    %c2_17 = arith.constant 2 : index
    %c0_18 = arith.constant 0 : index
    %c0_19 = arith.constant 0 : index
    %616 = vector.load %arg1[%c0_16, %c2_17, %c0_18, %c0_19] : memref<1x3x18x130xbf16, #tpu.memory_space<vmem>>, vector<1x1x18x130xbf16>
    %617 = vector.shape_cast %616 : vector<1x1x18x130xbf16> to vector<18x130xbf16>
    %618 = arith.extf %617 : vector<18x130xbf16> to vector<18x130xf32>
    %619 = vector.extract_strided_slice %618 {offsets = [0, 0], sizes = [16, 128], strides = [1, 1]} : vector<18x130xf32> to vector<16x128xf32>
    %c16 = arith.constant 16 : index
    %620 = memref.load %arg2[%c16] : memref<216xf32, #tpu.memory_space<smem>>
    %621 = vector.broadcast %620 : f32 to vector<16x128xf32>
    %622 = arith.mulf %621, %619 : vector<16x128xf32>
    %623 = arith.addf %587, %622 : vector<16x128xf32>
    %c17 = arith.constant 17 : index
    %624 = memref.load %arg2[%c17] : memref<216xf32, #tpu.memory_space<smem>>
    %625 = vector.broadcast %624 : f32 to vector<16x128xf32>
    %626 = arith.mulf %625, %619 : vector<16x128xf32>
    %627 = arith.addf %591, %626 : vector<16x128xf32>
    %c18 = arith.constant 18 : index
    %628 = memref.load %arg2[%c18] : memref<216xf32, #tpu.memory_space<smem>>
    %629 = vector.broadcast %628 : f32 to vector<16x128xf32>
    %630 = arith.mulf %629, %619 : vector<16x128xf32>
    %631 = arith.addf %595, %630 : vector<16x128xf32>
    %c19 = arith.constant 19 : index
    %632 = memref.load %arg2[%c19] : memref<216xf32, #tpu.memory_space<smem>>
    %633 = vector.broadcast %632 : f32 to vector<16x128xf32>
    %634 = arith.mulf %633, %619 : vector<16x128xf32>
    %635 = arith.addf %599, %634 : vector<16x128xf32>
    %c20 = arith.constant 20 : index
    %636 = memref.load %arg2[%c20] : memref<216xf32, #tpu.memory_space<smem>>
    %637 = vector.broadcast %636 : f32 to vector<16x128xf32>
    %638 = arith.mulf %637, %619 : vector<16x128xf32>
    %639 = arith.addf %603, %638 : vector<16x128xf32>
    %c21 = arith.constant 21 : index
    %640 = memref.load %arg2[%c21] : memref<216xf32, #tpu.memory_space<smem>>
    %641 = vector.broadcast %640 : f32 to vector<16x128xf32>
    %642 = arith.mulf %641, %619 : vector<16x128xf32>
    %643 = arith.addf %607, %642 : vector<16x128xf32>
    %c22 = arith.constant 22 : index
    %644 = memref.load %arg2[%c22] : memref<216xf32, #tpu.memory_space<smem>>
    %645 = vector.broadcast %644 : f32 to vector<16x128xf32>
    %646 = arith.mulf %645, %619 : vector<16x128xf32>
    %647 = arith.addf %611, %646 : vector<16x128xf32>
    %c23 = arith.constant 23 : index
    %648 = memref.load %arg2[%c23] : memref<216xf32, #tpu.memory_space<smem>>
    %649 = vector.broadcast %648 : f32 to vector<16x128xf32>
    %650 = arith.mulf %649, %619 : vector<16x128xf32>
    %651 = arith.addf %615, %650 : vector<16x128xf32>
    %652 = vector.extract_strided_slice %618 {offsets = [0, 1], sizes = [16, 128], strides = [1, 1]} : vector<18x130xf32> to vector<16x128xf32>
    %c40 = arith.constant 40 : index
    %653 = memref.load %arg2[%c40] : memref<216xf32, #tpu.memory_space<smem>>
    %654 = vector.broadcast %653 : f32 to vector<16x128xf32>
    %655 = arith.mulf %654, %652 : vector<16x128xf32>
    %656 = arith.addf %623, %655 : vector<16x128xf32>
    %c41 = arith.constant 41 : index
    %657 = memref.load %arg2[%c41] : memref<216xf32, #tpu.memory_space<smem>>
    %658 = vector.broadcast %657 : f32 to vector<16x128xf32>
    %659 = arith.mulf %658, %652 : vector<16x128xf32>
    %660 = arith.addf %627, %659 : vector<16x128xf32>
    %c42 = arith.constant 42 : index
    %661 = memref.load %arg2[%c42] : memref<216xf32, #tpu.memory_space<smem>>
    %662 = vector.broadcast %661 : f32 to vector<16x128xf32>
    %663 = arith.mulf %662, %652 : vector<16x128xf32>
    %664 = arith.addf %631, %663 : vector<16x128xf32>
    %c43 = arith.constant 43 : index
    %665 = memref.load %arg2[%c43] : memref<216xf32, #tpu.memory_space<smem>>
    %666 = vector.broadcast %665 : f32 to vector<16x128xf32>
    %667 = arith.mulf %666, %652 : vector<16x128xf32>
    %668 = arith.addf %635, %667 : vector<16x128xf32>
    %c44 = arith.constant 44 : index
    %669 = memref.load %arg2[%c44] : memref<216xf32, #tpu.memory_space<smem>>
    %670 = vector.broadcast %669 : f32 to vector<16x128xf32>
    %671 = arith.mulf %670, %652 : vector<16x128xf32>
    %672 = arith.addf %639, %671 : vector<16x128xf32>
    %c45 = arith.constant 45 : index
    %673 = memref.load %arg2[%c45] : memref<216xf32, #tpu.memory_space<smem>>
    %674 = vector.broadcast %673 : f32 to vector<16x128xf32>
    %675 = arith.mulf %674, %652 : vector<16x128xf32>
    %676 = arith.addf %643, %675 : vector<16x128xf32>
    %c46 = arith.constant 46 : index
    %677 = memref.load %arg2[%c46] : memref<216xf32, #tpu.memory_space<smem>>
    %678 = vector.broadcast %677 : f32 to vector<16x128xf32>
    %679 = arith.mulf %678, %652 : vector<16x128xf32>
    %680 = arith.addf %647, %679 : vector<16x128xf32>
    %c47 = arith.constant 47 : index
    %681 = memref.load %arg2[%c47] : memref<216xf32, #tpu.memory_space<smem>>
    %682 = vector.broadcast %681 : f32 to vector<16x128xf32>
    %683 = arith.mulf %682, %652 : vector<16x128xf32>
    %684 = arith.addf %651, %683 : vector<16x128xf32>
    %685 = vector.extract_strided_slice %618 {offsets = [0, 2], sizes = [16, 128], strides = [1, 1]} : vector<18x130xf32> to vector<16x128xf32>
    %c64 = arith.constant 64 : index
    %686 = memref.load %arg2[%c64] : memref<216xf32, #tpu.memory_space<smem>>
    %687 = vector.broadcast %686 : f32 to vector<16x128xf32>
    %688 = arith.mulf %687, %685 : vector<16x128xf32>
    %689 = arith.addf %656, %688 : vector<16x128xf32>
    %c65 = arith.constant 65 : index
    %690 = memref.load %arg2[%c65] : memref<216xf32, #tpu.memory_space<smem>>
    %691 = vector.broadcast %690 : f32 to vector<16x128xf32>
    %692 = arith.mulf %691, %685 : vector<16x128xf32>
    %693 = arith.addf %660, %692 : vector<16x128xf32>
    %c66 = arith.constant 66 : index
    %694 = memref.load %arg2[%c66] : memref<216xf32, #tpu.memory_space<smem>>
    %695 = vector.broadcast %694 : f32 to vector<16x128xf32>
    %696 = arith.mulf %695, %685 : vector<16x128xf32>
    %697 = arith.addf %664, %696 : vector<16x128xf32>
    %c67 = arith.constant 67 : index
    %698 = memref.load %arg2[%c67] : memref<216xf32, #tpu.memory_space<smem>>
    %699 = vector.broadcast %698 : f32 to vector<16x128xf32>
    %700 = arith.mulf %699, %685 : vector<16x128xf32>
    %701 = arith.addf %668, %700 : vector<16x128xf32>
    %c68 = arith.constant 68 : index
    %702 = memref.load %arg2[%c68] : memref<216xf32, #tpu.memory_space<smem>>
    %703 = vector.broadcast %702 : f32 to vector<16x128xf32>
    %704 = arith.mulf %703, %685 : vector<16x128xf32>
    %705 = arith.addf %672, %704 : vector<16x128xf32>
    %c69 = arith.constant 69 : index
    %706 = memref.load %arg2[%c69] : memref<216xf32, #tpu.memory_space<smem>>
    %707 = vector.broadcast %706 : f32 to vector<16x128xf32>
    %708 = arith.mulf %707, %685 : vector<16x128xf32>
    %709 = arith.addf %676, %708 : vector<16x128xf32>
    %c70 = arith.constant 70 : index
    %710 = memref.load %arg2[%c70] : memref<216xf32, #tpu.memory_space<smem>>
    %711 = vector.broadcast %710 : f32 to vector<16x128xf32>
    %712 = arith.mulf %711, %685 : vector<16x128xf32>
    %713 = arith.addf %680, %712 : vector<16x128xf32>
    %c71 = arith.constant 71 : index
    %714 = memref.load %arg2[%c71] : memref<216xf32, #tpu.memory_space<smem>>
    %715 = vector.broadcast %714 : f32 to vector<16x128xf32>
    %716 = arith.mulf %715, %685 : vector<16x128xf32>
    %717 = arith.addf %684, %716 : vector<16x128xf32>
    %718 = vector.extract_strided_slice %618 {offsets = [1, 0], sizes = [16, 128], strides = [1, 1]} : vector<18x130xf32> to vector<16x128xf32>
    %c88 = arith.constant 88 : index
    %719 = memref.load %arg2[%c88] : memref<216xf32, #tpu.memory_space<smem>>
    %720 = vector.broadcast %719 : f32 to vector<16x128xf32>
    %721 = arith.mulf %720, %718 : vector<16x128xf32>
    %722 = arith.addf %689, %721 : vector<16x128xf32>
    %c89 = arith.constant 89 : index
    %723 = memref.load %arg2[%c89] : memref<216xf32, #tpu.memory_space<smem>>
    %724 = vector.broadcast %723 : f32 to vector<16x128xf32>
    %725 = arith.mulf %724, %718 : vector<16x128xf32>
    %726 = arith.addf %693, %725 : vector<16x128xf32>
    %c90 = arith.constant 90 : index
    %727 = memref.load %arg2[%c90] : memref<216xf32, #tpu.memory_space<smem>>
    %728 = vector.broadcast %727 : f32 to vector<16x128xf32>
    %729 = arith.mulf %728, %718 : vector<16x128xf32>
    %730 = arith.addf %697, %729 : vector<16x128xf32>
    %c91 = arith.constant 91 : index
    %731 = memref.load %arg2[%c91] : memref<216xf32, #tpu.memory_space<smem>>
    %732 = vector.broadcast %731 : f32 to vector<16x128xf32>
    %733 = arith.mulf %732, %718 : vector<16x128xf32>
    %734 = arith.addf %701, %733 : vector<16x128xf32>
    %c92 = arith.constant 92 : index
    %735 = memref.load %arg2[%c92] : memref<216xf32, #tpu.memory_space<smem>>
    %736 = vector.broadcast %735 : f32 to vector<16x128xf32>
    %737 = arith.mulf %736, %718 : vector<16x128xf32>
    %738 = arith.addf %705, %737 : vector<16x128xf32>
    %c93 = arith.constant 93 : index
    %739 = memref.load %arg2[%c93] : memref<216xf32, #tpu.memory_space<smem>>
    %740 = vector.broadcast %739 : f32 to vector<16x128xf32>
    %741 = arith.mulf %740, %718 : vector<16x128xf32>
    %742 = arith.addf %709, %741 : vector<16x128xf32>
    %c94 = arith.constant 94 : index
    %743 = memref.load %arg2[%c94] : memref<216xf32, #tpu.memory_space<smem>>
    %744 = vector.broadcast %743 : f32 to vector<16x128xf32>
    %745 = arith.mulf %744, %718 : vector<16x128xf32>
    %746 = arith.addf %713, %745 : vector<16x128xf32>
    %c95 = arith.constant 95 : index
    %747 = memref.load %arg2[%c95] : memref<216xf32, #tpu.memory_space<smem>>
    %748 = vector.broadcast %747 : f32 to vector<16x128xf32>
    %749 = arith.mulf %748, %718 : vector<16x128xf32>
    %750 = arith.addf %717, %749 : vector<16x128xf32>
    %751 = vector.extract_strided_slice %618 {offsets = [1, 1], sizes = [16, 128], strides = [1, 1]} : vector<18x130xf32> to vector<16x128xf32>
    %c112 = arith.constant 112 : index
    %752 = memref.load %arg2[%c112] : memref<216xf32, #tpu.memory_space<smem>>
    %753 = vector.broadcast %752 : f32 to vector<16x128xf32>
    %754 = arith.mulf %753, %751 : vector<16x128xf32>
    %755 = arith.addf %722, %754 : vector<16x128xf32>
    %c113 = arith.constant 113 : index
    %756 = memref.load %arg2[%c113] : memref<216xf32, #tpu.memory_space<smem>>
    %757 = vector.broadcast %756 : f32 to vector<16x128xf32>
    %758 = arith.mulf %757, %751 : vector<16x128xf32>
    %759 = arith.addf %726, %758 : vector<16x128xf32>
    %c114 = arith.constant 114 : index
    %760 = memref.load %arg2[%c114] : memref<216xf32, #tpu.memory_space<smem>>
    %761 = vector.broadcast %760 : f32 to vector<16x128xf32>
    %762 = arith.mulf %761, %751 : vector<16x128xf32>
    %763 = arith.addf %730, %762 : vector<16x128xf32>
    %c115 = arith.constant 115 : index
    %764 = memref.load %arg2[%c115] : memref<216xf32, #tpu.memory_space<smem>>
    %765 = vector.broadcast %764 : f32 to vector<16x128xf32>
    %766 = arith.mulf %765, %751 : vector<16x128xf32>
    %767 = arith.addf %734, %766 : vector<16x128xf32>
    %c116 = arith.constant 116 : index
    %768 = memref.load %arg2[%c116] : memref<216xf32, #tpu.memory_space<smem>>
    %769 = vector.broadcast %768 : f32 to vector<16x128xf32>
    %770 = arith.mulf %769, %751 : vector<16x128xf32>
    %771 = arith.addf %738, %770 : vector<16x128xf32>
    %c117 = arith.constant 117 : index
    %772 = memref.load %arg2[%c117] : memref<216xf32, #tpu.memory_space<smem>>
    %773 = vector.broadcast %772 : f32 to vector<16x128xf32>
    %774 = arith.mulf %773, %751 : vector<16x128xf32>
    %775 = arith.addf %742, %774 : vector<16x128xf32>
    %c118 = arith.constant 118 : index
    %776 = memref.load %arg2[%c118] : memref<216xf32, #tpu.memory_space<smem>>
    %777 = vector.broadcast %776 : f32 to vector<16x128xf32>
    %778 = arith.mulf %777, %751 : vector<16x128xf32>
    %779 = arith.addf %746, %778 : vector<16x128xf32>
    %c119 = arith.constant 119 : index
    %780 = memref.load %arg2[%c119] : memref<216xf32, #tpu.memory_space<smem>>
    %781 = vector.broadcast %780 : f32 to vector<16x128xf32>
    %782 = arith.mulf %781, %751 : vector<16x128xf32>
    %783 = arith.addf %750, %782 : vector<16x128xf32>
    %784 = vector.extract_strided_slice %618 {offsets = [1, 2], sizes = [16, 128], strides = [1, 1]} : vector<18x130xf32> to vector<16x128xf32>
    %c136 = arith.constant 136 : index
    %785 = memref.load %arg2[%c136] : memref<216xf32, #tpu.memory_space<smem>>
    %786 = vector.broadcast %785 : f32 to vector<16x128xf32>
    %787 = arith.mulf %786, %784 : vector<16x128xf32>
    %788 = arith.addf %755, %787 : vector<16x128xf32>
    %c137 = arith.constant 137 : index
    %789 = memref.load %arg2[%c137] : memref<216xf32, #tpu.memory_space<smem>>
    %790 = vector.broadcast %789 : f32 to vector<16x128xf32>
    %791 = arith.mulf %790, %784 : vector<16x128xf32>
    %792 = arith.addf %759, %791 : vector<16x128xf32>
    %c138 = arith.constant 138 : index
    %793 = memref.load %arg2[%c138] : memref<216xf32, #tpu.memory_space<smem>>
    %794 = vector.broadcast %793 : f32 to vector<16x128xf32>
    %795 = arith.mulf %794, %784 : vector<16x128xf32>
    %796 = arith.addf %763, %795 : vector<16x128xf32>
    %c139 = arith.constant 139 : index
    %797 = memref.load %arg2[%c139] : memref<216xf32, #tpu.memory_space<smem>>
    %798 = vector.broadcast %797 : f32 to vector<16x128xf32>
    %799 = arith.mulf %798, %784 : vector<16x128xf32>
    %800 = arith.addf %767, %799 : vector<16x128xf32>
    %c140 = arith.constant 140 : index
    %801 = memref.load %arg2[%c140] : memref<216xf32, #tpu.memory_space<smem>>
    %802 = vector.broadcast %801 : f32 to vector<16x128xf32>
    %803 = arith.mulf %802, %784 : vector<16x128xf32>
    %804 = arith.addf %771, %803 : vector<16x128xf32>
    %c141 = arith.constant 141 : index
    %805 = memref.load %arg2[%c141] : memref<216xf32, #tpu.memory_space<smem>>
    %806 = vector.broadcast %805 : f32 to vector<16x128xf32>
    %807 = arith.mulf %806, %784 : vector<16x128xf32>
    %808 = arith.addf %775, %807 : vector<16x128xf32>
    %c142 = arith.constant 142 : index
    %809 = memref.load %arg2[%c142] : memref<216xf32, #tpu.memory_space<smem>>
    %810 = vector.broadcast %809 : f32 to vector<16x128xf32>
    %811 = arith.mulf %810, %784 : vector<16x128xf32>
    %812 = arith.addf %779, %811 : vector<16x128xf32>
    %c143 = arith.constant 143 : index
    %813 = memref.load %arg2[%c143] : memref<216xf32, #tpu.memory_space<smem>>
    %814 = vector.broadcast %813 : f32 to vector<16x128xf32>
    %815 = arith.mulf %814, %784 : vector<16x128xf32>
    %816 = arith.addf %783, %815 : vector<16x128xf32>
    %817 = vector.extract_strided_slice %618 {offsets = [2, 0], sizes = [16, 128], strides = [1, 1]} : vector<18x130xf32> to vector<16x128xf32>
    %c160 = arith.constant 160 : index
    %818 = memref.load %arg2[%c160] : memref<216xf32, #tpu.memory_space<smem>>
    %819 = vector.broadcast %818 : f32 to vector<16x128xf32>
    %820 = arith.mulf %819, %817 : vector<16x128xf32>
    %821 = arith.addf %788, %820 : vector<16x128xf32>
    %c161 = arith.constant 161 : index
    %822 = memref.load %arg2[%c161] : memref<216xf32, #tpu.memory_space<smem>>
    %823 = vector.broadcast %822 : f32 to vector<16x128xf32>
    %824 = arith.mulf %823, %817 : vector<16x128xf32>
    %825 = arith.addf %792, %824 : vector<16x128xf32>
    %c162 = arith.constant 162 : index
    %826 = memref.load %arg2[%c162] : memref<216xf32, #tpu.memory_space<smem>>
    %827 = vector.broadcast %826 : f32 to vector<16x128xf32>
    %828 = arith.mulf %827, %817 : vector<16x128xf32>
    %829 = arith.addf %796, %828 : vector<16x128xf32>
    %c163 = arith.constant 163 : index
    %830 = memref.load %arg2[%c163] : memref<216xf32, #tpu.memory_space<smem>>
    %831 = vector.broadcast %830 : f32 to vector<16x128xf32>
    %832 = arith.mulf %831, %817 : vector<16x128xf32>
    %833 = arith.addf %800, %832 : vector<16x128xf32>
    %c164 = arith.constant 164 : index
    %834 = memref.load %arg2[%c164] : memref<216xf32, #tpu.memory_space<smem>>
    %835 = vector.broadcast %834 : f32 to vector<16x128xf32>
    %836 = arith.mulf %835, %817 : vector<16x128xf32>
    %837 = arith.addf %804, %836 : vector<16x128xf32>
    %c165 = arith.constant 165 : index
    %838 = memref.load %arg2[%c165] : memref<216xf32, #tpu.memory_space<smem>>
    %839 = vector.broadcast %838 : f32 to vector<16x128xf32>
    %840 = arith.mulf %839, %817 : vector<16x128xf32>
    %841 = arith.addf %808, %840 : vector<16x128xf32>
    %c166 = arith.constant 166 : index
    %842 = memref.load %arg2[%c166] : memref<216xf32, #tpu.memory_space<smem>>
    %843 = vector.broadcast %842 : f32 to vector<16x128xf32>
    %844 = arith.mulf %843, %817 : vector<16x128xf32>
    %845 = arith.addf %812, %844 : vector<16x128xf32>
    %c167 = arith.constant 167 : index
    %846 = memref.load %arg2[%c167] : memref<216xf32, #tpu.memory_space<smem>>
    %847 = vector.broadcast %846 : f32 to vector<16x128xf32>
    %848 = arith.mulf %847, %817 : vector<16x128xf32>
    %849 = arith.addf %816, %848 : vector<16x128xf32>
    %850 = vector.extract_strided_slice %618 {offsets = [2, 1], sizes = [16, 128], strides = [1, 1]} : vector<18x130xf32> to vector<16x128xf32>
    %c184 = arith.constant 184 : index
    %851 = memref.load %arg2[%c184] : memref<216xf32, #tpu.memory_space<smem>>
    %852 = vector.broadcast %851 : f32 to vector<16x128xf32>
    %853 = arith.mulf %852, %850 : vector<16x128xf32>
    %854 = arith.addf %821, %853 : vector<16x128xf32>
    %c185 = arith.constant 185 : index
    %855 = memref.load %arg2[%c185] : memref<216xf32, #tpu.memory_space<smem>>
    %856 = vector.broadcast %855 : f32 to vector<16x128xf32>
    %857 = arith.mulf %856, %850 : vector<16x128xf32>
    %858 = arith.addf %825, %857 : vector<16x128xf32>
    %c186 = arith.constant 186 : index
    %859 = memref.load %arg2[%c186] : memref<216xf32, #tpu.memory_space<smem>>
    %860 = vector.broadcast %859 : f32 to vector<16x128xf32>
    %861 = arith.mulf %860, %850 : vector<16x128xf32>
    %862 = arith.addf %829, %861 : vector<16x128xf32>
    %c187 = arith.constant 187 : index
    %863 = memref.load %arg2[%c187] : memref<216xf32, #tpu.memory_space<smem>>
    %864 = vector.broadcast %863 : f32 to vector<16x128xf32>
    %865 = arith.mulf %864, %850 : vector<16x128xf32>
    %866 = arith.addf %833, %865 : vector<16x128xf32>
    %c188 = arith.constant 188 : index
    %867 = memref.load %arg2[%c188] : memref<216xf32, #tpu.memory_space<smem>>
    %868 = vector.broadcast %867 : f32 to vector<16x128xf32>
    %869 = arith.mulf %868, %850 : vector<16x128xf32>
    %870 = arith.addf %837, %869 : vector<16x128xf32>
    %c189 = arith.constant 189 : index
    %871 = memref.load %arg2[%c189] : memref<216xf32, #tpu.memory_space<smem>>
    %872 = vector.broadcast %871 : f32 to vector<16x128xf32>
    %873 = arith.mulf %872, %850 : vector<16x128xf32>
    %874 = arith.addf %841, %873 : vector<16x128xf32>
    %c190 = arith.constant 190 : index
    %875 = memref.load %arg2[%c190] : memref<216xf32, #tpu.memory_space<smem>>
    %876 = vector.broadcast %875 : f32 to vector<16x128xf32>
    %877 = arith.mulf %876, %850 : vector<16x128xf32>
    %878 = arith.addf %845, %877 : vector<16x128xf32>
    %c191 = arith.constant 191 : index
    %879 = memref.load %arg2[%c191] : memref<216xf32, #tpu.memory_space<smem>>
    %880 = vector.broadcast %879 : f32 to vector<16x128xf32>
    %881 = arith.mulf %880, %850 : vector<16x128xf32>
    %882 = arith.addf %849, %881 : vector<16x128xf32>
    %883 = vector.extract_strided_slice %618 {offsets = [2, 2], sizes = [16, 128], strides = [1, 1]} : vector<18x130xf32> to vector<16x128xf32>
    %c208 = arith.constant 208 : index
    %884 = memref.load %arg2[%c208] : memref<216xf32, #tpu.memory_space<smem>>
    %885 = vector.broadcast %884 : f32 to vector<16x128xf32>
    %886 = arith.mulf %885, %883 : vector<16x128xf32>
    %887 = arith.addf %854, %886 : vector<16x128xf32>
    %c209 = arith.constant 209 : index
    %888 = memref.load %arg2[%c209] : memref<216xf32, #tpu.memory_space<smem>>
    %889 = vector.broadcast %888 : f32 to vector<16x128xf32>
    %890 = arith.mulf %889, %883 : vector<16x128xf32>
    %891 = arith.addf %858, %890 : vector<16x128xf32>
    %c210 = arith.constant 210 : index
    %892 = memref.load %arg2[%c210] : memref<216xf32, #tpu.memory_space<smem>>
    %893 = vector.broadcast %892 : f32 to vector<16x128xf32>
    %894 = arith.mulf %893, %883 : vector<16x128xf32>
    %895 = arith.addf %862, %894 : vector<16x128xf32>
    %c211 = arith.constant 211 : index
    %896 = memref.load %arg2[%c211] : memref<216xf32, #tpu.memory_space<smem>>
    %897 = vector.broadcast %896 : f32 to vector<16x128xf32>
    %898 = arith.mulf %897, %883 : vector<16x128xf32>
    %899 = arith.addf %866, %898 : vector<16x128xf32>
    %c212 = arith.constant 212 : index
    %900 = memref.load %arg2[%c212] : memref<216xf32, #tpu.memory_space<smem>>
    %901 = vector.broadcast %900 : f32 to vector<16x128xf32>
    %902 = arith.mulf %901, %883 : vector<16x128xf32>
    %903 = arith.addf %870, %902 : vector<16x128xf32>
    %c213 = arith.constant 213 : index
    %904 = memref.load %arg2[%c213] : memref<216xf32, #tpu.memory_space<smem>>
    %905 = vector.broadcast %904 : f32 to vector<16x128xf32>
    %906 = arith.mulf %905, %883 : vector<16x128xf32>
    %907 = arith.addf %874, %906 : vector<16x128xf32>
    %c214 = arith.constant 214 : index
    %908 = memref.load %arg2[%c214] : memref<216xf32, #tpu.memory_space<smem>>
    %909 = vector.broadcast %908 : f32 to vector<16x128xf32>
    %910 = arith.mulf %909, %883 : vector<16x128xf32>
    %911 = arith.addf %878, %910 : vector<16x128xf32>
    %c215 = arith.constant 215 : index
    %912 = memref.load %arg2[%c215] : memref<216xf32, #tpu.memory_space<smem>>
    %913 = vector.broadcast %912 : f32 to vector<16x128xf32>
    %914 = arith.mulf %913, %883 : vector<16x128xf32>
    %915 = arith.addf %882, %914 : vector<16x128xf32>
    %c0_20 = arith.constant 0 : index
    %916 = memref.load %arg5[%c0_20] : memref<1xf32, #tpu.memory_space<smem>>
    %917 = vector.broadcast %916 : f32 to vector<16x128xf32>
    %c0_21 = arith.constant 0 : index
    %918 = memref.load %arg4[%c0_21] : memref<8xf32, #tpu.memory_space<smem>>
    %cst = arith.constant 0.000000e+00 : f32
    %919 = vector.broadcast %cst : f32 to vector<16x128xf32>
    %920 = arith.maximumf %887, %919 : vector<16x128xf32>
    %921 = vector.broadcast %918 : f32 to vector<16x128xf32>
    %922 = arith.mulf %921, %920 : vector<16x128xf32>
    %923 = arith.addf %917, %922 : vector<16x128xf32>
    %c1_22 = arith.constant 1 : index
    %924 = memref.load %arg4[%c1_22] : memref<8xf32, #tpu.memory_space<smem>>
    %cst_23 = arith.constant 0.000000e+00 : f32
    %925 = vector.broadcast %cst_23 : f32 to vector<16x128xf32>
    %926 = arith.maximumf %891, %925 : vector<16x128xf32>
    %927 = vector.broadcast %924 : f32 to vector<16x128xf32>
    %928 = arith.mulf %927, %926 : vector<16x128xf32>
    %929 = arith.addf %923, %928 : vector<16x128xf32>
    %c2_24 = arith.constant 2 : index
    %930 = memref.load %arg4[%c2_24] : memref<8xf32, #tpu.memory_space<smem>>
    %cst_25 = arith.constant 0.000000e+00 : f32
    %931 = vector.broadcast %cst_25 : f32 to vector<16x128xf32>
    %932 = arith.maximumf %895, %931 : vector<16x128xf32>
    %933 = vector.broadcast %930 : f32 to vector<16x128xf32>
    %934 = arith.mulf %933, %932 : vector<16x128xf32>
    %935 = arith.addf %929, %934 : vector<16x128xf32>
    %c3_26 = arith.constant 3 : index
    %936 = memref.load %arg4[%c3_26] : memref<8xf32, #tpu.memory_space<smem>>
    %cst_27 = arith.constant 0.000000e+00 : f32
    %937 = vector.broadcast %cst_27 : f32 to vector<16x128xf32>
    %938 = arith.maximumf %899, %937 : vector<16x128xf32>
    %939 = vector.broadcast %936 : f32 to vector<16x128xf32>
    %940 = arith.mulf %939, %938 : vector<16x128xf32>
    %941 = arith.addf %935, %940 : vector<16x128xf32>
    %c4_28 = arith.constant 4 : index
    %942 = memref.load %arg4[%c4_28] : memref<8xf32, #tpu.memory_space<smem>>
    %cst_29 = arith.constant 0.000000e+00 : f32
    %943 = vector.broadcast %cst_29 : f32 to vector<16x128xf32>
    %944 = arith.maximumf %903, %943 : vector<16x128xf32>
    %945 = vector.broadcast %942 : f32 to vector<16x128xf32>
    %946 = arith.mulf %945, %944 : vector<16x128xf32>
    %947 = arith.addf %941, %946 : vector<16x128xf32>
    %c5_30 = arith.constant 5 : index
    %948 = memref.load %arg4[%c5_30] : memref<8xf32, #tpu.memory_space<smem>>
    %cst_31 = arith.constant 0.000000e+00 : f32
    %949 = vector.broadcast %cst_31 : f32 to vector<16x128xf32>
    %950 = arith.maximumf %907, %949 : vector<16x128xf32>
    %951 = vector.broadcast %948 : f32 to vector<16x128xf32>
    %952 = arith.mulf %951, %950 : vector<16x128xf32>
    %953 = arith.addf %947, %952 : vector<16x128xf32>
    %c6_32 = arith.constant 6 : index
    %954 = memref.load %arg4[%c6_32] : memref<8xf32, #tpu.memory_space<smem>>
    %cst_33 = arith.constant 0.000000e+00 : f32
    %955 = vector.broadcast %cst_33 : f32 to vector<16x128xf32>
    %956 = arith.maximumf %911, %955 : vector<16x128xf32>
    %957 = vector.broadcast %954 : f32 to vector<16x128xf32>
    %958 = arith.mulf %957, %956 : vector<16x128xf32>
    %959 = arith.addf %953, %958 : vector<16x128xf32>
    %c7_34 = arith.constant 7 : index
    %960 = memref.load %arg4[%c7_34] : memref<8xf32, #tpu.memory_space<smem>>
    %cst_35 = arith.constant 0.000000e+00 : f32
    %961 = vector.broadcast %cst_35 : f32 to vector<16x128xf32>
    %962 = arith.maximumf %915, %961 : vector<16x128xf32>
    %963 = vector.broadcast %960 : f32 to vector<16x128xf32>
    %964 = arith.mulf %963, %962 : vector<16x128xf32>
    %965 = arith.addf %959, %964 : vector<16x128xf32>
    %966 = arith.negf %965 : vector<16x128xf32>
    %967 = math.exp %966 : vector<16x128xf32>
    %cst_36 = arith.constant 1.000000e+00 : f32
    %968 = vector.broadcast %cst_36 : f32 to vector<16x128xf32>
    %969 = arith.addf %968, %967 : vector<16x128xf32>
    %970 = arith.divf %968, %969 : vector<16x128xf32>
    %c0_37 = arith.constant 0 : index
    %c0_38 = arith.constant 0 : index
    %c0_39 = arith.constant 0 : index
    %971 = vector.load %arg6[%c0_37, %c0_38, %c0_39] : memref<1x16x128xf32, #tpu.memory_space<vmem>>, vector<1x16x128xf32>
    %972 = vector.shape_cast %971 : vector<1x16x128xf32> to vector<16x128xf32>
    %973 = vector.shape_cast %970 : vector<16x128xf32> to vector<1x16x128xf32>
    tpu.vector_store %arg6[%c0_37, %c0_38, %c0_39], %973 {strides = array<i32>} : memref<1x16x128xf32, #tpu.memory_space<vmem>>, vector<1x16x128xf32>,
    return
  }
  func.func @transform_0(%arg0: i32) -> (i32, i32, i32, i32) {
    %c0_i32 = arith.constant 0 : i32
    %c0_i32_0 = arith.constant 0 : i32
    %c0_i32_1 = arith.constant 0 : i32
    %c0_i32_2 = arith.constant 0 : i32
    return %arg0, %c0_i32, %c0_i32_0, %c0_i32_1 : i32, i32, i32, i32
  }
  func.func @transform_1(%arg0: i32) -> i32 {
    %c0_i32 = arith.constant 0 : i32
    %c0_i32_0 = arith.constant 0 : i32
    return %c0_i32 : i32
  }
  func.func @transform_2(%arg0: i32) -> i32 {
    %c0_i32 = arith.constant 0 : i32
    %c0_i32_0 = arith.constant 0 : i32
    return %c0_i32 : i32
  }
  func.func @transform_3(%arg0: i32) -> i32 {
    %c0_i32 = arith.constant 0 : i32
    %c0_i32_0 = arith.constant 0 : i32
    return %c0_i32 : i32
  }
  func.func @transform_4(%arg0: i32) -> i32 {
    %c0_i32 = arith.constant 0 : i32
    %c0_i32_0 = arith.constant 0 : i32
    return %c0_i32 : i32
  }
  func.func @transform_5(%arg0: i32) -> (i32, i32, i32) {
    %c0_i32 = arith.constant 0 : i32
    %c0_i32_0 = arith.constant 0 : i32
    %c0_i32_1 = arith.constant 0 : i32
    return %arg0, %c0_i32, %c0_i32_0 : i32, i32, i32
  }
}

</mosaic_0001>

<bundles_post_ra>
// kernel: tpu_custom_call.1
= control target key start
LH: loop header
LB: loop body
LE: loop exit
PB: predicated region body
PF: predicated region fallthrough
CT: control target
= control target key end

     0   :  { %s11937_s0 = inlined_call_operand.vmem [shape: bf16[2,3,18,130], index: 0, kind: input, shape index: {}]   ;;  %s11938_s1 = inlined_call_operand.vmem [shape: f32[216], index: 1, kind: input, shape index: {}]   ;;  %s11939_s2 = inlined_call_operand.vmem [shape: f32[8], index: 2, kind: input, shape index: {}]   ;;  %s11940_s3 = inlined_call_operand.vmem [shape: f32[8], index: 3, kind: input, shape index: {}]   ;;  %s11941_s4 = inlined_call_operand.<no memory space> [shape: f32[1], index: 4, kind: input, shape index: {}]   ;;  %s11942_s5 = inlined_call_operand.hbm [shape: f32[2,16,128], index: 5, kind: output, shape index: {}]  }
   0x1   :  { %10 = sst [smem:[#allocation2]] %s11941_s4 }
   0x2   :  { %11 = vsyncpa [#allocation5], 0 }
   0x3   :  { %12 = vsyncpa [#allocation7], 0 }
   0x4   :  { %13 = vsyncpa [#allocation4], 0 }
   0x5   :  { %15 = vsyncpa [#allocation4 + $0x1], 0  ;;  %s6782_s20 = smov 0   ;;  %s6784_s21 = smov 0  }
   0x6   :  { %s6786_s22 = smov 0   ;;  %s6788_s23 = smov 0  }
   0x7 LB: > { %s6803_s4 = sadd.s32 4294967295, %s6740_s23   ;;  %s6287_s24 = sadd.s32 4294967294, %s6740_s23   ;;  %s6740_s23 = sphi %s6788_s23, %s12783_s23   ;;  %s6736_s22 = sphi %s6786_s22, %s12782_s22   ;;  %s6732_s21 = sphi %s6784_s21, %s12781_s21   ;;  %s6728_s20 = sphi %s6782_s20, %s12780_s20  }
   0x8   : > { %s6807_s25 = sadd.s32 1, %s6740_s23   ;;  %s138_s26 = sadd.s32 1, %s6736_s22 }
   0x9   : > { %s135_s27 = ssub.s32 %s6740_s23, %s6807_s25  ;;  %p148_p0 = scmp.ne.s32.totalorder %s6736_s22, %s6732_s21 }
   0xa   : > { %p136_p1 = scmp.eq.s32.totalorder %s135_s27, 0  ;;  %p149_p2 = scmp.eq.s32.totalorder %s6803_s4, 1 }
   0xb   : > { %p154_p3 = scmp.ne.s32.totalorder %s6732_s21, %s6728_s20  ;;  %p155_p4 = scmp.eq.s32.totalorder %s6287_s24, 1 }
   0xc   : > { %s6818_s28 = scalar_select %p136_p1, %s6736_s22, %s138_s26  }
   0xd   : > { %p6820_p5 = por %p149_p2, %p148_p0  ;;  %p6824_p6 = por %p155_p4, %p154_p3 }
   0xe   : > { %p6288_p7 = scmp.ge.s32.totalorder %s6740_s23, 1  ;;  %p162_p8 = scmp.lt.s32.totalorder %s6740_s23, 3 }
   0xf   : > { %p6571_p9 = scmp.eq.s32.totalorder %s6803_s4, 0  ;;  %s184_s9 = sshll.u32 %s11939_s2, 4  ;;  %s185_s9 = int_to_ptr.vmem [resolvable:$true] %s184_s9 }
  0x10   : > { %p6831_p10 = pnand %p6288_p7, %p162_p8  ;;  %s174_s12 = sshll.u32 %s11938_s1, 4  ;;  %s175_s12 = int_to_ptr.vmem [resolvable:$true] %s174_s12 }
  0x11   : > { %s194_s15 = sshll.u32 %s11940_s3, 4  ;;  %s6742_s16 = smov [#allocation6]   ;;  %s195_s15 = int_to_ptr.vmem [resolvable:$true] %s194_s15 }
  0x12   : > { %p6557_p11 = pneg %p6831_p10  ;;  %s6743_s17 = smov [#allocation3]  }
  0x13   : > { %s6744_s18 = smov [#allocation8]  }
  0x14   : > { %p6558_p12 = pnand %p6571_p9, %p6557_p11  ;;  %218 = sbr.rel (%p6831_p10) target bundleno = 1727 (0x6bf), region = 40 }
  0x16   : > { %6563 = dma.vmem_to_smem (!%p6558_p12), %s185_s9, 16, %s6742_s16, [#allocation7]  }
  0x17   : > { %6560 = dma.vmem_to_smem (!%p6558_p12), %s175_s12, 32, %s6743_s17, [#allocation5]  }
  0x18   : > { %6566 = dma.vmem_to_smem (!%p6558_p12), %s195_s15, 16, %s6744_s18, [#allocation7]  }
  0x19   : > { %6715 = dma.done.wait (%p6571_p9), [#allocation5], 32  }
  0x1a   : > { %6717 = vsyncadd (%p6571_p9), [#allocation5], 4294967264 }
  0x1b   : > { %6719 = dma.done.wait (%p6571_p9), [#allocation7], 32  }
  0x1c   : > { %6721 = vsyncadd (%p6571_p9), [#allocation7], 4294967264 }
  0x1d   : > { %235 = sfence }
  0x1e   : > { %p258_p13 = scmp.lt.s32.totalorder %s6803_s4, 1  ;;  %s6313_s19 = sld [smem:[#allocation3 + $0x18]]  ;;  %vm730_vm0 = vcmask 1046528   ;;  %vm1475_vm1 = vcmask 1045504   ;;  %vm354_vm2 = vcmask 1039360   ;;  %vm547_vm3 = vcmask 1031168  }
  0x1f   : > { %s6314_s24 = sld [smem:[#allocation3 + $0x19]]  ;;  %s6745_s9 = smov 127  }
  0x20   : > { %s259_s26 = scalar_select %p258_p13, %s6803_s4, 1 }
  0x21   : > { %s6315_s10 = sld [smem:[#allocation3 + $0x1a]]  ;;  %s6746_s18 = smov 126  }
  0x22   : > { %s6542_s27 = smul.u32 72, %s259_s26  ;;  %s6316_s11 = sld [smem:[#allocation3 + $0x1b]] }
  0x23   : > { %s6317_s12 = sld [smem:[#allocation3 + $0x1c]] }
  0x24   : > { %s6863_s8 = scalar_lea.vmem %s11937_s0, %s6542_s27  ;;  %v337_v1 = vstv %s6313_s19  ;;  %s6318_s13 = sld [smem:[#allocation3 + $0x1d]] }
  0x25   : > { %v280_v0 = vld [vmem:[%s6863_s8 + $0x8] sm:$0xff]  ;;  %v279_v2 = vld [vmem:[%s6863_s8] sm:$0xff]  ;;  %v362_v5 = vstv %s6314_s24  ;;  %s6319_s14 = sld [smem:[#allocation3 + $0x1e]] }
  0x26   : > { %v6867_v3 = vunpack.c.l.bf16 %v280_v0  ;;  %v6869_v4 = vunpack.c.l.bf16 %v279_v2  ;;  %v6876_v9 = vunpack.c.h.bf16 %v280_v0  ;;  %v6878_v10 = vunpack.c.h.bf16 %v279_v2  ;;  %s6320_s15 = sld [smem:[#allocation3 + $0x1f]] }
  0x27   : > { %v386_v16 = vstv %s6315_s10  ;;  %s6321_s16 = sld [smem:[#allocation3 + $0x30]] }
  0x28   : > { %v340_v6 = vmul.f32 %v337_v1, %v6867_v3  ;;  %v338_v7 = vmul.f32 %v337_v1, %v6869_v4  ;;  %v363_v8 = vmul.f32 %v362_v5, %v6869_v4  ;;  %v341_v11 = vmul.f32 %v337_v1, %v6876_v9  ;;  %s6322_s17 = sld [smem:[#allocation3 + $0x31]] }
  0x29   : > { %v339_v12 = vmul.f32 %v337_v1, %v6878_v10  ;;  %v364_v13 = vmul.f32 %v362_v5, %v6878_v10  ;;  %v366_v14 = vmul.f32 %v362_v5, %v6876_v9  ;;  %v365_v15 = vmul.f32 %v362_v5, %v6867_v3  ;;  %s6323_s19 = sld [smem:[#allocation3 + $0x32]] }
  0x2a   : > { %350 = vrot.lane.b32.xlu1 %v340_v6, %s6745_s9  ;;  %346 = vrot.lane.b32.xlu0 %v338_v7, %s6745_s9  ;;  %v387_v17 = vmul.f32 %v386_v16, %v6869_v4  ;;  %v389_v18 = vmul.f32 %v386_v16, %v6867_v3  ;;  %v388_v19 = vmul.f32 %v386_v16, %v6878_v10  ;;  %v410_v21 = vstv %s6316_s11  ;;  %s6324_s24 = sld [smem:[#allocation3 + $0x33]] }
  0x2b   : > { %371 = vrot.lane.b32.xlu2 %v363_v8, %s6745_s9  ;;  %v390_v20 = vmul.f32 %v386_v16, %v6876_v9  ;;  %v412_v22 = vmul.f32 %v410_v21, %v6878_v10  ;;  %v411_v23 = vmul.f32 %v410_v21, %v6869_v4  ;;  %v413_v24 = vmul.f32 %v410_v21, %v6867_v3  ;;  %s6325_s26 = sld [smem:[#allocation3 + $0x34]] }
  0x2c   : > { %v434_v25 = vstv %s6317_s12  ;;  %v414_v27 = vmul.f32 %v410_v21, %v6876_v9  ;;  %v458_v31 = vstv %s6318_s13  ;;  %v482_v36 = vstv %s6319_s14  ;;  %s6326_s27 = sld [smem:[#allocation3 + $0x35]] }
  0x2d   : > { %v435_v26 = vmul.f32 %v434_v25, %v6869_v4  ;;  %v436_v28 = vmul.f32 %v434_v25, %v6878_v10  ;;  %v438_v29 = vmul.f32 %v434_v25, %v6876_v9  ;;  %v437_v30 = vmul.f32 %v434_v25, %v6867_v3  ;;  %s6327_s6 = sld [smem:[#allocation3 + $0x36]] }
  0x2e   : > { %v459_v32 = vmul.f32 %v458_v31, %v6869_v4  ;;  %v461_v33 = vmul.f32 %v458_v31, %v6867_v3  ;;  %v460_v34 = vmul.f32 %v458_v31, %v6878_v10  ;;  %v462_v35 = vmul.f32 %v458_v31, %v6876_v9  ;;  %s6328_s7 = sld [smem:[#allocation3 + $0x37]] }
  0x2f   : > { %v484_v37 = vmul.f32 %v482_v36, %v6878_v10  ;;  %v483_v38 = vmul.f32 %v482_v36, %v6869_v4  ;;  %v485_v39 = vmul.f32 %v482_v36, %v6867_v3  ;;  %v506_v40 = vstv %s6320_s15  ;;  %s6337_s10 = sld [smem:[#allocation3 + $0x60]] }
  0x30   : > { %v507_v41 = vmul.f32 %v506_v40, %v6869_v4  ;;  %v486_v42 = vmul.f32 %v482_v36, %v6876_v9  ;;  %v508_v43 = vmul.f32 %v506_v40, %v6878_v10  ;;  %v510_v44 = vmul.f32 %v506_v40, %v6876_v9  ;;  %s6338_s11 = sld [smem:[#allocation3 + $0x61]] }
  0x31   : > { %v509_v45 = vmul.f32 %v506_v40, %v6867_v3  ;;  %v530_v46 = vstv %s6321_s16  ;;  %v555_v51 = vstv %s6322_s17  ;;  %v579_v56 = vstv %s6323_s19  ;;  %s6339_s12 = sld [smem:[#allocation3 + $0x62]] }
  0x32   : > { %352 = vrot.lane.b32.xlu1 %v341_v11, %s6745_s9  ;;  %348 = vrot.lane.b32.xlu0 %v339_v12, %s6745_s9  ;;  %v531_v47 = vmul.f32 %v530_v46, %v6869_v4  ;;  %v533_v48 = vmul.f32 %v530_v46, %v6867_v3  ;;  %v532_v49 = vmul.f32 %v530_v46, %v6878_v10  ;;  %v603_v0 = vstv %s6324_s24  ;;  %s6340_s13 = sld [smem:[#allocation3 + $0x63]] }
  0x33   : > { %373 = vrot.lane.b32.xlu2 %v364_v13, %s6745_s9  ;;  %v534_v50 = vmul.f32 %v530_v46, %v6876_v9  ;;  %v557_v53 = vmul.f32 %v555_v51, %v6878_v10  ;;  %v556_v54 = vmul.f32 %v555_v51, %v6869_v4  ;;  %v558_v55 = vmul.f32 %v555_v51, %v6867_v3  ;;  %s6341_s14 = sld [smem:[#allocation3 + $0x64]] }
  0x34   : > { %v580_v58 = vmul.f32 %v579_v56, %v6869_v4  ;;  %v559_v59 = vmul.f32 %v555_v51, %v6876_v9  ;;  %v581_v60 = vmul.f32 %v579_v56, %v6878_v10  ;;  %v583_v62 = vmul.f32 %v579_v56, %v6876_v9  ;;  %s6342_s15 = sld [smem:[#allocation3 + $0x65]] }
  0x35   : > { %v582_v63 = vmul.f32 %v579_v56, %v6867_v3  ;;  %v604_v1 = vmul.f32 %v603_v0, %v6869_v4  ;;  %v606_v7 = vmul.f32 %v603_v0, %v6867_v3  ;;  %v605_v8 = vmul.f32 %v603_v0, %v6878_v10  ;;  %s6343_s16 = sld [smem:[#allocation3 + $0x66]] }
  0x36   : > { %v607_v11 = vmul.f32 %v603_v0, %v6876_v9  ;;  %v627_v12 = vstv %s6325_s26  ;;  %v675_v31 = vstv %s6327_s6  ;;  %s6344_s17 = sld [smem:[#allocation3 + $0x67]] }
  0x37   : > { %v629_v16 = vmul.f32 %v627_v12, %v6878_v10  ;;  %v678_v36 = vmul.f32 %v675_v31, %v6867_v3  ;;  %s6345_s19 = sld [smem:[#allocation3 + $0x78]] }
  0x38   : > { %s6346_s24 = sld [smem:[#allocation3 + $0x79]] }
  0x39   : > { %s6347_s26 = sld [smem:[#allocation3 + $0x7a]] }
  0x3a   : > { %377 = vrot.lane.b32.xlu1 %v366_v14, %s6745_s9  ;;  %375 = vrot.lane.b32.xlu0 %v365_v15, %s6745_s9  ;;  %s6349_s6 = sld [smem:[#allocation3 + $0x7c]] }
  0x3b   : > { %395 = vrot.lane.b32.xlu2 %v387_v17, %s6745_s9  ;;  %v628_v17 = vmul.f32 %v627_v12, %v6869_v4 }
  0x42   : > { %399 = vrot.lane.b32.xlu1 %v389_v18, %s6745_s9  ;;  %397 = vrot.lane.b32.xlu0 %v388_v19, %s6745_s9  ;;  %v630_v18 = vmul.f32 %v627_v12, %v6867_v3  ;;  %v651_v19 = vstv %s6326_s27  ;;  %s6348_s27 = sld [smem:[#allocation3 + $0x7b]] }
  0x43   : > { %401 = vrot.lane.b32.xlu2 %v390_v20, %s6745_s9  ;;  %v653_v25 = vmul.f32 %v651_v19, %v6878_v10 }
  0x4a   : > { %421 = vrot.lane.b32.xlu1 %v412_v22, %s6745_s9  ;;  %419 = vrot.lane.b32.xlu0 %v411_v23, %s6745_s9  ;;  %v652_v23 = vmul.f32 %v651_v19, %v6869_v4 }
  0x4b   : > { %423 = vrot.lane.b32.xlu2 %v413_v24, %s6745_s9  ;;  %v631_v24 = vmul.f32 %v627_v12, %v6876_v9 }
  0x52   : > { %443 = vrot.lane.b32.xlu1 %v435_v26, %s6745_s9  ;;  %425 = vrot.lane.b32.xlu0 %v414_v27, %s6745_s9 }
  0x53   : > { %445 = vrot.lane.b32.xlu2 %v436_v28, %s6745_s9 }
  0x5a   : > { %449 = vrot.lane.b32.xlu1 %v438_v29, %s6745_s9  ;;  %447 = vrot.lane.b32.xlu0 %v437_v30, %s6745_s9  ;;  %v655_v29 = vmul.f32 %v651_v19, %v6876_v9  ;;  %v654_v30 = vmul.f32 %v651_v19, %v6867_v3 }
  0x5b   : > { %467 = vrot.lane.b32.xlu2 %v459_v32, %s6745_s9  ;;  %v676_v32 = vmul.f32 %v675_v31, %v6869_v4 }
  0x62   : > { %471 = vrot.lane.b32.xlu1 %v461_v33, %s6745_s9  ;;  %469 = vrot.lane.b32.xlu0 %v460_v34, %s6745_s9 }
  0x63   : > { %473 = vrot.lane.b32.xlu2 %v462_v35, %s6745_s9 }
  0x6a   : > { %493 = vrot.lane.b32.xlu1 %v484_v37, %s6745_s9  ;;  %491 = vrot.lane.b32.xlu0 %v483_v38, %s6745_s9  ;;  %v677_v37 = vmul.f32 %v675_v31, %v6878_v10  ;;  %v679_v38 = vmul.f32 %v675_v31, %v6876_v9 }
  0x6b   : > { %495 = vrot.lane.b32.xlu2 %v485_v39, %s6745_s9  ;;  %v699_v39 = vstv %s6328_s7  ;;  %s6350_s7 = sld [smem:[#allocation3 + $0x7d]] }
  0x72   : > { %515 = vrot.lane.b32.xlu1 %v507_v41, %s6745_s9  ;;  %497 = vrot.lane.b32.xlu0 %v486_v42, %s6745_s9  ;;  %v860_v42 = vstv %s6337_s10  ;;  %s6351_s10 = sld [smem:[#allocation3 + $0x7e]] }
  0x73   : > { %517 = vrot.lane.b32.xlu2 %v508_v43, %s6745_s9  ;;  %v861_v46 = vmul.f32 %v860_v42, %v6869_v4 }
  0x7a   : > { %521 = vrot.lane.b32.xlu1 %v510_v44, %s6745_s9  ;;  %519 = vrot.lane.b32.xlu0 %v509_v45, %s6745_s9  ;;  %v701_v44 = vmul.f32 %v699_v39, %v6878_v10  ;;  %v700_v45 = vmul.f32 %v699_v39, %v6869_v4 }
  0x7b   : > { %539 = vrot.lane.b32.xlu2 %v531_v47, %s6746_s18  ;;  %v863_v47 = vmul.f32 %v860_v42, %v6867_v3 }
  0x82   : > { %543 = vrot.lane.b32.xlu1 %v533_v48, %s6746_s18  ;;  %541 = vrot.lane.b32.xlu0 %v532_v49, %s6746_s18  ;;  %v281_v48 = vld [vmem:[%s6863_s8 + $0x10] sm:$0x11]  ;;  %v702_v49 = vmul.f32 %v699_v39, %v6867_v3 }
  0x83   : > { %545 = vrot.lane.b32.xlu2 %v534_v50, %s6746_s18  ;;  %v862_v50 = vmul.f32 %v860_v42, %v6878_v10  ;;  %v7046_v51 = vunpack.c.h.bf16 %v281_v48  ;;  %v7049_v56 = vunpack.c.l.bf16 %v281_v48 }
  0x85   : > { %v6947_v52 = vpop.permute.xlu2 %371  ;;  %v866_v0 = vmul.f32 %v860_v42, %v7046_v51 }
  0x8a   : > { %566 = vrot.lane.b32.xlu1 %v557_v53, %s6746_s18  ;;  %564 = vrot.lane.b32.xlu0 %v556_v54, %s6746_s18  ;;  %v864_v53 = vmul.f32 %v860_v42, %v6876_v9  ;;  %v873_v54 = vrot.slane %v861_v46, 1 }
  0x8b   : > { %568 = vrot.lane.b32.xlu2 %v558_v55, %s6746_s18  ;;  %v874_v55 = vrot.slane %v863_v47, 1  ;;  %v936_v47 = vstv %s6339_s12  ;;  %s6361_s12 = sld [smem:[#allocation3 + $0xa8]] }
  0x8d   : > { %v6955_v57 = vpop.permute.xlu2 %373 }
  0x92   : > { %588 = vrot.lane.b32.xlu1 %v580_v58, %s6746_s18  ;;  %570 = vrot.lane.b32.xlu0 %v559_v59, %s6746_s18 }
  0x93   : > { %590 = vrot.lane.b32.xlu2 %v581_v60, %s6746_s18  ;;  %v876_v60 = vrot.slane %v862_v50, 1 }
  0x95   : > { %v6963_v61 = vpop.permute.xlu2 %395 }
  0x9a   : > { %594 = vrot.lane.b32.xlu1 %v583_v62, %s6746_s18  ;;  %592 = vrot.lane.b32.xlu0 %v582_v63, %s6746_s18  ;;  %v703_v63 = vmul.f32 %v699_v39, %v6876_v9 }
  0x9b   : > { %612 = vrot.lane.b32.xlu2 %v604_v1, %s6746_s18  ;;  %v877_v1 = vrot.slane %v864_v53, 1 }
  0x9c   : > { %v6971_v2 = vpop.permute.xlu1 %350  ;;  %v6973_v5 = vpop.permute.xlu0 %346 }
  0x9d   : > { %v6975_v6 = vpop.permute.xlu2 %401  ;;  %v878_v12 = vsel %vm730_vm0, %v876_v60, %v877_v1 }
  0xa2   : > { %616 = vrot.lane.b32.xlu1 %v606_v7, %s6746_s18  ;;  %614 = vrot.lane.b32.xlu0 %v605_v8, %s6746_s18  ;;  %v875_v7 = vsel %vm730_vm0, %v873_v54, %v874_v55  ;;  %v865_v8 = vmul.f32 %v860_v42, %v7049_v56  ;;  %v938_v54 = vmul.f32 %v936_v47, %v6878_v10 }
  0xa3   : > { %618 = vrot.lane.b32.xlu2 %v607_v11, %s6746_s18  ;;  %v898_v11 = vstv %s6338_s11  ;;  %s6352_s11 = sld [smem:[#allocation3 + $0x7f]] }
  0xa4   : > { %v6983_v13 = vpop.permute.xlu1 %352  ;;  %v6985_v14 = vpop.permute.xlu0 %348  ;;  %v879_v19 = vrot.slane %v865_v8, 1  ;;  %v904_v42 = vmul.f32 %v898_v11, %v7046_v51  ;;  %v941_v8 = vmul.f32 %v936_v47, %v7049_v56 }
  0xa5   : > { %v6987_v15 = vpop.permute.xlu2 %423 }
  0xa6   : > { %v919_v50 = vrot.slane %v904_v42, 1 }
  0xaa   : > { %638 = vrot.lane.b32.xlu1 %v629_v16, %s6746_s18  ;;  %636 = vrot.lane.b32.xlu0 %v628_v17, %s6746_s18  ;;  %v899_v16 = vmul.f32 %v898_v11, %v6869_v4  ;;  %v881_v17 = vrot.slane %v866_v0, 1  ;;  %v937_v0 = vmul.f32 %v936_v47, %v6869_v4 }
  0xab   : > { %640 = vrot.lane.b32.xlu2 %v630_v18, %s6746_s18  ;;  %v901_v18 = vmul.f32 %v898_v11, %v6867_v3 }
  0xac   : > { %v6995_v20 = vpop.permute.xlu1 %377  ;;  %v6997_v21 = vpop.permute.xlu0 %375 }
  0xad   : > { %v6999_v22 = vpop.permute.xlu2 %445  ;;  %v912_v31 = vrot.slane %v901_v18, 1 }
  0xb2   : > { %660 = vrot.lane.b32.xlu1 %v652_v23, %s6746_s18  ;;  %642 = vrot.lane.b32.xlu0 %v631_v24, %s6746_s18 }
  0xb3   : > { %662 = vrot.lane.b32.xlu2 %v653_v25, %s6746_s18  ;;  %v911_v25 = vrot.slane %v899_v16, 1  ;;  %v949_v16 = vrot.slane %v937_v0, 1 }
  0xb4   : > { %v7007_v26 = vpop.permute.xlu1 %399  ;;  %v7009_v27 = vpop.permute.xlu0 %397 }
  0xb5   : > { %v7011_v28 = vpop.permute.xlu2 %467  ;;  %v913_v39 = vsel %vm730_vm0, %v911_v25, %v912_v31  ;;  %v974_v25 = vstv %s6340_s13  ;;  %s6362_s13 = sld [smem:[#allocation3 + $0xa9]] }
  0xb6   : > { %v980_v0 = vmul.f32 %v974_v25, %v7046_v51 }
  0xba   : > { %666 = vrot.lane.b32.xlu1 %v655_v29, %s6746_s18  ;;  %664 = vrot.lane.b32.xlu0 %v654_v30, %s6746_s18  ;;  %v882_v30 = vsel %vm730_vm0, %v877_v1, %v881_v17  ;;  %v939_v1 = vmul.f32 %v936_v47, %v6867_v3 }
  0xbb   : > { %684 = vrot.lane.b32.xlu2 %v676_v32, %s6746_s18  ;;  %v880_v32 = vsel %vm730_vm0, %v874_v55, %v879_v19  ;;  %v940_v55 = vmul.f32 %v936_v47, %v6876_v9 }
  0xbc   : > { %v7019_v33 = vpop.permute.xlu1 %421  ;;  %v7021_v34 = vpop.permute.xlu0 %419  ;;  %v950_v17 = vrot.slane %v939_v1, 1 }
  0xbd   : > { %v7023_v35 = vpop.permute.xlu2 %473 }
  0xc2   : > { %688 = vrot.lane.b32.xlu1 %v678_v36, %s6746_s18  ;;  %686 = vrot.lane.b32.xlu0 %v677_v37, %s6746_s18  ;;  %v903_v36 = vmul.f32 %v898_v11, %v7049_v56  ;;  %v900_v37 = vmul.f32 %v898_v11, %v6878_v10 }
  0xc3   : > { %690 = vrot.lane.b32.xlu2 %v679_v38, %s6746_s18  ;;  %v902_v38 = vmul.f32 %v898_v11, %v6876_v9  ;;  %v952_v11 = vrot.slane %v938_v54, 1 }
  0xc4   : > { %v7031_v40 = vpop.permute.xlu1 %443  ;;  %v7033_v41 = vpop.permute.xlu0 %425 }
  0xc5   : > { %v7035_v43 = vpop.permute.xlu2 %495  ;;  %v915_v46 = vrot.slane %v902_v38, 1  ;;  %v977_v38 = vmul.f32 %v974_v25, %v6867_v3 }
  0xca   : > { %710 = vrot.lane.b32.xlu1 %v701_v44, %s6746_s18  ;;  %708 = vrot.lane.b32.xlu0 %v700_v45, %s6746_s18  ;;  %v917_v44 = vrot.slane %v903_v36, 1  ;;  %v914_v45 = vrot.slane %v900_v37, 1  ;;  %v951_v36 = vsel %vm730_vm0, %v949_v16, %v950_v17  ;;  %v975_v37 = vmul.f32 %v974_v25, %v6869_v4 }
  0xcb   : > { %712 = vrot.lane.b32.xlu2 %v702_v49, %s6746_s18  ;;  %v1012_v16 = vstv %s6341_s14  ;;  %s6363_s14 = sld [smem:[#allocation3 + $0xaa]] }
  0xcc   : > { %v7052_v58 = vpop.permute.xlu1 %449  ;;  %v7054_v59 = vpop.permute.xlu0 %447  ;;  %v918_v60 = vsel %vm730_vm0, %v912_v31, %v917_v44  ;;  %v976_v44 = vmul.f32 %v974_v25, %v6878_v10 }
  0xcd   : > { %v7056_v62 = vpop.permute.xlu2 %517 }
  0xd2   : > { %883 = vrot.lane.b32.xlu1 %v875_v7, %s6745_s9  ;;  %714 = vrot.lane.b32.xlu0 %v703_v63, %s6746_s18  ;;  %v916_v63 = vsel %vm730_vm0, %v914_v45, %v915_v46  ;;  %v920_v7 = vsel %vm730_vm0, %v915_v46, %v919_v50  ;;  %v978_v45 = vmul.f32 %v974_v25, %v6876_v9  ;;  %v987_v46 = vrot.slane %v975_v37, 1 }
  0xd3   : > { %885 = vrot.lane.b32.xlu2 %v878_v12, %s6745_s9  ;;  %v953_v12 = vrot.slane %v940_v55, 1  ;;  %v988_v50 = vrot.slane %v977_v38, 1 }
  0xd4   : > { %v7068_v23 = vpop.permute.xlu1 %471  ;;  %v7070_v24 = vpop.permute.xlu0 %469  ;;  %v991_v1 = vrot.slane %v978_v45, 1 }
  0xd5   : > { %v7072_v29 = vpop.permute.xlu2 %539 }
  0xd6   : > { %11953 = vst [vmem:[#allocation13_spill] sm:$0xff] %v7072_v29 }
  0xda   : > { %889 = vrot.lane.b32.xlu1 %v882_v30, %s6745_s9  ;;  %887 = vrot.lane.b32.xlu0 %v880_v32, %s6745_s9  ;;  %v955_v30 = vrot.slane %v941_v8, 1  ;;  %v954_v32 = vsel %vm730_vm0, %v952_v11, %v953_v12  ;;  %v979_v11 = vmul.f32 %v974_v25, %v7049_v56 }
  0xdb   : > { %921 = vrot.lane.b32.xlu2 %v913_v39, %s6745_s9  ;;  %v942_v39 = vmul.f32 %v936_v47, %v7046_v51  ;;  %v990_v47 = vrot.slane %v976_v44, 1 }
  0xdc   : > { %v7084_v48 = vpop.permute.xlu1 %493  ;;  %v7086_v49 = vpop.permute.xlu0 %491  ;;  %v956_v42 = vsel %vm730_vm0, %v950_v17, %v955_v30  ;;  %v1013_v30 = vmul.f32 %v1012_v16, %v6869_v4  ;;  %v993_v37 = vrot.slane %v979_v11, 1 }
  0xdd   : > { %v7088_v53 = vpop.permute.xlu2 %545  ;;  %v957_v54 = vrot.slane %v942_v39, 1  ;;  %v992_v17 = vsel %vm730_vm0, %v990_v47, %v991_v1  ;;  %v1016_v47 = vmul.f32 %v1012_v16, %v6876_v9 }
  0xde   : > { %v1025_v25 = vrot.slane %v1013_v30, 1  ;;  %v994_v45 = vsel %vm730_vm0, %v988_v50, %v993_v37 }
  0xdf   : > { %v958_v8 = vsel %vm730_vm0, %v953_v12, %v957_v54  ;;  %v1014_v54 = vmul.f32 %v1012_v16, %v6878_v10 }
  0xe1   : > { %v1028_v11 = vrot.slane %v1014_v54, 1 }
  0xe2   : > { %925 = vrot.lane.b32.xlu1 %v918_v60, %s6745_s9  ;;  %923 = vrot.lane.b32.xlu0 %v916_v63, %s6745_s9 }
  0xe3   : > { %927 = vrot.lane.b32.xlu2 %v920_v7, %s6745_s9  ;;  %v989_v7 = vsel %vm730_vm0, %v987_v46, %v988_v50  ;;  %v1017_v46 = vmul.f32 %v1012_v16, %v7049_v56 }
  0xe4   : > { %v7101_v18 = vpop.permute.xlu1 %515  ;;  %v7103_v19 = vpop.permute.xlu0 %497 }
  0xe5   : > { %v7105_v31 = vpop.permute.xlu2 %568 }
  0xe6   : > { %11954 = vst [vmem:[#allocation14_spill] sm:$0xff] %v7105_v31 }
  0xea   : > { %961 = vrot.lane.b32.xlu1 %v954_v32, %s6745_s9  ;;  %959 = vrot.lane.b32.xlu0 %v951_v36, %s6745_s9  ;;  %v995_v32 = vrot.slane %v980_v0, 1  ;;  %v1015_v36 = vmul.f32 %v1012_v16, %v6867_v3 }
  0xeb   : > { %963 = vrot.lane.b32.xlu2 %v956_v42, %s6745_s9 }
  0xec   : > { %v7118_v55 = vpop.permute.xlu1 %521  ;;  %v7120_v60 = vpop.permute.xlu0 %519  ;;  %v996_v42 = vsel %vm730_vm0, %v991_v1, %v995_v32  ;;  %v1026_v44 = vrot.slane %v1015_v36, 1  ;;  %v1029_v1 = vrot.slane %v1016_v47, 1 }
  0xed   : > { %11955 = vst [vmem:[#allocation15_spill] sm:$0xff] %v7118_v55  ;;  %v7122_v63 = vpop.permute.xlu2 %590 }
  0xee   : > { %11956 = vst [vmem:[#allocation16_spill] sm:$0xff] %v7120_v60  ;;  %v1027_v0 = vsel %vm730_vm0, %v1025_v25, %v1026_v44 }
  0xef   : > { %11957 = vst [vmem:[#allocation17_spill] sm:$0xff] %v7122_v63 }
  0xf2   : > { %997 = vrot.lane.b32.xlu1 %v989_v7, %s6745_s9  ;;  %965 = vrot.lane.b32.xlu0 %v958_v8, %s6745_s9  ;;  %v1018_v7 = vmul.f32 %v1012_v16, %v7046_v51  ;;  %v1031_v8 = vrot.slane %v1017_v46, 1 }
  0xf3   : > { %999 = vrot.lane.b32.xlu2 %v992_v17, %s6745_s9  ;;  %v1050_v17 = vstv %s6342_s15  ;;  %s6364_s15 = sld [smem:[#allocation3 + $0xab]] }
  0xf4   : > { %v7134_v38 = vpop.permute.xlu1 %543  ;;  %v7136_v12 = vpop.permute.xlu0 %541  ;;  %v1033_v32 = vrot.slane %v1018_v7, 1  ;;  %v1052_v16 = vmul.f32 %v1050_v17, %v6878_v10  ;;  %v1054_v37 = vmul.f32 %v1050_v17, %v6876_v9  ;;  %v1032_v25 = vsel %vm730_vm0, %v1026_v44, %v1031_v8 }
  0xf5   : > { %11958 = vst [vmem:[#allocation18_spill] sm:$0xff] %v7134_v38  ;;  %v7138_v39 = vpop.permute.xlu2 %612  ;;  %v1053_v46 = vmul.f32 %v1050_v17, %v6867_v3  ;;  %v1055_v47 = vmul.f32 %v1050_v17, %v7049_v56 }
  0xf6   : > { %11959 = vst [vmem:[#allocation19_spill] sm:$0xff] %v7136_v12  ;;  %v1034_v54 = vsel %vm730_vm0, %v1029_v1, %v1033_v32  ;;  %v1067_v7 = vrot.slane %v1054_v37, 1  ;;  %v1056_v37 = vmul.f32 %v1050_v17, %v7046_v51 }
  0xf7   : > { %11960 = vst [vmem:[#allocation20_spill] sm:$0xff] %v7138_v39  ;;  %v1064_v39 = vrot.slane %v1053_v46, 1  ;;  %v1069_v31 = vrot.slane %v1055_v47, 1 }
  0xfa   : > { %1003 = vrot.lane.b32.xlu1 %v996_v42, %s6745_s9  ;;  %1001 = vrot.lane.b32.xlu0 %v994_v45, %s6745_s9  ;;  %v1030_v42 = vsel %vm730_vm0, %v1028_v11, %v1029_v1  ;;  %v1051_v45 = vmul.f32 %v1050_v17, %v6869_v4  ;;  %v1088_v11 = vstv %s6343_s16  ;;  %s6365_s16 = sld [smem:[#allocation3 + $0xac]] }
  0xfb   : > { %1035 = vrot.lane.b32.xlu2 %v1027_v0, %s6745_s9  ;;  %v1066_v0 = vrot.slane %v1052_v16, 1  ;;  %v1091_v16 = vmul.f32 %v1088_v11, %v6867_v3  ;;  %v1092_v46 = vmul.f32 %v1088_v11, %v6876_v9 }
  0xfc   : > { %v7150_v50 = vpop.permute.xlu1 %566  ;;  %v7152_v30 = vpop.permute.xlu0 %564 }
  0xfd   : > { %11961 = vst [vmem:[#allocation21_spill] sm:$0xff] %v7150_v50  ;;  %v7154_v36 = vpop.permute.xlu2 %618  ;;  %v1068_v1 = vsel %vm730_vm0, %v1066_v0, %v1067_v7  ;;  %v1102_v47 = vrot.slane %v1091_v16, 1  ;;  %v1126_v16 = vstv %s6344_s17  ;;  %s6366_s17 = sld [smem:[#allocation3 + $0xad]] }
  0xfe   : > { %11962 = vst [vmem:[#allocation22_spill] sm:$0xff] %v7152_v30 }
  0xff   : > { %11963 = vst [vmem:[#allocation23_spill] sm:$0xff] %v7154_v36  ;;  %v1063_v36 = vrot.slane %v1051_v45, 1  ;;  %v1090_v45 = vmul.f32 %v1088_v11, %v6878_v10 }
 0x101   : > { %v1065_v32 = vsel %vm730_vm0, %v1063_v36, %v1064_v39  ;;  %v1071_v36 = vrot.slane %v1056_v37, 1  ;;  %v1104_v17 = vrot.slane %v1090_v45, 1 }
 0x102   : > { %1039 = vrot.lane.b32.xlu1 %v1032_v25, %s6745_s9  ;;  %1037 = vrot.lane.b32.xlu0 %v1030_v42, %s6745_s9  ;;  %v1089_v25 = vmul.f32 %v1088_v11, %v6869_v4  ;;  %v1070_v42 = vsel %vm730_vm0, %v1064_v39, %v1069_v31  ;;  %v1094_v31 = vmul.f32 %v1088_v11, %v7046_v51  ;;  %v1105_v39 = vrot.slane %v1092_v46, 1 }
 0x103   : > { %1041 = vrot.lane.b32.xlu2 %v1034_v54, %s6745_s9 }
 0x104   : > { %v7167_v44 = vpop.permute.xlu1 %588  ;;  %v7169_v8 = vpop.permute.xlu0 %570  ;;  %v1101_v54 = vrot.slane %v1089_v25, 1  ;;  %v1093_v25 = vmul.f32 %v1088_v11, %v7049_v56  ;;  %v1106_v37 = vsel %vm730_vm0, %v1104_v17, %v1105_v39  ;;  %v1109_v45 = vrot.slane %v1094_v31, 1 }
 0x105   : > { %11964 = vst [vmem:[#allocation24_spill] sm:$0xff] %v7167_v44  ;;  %v7171_v63 = vpop.permute.xlu2 %640  ;;  %v1131_v31 = vmul.f32 %v1126_v16, %v7049_v56 }
 0x106   : > { %11965 = vst [vmem:[#allocation25_spill] sm:$0xff] %v7169_v8 }
 0x107   : > { %11966 = vst [vmem:[#allocation26_spill] sm:$0xff] %v7171_v63 }
 0x10a   : > { %1075 = vrot.lane.b32.xlu1 %v1068_v1, %s6745_s9  ;;  %1073 = vrot.lane.b32.xlu0 %v1065_v32, %s6745_s9  ;;  %v1103_v1 = vsel %vm730_vm0, %v1101_v54, %v1102_v47  ;;  %v1072_v32 = vsel %vm730_vm0, %v1067_v7, %v1071_v36  ;;  %v1110_v36 = vsel %vm730_vm0, %v1105_v39, %v1109_v45 }
 0x10b   : > { %1077 = vrot.lane.b32.xlu2 %v1070_v42, %s6745_s9  ;;  %v1127_v42 = vmul.f32 %v1126_v16, %v6869_v4 }
 0x10c   : > { %v7184_v0 = vpop.permute.xlu1 %594  ;;  %v7186_v63 = vpop.permute.xlu0 %592 }
 0x10d   : > { %11967 = vst [vmem:[#allocation27_spill] sm:$0xff] %v7184_v0  ;;  %v7188_v8 = vpop.permute.xlu2 %662  ;;  %v1139_v11 = vrot.slane %v1127_v42, 1  ;;  %v1145_v42 = vrot.slane %v1131_v31, 1 }
 0x10e   : > { %11968 = vst [vmem:[#allocation28_spill] sm:$0xff] %v7186_v63  ;;  %v1107_v63 = vrot.slane %v1093_v25, 1  ;;  %v1130_v25 = vmul.f32 %v1126_v16, %v6876_v9 }
 0x10f   : > { %11969 = vst [vmem:[#allocation29_spill] sm:$0xff] %v7188_v8  ;;  %v1129_v8 = vmul.f32 %v1126_v16, %v6867_v3 }
 0x110   : > { %v1143_v39 = vrot.slane %v1130_v25, 1 }
 0x111   : > { %v1140_v17 = vrot.slane %v1129_v8, 1  ;;  %v1164_v8 = vstv %s6345_s19  ;;  %s6367_s19 = sld [smem:[#allocation3 + $0xae]] }
 0x112   : > { %1111 = vrot.lane.b32.xlu1 %v1103_v1, %s6745_s9  ;;  %1079 = vrot.lane.b32.xlu0 %v1072_v32, %s6745_s9  ;;  %v1108_v1 = vsel %vm730_vm0, %v1102_v47, %v1107_v63  ;;  %v1128_v32 = vmul.f32 %v1126_v16, %v6878_v10  ;;  %v1165_v31 = vmul.f32 %v1164_v8, %v6869_v4 }
 0x113   : > { %1113 = vrot.lane.b32.xlu2 %v1106_v37, %s6745_s9  ;;  %v1141_v37 = vsel %vm730_vm0, %v1139_v11, %v1140_v17  ;;  %v1168_v11 = vmul.f32 %v1164_v8, %v6876_v9 }
 0x114   : > { %v7200_v46 = vpop.permute.xlu1 %616  ;;  %v7202_v7 = vpop.permute.xlu0 %614 }
 0x115   : > { %11970 = vst [vmem:[#allocation30_spill] sm:$0xff] %v7200_v46  ;;  %v7204_v54 = vpop.permute.xlu2 %684  ;;  %v1132_v46 = vmul.f32 %v1126_v16, %v7046_v51  ;;  %v1166_v16 = vmul.f32 %v1164_v8, %v6878_v10 }
 0x116   : > { %11971 = vst [vmem:[#allocation31_spill] sm:$0xff] %v7202_v7 }
 0x117   : > { %11972 = vst [vmem:[#allocation32_spill] sm:$0xff] %v7204_v54  ;;  %v1142_v54 = vrot.slane %v1128_v32, 1  ;;  %v1147_v45 = vrot.slane %v1132_v46, 1  ;;  %v1167_v32 = vmul.f32 %v1164_v8, %v6867_v3  ;;  %v1180_v46 = vrot.slane %v1166_v16, 1 }
 0x119   : > { %v1148_v25 = vsel %vm730_vm0, %v1143_v39, %v1147_v45 }
 0x11a   : > { %1117 = vrot.lane.b32.xlu1 %v1110_v36, %s6745_s9  ;;  %1115 = vrot.lane.b32.xlu0 %v1108_v1, %s6745_s9  ;;  %v1146_v36 = vsel %vm730_vm0, %v1140_v17, %v1145_v42  ;;  %v1144_v1 = vsel %vm730_vm0, %v1142_v54, %v1143_v39  ;;  %v1202_v42 = vstv %s6346_s24  ;;  %s6368_s24 = sld [smem:[#allocation3 + $0xaf]] }
 0x11b   : > { %1149 = vrot.lane.b32.xlu2 %v1141_v37, %s6745_s9  ;;  %v1169_v37 = vmul.f32 %v1164_v8, %v7049_v56  ;;  %v1205_v16 = vmul.f32 %v1202_v42, %v6867_v3 }
 0x11c   : > { %v7216_v63 = vpop.permute.xlu1 %638  ;;  %v7218_v47 = vpop.permute.xlu0 %636 }
 0x11d   : > { %11973 = vst [vmem:[#allocation33_spill] sm:$0xff] %v7216_v63  ;;  %v7220_v7 = vpop.permute.xlu2 %690  ;;  %v1178_v63 = vrot.slane %v1167_v32, 1  ;;  %v1183_v0 = vrot.slane %v1169_v37, 1  ;;  %v1206_v32 = vmul.f32 %v1202_v42, %v6876_v9  ;;  %v1216_v37 = vrot.slane %v1205_v16, 1 }
 0x11e   : > { %11974 = vst [vmem:[#allocation34_spill] sm:$0xff] %v7218_v47  ;;  %v1177_v47 = vrot.slane %v1165_v31, 1  ;;  %v1204_v31 = vmul.f32 %v1202_v42, %v6878_v10  ;;  %v1240_v16 = vstv %s6347_s26  ;;  %s6369_s26 = sld [smem:[#allocation3 + $0xc0]] }
 0x11f   : > { %11975 = vst [vmem:[#allocation35_spill] sm:$0xff] %v7220_v7  ;;  %v1181_v7 = vrot.slane %v1168_v11, 1  ;;  %v1170_v11 = vmul.f32 %v1164_v8, %v7046_v51 }
 0x120   : > { %v1179_v45 = vsel %vm730_vm0, %v1177_v47, %v1178_v63  ;;  %v1218_v8 = vrot.slane %v1204_v31, 1 }
 0x121   : > { %v1182_v39 = vsel %vm730_vm0, %v1180_v46, %v1181_v7  ;;  %v1185_v47 = vrot.slane %v1170_v11, 1 }
 0x122   : > { %1153 = vrot.lane.b32.xlu1 %v1146_v36, %s6745_s9  ;;  %1151 = vrot.lane.b32.xlu0 %v1144_v1, %s6745_s9  ;;  %v1203_v36 = vmul.f32 %v1202_v42, %v6869_v4  ;;  %v1184_v1 = vsel %vm730_vm0, %v1178_v63, %v1183_v0  ;;  %v1208_v0 = vmul.f32 %v1202_v42, %v7046_v51  ;;  %v1219_v63 = vrot.slane %v1206_v32, 1 }
 0x123   : > { %1155 = vrot.lane.b32.xlu2 %v1148_v25, %s6745_s9 }
 0x124   : > { %v7233_v17 = vpop.permute.xlu1 %660  ;;  %v7235_v54 = vpop.permute.xlu0 %642  ;;  %v1215_v25 = vrot.slane %v1203_v36, 1  ;;  %v1207_v36 = vmul.f32 %v1202_v42, %v7049_v56  ;;  %v1220_v11 = vsel %vm730_vm0, %v1218_v8, %v1219_v63  ;;  %v1223_v31 = vrot.slane %v1208_v0, 1 }
 0x125   : > { %11976 = vst [vmem:[#allocation36_spill] sm:$0xff] %v7233_v17  ;;  %v7237_v44 = vpop.permute.xlu2 %712  ;;  %v1245_v0 = vmul.f32 %v1240_v16, %v7049_v56 }
 0x126   : > { %11977 = vst [vmem:[#allocation37_spill] sm:$0xff] %v7235_v54 }
 0x127   : > { %11978 = vst [vmem:[#allocation38_spill] sm:$0xff] %v7237_v44 }
 0x12a   : > { %1189 = vrot.lane.b32.xlu1 %v1182_v39, %s6746_s18  ;;  %1187 = vrot.lane.b32.xlu0 %v1179_v45, %s6746_s18  ;;  %v1217_v39 = vsel %vm730_vm0, %v1215_v25, %v1216_v37  ;;  %v1186_v45 = vsel %vm730_vm0, %v1181_v7, %v1185_v47  ;;  %v1224_v47 = vsel %vm730_vm0, %v1219_v63, %v1223_v31 }
 0x12b   : > { %1191 = vrot.lane.b32.xlu2 %v1184_v1, %s6746_s18  ;;  %v1241_v1 = vmul.f32 %v1240_v16, %v6869_v4 }
 0x12c   : > { %v7250_v46 = vpop.permute.xlu1 %666  ;;  %v7252_v44 = vpop.permute.xlu0 %664 }
 0x12d   : > { %11979 = vst [vmem:[#allocation39_spill] sm:$0xff] %v7250_v46  ;;  %v7254_v54 = vpop.permute.xlu2 %885  ;;  %v1253_v42 = vrot.slane %v1241_v1, 1  ;;  %v1259_v1 = vrot.slane %v1245_v0, 1 }
 0x12e   : > { %11980 = vst [vmem:[#allocation40_spill] sm:$0xff] %v7252_v44  ;;  %v1221_v44 = vrot.slane %v1207_v36, 1  ;;  %v1244_v36 = vmul.f32 %v1240_v16, %v6876_v9 }
 0x12f   : > { %11981 = vst [vmem:[#allocation41_spill] sm:$0xff] %v7254_v54  ;;  %v1243_v54 = vmul.f32 %v1240_v16, %v6867_v3 }
 0x130   : > { %v1257_v63 = vrot.slane %v1244_v36, 1 }
 0x131   : > { %v1254_v8 = vrot.slane %v1243_v54, 1  ;;  %v1278_v54 = vstv %s6348_s27  ;;  %s6370_s27 = sld [smem:[#allocation3 + $0xc1]] }
 0x132   : > { %1225 = vrot.lane.b32.xlu1 %v1217_v39, %s6746_s18  ;;  %1193 = vrot.lane.b32.xlu0 %v1186_v45, %s6746_s18  ;;  %v1222_v39 = vsel %vm730_vm0, %v1216_v37, %v1221_v44  ;;  %v1242_v45 = vmul.f32 %v1240_v16, %v6878_v10  ;;  %v1279_v0 = vmul.f32 %v1278_v54, %v6869_v4 }
 0x133   : > { %1227 = vrot.lane.b32.xlu2 %v1220_v11, %s6746_s18  ;;  %v1255_v11 = vsel %vm730_vm0, %v1253_v42, %v1254_v8  ;;  %v1282_v42 = vmul.f32 %v1278_v54, %v6876_v9 }
 0x134   : > { %v7266_v32 = vpop.permute.xlu1 %688  ;;  %v7268_v7 = vpop.permute.xlu0 %686 }
 0x135   : > { %11982 = vst [vmem:[#allocation42_spill] sm:$0xff] %v7266_v32  ;;  %v7270_v25 = vpop.permute.xlu2 %921  ;;  %v1246_v32 = vmul.f32 %v1240_v16, %v7046_v51  ;;  %v1280_v16 = vmul.f32 %v1278_v54, %v6878_v10 }
 0x136   : > { %11983 = vst [vmem:[#allocation43_spill] sm:$0xff] %v7268_v7 }
 0x137   : > { %11984 = vst [vmem:[#allocation44_spill] sm:$0xff] %v7270_v25  ;;  %v1256_v25 = vrot.slane %v1242_v45, 1  ;;  %v1261_v31 = vrot.slane %v1246_v32, 1  ;;  %v1281_v45 = vmul.f32 %v1278_v54, %v6867_v3  ;;  %v1294_v32 = vrot.slane %v1280_v16, 1 }
 0x139   : > { %v1262_v36 = vsel %vm730_vm0, %v1257_v63, %v1261_v31 }
 0x13a   : > { %1231 = vrot.lane.b32.xlu1 %v1224_v47, %s6746_s18  ;;  %1229 = vrot.lane.b32.xlu0 %v1222_v39, %s6746_s18  ;;  %v1260_v47 = vsel %vm730_vm0, %v1254_v8, %v1259_v1  ;;  %v1258_v39 = vsel %vm730_vm0, %v1256_v25, %v1257_v63  ;;  %v1316_v1 = vstv %s6349_s6  ;;  %s6371_s6 = sld [smem:[#allocation3 + $0xc2]] }
 0x13b   : > { %1263 = vrot.lane.b32.xlu2 %v1255_v11, %s6746_s18  ;;  %v1283_v11 = vmul.f32 %v1278_v54, %v7049_v56  ;;  %v1319_v16 = vmul.f32 %v1316_v1, %v6867_v3 }
 0x13c   : > { %v7282_v44 = vpop.permute.xlu1 %710  ;;  %v7284_v37 = vpop.permute.xlu0 %708 }
 0x13d   : > { %11985 = vst [vmem:[#allocation45_spill] sm:$0xff] %v7282_v44  ;;  %v7286_v7 = vpop.permute.xlu2 %927  ;;  %v1292_v44 = vrot.slane %v1281_v45, 1  ;;  %v1297_v46 = vrot.slane %v1283_v11, 1  ;;  %v1320_v45 = vmul.f32 %v1316_v1, %v6876_v9  ;;  %v1330_v11 = vrot.slane %v1319_v16, 1 }
 0x13e   : > { %11986 = vst [vmem:[#allocation46_spill] sm:$0xff] %v7284_v37  ;;  %v1291_v37 = vrot.slane %v1279_v0, 1  ;;  %v1318_v0 = vmul.f32 %v1316_v1, %v6878_v10  ;;  %v1354_v16 = vstv %s6350_s7  ;;  %s6372_s7 = sld [smem:[#allocation3 + $0xc3]] }
 0x13f   : > { %11987 = vst [vmem:[#allocation47_spill] sm:$0xff] %v7286_v7  ;;  %v1295_v7 = vrot.slane %v1282_v42, 1  ;;  %v1284_v42 = vmul.f32 %v1278_v54, %v7046_v51 }
 0x140   : > { %v1293_v31 = vsel %vm730_vm0, %v1291_v37, %v1292_v44  ;;  %v1332_v54 = vrot.slane %v1318_v0, 1 }
 0x141   : > { %v1296_v63 = vsel %vm730_vm0, %v1294_v32, %v1295_v7  ;;  %v1299_v37 = vrot.slane %v1284_v42, 1 }
 0x142   : > { %1267 = vrot.lane.b32.xlu1 %v1260_v47, %s6746_s18  ;;  %1265 = vrot.lane.b32.xlu0 %v1258_v39, %s6746_s18  ;;  %v1317_v47 = vmul.f32 %v1316_v1, %v6869_v4  ;;  %v1298_v39 = vsel %vm730_vm0, %v1292_v44, %v1297_v46  ;;  %v1322_v46 = vmul.f32 %v1316_v1, %v7046_v51  ;;  %v1333_v44 = vrot.slane %v1320_v45, 1 }
 0x143   : > { %1269 = vrot.lane.b32.xlu2 %v1262_v36, %s6746_s18 }
 0x144   : > { %v7299_v8 = vpop.permute.xlu1 %883  ;;  %v7301_v25 = vpop.permute.xlu0 %714  ;;  %v1329_v36 = vrot.slane %v1317_v47, 1  ;;  %v1321_v47 = vmul.f32 %v1316_v1, %v7049_v56  ;;  %v1334_v42 = vsel %vm730_vm0, %v1332_v54, %v1333_v44  ;;  %v1337_v0 = vrot.slane %v1322_v46, 1 }
 0x145   : > { %11988 = vst [vmem:[#allocation48_spill] sm:$0xff] %v7299_v8  ;;  %v7303_v17 = vpop.permute.xlu2 %963  ;;  %v1359_v46 = vmul.f32 %v1354_v16, %v7049_v56 }
 0x146   : > { %11989 = vst [vmem:[#allocation49_spill] sm:$0xff] %v7301_v25 }
 0x147   : > { %11990 = vst [vmem:[#allocation50_spill] sm:$0xff] %v7303_v17 }
 0x14a   : > { %1303 = vrot.lane.b32.xlu1 %v1296_v63, %s6746_s18  ;;  %1301 = vrot.lane.b32.xlu0 %v1293_v31, %s6746_s18  ;;  %v1331_v63 = vsel %vm730_vm0, %v1329_v36, %v1330_v11  ;;  %v1300_v31 = vsel %vm730_vm0, %v1295_v7, %v1299_v37  ;;  %v1338_v37 = vsel %vm730_vm0, %v1333_v44, %v1337_v0 }
 0x14b   : > { %1305 = vrot.lane.b32.xlu2 %v1298_v39, %s6746_s18  ;;  %v1355_v39 = vmul.f32 %v1354_v16, %v6869_v4 }
 0x14c   : > { %v7316_v32 = vpop.permute.xlu1 %889  ;;  %v7318_v17 = vpop.permute.xlu0 %887 }
 0x14d   : > { %11991 = vst [vmem:[#allocation51_spill] sm:$0xff] %v7316_v32  ;;  %v7320_v8 = vpop.permute.xlu2 %999  ;;  %v1367_v1 = vrot.slane %v1355_v39, 1  ;;  %v1373_v39 = vrot.slane %v1359_v46, 1 }
 0x14e   : > { %11992 = vst [vmem:[#allocation52_spill] sm:$0xff] %v7318_v17  ;;  %v1335_v17 = vrot.slane %v1321_v47, 1  ;;  %v1358_v47 = vmul.f32 %v1354_v16, %v6876_v9 }
 0x14f   : > { %11993 = vst [vmem:[#allocation53_spill] sm:$0xff] %v7320_v8  ;;  %v1357_v8 = vmul.f32 %v1354_v16, %v6867_v3 }
 0x150   : > { %v1371_v44 = vrot.slane %v1358_v47, 1 }
 0x151   : > { %v1368_v54 = vrot.slane %v1357_v8, 1  ;;  %v1392_v8 = vstv %s6351_s10  ;;  %s6373_s10 = sld [smem:[#allocation3 + $0xc4]] }
 0x152   : > { %1339 = vrot.lane.b32.xlu1 %v1331_v63, %s6746_s18  ;;  %1307 = vrot.lane.b32.xlu0 %v1300_v31, %s6746_s18  ;;  %v1336_v63 = vsel %vm730_vm0, %v1330_v11, %v1335_v17  ;;  %v1356_v31 = vmul.f32 %v1354_v16, %v6878_v10  ;;  %v1393_v46 = vmul.f32 %v1392_v8, %v6869_v4 }
 0x153   : > { %1341 = vrot.lane.b32.xlu2 %v1334_v42, %s6746_s18  ;;  %v1369_v42 = vsel %vm730_vm0, %v1367_v1, %v1368_v54  ;;  %v1396_v1 = vmul.f32 %v1392_v8, %v6876_v9 }
 0x154   : > { %v7332_v45 = vpop.permute.xlu1 %925  ;;  %v7334_v7 = vpop.permute.xlu0 %923 }
 0x155   : > { %11994 = vst [vmem:[#allocation54_spill] sm:$0xff] %v7332_v45  ;;  %v7336_v36 = vpop.permute.xlu2 %1035  ;;  %v1360_v45 = vmul.f32 %v1354_v16, %v7046_v51  ;;  %v1394_v16 = vmul.f32 %v1392_v8, %v6878_v10 }
 0x156   : > { %11995 = vst [vmem:[#allocation55_spill] sm:$0xff] %v7334_v7 }
 0x157   : > { %11996 = vst [vmem:[#allocation56_spill] sm:$0xff] %v7336_v36  ;;  %v1370_v36 = vrot.slane %v1356_v31, 1  ;;  %v1375_v0 = vrot.slane %v1360_v45, 1  ;;  %v1395_v31 = vmul.f32 %v1392_v8, %v6867_v3  ;;  %v1408_v45 = vrot.slane %v1394_v16, 1 }
 0x159   : > { %v1376_v47 = vsel %vm730_vm0, %v1371_v44, %v1375_v0 }
 0x15a   : > { %1345 = vrot.lane.b32.xlu1 %v1338_v37, %s6746_s18  ;;  %1343 = vrot.lane.b32.xlu0 %v1336_v63, %s6746_s18  ;;  %v1374_v37 = vsel %vm730_vm0, %v1368_v54, %v1373_v39  ;;  %v1372_v63 = vsel %vm730_vm0, %v1370_v36, %v1371_v44  ;;  %v1430_v39 = vstv %s6352_s11  ;;  %s6374_s11 = sld [smem:[#allocation3 + $0xc5]] }
 0x15b   : > { %1377 = vrot.lane.b32.xlu2 %v1369_v42, %s6746_s18  ;;  %v1397_v42 = vmul.f32 %v1392_v8, %v7049_v56  ;;  %v1433_v16 = vmul.f32 %v1430_v39, %v6867_v3 }
 0x15c   : > { %v7348_v17 = vpop.permute.xlu1 %961  ;;  %v7350_v11 = vpop.permute.xlu0 %959 }
 0x15d   : > { %11997 = vst [vmem:[#allocation57_spill] sm:$0xff] %v7348_v17  ;;  %v7352_v7 = vpop.permute.xlu2 %1041  ;;  %v1406_v17 = vrot.slane %v1395_v31, 1  ;;  %v1411_v32 = vrot.slane %v1397_v42, 1  ;;  %v1434_v31 = vmul.f32 %v1430_v39, %v6876_v9  ;;  %v1444_v42 = vrot.slane %v1433_v16, 1 }
 0x15e   : > { %11998 = vst [vmem:[#allocation58_spill] sm:$0xff] %v7350_v11  ;;  %v1405_v11 = vrot.slane %v1393_v46, 1  ;;  %v1432_v46 = vmul.f32 %v1430_v39, %v6878_v10  ;;  %v1605_v16 = vstv %s6361_s12  ;;  %s6375_s12 = sld [smem:[#allocation3 + $0xc6]] }
 0x15f   : > { %11999 = vst [vmem:[#allocation59_spill] sm:$0xff] %v7352_v7  ;;  %v1409_v7 = vrot.slane %v1396_v1, 1  ;;  %v1398_v1 = vmul.f32 %v1392_v8, %v7046_v51 }
 0x160   : > { %v1407_v0 = vsel %vm730_vm0, %v1405_v11, %v1406_v17  ;;  %v1446_v8 = vrot.slane %v1432_v46, 1 }
 0x161   : > { %v1410_v44 = vsel %vm730_vm0, %v1408_v45, %v1409_v7  ;;  %v1413_v11 = vrot.slane %v1398_v1, 1 }
 0x162   : > { %1381 = vrot.lane.b32.xlu1 %v1374_v37, %s6746_s18  ;;  %1379 = vrot.lane.b32.xlu0 %v1372_v63, %s6746_s18  ;;  %v1431_v37 = vmul.f32 %v1430_v39, %v6869_v4  ;;  %v1412_v63 = vsel %vm730_vm0, %v1406_v17, %v1411_v32  ;;  %v1436_v32 = vmul.f32 %v1430_v39, %v7046_v51  ;;  %v1447_v17 = vrot.slane %v1434_v31, 1 }
 0x163   : > { %1383 = vrot.lane.b32.xlu2 %v1376_v47, %s6746_s18 }
 0x164   : > { %v7365_v54 = vpop.permute.xlu1 %997  ;;  %v7367_v36 = vpop.permute.xlu0 %965  ;;  %v1443_v47 = vrot.slane %v1431_v37, 1  ;;  %v1414_v37 = vsel %vm730_vm0, %v1409_v7, %v1413_v11  ;;  %v1448_v1 = vsel %vm730_vm0, %v1446_v8, %v1447_v17  ;;  %v1451_v46 = vrot.slane %v1436_v32, 1 }
 0x165   : > { %12000 = vst [vmem:[#allocation60_spill] sm:$0xff] %v7365_v54  ;;  %v7369_v25 = vpop.permute.xlu2 %1077  ;;  %v1610_v32 = vmul.f32 %v1605_v16, %v7049_v56 }
 0x166   : > { %12001 = vst [vmem:[#allocation61_spill] sm:$0xff] %v7367_v36  ;;  %v1452_v11 = vsel %vm730_vm0, %v1447_v17, %v1451_v46 }
 0x167   : > { %12002 = vst [vmem:[#allocation62_spill] sm:$0xff] %v7369_v25 }
 0x16a   : > { %1417 = vrot.lane.b32.xlu1 %v1410_v44, %s6746_s18  ;;  %1415 = vrot.lane.b32.xlu0 %v1407_v0, %s6746_s18  ;;  %v1435_v44 = vmul.f32 %v1430_v39, %v7049_v56  ;;  %v1445_v0 = vsel %vm730_vm0, %v1443_v47, %v1444_v42 }
 0x16b   : > { %1419 = vrot.lane.b32.xlu2 %v1412_v63, %s6746_s18  ;;  %v1606_v63 = vmul.f32 %v1605_v16, %v6869_v4 }
 0x16c   : > { %v7382_v45 = vpop.permute.xlu1 %1003  ;;  %v7384_v25 = vpop.permute.xlu0 %1001 }
 0x16d   : > { %12003 = vst [vmem:[#allocation63_spill] sm:$0xff] %v7382_v45  ;;  %v7386_v36 = vpop.permute.xlu2 %1113  ;;  %v1618_v7 = vrot.slane %v1606_v63, 2  ;;  %v1624_v63 = vrot.slane %v1610_v32, 2 }
 0x16e   : > { %12004 = vst [vmem:[#allocation64_spill] sm:$0xff] %v7384_v25  ;;  %v1608_v25 = vmul.f32 %v1605_v16, %v6867_v3 }
 0x16f   : > { %12005 = vst [vmem:[#allocation65_spill] sm:$0xff] %v7386_v36  ;;  %v1449_v36 = vrot.slane %v1435_v44, 1  ;;  %v1607_v44 = vmul.f32 %v1605_v16, %v6878_v10 }
 0x171   : > { %v1450_v8 = vsel %vm730_vm0, %v1444_v42, %v1449_v36  ;;  %v1621_v17 = vrot.slane %v1607_v44, 2  ;;  %v1643_v36 = vstv %s6362_s13  ;;  %s6376_s13 = sld [smem:[#allocation3 + $0xc7]] }
 0x172   : > { %1453 = vrot.lane.b32.xlu1 %v1445_v0, %s6746_s18  ;;  %1421 = vrot.lane.b32.xlu0 %v1414_v37, %s6746_s18  ;;  %v1619_v0 = vrot.slane %v1608_v25, 2  ;;  %v1609_v37 = vmul.f32 %v1605_v16, %v6876_v9  ;;  %v1644_v32 = vmul.f32 %v1643_v36, %v6869_v4  ;;  %v1646_v44 = vmul.f32 %v1643_v36, %v6867_v3 }
 0x173   : > { %1455 = vrot.lane.b32.xlu2 %v1448_v1, %s6746_s18 }
 0x174   : > { %v7398_v39 = vpop.permute.xlu1 %1039  ;;  %v7400_v31 = vpop.permute.xlu0 %1037  ;;  %v1620_v1 = vsel %vm1475_vm1, %v1618_v7, %v1619_v0  ;;  %v1622_v46 = vrot.slane %v1609_v37, 2  ;;  %v1647_v7 = vmul.f32 %v1643_v36, %v6876_v9 }
 0x175   : > { %12006 = vst [vmem:[#allocation66_spill] sm:$0xff] %v7398_v39  ;;  %v7402_v47 = vpop.permute.xlu2 %1149  ;;  %v1611_v39 = vmul.f32 %v1605_v16, %v7046_v51  ;;  %v1645_v16 = vmul.f32 %v1643_v36, %v6878_v10 }
 0x176   : > { %12007 = vst [vmem:[#allocation67_spill] sm:$0xff] %v7400_v31 }
 0x177   : > { %12008 = vst [vmem:[#allocation68_spill] sm:$0xff] %v7402_v47  ;;  %v1626_v47 = vrot.slane %v1611_v39, 2  ;;  %v1659_v39 = vrot.slane %v1645_v16, 2 }
 0x179   : > { %v1627_v37 = vsel %vm1475_vm1, %v1622_v46, %v1626_v47 }
 0x17a   : > { %1459 = vrot.lane.b32.xlu1 %v1452_v11, %s6746_s18  ;;  %1457 = vrot.lane.b32.xlu0 %v1450_v8, %s6746_s18  ;;  %v1625_v11 = vsel %vm1475_vm1, %v1619_v0, %v1624_v63  ;;  %v1623_v8 = vsel %vm1475_vm1, %v1621_v17, %v1622_v46  ;;  %v1681_v17 = vstv %s6363_s14  ;;  %s6388_s14 = sld [smem:[#allocation3 + $0x20]] }
 0x17b   : > { %1628 = vrot.lane.b32.xlu2 %v1620_v1, %s6745_s9  ;;  %v1648_v1 = vmul.f32 %v1643_v36, %v7049_v56  ;;  %v1684_v16 = vmul.f32 %v1681_v17, %v6867_v3 }
 0x17c   : > { %v7414_v25 = vpop.permute.xlu1 %1075  ;;  %v7416_v42 = vpop.permute.xlu0 %1073 }
 0x17d   : > { %12009 = vst [vmem:[#allocation69_spill] sm:$0xff] %v7414_v25  ;;  %v7418_v31 = vpop.permute.xlu2 %1155  ;;  %v1657_v25 = vrot.slane %v1646_v44, 2  ;;  %v1662_v45 = vrot.slane %v1648_v1, 2  ;;  %v1685_v44 = vmul.f32 %v1681_v17, %v6876_v9  ;;  %v1695_v1 = vrot.slane %v1684_v16, 2 }
 0x17e   : > { %12010 = vst [vmem:[#allocation70_spill] sm:$0xff] %v7416_v42  ;;  %v1656_v42 = vrot.slane %v1644_v32, 2  ;;  %v1683_v32 = vmul.f32 %v1681_v17, %v6878_v10  ;;  %v1719_v16 = vstv %s6364_s15  ;;  %s6389_s15 = sld [smem:[#allocation3 + $0x21]] }
 0x17f   : > { %12011 = vst [vmem:[#allocation71_spill] sm:$0xff] %v7418_v31  ;;  %v1660_v31 = vrot.slane %v1647_v7, 2  ;;  %v1649_v7 = vmul.f32 %v1643_v36, %v7046_v51 }
 0x180   : > { %v1658_v46 = vsel %vm1475_vm1, %v1656_v42, %v1657_v25  ;;  %v1697_v36 = vrot.slane %v1683_v32, 2 }
 0x181   : > { %v1661_v47 = vsel %vm1475_vm1, %v1659_v39, %v1660_v31  ;;  %v1664_v42 = vrot.slane %v1649_v7, 2 }
 0x182   : > { %1632 = vrot.lane.b32.xlu1 %v1625_v11, %s6745_s9  ;;  %1630 = vrot.lane.b32.xlu0 %v1623_v8, %s6745_s9  ;;  %v1682_v11 = vmul.f32 %v1681_v17, %v6869_v4  ;;  %v1663_v8 = vsel %vm1475_vm1, %v1657_v25, %v1662_v45  ;;  %v1687_v45 = vmul.f32 %v1681_v17, %v7046_v51  ;;  %v1698_v25 = vrot.slane %v1685_v44, 2 }
 0x183   : > { %1634 = vrot.lane.b32.xlu2 %v1627_v37, %s6745_s9 }
 0x184   : > { %v7431_v0 = vpop.permute.xlu1 %1111  ;;  %v7433_v63 = vpop.permute.xlu0 %1079  ;;  %v1694_v37 = vrot.slane %v1682_v11, 2  ;;  %v1686_v11 = vmul.f32 %v1681_v17, %v7049_v56  ;;  %v1699_v7 = vsel %vm1475_vm1, %v1697_v36, %v1698_v25  ;;  %v1702_v32 = vrot.slane %v1687_v45, 2 }
 0x185   : > { %12012 = vst [vmem:[#allocation72_spill] sm:$0xff] %v7431_v0  ;;  %v7435_v54 = vpop.permute.xlu2 %1191  ;;  %v1724_v45 = vmul.f32 %v1719_v16, %v7049_v56 }
 0x186   : > { %12013 = vst [vmem:[#allocation73_spill] sm:$0xff] %v7433_v63 }
 0x187   : > { %12014 = vst [vmem:[#allocation74_spill] sm:$0xff] %v7435_v54 }
 0x18a   : > { %1668 = vrot.lane.b32.xlu1 %v1661_v47, %s6745_s9  ;;  %1666 = vrot.lane.b32.xlu0 %v1658_v46, %s6745_s9  ;;  %v1696_v47 = vsel %vm1475_vm1, %v1694_v37, %v1695_v1  ;;  %v1665_v46 = vsel %vm1475_vm1, %v1660_v31, %v1664_v42  ;;  %v1703_v42 = vsel %vm1475_vm1, %v1698_v25, %v1702_v32 }
 0x18b   : > { %1670 = vrot.lane.b32.xlu2 %v1663_v8, %s6745_s9  ;;  %v1720_v8 = vmul.f32 %v1719_v16, %v6869_v4 }
 0x18c   : > { %v7448_v39 = vpop.permute.xlu1 %1117  ;;  %v7450_v54 = vpop.permute.xlu0 %1115 }
 0x18d   : > { %12015 = vst [vmem:[#allocation75_spill] sm:$0xff] %v7448_v39  ;;  %v7452_v63 = vpop.permute.xlu2 %1227  ;;  %v1732_v17 = vrot.slane %v1720_v8, 2  ;;  %v1738_v8 = vrot.slane %v1724_v45, 2 }
 0x18e   : > { %12016 = vst [vmem:[#allocation76_spill] sm:$0xff] %v7450_v54  ;;  %v1700_v54 = vrot.slane %v1686_v11, 2  ;;  %v1723_v11 = vmul.f32 %v1719_v16, %v6876_v9 }
 0x18f   : > { %12017 = vst [vmem:[#allocation77_spill] sm:$0xff] %v7452_v63  ;;  %v1722_v63 = vmul.f32 %v1719_v16, %v6867_v3 }
 0x190   : > { %v1736_v25 = vrot.slane %v1723_v11, 2 }
 0x191   : > { %v1733_v36 = vrot.slane %v1722_v63, 2  ;;  %v1757_v63 = vstv %s6365_s16  ;;  %s6390_s16 = sld [smem:[#allocation3 + $0x22]] }
 0x192   : > { %1704 = vrot.lane.b32.xlu1 %v1696_v47, %s6745_s9  ;;  %1672 = vrot.lane.b32.xlu0 %v1665_v46, %s6745_s9  ;;  %v1701_v47 = vsel %vm1475_vm1, %v1695_v1, %v1700_v54  ;;  %v1721_v46 = vmul.f32 %v1719_v16, %v6878_v10  ;;  %v1758_v45 = vmul.f32 %v1757_v63, %v6869_v4 }
 0x193   : > { %1706 = vrot.lane.b32.xlu2 %v1699_v7, %s6745_s9  ;;  %v1734_v7 = vsel %vm1475_vm1, %v1732_v17, %v1733_v36  ;;  %v1761_v17 = vmul.f32 %v1757_v63, %v6876_v9 }
 0x194   : > { %v7464_v44 = vpop.permute.xlu1 %1153  ;;  %v7466_v31 = vpop.permute.xlu0 %1151 }
 0x195   : > { %12018 = vst [vmem:[#allocation78_spill] sm:$0xff] %v7464_v44  ;;  %v7468_v37 = vpop.permute.xlu2 %1263  ;;  %v1725_v44 = vmul.f32 %v1719_v16, %v7046_v51  ;;  %v1759_v16 = vmul.f32 %v1757_v63, %v6878_v10 }
 0x196   : > { %12019 = vst [vmem:[#allocation79_spill] sm:$0xff] %v7466_v31 }
 0x197   : > { %12020 = vst [vmem:[#allocation80_spill] sm:$0xff] %v7468_v37  ;;  %v1735_v37 = vrot.slane %v1721_v46, 2  ;;  %v1740_v32 = vrot.slane %v1725_v44, 2  ;;  %v1760_v46 = vmul.f32 %v1757_v63, %v6867_v3  ;;  %v1773_v44 = vrot.slane %v1759_v16, 2 }
 0x199   : > { %v1741_v11 = vsel %vm1475_vm1, %v1736_v25, %v1740_v32 }
 0x19a   : > { %1710 = vrot.lane.b32.xlu1 %v1703_v42, %s6745_s9  ;;  %1708 = vrot.lane.b32.xlu0 %v1701_v47, %s6745_s9  ;;  %v1739_v42 = vsel %vm1475_vm1, %v1733_v36, %v1738_v8  ;;  %v1737_v47 = vsel %vm1475_vm1, %v1735_v37, %v1736_v25  ;;  %v1795_v8 = vstv %s6366_s17  ;;  %s6391_s17 = sld [smem:[#allocation3 + $0x23]] }
 0x19b   : > { %1742 = vrot.lane.b32.xlu2 %v1734_v7, %s6745_s9  ;;  %v1762_v7 = vmul.f32 %v1757_v63, %v7049_v56  ;;  %v1798_v16 = vmul.f32 %v1795_v8, %v6867_v3 }
 0x19c   : > { %v7480_v54 = vpop.permute.xlu1 %1189  ;;  %v7482_v1 = vpop.permute.xlu0 %1187 }
 0x19d   : > { %12021 = vst [vmem:[#allocation81_spill] sm:$0xff] %v7480_v54  ;;  %v7484_v31 = vpop.permute.xlu2 %1269  ;;  %v1771_v54 = vrot.slane %v1760_v46, 2  ;;  %v1776_v39 = vrot.slane %v1762_v7, 2  ;;  %v1799_v46 = vmul.f32 %v1795_v8, %v6876_v9  ;;  %v1809_v7 = vrot.slane %v1798_v16, 2 }
 0x19e   : > { %12022 = vst [vmem:[#allocation82_spill] sm:$0xff] %v7482_v1  ;;  %v1770_v1 = vrot.slane %v1758_v45, 2  ;;  %v1797_v45 = vmul.f32 %v1795_v8, %v6878_v10  ;;  %v1833_v16 = vstv %s6367_s19  ;;  %s6392_s19 = sld [smem:[#allocation3 + $0x24]] }
 0x19f   : > { %12023 = vst [vmem:[#allocation83_spill] sm:$0xff] %v7484_v31  ;;  %v1774_v31 = vrot.slane %v1761_v17, 2  ;;  %v1763_v17 = vmul.f32 %v1757_v63, %v7046_v51 }
 0x1a0   : > { %v1772_v32 = vsel %vm1475_vm1, %v1770_v1, %v1771_v54  ;;  %v1811_v63 = vrot.slane %v1797_v45, 2 }
 0x1a1   : > { %v1775_v25 = vsel %vm1475_vm1, %v1773_v44, %v1774_v31  ;;  %v1778_v1 = vrot.slane %v1763_v17, 2 }
 0x1a2   : > { %1746 = vrot.lane.b32.xlu1 %v1739_v42, %s6745_s9  ;;  %1744 = vrot.lane.b32.xlu0 %v1737_v47, %s6745_s9  ;;  %v1796_v42 = vmul.f32 %v1795_v8, %v6869_v4  ;;  %v1777_v47 = vsel %vm1475_vm1, %v1771_v54, %v1776_v39  ;;  %v1801_v39 = vmul.f32 %v1795_v8, %v7046_v51  ;;  %v1812_v54 = vrot.slane %v1799_v46, 2 }
 0x1a3   : > { %1748 = vrot.lane.b32.xlu2 %v1741_v11, %s6745_s9 }
 0x1a4   : > { %v7497_v36 = vpop.permute.xlu1 %1225  ;;  %v7499_v37 = vpop.permute.xlu0 %1193  ;;  %v1808_v11 = vrot.slane %v1796_v42, 2  ;;  %v1800_v42 = vmul.f32 %v1795_v8, %v7049_v56  ;;  %v1813_v17 = vsel %vm1475_vm1, %v1811_v63, %v1812_v54  ;;  %v1816_v45 = vrot.slane %v1801_v39, 2 }
 0x1a5   : > { %12024 = vst [vmem:[#allocation84_spill] sm:$0xff] %v7497_v36  ;;  %v7501_v0 = vpop.permute.xlu2 %1305  ;;  %v1838_v39 = vmul.f32 %v1833_v16, %v7049_v56 }
 0x1a6   : > { %12025 = vst [vmem:[#allocation85_spill] sm:$0xff] %v7499_v37 }
 0x1a7   : > { %12026 = vst [vmem:[#allocation86_spill] sm:$0xff] %v7501_v0 }
 0x1aa   : > { %1782 = vrot.lane.b32.xlu1 %v1775_v25, %s6745_s9  ;;  %1780 = vrot.lane.b32.xlu0 %v1772_v32, %s6745_s9  ;;  %v1810_v25 = vsel %vm1475_vm1, %v1808_v11, %v1809_v7  ;;  %v1779_v32 = vsel %vm1475_vm1, %v1774_v31, %v1778_v1  ;;  %v1817_v1 = vsel %vm1475_vm1, %v1812_v54, %v1816_v45 }
 0x1ab   : > { %1784 = vrot.lane.b32.xlu2 %v1777_v47, %s6745_s9  ;;  %v1834_v47 = vmul.f32 %v1833_v16, %v6869_v4 }
 0x1ac   : > { %v7514_v44 = vpop.permute.xlu1 %1231  ;;  %v7516_v0 = vpop.permute.xlu0 %1229 }
 0x1ad   : > { %12027 = vst [vmem:[#allocation87_spill] sm:$0xff] %v7514_v44  ;;  %v7518_v37 = vpop.permute.xlu2 %1341  ;;  %v1846_v8 = vrot.slane %v1834_v47, 2  ;;  %v1852_v47 = vrot.slane %v1838_v39, 2 }
 0x1ae   : > { %12028 = vst [vmem:[#allocation88_spill] sm:$0xff] %v7516_v0  ;;  %v1814_v0 = vrot.slane %v1800_v42, 2  ;;  %v1837_v42 = vmul.f32 %v1833_v16, %v6876_v9 }
 0x1af   : > { %12029 = vst [vmem:[#allocation89_spill] sm:$0xff] %v7518_v37  ;;  %v1836_v37 = vmul.f32 %v1833_v16, %v6867_v3 }
 0x1b0   : > { %v1850_v54 = vrot.slane %v1837_v42, 2 }
 0x1b1   : > { %v1847_v63 = vrot.slane %v1836_v37, 2  ;;  %v1871_v37 = vstv %s6368_s24  ;;  %s6393_s24 = sld [smem:[#allocation3 + $0x25]] }
 0x1b2   : > { %1818 = vrot.lane.b32.xlu1 %v1810_v25, %s6745_s9  ;;  %1786 = vrot.lane.b32.xlu0 %v1779_v32, %s6745_s9  ;;  %v1815_v25 = vsel %vm1475_vm1, %v1809_v7, %v1814_v0  ;;  %v1835_v32 = vmul.f32 %v1833_v16, %v6878_v10  ;;  %v1872_v39 = vmul.f32 %v1871_v37, %v6869_v4 }
 0x1b3   : > { %1820 = vrot.lane.b32.xlu2 %v1813_v17, %s6745_s9  ;;  %v1848_v17 = vsel %vm1475_vm1, %v1846_v8, %v1847_v63  ;;  %v1875_v8 = vmul.f32 %v1871_v37, %v6876_v9 }
 0x1b4   : > { %v7530_v46 = vpop.permute.xlu1 %1267  ;;  %v7532_v31 = vpop.permute.xlu0 %1265 }
 0x1b5   : > { %12030 = vst [vmem:[#allocation90_spill] sm:$0xff] %v7530_v46  ;;  %v7534_v11 = vpop.permute.xlu2 %1377  ;;  %v1839_v46 = vmul.f32 %v1833_v16, %v7046_v51  ;;  %v1873_v16 = vmul.f32 %v1871_v37, %v6878_v10 }
 0x1b6   : > { %12031 = vst [vmem:[#allocation91_spill] sm:$0xff] %v7532_v31 }
 0x1b7   : > { %12032 = vst [vmem:[#allocation92_spill] sm:$0xff] %v7534_v11  ;;  %v1849_v11 = vrot.slane %v1835_v32, 2  ;;  %v1854_v45 = vrot.slane %v1839_v46, 2  ;;  %v1874_v32 = vmul.f32 %v1871_v37, %v6867_v3  ;;  %v1887_v46 = vrot.slane %v1873_v16, 2 }
 0x1b9   : > { %v1855_v42 = vsel %vm1475_vm1, %v1850_v54, %v1854_v45 }
 0x1ba   : > { %1824 = vrot.lane.b32.xlu1 %v1817_v1, %s6745_s9  ;;  %1822 = vrot.lane.b32.xlu0 %v1815_v25, %s6745_s9  ;;  %v1853_v1 = vsel %vm1475_vm1, %v1847_v63, %v1852_v47  ;;  %v1851_v25 = vsel %vm1475_vm1, %v1849_v11, %v1850_v54  ;;  %v1909_v47 = vstv %s6369_s26  ;;  %s6394_s26 = sld [smem:[#allocation3 + $0x26]] }
 0x1bb   : > { %1856 = vrot.lane.b32.xlu2 %v1848_v17, %s6745_s9  ;;  %v1876_v17 = vmul.f32 %v1871_v37, %v7049_v56  ;;  %v1912_v16 = vmul.f32 %v1909_v47, %v6867_v3 }
 0x1bc   : > { %v7546_v0 = vpop.permute.xlu1 %1303  ;;  %v7548_v7 = vpop.permute.xlu0 %1301 }
 0x1bd   : > { %12033 = vst [vmem:[#allocation93_spill] sm:$0xff] %v7546_v0  ;;  %v7550_v31 = vpop.permute.xlu2 %1383  ;;  %v1885_v0 = vrot.slane %v1874_v32, 2  ;;  %v1890_v44 = vrot.slane %v1876_v17, 2  ;;  %v1913_v32 = vmul.f32 %v1909_v47, %v6876_v9  ;;  %v1923_v17 = vrot.slane %v1912_v16, 2 }
 0x1be   : > { %12034 = vst [vmem:[#allocation94_spill] sm:$0xff] %v7548_v7  ;;  %v1884_v7 = vrot.slane %v1872_v39, 2  ;;  %v1911_v39 = vmul.f32 %v1909_v47, %v6878_v10  ;;  %v1947_v16 = vstv %s6370_s27  ;;  %s6395_s27 = sld [smem:[#allocation3 + $0x27]] }
 0x1bf   : > { %12035 = vst [vmem:[#allocation95_spill] sm:$0xff] %v7550_v31  ;;  %v1888_v31 = vrot.slane %v1875_v8, 2  ;;  %v1877_v8 = vmul.f32 %v1871_v37, %v7046_v51 }
 0x1c0   : > { %v1886_v45 = vsel %vm1475_vm1, %v1884_v7, %v1885_v0  ;;  %v1925_v37 = vrot.slane %v1911_v39, 2 }
 0x1c1   : > { %v1889_v54 = vsel %vm1475_vm1, %v1887_v46, %v1888_v31  ;;  %v1892_v7 = vrot.slane %v1877_v8, 2 }
 0x1c2   : > { %1860 = vrot.lane.b32.xlu1 %v1853_v1, %s6745_s9  ;;  %1858 = vrot.lane.b32.xlu0 %v1851_v25, %s6745_s9  ;;  %v1910_v1 = vmul.f32 %v1909_v47, %v6869_v4  ;;  %v1891_v25 = vsel %vm1475_vm1, %v1885_v0, %v1890_v44  ;;  %v1915_v44 = vmul.f32 %v1909_v47, %v7046_v51  ;;  %v1926_v0 = vrot.slane %v1913_v32, 2 }
 0x1c3   : > { %1862 = vrot.lane.b32.xlu2 %v1855_v42, %s6745_s9 }
 0x1c4   : > { %v7563_v63 = vpop.permute.xlu1 %1339  ;;  %v7565_v11 = vpop.permute.xlu0 %1307  ;;  %v1922_v42 = vrot.slane %v1910_v1, 2  ;;  %v1914_v1 = vmul.f32 %v1909_v47, %v7049_v56  ;;  %v1927_v8 = vsel %vm1475_vm1, %v1925_v37, %v1926_v0  ;;  %v1930_v39 = vrot.slane %v1915_v44, 2 }
 0x1c5   : > { %12036 = vst [vmem:[#allocation96_spill] sm:$0xff] %v7563_v63  ;;  %v7567_v36 = vpop.permute.xlu2 %1419  ;;  %v1952_v44 = vmul.f32 %v1947_v16, %v7049_v56 }
 0x1c6   : > { %12037 = vst [vmem:[#allocation97_spill] sm:$0xff] %v7565_v11 }
 0x1c7   : > { %12038 = vst [vmem:[#allocation98_spill] sm:$0xff] %v7567_v36 }
 0x1ca   : > { %1896 = vrot.lane.b32.xlu1 %v1889_v54, %s6745_s9  ;;  %1894 = vrot.lane.b32.xlu0 %v1886_v45, %s6745_s9  ;;  %v1924_v54 = vsel %vm1475_vm1, %v1922_v42, %v1923_v17  ;;  %v1893_v45 = vsel %vm1475_vm1, %v1888_v31, %v1892_v7  ;;  %v1931_v7 = vsel %vm1475_vm1, %v1926_v0, %v1930_v39 }
 0x1cb   : > { %1898 = vrot.lane.b32.xlu2 %v1891_v25, %s6745_s9  ;;  %v1948_v25 = vmul.f32 %v1947_v16, %v6869_v4 }
 0x1cc   : > { %v7580_v46 = vpop.permute.xlu1 %1345  ;;  %v7582_v36 = vpop.permute.xlu0 %1343 }
 0x1cd   : > { %12039 = vst [vmem:[#allocation99_spill] sm:$0xff] %v7580_v46  ;;  %v7584_v63 = vpop.permute.xlu2 %1455  ;;  %v1960_v47 = vrot.slane %v1948_v25, 2  ;;  %v1966_v25 = vrot.slane %v1952_v44, 2 }
 0x1ce   : > { %12040 = vst [vmem:[#allocation100_spill] sm:$0xff] %v7582_v36  ;;  %v1928_v36 = vrot.slane %v1914_v1, 2  ;;  %v1951_v1 = vmul.f32 %v1947_v16, %v6876_v9 }
 0x1cf   : > { %12041 = vst [vmem:[#allocation101_spill] sm:$0xff] %v7584_v63  ;;  %v1950_v63 = vmul.f32 %v1947_v16, %v6867_v3 }
 0x1d0   : > { %v1964_v0 = vrot.slane %v1951_v1, 2 }
 0x1d1   : > { %v1961_v37 = vrot.slane %v1950_v63, 2  ;;  %v1985_v63 = vstv %s6371_s6  ;;  %s6396_s6 = sld [smem:[#allocation3 + $0x38]] }
 0x1d2   : > { %1932 = vrot.lane.b32.xlu1 %v1924_v54, %s6746_s18  ;;  %1900 = vrot.lane.b32.xlu0 %v1893_v45, %s6745_s9  ;;  %v1929_v54 = vsel %vm1475_vm1, %v1923_v17, %v1928_v36  ;;  %v1949_v45 = vmul.f32 %v1947_v16, %v6878_v10  ;;  %v1986_v44 = vmul.f32 %v1985_v63, %v6869_v4 }
 0x1d3   : > { %1934 = vrot.lane.b32.xlu2 %v1927_v8, %s6746_s18  ;;  %v1962_v8 = vsel %vm1475_vm1, %v1960_v47, %v1961_v37  ;;  %v1989_v47 = vmul.f32 %v1985_v63, %v6876_v9 }
 0x1d4   : > { %v7596_v32 = vpop.permute.xlu1 %1381  ;;  %v7598_v31 = vpop.permute.xlu0 %1379 }
 0x1d5   : > { %12042 = vst [vmem:[#allocation102_spill] sm:$0xff] %v7596_v32  ;;  %v7600_v42 = vpop.permute.xlu2 %1628  ;;  %v1953_v32 = vmul.f32 %v1947_v16, %v7046_v51  ;;  %v1987_v16 = vmul.f32 %v1985_v63, %v6878_v10 }
 0x1d6   : > { %12043 = vst [vmem:[#allocation103_spill] sm:$0xff] %v7598_v31 }
 0x1d7   : > { %12044 = vst [vmem:[#allocation104_spill] sm:$0xff] %v7600_v42  ;;  %v1963_v42 = vrot.slane %v1949_v45, 2  ;;  %v1968_v39 = vrot.slane %v1953_v32, 2  ;;  %v1988_v45 = vmul.f32 %v1985_v63, %v6867_v3  ;;  %v2001_v32 = vrot.slane %v1987_v16, 2 }
 0x1d9   : > { %v1969_v1 = vsel %vm1475_vm1, %v1964_v0, %v1968_v39 }
 0x1da   : > { %1938 = vrot.lane.b32.xlu1 %v1931_v7, %s6746_s18  ;;  %1936 = vrot.lane.b32.xlu0 %v1929_v54, %s6746_s18  ;;  %v1967_v7 = vsel %vm1475_vm1, %v1961_v37, %v1966_v25  ;;  %v1965_v54 = vsel %vm1475_vm1, %v1963_v42, %v1964_v0  ;;  %v2023_v25 = vstv %s6372_s7  ;;  %s6397_s7 = sld [smem:[#allocation3 + $0x39]] }
 0x1db   : > { %1970 = vrot.lane.b32.xlu2 %v1962_v8, %s6746_s18  ;;  %v1990_v8 = vmul.f32 %v1985_v63, %v7049_v56  ;;  %v2026_v16 = vmul.f32 %v2023_v25, %v6867_v3 }
 0x1dc   : > { %v7612_v36 = vpop.permute.xlu1 %1417  ;;  %v7614_v17 = vpop.permute.xlu0 %1415 }
 0x1dd   : > { %12045 = vst [vmem:[#allocation105_spill] sm:$0xff] %v7612_v36  ;;  %v7616_v31 = vpop.permute.xlu2 %1634  ;;  %v1999_v36 = vrot.slane %v1988_v45, 2  ;;  %v2004_v46 = vrot.slane %v1990_v8, 2  ;;  %v2027_v45 = vmul.f32 %v2023_v25, %v6876_v9  ;;  %v2037_v8 = vrot.slane %v2026_v16, 2 }
 0x1de   : > { %12046 = vst [vmem:[#allocation106_spill] sm:$0xff] %v7614_v17  ;;  %v1998_v17 = vrot.slane %v1986_v44, 2  ;;  %v2025_v44 = vmul.f32 %v2023_v25, %v6878_v10  ;;  %v2061_v16 = vstv %s6373_s10  ;;  %s6398_s10 = sld [smem:[#allocation3 + $0x3a]] }
 0x1df   : > { %12047 = vst [vmem:[#allocation107_spill] sm:$0xff] %v7616_v31  ;;  %v2002_v31 = vrot.slane %v1989_v47, 2  ;;  %v1991_v47 = vmul.f32 %v1985_v63, %v7046_v51 }
 0x1e0   : > { %v2000_v39 = vsel %vm1475_vm1, %v1998_v17, %v1999_v36  ;;  %v2039_v63 = vrot.slane %v2025_v44, 2 }
 0x1e1   : > { %v2003_v0 = vsel %vm1475_vm1, %v2001_v32, %v2002_v31  ;;  %v2006_v17 = vrot.slane %v1991_v47, 2 }
 0x1e2   : > { %1974 = vrot.lane.b32.xlu1 %v1967_v7, %s6746_s18  ;;  %1972 = vrot.lane.b32.xlu0 %v1965_v54, %s6746_s18  ;;  %v2024_v7 = vmul.f32 %v2023_v25, %v6869_v4  ;;  %v2005_v54 = vsel %vm1475_vm1, %v1999_v36, %v2004_v46  ;;  %v2029_v46 = vmul.f32 %v2023_v25, %v7046_v51  ;;  %v2040_v36 = vrot.slane %v2027_v45, 2 }
 0x1e3   : > { %1976 = vrot.lane.b32.xlu2 %v1969_v1, %s6746_s18 }
 0x1e4   : > { %v7629_v37 = vpop.permute.xlu1 %1453  ;;  %v7631_v42 = vpop.permute.xlu0 %1421  ;;  %v2036_v1 = vrot.slane %v2024_v7, 2  ;;  %v2028_v7 = vmul.f32 %v2023_v25, %v7049_v56  ;;  %v2041_v47 = vsel %vm1475_vm1, %v2039_v63, %v2040_v36  ;;  %v2044_v44 = vrot.slane %v2029_v46, 2 }
 0x1e5   : > { %12048 = vst [vmem:[#allocation108_spill] sm:$0xff] %v7629_v37  ;;  %v7633_v11 = vpop.permute.xlu2 %1670  ;;  %v2066_v46 = vmul.f32 %v2061_v16, %v7049_v56 }
 0x1e6   : > { %12049 = vst [vmem:[#allocation109_spill] sm:$0xff] %v7631_v42 }
 0x1e7   : > { %12050 = vst [vmem:[#allocation110_spill] sm:$0xff] %v7633_v11 }
 0x1ea   : > { %2010 = vrot.lane.b32.xlu1 %v2003_v0, %s6746_s18  ;;  %2008 = vrot.lane.b32.xlu0 %v2000_v39, %s6746_s18  ;;  %v2038_v0 = vsel %vm1475_vm1, %v2036_v1, %v2037_v8  ;;  %v2007_v39 = vsel %vm1475_vm1, %v2002_v31, %v2006_v17  ;;  %v2045_v17 = vsel %vm1475_vm1, %v2040_v36, %v2044_v44 }
 0x1eb   : > { %2012 = vrot.lane.b32.xlu2 %v2005_v54, %s6746_s18  ;;  %v2062_v54 = vmul.f32 %v2061_v16, %v6869_v4 }
 0x1ec   : > { %v7646_v32 = vpop.permute.xlu1 %1459  ;;  %v7648_v11 = vpop.permute.xlu0 %1457 }
 0x1ed   : > { %12051 = vst [vmem:[#allocation111_spill] sm:$0xff] %v7646_v32  ;;  %v7650_v42 = vpop.permute.xlu2 %1706  ;;  %v2074_v25 = vrot.slane %v2062_v54, 2  ;;  %v2080_v54 = vrot.slane %v2066_v46, 2 }
 0x1ee   : > { %12052 = vst [vmem:[#allocation112_spill] sm:$0xff] %v7648_v11  ;;  %v2042_v11 = vrot.slane %v2028_v7, 2  ;;  %v2065_v7 = vmul.f32 %v2061_v16, %v6876_v9 }
 0x1ef   : > { %12053 = vst [vmem:[#allocation113_spill] sm:$0xff] %v7650_v42  ;;  %v2064_v42 = vmul.f32 %v2061_v16, %v6867_v3 }
 0x1f0   : > { %v2078_v36 = vrot.slane %v2065_v7, 2 }
 0x1f1   : > { %v2075_v63 = vrot.slane %v2064_v42, 2  ;;  %v2099_v42 = vstv %s6374_s11  ;;  %s6399_s11 = sld [smem:[#allocation3 + $0x3b]] }
 0x1f2   : > { %2046 = vrot.lane.b32.xlu1 %v2038_v0, %s6746_s18  ;;  %2014 = vrot.lane.b32.xlu0 %v2007_v39, %s6746_s18  ;;  %v2043_v0 = vsel %vm1475_vm1, %v2037_v8, %v2042_v11  ;;  %v2063_v39 = vmul.f32 %v2061_v16, %v6878_v10  ;;  %v2100_v46 = vmul.f32 %v2099_v42, %v6869_v4 }
 0x1f3   : > { %2048 = vrot.lane.b32.xlu2 %v2041_v47, %s6746_s18  ;;  %v2076_v47 = vsel %vm1475_vm1, %v2074_v25, %v2075_v63  ;;  %v2103_v25 = vmul.f32 %v2099_v42, %v6876_v9 }
 0x1f4   : > { %v7662_v45 = vpop.permute.xlu1 %1632  ;;  %v7664_v31 = vpop.permute.xlu0 %1630 }
 0x1f5   : > { %12054 = vst [vmem:[#allocation114_spill] sm:$0xff] %v7662_v45  ;;  %v7666_v1 = vpop.permute.xlu2 %1742  ;;  %v2067_v45 = vmul.f32 %v2061_v16, %v7046_v51  ;;  %v2101_v16 = vmul.f32 %v2099_v42, %v6878_v10 }
 0x1f6   : > { %12055 = vst [vmem:[#allocation115_spill] sm:$0xff] %v7664_v31 }
 0x1f7   : > { %12056 = vst [vmem:[#allocation116_spill] sm:$0xff] %v7666_v1  ;;  %v2077_v1 = vrot.slane %v2063_v39, 2  ;;  %v2082_v44 = vrot.slane %v2067_v45, 2  ;;  %v2102_v39 = vmul.f32 %v2099_v42, %v6867_v3  ;;  %v2115_v45 = vrot.slane %v2101_v16, 2 }
 0x1f9   : > { %v2083_v7 = vsel %vm1475_vm1, %v2078_v36, %v2082_v44 }
 0x1fa   : > { %2052 = vrot.lane.b32.xlu1 %v2045_v17, %s6746_s18  ;;  %2050 = vrot.lane.b32.xlu0 %v2043_v0, %s6746_s18  ;;  %v2081_v17 = vsel %vm1475_vm1, %v2075_v63, %v2080_v54  ;;  %v2079_v0 = vsel %vm1475_vm1, %v2077_v1, %v2078_v36  ;;  %v2137_v54 = vstv %s6375_s12  ;;  %s6400_s12 = sld [smem:[#allocation3 + $0x3c]] }
 0x1fb   : > { %2084 = vrot.lane.b32.xlu2 %v2076_v47, %s6746_s18  ;;  %v2104_v47 = vmul.f32 %v2099_v42, %v7049_v56  ;;  %v2140_v16 = vmul.f32 %v2137_v54, %v6867_v3 }
 0x1fc   : > { %v7678_v11 = vpop.permute.xlu1 %1668  ;;  %v7680_v8 = vpop.permute.xlu0 %1666 }
 0x1fd   : > { %12057 = vst [vmem:[#allocation117_spill] sm:$0xff] %v7678_v11  ;;  %v7682_v31 = vpop.permute.xlu2 %1748  ;;  %v2113_v11 = vrot.slane %v2102_v39, 2  ;;  %v2118_v32 = vrot.slane %v2104_v47, 2  ;;  %v2141_v39 = vmul.f32 %v2137_v54, %v6876_v9  ;;  %v2151_v47 = vrot.slane %v2140_v16, 2 }
 0x1fe   : > { %12058 = vst [vmem:[#allocation118_spill] sm:$0xff] %v7680_v8  ;;  %v2112_v8 = vrot.slane %v2100_v46, 2  ;;  %v2139_v46 = vmul.f32 %v2137_v54, %v6878_v10  ;;  %v2175_v16 = vstv %s6376_s13  ;;  %s6401_s13 = sld [smem:[#allocation3 + $0x3d]] }
 0x1ff   : > { %12059 = vst [vmem:[#allocation119_spill] sm:$0xff] %v7682_v31  ;;  %v2116_v31 = vrot.slane %v2103_v25, 2  ;;  %v2105_v25 = vmul.f32 %v2099_v42, %v7046_v51 }
 0x200   : > { %v2114_v44 = vsel %vm1475_vm1, %v2112_v8, %v2113_v11  ;;  %v2153_v42 = vrot.slane %v2139_v46, 2 }
 0x201   : > { %v2117_v36 = vsel %vm1475_vm1, %v2115_v45, %v2116_v31  ;;  %v2120_v8 = vrot.slane %v2105_v25, 2 }
 0x202   : > { %2088 = vrot.lane.b32.xlu1 %v2081_v17, %s6746_s18  ;;  %2086 = vrot.lane.b32.xlu0 %v2079_v0, %s6746_s18  ;;  %v2138_v17 = vmul.f32 %v2137_v54, %v6869_v4  ;;  %v2119_v0 = vsel %vm1475_vm1, %v2113_v11, %v2118_v32  ;;  %v2143_v32 = vmul.f32 %v2137_v54, %v7046_v51  ;;  %v2154_v11 = vrot.slane %v2141_v39, 2 }
 0x203   : > { %2090 = vrot.lane.b32.xlu2 %v2083_v7, %s6746_s18 }
 0x204   : > { %v7695_v63 = vpop.permute.xlu1 %1704  ;;  %v7697_v1 = vpop.permute.xlu0 %1672  ;;  %v2150_v7 = vrot.slane %v2138_v17, 2  ;;  %v2142_v17 = vmul.f32 %v2137_v54, %v7049_v56  ;;  %v2155_v25 = vsel %vm1475_vm1, %v2153_v42, %v2154_v11  ;;  %v2158_v46 = vrot.slane %v2143_v32, 2 }
 0x205   : > { %12060 = vst [vmem:[#allocation120_spill] sm:$0xff] %v7695_v63  ;;  %v7699_v37 = vpop.permute.xlu2 %1784  ;;  %v2177_v32 = vmul.f32 %v2175_v16, %v6878_v10 }
 0x206   : > { %12061 = vst [vmem:[#allocation121_spill] sm:$0xff] %v7697_v1 }
 0x207   : > { %12062 = vst [vmem:[#allocation122_spill] sm:$0xff] %v7699_v37 }
 0x20a   : > { %2124 = vrot.lane.b32.xlu1 %v2117_v36, %s6746_s18  ;;  %2122 = vrot.lane.b32.xlu0 %v2114_v44, %s6746_s18  ;;  %v2152_v36 = vsel %vm1475_vm1, %v2150_v7, %v2151_v47  ;;  %v2121_v44 = vsel %vm1475_vm1, %v2116_v31, %v2120_v8  ;;  %v2159_v8 = vsel %vm1475_vm1, %v2154_v11, %v2158_v46  ;;  %v2191_v11 = vrot.slane %v2177_v32, 2  ;;  %v6377_v46 = vld [vmem:[%s6863_s8 + $0x18] sm:$0xff]  ;;  %v6378_v32 = vld [vmem:[%s6863_s8 + $0x20] sm:$0xff] }
 0x20b   : > { %2126 = vrot.lane.b32.xlu2 %v2119_v0, %s6746_s18  ;;  %v2176_v0 = vmul.f32 %v2175_v16, %v6869_v4 }
 0x20c   : > { %v7712_v45 = vpop.permute.xlu1 %1710  ;;  %v7714_v37 = vpop.permute.xlu0 %1708 }
 0x20d   : > { %12063 = vst [vmem:[#allocation123_spill] sm:$0xff] %v7712_v45  ;;  %v7716_v1 = vpop.permute.xlu2 %1820  ;;  %v2188_v54 = vrot.slane %v2176_v0, 2 }
 0x20e   : > { %12064 = vst [vmem:[#allocation124_spill] sm:$0xff] %v7714_v37  ;;  %v2156_v37 = vrot.slane %v2142_v17, 2  ;;  %v2179_v17 = vmul.f32 %v2175_v16, %v6876_v9 }
 0x20f   : > { %12065 = vst [vmem:[#allocation125_spill] sm:$0xff] %v7716_v1  ;;  %v2178_v1 = vmul.f32 %v2175_v16, %v6867_v3 }
 0x211   : > { %v2189_v42 = vrot.slane %v2178_v1, 2  ;;  %v2192_v1 = vrot.slane %v2179_v17, 2  ;;  %v7766_v17 = vunpack.c.l.bf16 %v6378_v32 }
 0x212   : > { %2160 = vrot.lane.b32.xlu1 %v2152_v36, %s6746_s18  ;;  %2128 = vrot.lane.b32.xlu0 %v2121_v44, %s6746_s18  ;;  %v2157_v36 = vsel %vm1475_vm1, %v2151_v47, %v2156_v37  ;;  %v2180_v44 = vmul.f32 %v2175_v16, %v7049_v56 }
 0x213   : > { %2162 = vrot.lane.b32.xlu2 %v2155_v25, %s6746_s18  ;;  %v2190_v25 = vsel %vm1475_vm1, %v2188_v54, %v2189_v42  ;;  %12075 = vst [vmem:[#allocation135_spill] sm:$0xff] %v7766_v17 }
 0x214   : > { %v7728_v39 = vpop.permute.xlu1 %1746  ;;  %v7730_v31 = vpop.permute.xlu0 %1744  ;;  %v2194_v0 = vrot.slane %v2180_v44, 2  ;;  %v2271_v44 = vstv %s6388_s14  ;;  %s6402_s14 = sld [smem:[#allocation3 + $0x3e]] }
 0x215   : > { %12066 = vst [vmem:[#allocation126_spill] sm:$0xff] %v7728_v39  ;;  %v7732_v7 = vpop.permute.xlu2 %1856  ;;  %v2181_v39 = vmul.f32 %v2175_v16, %v7046_v51  ;;  %v2193_v16 = vsel %vm1475_vm1, %v2191_v11, %v2192_v1 }
 0x216   : > { %12067 = vst [vmem:[#allocation127_spill] sm:$0xff] %v7730_v31  ;;  %v2195_v51 = vsel %vm1475_vm1, %v2189_v42, %v2194_v0 }
 0x217   : > { %12068 = vst [vmem:[#allocation128_spill] sm:$0xff] %v7732_v7  ;;  %v2196_v9 = vrot.slane %v2181_v39, 2 }
 0x219   : > { %v2197_v54 = vsel %vm1475_vm1, %v2192_v1, %v2196_v9  ;;  %v2274_v1 = vmul.f32 %v2271_v44, %v7766_v17  ;;  %v7775_v9 = vunpack.c.h.bf16 %v6378_v32 }
 0x21a   : > { %2166 = vrot.lane.b32.xlu1 %v2159_v8, %s6746_s18  ;;  %2164 = vrot.lane.b32.xlu0 %v2157_v36, %s6746_s18  ;;  %v7756_v8 = vunpack.c.l.bf16 %v6377_v46  ;;  %v7758_v36 = vunpack.c.h.bf16 %v6377_v46 }
 0x21b   : > { %2198 = vrot.lane.b32.xlu2 %v2190_v25, %s6746_s18  ;;  %v2275_v7 = vmul.f32 %v2271_v44, %v7775_v9 }
 0x21c   : > { %v7744_v37 = vpop.permute.xlu1 %1782  ;;  %v7746_v10 = vpop.permute.xlu0 %1780  ;;  %12072 = vst [vmem:[#allocation132_spill] sm:$0xff] %v7756_v8  ;;  %v2273_v0 = vmul.f32 %v2271_v44, %v7758_v36  ;;  %v2272_v11 = vmul.f32 %v2271_v44, %v7756_v8  ;;  %v2319_v44 = vstv %s6390_s16  ;;  %s6412_s16 = sld [smem:[#allocation3 + $0x68]] }
 0x21d   : > { %12069 = vst [vmem:[#allocation129_spill] sm:$0xff] %v7744_v37  ;;  %v7748_v47 = vpop.permute.xlu2 %1862 }
 0x21e   : > { %12070 = vst [vmem:[#allocation130_spill] sm:$0xff] %v7746_v10 }
 0x21f   : > { %12071 = vst [vmem:[#allocation131_spill] sm:$0xff] %v7748_v47 }
 0x222   : > { %2202 = vrot.lane.b32.xlu1 %v2195_v51, %s6746_s18  ;;  %2200 = vrot.lane.b32.xlu0 %v2193_v16, %s6746_s18  ;;  %v2295_v51 = vstv %s6389_s15  ;;  %s6403_s15 = sld [smem:[#allocation3 + $0x3f]] }
 0x223   : > { %2204 = vrot.lane.b32.xlu2 %v2197_v54, %s6746_s18  ;;  %v2298_v47 = vmul.f32 %v2295_v51, %v7766_v17 }
 0x224   : > { %v7761_v39 = vpop.permute.xlu1 %1818  ;;  %v7763_v42 = vpop.permute.xlu0 %1786 }
 0x225   : > { %12073 = vst [vmem:[#allocation133_spill] sm:$0xff] %v7761_v39  ;;  %v7768_v25 = vpop.permute.xlu2 %1898 }
 0x226   : > { %12074 = vst [vmem:[#allocation134_spill] sm:$0xff] %v7763_v42 }
 0x227   : > { %12076 = vst [vmem:[#allocation136_spill] sm:$0xff] %v7768_v25  ;;  %v2296_v25 = vmul.f32 %v2295_v51, %v7756_v8 }
 0x22a   : > { %2282 = vrot.lane.b32.xlu1 %v2273_v0, %s6745_s9  ;;  %2280 = vrot.lane.b32.xlu0 %v2272_v11, %s6745_s9  ;;  %v2297_v0 = vmul.f32 %v2295_v51, %v7758_v36 }
 0x22b   : > { %2284 = vrot.lane.b32.xlu2 %v2274_v1, %s6745_s9 }
 0x22c   : > { %v7778_v16 = vpop.permute.xlu1 %1824  ;;  %v7780_v46 = vpop.permute.xlu0 %1822 }
 0x22d   : > { %12077 = vst [vmem:[#allocation137_spill] sm:$0xff] %v7778_v16  ;;  %v7782_v54 = vpop.permute.xlu2 %1934  ;;  %v6379_v16 = vld [vmem:[%s6863_s8 + $0x28] sm:$0x11] }
 0x22e   : > { %12078 = vst [vmem:[#allocation138_spill] sm:$0xff] %v7780_v46  ;;  %v2320_v46 = vmul.f32 %v2319_v44, %v7756_v8  ;;  %v8024_v39 = vunpack.c.l.bf16 %v6379_v16 }
 0x22f   : > { %12079 = vst [vmem:[#allocation139_spill] sm:$0xff] %v7782_v54  ;;  %v2299_v54 = vmul.f32 %v2295_v51, %v7775_v9  ;;  %v2321_v51 = vmul.f32 %v2319_v44, %v7758_v36 }
 0x230   : > { %12137 = vst [vmem:[#allocation197_spill] sm:$0xff] %v8024_v39 }
 0x232   : > { %2304 = vrot.lane.b32.xlu1 %v2296_v25, %s6745_s9  ;;  %2286 = vrot.lane.b32.xlu0 %v2275_v7, %s6745_s9 }
 0x233   : > { %2306 = vrot.lane.b32.xlu2 %v2297_v0, %s6745_s9 }
 0x234   : > { %v7790_v32 = vpop.permute.xlu1 %1860  ;;  %v7792_v11 = vpop.permute.xlu0 %1858 }
 0x235   : > { %12080 = vst [vmem:[#allocation140_spill] sm:$0xff] %v7790_v32  ;;  %v7794_v1 = vpop.permute.xlu2 %1970 }
 0x236   : > { %12081 = vst [vmem:[#allocation141_spill] sm:$0xff] %v7792_v11  ;;  %v2323_v11 = vmul.f32 %v2319_v44, %v7775_v9 }
 0x237   : > { %12082 = vst [vmem:[#allocation142_spill] sm:$0xff] %v7794_v1  ;;  %v2322_v1 = vmul.f32 %v2319_v44, %v7766_v17 }
 0x23a   : > { %2310 = vrot.lane.b32.xlu1 %v2299_v54, %s6745_s9  ;;  %2308 = vrot.lane.b32.xlu0 %v2298_v47, %s6745_s9  ;;  %v2343_v47 = vstv %s6391_s17  ;;  %s6413_s17 = sld [smem:[#allocation3 + $0x69]] }
 0x23b   : > { %2328 = vrot.lane.b32.xlu2 %v2320_v46, %s6745_s9  ;;  %v2346_v44 = vmul.f32 %v2343_v47, %v7766_v17 }
 0x23c   : > { %v7802_v7 = vpop.permute.xlu1 %1896  ;;  %v7804_v25 = vpop.permute.xlu0 %1894 }
 0x23d   : > { %12083 = vst [vmem:[#allocation143_spill] sm:$0xff] %v7802_v7  ;;  %v7806_v0 = vpop.permute.xlu2 %1976  ;;  %v2344_v7 = vmul.f32 %v2343_v47, %v7756_v8 }
 0x23e   : > { %12084 = vst [vmem:[#allocation144_spill] sm:$0xff] %v7804_v25 }
 0x23f   : > { %12085 = vst [vmem:[#allocation145_spill] sm:$0xff] %v7806_v0  ;;  %v2345_v0 = vmul.f32 %v2343_v47, %v7758_v36 }
 0x242   : > { %2332 = vrot.lane.b32.xlu1 %v2322_v1, %s6745_s9  ;;  %2330 = vrot.lane.b32.xlu0 %v2321_v51, %s6745_s9  ;;  %v2367_v1 = vstv %s6392_s19  ;;  %s6414_s19 = sld [smem:[#allocation3 + $0x6a]] }
 0x243   : > { %2334 = vrot.lane.b32.xlu2 %v2323_v11, %s6745_s9  ;;  %v2369_v32 = vmul.f32 %v2367_v1, %v7758_v36 }
 0x244   : > { %v7814_v46 = vpop.permute.xlu1 %1932  ;;  %v7816_v54 = vpop.permute.xlu0 %1900 }
 0x245   : > { %12086 = vst [vmem:[#allocation146_spill] sm:$0xff] %v7814_v46  ;;  %v7818_v25 = vpop.permute.xlu2 %2012  ;;  %v2347_v46 = vmul.f32 %v2343_v47, %v7775_v9  ;;  %v2391_v47 = vstv %s6393_s24  ;;  %s6415_s24 = sld [smem:[#allocation3 + $0x6b]] }
 0x246   : > { %12087 = vst [vmem:[#allocation147_spill] sm:$0xff] %v7816_v54 }
 0x247   : > { %12088 = vst [vmem:[#allocation148_spill] sm:$0xff] %v7818_v25  ;;  %v2368_v25 = vmul.f32 %v2367_v1, %v7756_v8 }
 0x24a   : > { %2354 = vrot.lane.b32.xlu1 %v2345_v0, %s6745_s9  ;;  %2352 = vrot.lane.b32.xlu0 %v2344_v7, %s6745_s9 }
 0x24b   : > { %2356 = vrot.lane.b32.xlu2 %v2346_v44, %s6745_s9 }
 0x24c   : > { %v7826_v11 = vpop.permute.xlu1 %1938  ;;  %v7828_v51 = vpop.permute.xlu0 %1936 }
 0x24d   : > { %12089 = vst [vmem:[#allocation149_spill] sm:$0xff] %v7826_v11  ;;  %v7830_v54 = vpop.permute.xlu2 %2048  ;;  %v2392_v11 = vmul.f32 %v2391_v47, %v7756_v8 }
 0x24e   : > { %12090 = vst [vmem:[#allocation150_spill] sm:$0xff] %v7828_v51  ;;  %v2370_v51 = vmul.f32 %v2367_v1, %v7766_v17 }
 0x24f   : > { %12091 = vst [vmem:[#allocation151_spill] sm:$0xff] %v7830_v54  ;;  %v2371_v54 = vmul.f32 %v2367_v1, %v7775_v9  ;;  %v2393_v1 = vmul.f32 %v2391_v47, %v7758_v36 }
 0x252   : > { %2376 = vrot.lane.b32.xlu1 %v2368_v25, %s6745_s9  ;;  %2358 = vrot.lane.b32.xlu0 %v2347_v46, %s6745_s9 }
 0x253   : > { %2378 = vrot.lane.b32.xlu2 %v2369_v32, %s6745_s9 }
 0x254   : > { %v7838_v7 = vpop.permute.xlu1 %1974  ;;  %v7840_v0 = vpop.permute.xlu0 %1972 }
 0x255   : > { %12092 = vst [vmem:[#allocation152_spill] sm:$0xff] %v7838_v7  ;;  %v7842_v44 = vpop.permute.xlu2 %2084  ;;  %v2395_v7 = vmul.f32 %v2391_v47, %v7775_v9 }
 0x256   : > { %12093 = vst [vmem:[#allocation153_spill] sm:$0xff] %v7840_v0 }
 0x257   : > { %12094 = vst [vmem:[#allocation154_spill] sm:$0xff] %v7842_v44  ;;  %v2394_v44 = vmul.f32 %v2391_v47, %v7766_v17 }
 0x25a   : > { %2382 = vrot.lane.b32.xlu1 %v2371_v54, %s6745_s9  ;;  %2380 = vrot.lane.b32.xlu0 %v2370_v51, %s6745_s9  ;;  %v2415_v54 = vstv %s6394_s26  ;;  %s6416_s26 = sld [smem:[#allocation3 + $0x6c]] }
 0x25b   : > { %2400 = vrot.lane.b32.xlu2 %v2392_v11, %s6745_s9  ;;  %v2418_v47 = vmul.f32 %v2415_v54, %v7766_v17 }
 0x25c   : > { %v7850_v32 = vpop.permute.xlu1 %2010  ;;  %v7852_v25 = vpop.permute.xlu0 %2008 }
 0x25d   : > { %12095 = vst [vmem:[#allocation155_spill] sm:$0xff] %v7850_v32  ;;  %v7854_v46 = vpop.permute.xlu2 %2090  ;;  %v2416_v32 = vmul.f32 %v2415_v54, %v7756_v8 }
 0x25e   : > { %12096 = vst [vmem:[#allocation156_spill] sm:$0xff] %v7852_v25 }
 0x25f   : > { %12097 = vst [vmem:[#allocation157_spill] sm:$0xff] %v7854_v46  ;;  %v2417_v46 = vmul.f32 %v2415_v54, %v7758_v36 }
 0x262   : > { %2404 = vrot.lane.b32.xlu1 %v2394_v44, %s6745_s9  ;;  %2402 = vrot.lane.b32.xlu0 %v2393_v1, %s6745_s9  ;;  %v2439_v44 = vstv %s6395_s27  ;;  %s6417_s27 = sld [smem:[#allocation3 + $0x6d]] }
 0x263   : > { %2406 = vrot.lane.b32.xlu2 %v2395_v7, %s6745_s9  ;;  %v2441_v0 = vmul.f32 %v2439_v44, %v7758_v36 }
 0x264   : > { %v7862_v11 = vpop.permute.xlu1 %2046  ;;  %v7864_v51 = vpop.permute.xlu0 %2014 }
 0x265   : > { %12098 = vst [vmem:[#allocation158_spill] sm:$0xff] %v7862_v11  ;;  %v7866_v25 = vpop.permute.xlu2 %2126  ;;  %v2419_v11 = vmul.f32 %v2415_v54, %v7775_v9  ;;  %v2463_v54 = vstv %s6396_s6  ;;  %s6418_s6 = sld [smem:[#allocation3 + $0x6e]] }
 0x266   : > { %12099 = vst [vmem:[#allocation159_spill] sm:$0xff] %v7864_v51 }
 0x267   : > { %12100 = vst [vmem:[#allocation160_spill] sm:$0xff] %v7866_v25  ;;  %v2440_v25 = vmul.f32 %v2439_v44, %v7756_v8 }
 0x26a   : > { %2426 = vrot.lane.b32.xlu1 %v2417_v46, %s6745_s9  ;;  %2424 = vrot.lane.b32.xlu0 %v2416_v32, %s6745_s9 }
 0x26b   : > { %2428 = vrot.lane.b32.xlu2 %v2418_v47, %s6745_s9 }
 0x26c   : > { %v7874_v7 = vpop.permute.xlu1 %2052  ;;  %v7876_v1 = vpop.permute.xlu0 %2050 }
 0x26d   : > { %12101 = vst [vmem:[#allocation161_spill] sm:$0xff] %v7874_v7  ;;  %v7878_v51 = vpop.permute.xlu2 %2162  ;;  %v2464_v7 = vmul.f32 %v2463_v54, %v7756_v8 }
 0x26e   : > { %12102 = vst [vmem:[#allocation162_spill] sm:$0xff] %v7876_v1  ;;  %v2442_v1 = vmul.f32 %v2439_v44, %v7766_v17 }
 0x26f   : > { %12103 = vst [vmem:[#allocation163_spill] sm:$0xff] %v7878_v51  ;;  %v2443_v51 = vmul.f32 %v2439_v44, %v7775_v9  ;;  %v2465_v44 = vmul.f32 %v2463_v54, %v7758_v36 }
 0x272   : > { %2448 = vrot.lane.b32.xlu1 %v2440_v25, %s6745_s9  ;;  %2430 = vrot.lane.b32.xlu0 %v2419_v11, %s6745_s9 }
 0x273   : > { %2450 = vrot.lane.b32.xlu2 %v2441_v0, %s6745_s9 }
 0x274   : > { %v7886_v32 = vpop.permute.xlu1 %2088  ;;  %v7888_v46 = vpop.permute.xlu0 %2086 }
 0x275   : > { %12104 = vst [vmem:[#allocation164_spill] sm:$0xff] %v7886_v32  ;;  %v7890_v47 = vpop.permute.xlu2 %2198  ;;  %v2467_v32 = vmul.f32 %v2463_v54, %v7775_v9 }
 0x276   : > { %12105 = vst [vmem:[#allocation165_spill] sm:$0xff] %v7888_v46 }
 0x277   : > { %12106 = vst [vmem:[#allocation166_spill] sm:$0xff] %v7890_v47  ;;  %v2466_v47 = vmul.f32 %v2463_v54, %v7766_v17 }
 0x27a   : > { %2454 = vrot.lane.b32.xlu1 %v2443_v51, %s6745_s9  ;;  %2452 = vrot.lane.b32.xlu0 %v2442_v1, %s6745_s9  ;;  %v2487_v51 = vstv %s6397_s7  ;;  %s6419_s7 = sld [smem:[#allocation3 + $0x6f]] }
 0x27b   : > { %2472 = vrot.lane.b32.xlu2 %v2464_v7, %s6746_s18  ;;  %v2490_v54 = vmul.f32 %v2487_v51, %v7766_v17 }
 0x27c   : > { %v7898_v0 = vpop.permute.xlu1 %2124  ;;  %v7900_v25 = vpop.permute.xlu0 %2122 }
 0x27d   : > { %12107 = vst [vmem:[#allocation167_spill] sm:$0xff] %v7898_v0  ;;  %v7902_v11 = vpop.permute.xlu2 %2204  ;;  %v2488_v0 = vmul.f32 %v2487_v51, %v7756_v8 }
 0x27e   : > { %12108 = vst [vmem:[#allocation168_spill] sm:$0xff] %v7900_v25 }
 0x27f   : > { %12109 = vst [vmem:[#allocation169_spill] sm:$0xff] %v7902_v11  ;;  %v2489_v11 = vmul.f32 %v2487_v51, %v7758_v36 }
 0x282   : > { %2476 = vrot.lane.b32.xlu1 %v2466_v47, %s6746_s18  ;;  %2474 = vrot.lane.b32.xlu0 %v2465_v44, %s6746_s18  ;;  %v2511_v47 = vstv %s6398_s10  ;;  %s6420_s10 = sld [smem:[#allocation3 + $0x80]] }
 0x283   : > { %2478 = vrot.lane.b32.xlu2 %v2467_v32, %s6746_s18  ;;  %v2513_v46 = vmul.f32 %v2511_v47, %v7758_v36 }
 0x284   : > { %v7910_v7 = vpop.permute.xlu1 %2160  ;;  %v7912_v1 = vpop.permute.xlu0 %2128 }
 0x285   : > { %12110 = vst [vmem:[#allocation170_spill] sm:$0xff] %v7910_v7  ;;  %v7914_v25 = vpop.permute.xlu2 %2284 }
 0x286   : > { %12111 = vst [vmem:[#allocation171_spill] sm:$0xff] %v7912_v1  ;;  %v2491_v1 = vmul.f32 %v2487_v51, %v7775_v9  ;;  %v2535_v51 = vstv %s6399_s11  ;;  %s6421_s11 = sld [smem:[#allocation3 + $0x81]] }
 0x287   : > { %12112 = vst [vmem:[#allocation172_spill] sm:$0xff] %v7914_v25  ;;  %v2512_v25 = vmul.f32 %v2511_v47, %v7756_v8 }
 0x28a   : > { %2498 = vrot.lane.b32.xlu1 %v2489_v11, %s6746_s18  ;;  %2496 = vrot.lane.b32.xlu0 %v2488_v0, %s6746_s18 }
 0x28b   : > { %2500 = vrot.lane.b32.xlu2 %v2490_v54, %s6746_s18 }
 0x28c   : > { %v7922_v32 = vpop.permute.xlu1 %2166  ;;  %v7924_v44 = vpop.permute.xlu0 %2164 }
 0x28d   : > { %12113 = vst [vmem:[#allocation173_spill] sm:$0xff] %v7922_v32  ;;  %v7926_v7 = vpop.permute.xlu2 %2306  ;;  %v2536_v32 = vmul.f32 %v2535_v51, %v7756_v8 }
 0x28e   : > { %12114 = vst [vmem:[#allocation174_spill] sm:$0xff] %v7924_v44  ;;  %v2514_v44 = vmul.f32 %v2511_v47, %v7766_v17 }
 0x28f   : > { %12115 = vst [vmem:[#allocation175_spill] sm:$0xff] %v7926_v7  ;;  %v2515_v7 = vmul.f32 %v2511_v47, %v7775_v9  ;;  %v2537_v47 = vmul.f32 %v2535_v51, %v7758_v36 }
 0x292   : > { %2520 = vrot.lane.b32.xlu1 %v2512_v25, %s6746_s18  ;;  %2502 = vrot.lane.b32.xlu0 %v2491_v1, %s6746_s18 }
 0x293   : > { %2522 = vrot.lane.b32.xlu2 %v2513_v46, %s6746_s18 }
 0x294   : > { %v7934_v0 = vpop.permute.xlu1 %2202  ;;  %v7936_v11 = vpop.permute.xlu0 %2200 }
 0x295   : > { %12116 = vst [vmem:[#allocation176_spill] sm:$0xff] %v7934_v0  ;;  %v7938_v54 = vpop.permute.xlu2 %2328 }
 0x296   : > { %12117 = vst [vmem:[#allocation177_spill] sm:$0xff] %v7936_v11  ;;  %v2539_v11 = vmul.f32 %v2535_v51, %v7775_v9 }
 0x297   : > { %12118 = vst [vmem:[#allocation178_spill] sm:$0xff] %v7938_v54  ;;  %v2538_v54 = vmul.f32 %v2535_v51, %v7766_v17 }
 0x29a   : > { %2526 = vrot.lane.b32.xlu1 %v2515_v7, %s6746_s18  ;;  %2524 = vrot.lane.b32.xlu0 %v2514_v44, %s6746_s18  ;;  %v2559_v7 = vstv %s6400_s12  ;;  %s6422_s12 = sld [smem:[#allocation3 + $0x82]] }
 0x29b   : > { %2544 = vrot.lane.b32.xlu2 %v2536_v32, %s6746_s18  ;;  %v2562_v51 = vmul.f32 %v2559_v7, %v7766_v17 }
 0x29c   : > { %v7946_v46 = vpop.permute.xlu1 %2282  ;;  %v7948_v25 = vpop.permute.xlu0 %2280 }
 0x29d   : > { %12119 = vst [vmem:[#allocation179_spill] sm:$0xff] %v7946_v46  ;;  %v7950_v1 = vpop.permute.xlu2 %2334  ;;  %v2560_v46 = vmul.f32 %v2559_v7, %v7756_v8 }
 0x29e   : > { %12120 = vst [vmem:[#allocation180_spill] sm:$0xff] %v7948_v25 }
 0x29f   : > { %12121 = vst [vmem:[#allocation181_spill] sm:$0xff] %v7950_v1  ;;  %v2561_v1 = vmul.f32 %v2559_v7, %v7758_v36 }
 0x2a2   : > { %2548 = vrot.lane.b32.xlu1 %v2538_v54, %s6746_s18  ;;  %2546 = vrot.lane.b32.xlu0 %v2537_v47, %s6746_s18  ;;  %v2583_v54 = vstv %s6401_s13  ;;  %s6423_s13 = sld [smem:[#allocation3 + $0x83]] }
 0x2a3   : > { %2550 = vrot.lane.b32.xlu2 %v2539_v11, %s6746_s18  ;;  %v2585_v0 = vmul.f32 %v2583_v54, %v7758_v36 }
 0x2a4   : > { %v7958_v32 = vpop.permute.xlu1 %2304  ;;  %v7960_v44 = vpop.permute.xlu0 %2286 }
 0x2a5   : > { %12122 = vst [vmem:[#allocation182_spill] sm:$0xff] %v7958_v32  ;;  %v7962_v25 = vpop.permute.xlu2 %2356  ;;  %v2563_v32 = vmul.f32 %v2559_v7, %v7775_v9  ;;  %v2607_v7 = vstv %s6402_s14  ;;  %s6424_s14 = sld [smem:[#allocation3 + $0x84]] }
 0x2a6   : > { %12123 = vst [vmem:[#allocation183_spill] sm:$0xff] %v7960_v44 }
 0x2a7   : > { %12124 = vst [vmem:[#allocation184_spill] sm:$0xff] %v7962_v25  ;;  %v2584_v25 = vmul.f32 %v2583_v54, %v7756_v8 }
 0x2aa   : > { %2570 = vrot.lane.b32.xlu1 %v2561_v1, %s6746_s18  ;;  %2568 = vrot.lane.b32.xlu0 %v2560_v46, %s6746_s18 }
 0x2ab   : > { %2572 = vrot.lane.b32.xlu2 %v2562_v51, %s6746_s18 }
 0x2ac   : > { %v7970_v11 = vpop.permute.xlu1 %2310  ;;  %v7972_v47 = vpop.permute.xlu0 %2308 }
 0x2ad   : > { %12125 = vst [vmem:[#allocation185_spill] sm:$0xff] %v7970_v11  ;;  %v7974_v44 = vpop.permute.xlu2 %2378  ;;  %v2608_v11 = vmul.f32 %v2607_v7, %v7756_v8 }
 0x2ae   : > { %12126 = vst [vmem:[#allocation186_spill] sm:$0xff] %v7972_v47  ;;  %v2586_v47 = vmul.f32 %v2583_v54, %v7766_v17 }
 0x2af   : > { %12127 = vst [vmem:[#allocation187_spill] sm:$0xff] %v7974_v44  ;;  %v2587_v44 = vmul.f32 %v2583_v54, %v7775_v9  ;;  %v2610_v54 = vmul.f32 %v2607_v7, %v7766_v17 }
 0x2b2   : > { %2592 = vrot.lane.b32.xlu1 %v2584_v25, %s6746_s18  ;;  %2574 = vrot.lane.b32.xlu0 %v2563_v32, %s6746_s18 }
 0x2b3   : > { %2594 = vrot.lane.b32.xlu2 %v2585_v0, %s6746_s18 }
 0x2b4   : > { %v7982_v46 = vpop.permute.xlu1 %2332  ;;  %v7984_v1 = vpop.permute.xlu0 %2330 }
 0x2b5   : > { %12128 = vst [vmem:[#allocation188_spill] sm:$0xff] %v7982_v46  ;;  %v7986_v51 = vpop.permute.xlu2 %2400 }
 0x2b6   : > { %12129 = vst [vmem:[#allocation189_spill] sm:$0xff] %v7984_v1  ;;  %v2611_v1 = vmul.f32 %v2607_v7, %v7775_v9 }
 0x2b7   : > { %12130 = vst [vmem:[#allocation190_spill] sm:$0xff] %v7986_v51  ;;  %v2609_v51 = vmul.f32 %v2607_v7, %v7758_v36 }
 0x2ba   : > { %2598 = vrot.lane.b32.xlu1 %v2587_v44, %s6746_s18  ;;  %2596 = vrot.lane.b32.xlu0 %v2586_v47, %s6746_s18  ;;  %v2631_v44 = vstv %s6403_s15  ;;  %s6425_s15 = sld [smem:[#allocation3 + $0x85]] }
 0x2bb   : > { %2616 = vrot.lane.b32.xlu2 %v2608_v11, %s6746_s18  ;;  %v2632_v46 = vmul.f32 %v2631_v44, %v7756_v8 }
 0x2bc   : > { %v7994_v0 = vpop.permute.xlu1 %2354  ;;  %v7996_v25 = vpop.permute.xlu0 %2352 }
 0x2bd   : > { %12131 = vst [vmem:[#allocation191_spill] sm:$0xff] %v7994_v0  ;;  %v7998_v32 = vpop.permute.xlu2 %2406  ;;  %v2633_v0 = vmul.f32 %v2631_v44, %v7758_v36 }
 0x2be   : > { %12132 = vst [vmem:[#allocation192_spill] sm:$0xff] %v7996_v25  ;;  %v2791_v25 = vstv %s6412_s16  ;;  %s6426_s16 = sld [smem:[#allocation3 + $0x86]] }
 0x2bf   : > { %12133 = vst [vmem:[#allocation193_spill] sm:$0xff] %v7998_v32  ;;  %v2792_v7 = vmul.f32 %v2791_v25, %v7756_v8 }
 0x2c2   : > { %2620 = vrot.lane.b32.xlu1 %v2610_v54, %s6746_s18  ;;  %2618 = vrot.lane.b32.xlu0 %v2609_v51, %s6746_s18  ;;  %v2794_v54 = vmul.f32 %v2791_v25, %v7766_v17  ;;  %v2634_v51 = vmul.f32 %v2631_v44, %v7766_v17 }
 0x2c3   : > { %2622 = vrot.lane.b32.xlu2 %v2611_v1, %s6746_s18  ;;  %v2793_v1 = vmul.f32 %v2791_v25, %v7758_v36 }
 0x2c4   : > { %v8006_v11 = vpop.permute.xlu1 %2376  ;;  %v8008_v47 = vpop.permute.xlu0 %2358  ;;  %v2805_v42 = vrot.slane %v2794_v54, 1 }
 0x2c5   : > { %12134 = vst [vmem:[#allocation194_spill] sm:$0xff] %v8006_v11  ;;  %v8010_v32 = vpop.permute.xlu2 %2428  ;;  %v2804_v11 = vrot.slane %v2792_v7, 1  ;;  %v2807_v31 = vrot.slane %v2793_v1, 1  ;;  %v2796_v7 = vmul.f32 %v2791_v25, %v8024_v39 }
 0x2c6   : > { %12135 = vst [vmem:[#allocation195_spill] sm:$0xff] %v8008_v47  ;;  %v8021_v47 = vunpack.c.h.bf16 %v6379_v16  ;;  %v2829_v16 = vstv %s6413_s17  ;;  %s6427_s17 = sld [smem:[#allocation3 + $0x87]] }
 0x2c7   : > { %12136 = vst [vmem:[#allocation196_spill] sm:$0xff] %v8010_v32  ;;  %v2795_v32 = vmul.f32 %v2791_v25, %v7775_v9  ;;  %v2806_v30 = vsel %vm730_vm0, %v2804_v11, %v2805_v42 }
 0x2c9   : > { %v2808_v63 = vrot.slane %v2795_v32, 1 }
 0x2ca   : > { %2642 = vrot.lane.b32.xlu1 %v2633_v0, %s6746_s18  ;;  %2640 = vrot.lane.b32.xlu0 %v2632_v46, %s6746_s18  ;;  %v2635_v0 = vmul.f32 %v2631_v44, %v7775_v9  ;;  %v2797_v46 = vmul.f32 %v2791_v25, %v8021_v47  ;;  %v2810_v44 = vrot.slane %v2796_v7, 1  ;;  %v2833_v7 = vmul.f32 %v2829_v16, %v7775_v9 }
 0x2cb   : > { %2644 = vrot.lane.b32.xlu2 %v2634_v51, %s6746_s18  ;;  %v2809_v54 = vsel %vm730_vm0, %v2807_v31, %v2808_v63  ;;  %v2830_v51 = vmul.f32 %v2829_v16, %v7756_v8 }
 0x2cc   : > { %v8027_v10 = vpop.permute.xlu1 %2382  ;;  %v8029_v37 = vpop.permute.xlu0 %2380  ;;  %v2812_v1 = vrot.slane %v2797_v46, 1  ;;  %v2831_v46 = vmul.f32 %v2829_v16, %v7758_v36 }
 0x2cd   : > { %12138 = vst [vmem:[#allocation198_spill] sm:$0xff] %v8027_v10  ;;  %v8031_v45 = vpop.permute.xlu2 %2450  ;;  %v2842_v25 = vrot.slane %v2830_v51, 1 }
 0x2ce   : > { %12139 = vst [vmem:[#allocation199_spill] sm:$0xff] %v8029_v37  ;;  %v2813_v31 = vsel %vm730_vm0, %v2808_v63, %v2812_v1  ;;  %v2846_v63 = vrot.slane %v2833_v7, 1 }
 0x2cf   : > { %12140 = vst [vmem:[#allocation200_spill] sm:$0xff] %v8031_v45  ;;  %v2832_v45 = vmul.f32 %v2829_v16, %v7766_v17 }
 0x2d1   : > { %v2843_v10 = vrot.slane %v2832_v45, 1  ;;  %v2867_v45 = vstv %s6414_s19  ;;  %s6436_s19 = sld [smem:[#allocation3 + $0xb0]] }
 0x2d2   : > { %2814 = vrot.lane.b32.xlu1 %v2806_v30, %s6745_s9  ;;  %2646 = vrot.lane.b32.xlu0 %v2635_v0, %s6746_s18  ;;  %v2811_v30 = vsel %vm730_vm0, %v2805_v42, %v2810_v44  ;;  %v2834_v0 = vmul.f32 %v2829_v16, %v8024_v39 }
 0x2d3   : > { %2816 = vrot.lane.b32.xlu2 %v2809_v54, %s6745_s9  ;;  %v2844_v54 = vsel %vm730_vm0, %v2842_v25, %v2843_v10  ;;  %v2871_v25 = vmul.f32 %v2867_v45, %v7775_v9 }
 0x2d4   : > { %v8043_v32 = vpop.permute.xlu1 %2404  ;;  %v8045_v11 = vpop.permute.xlu0 %2402  ;;  %v2848_v51 = vrot.slane %v2834_v0, 1  ;;  %v2868_v0 = vmul.f32 %v2867_v45, %v7756_v8 }
 0x2d5   : > { %12141 = vst [vmem:[#allocation201_spill] sm:$0xff] %v8043_v32  ;;  %v8047_v37 = vpop.permute.xlu2 %2472  ;;  %v2835_v32 = vmul.f32 %v2829_v16, %v8021_v47  ;;  %v2869_v16 = vmul.f32 %v2867_v45, %v7758_v36 }
 0x2d6   : > { %12142 = vst [vmem:[#allocation202_spill] sm:$0xff] %v8045_v11 }
 0x2d7   : > { %12143 = vst [vmem:[#allocation203_spill] sm:$0xff] %v8047_v37  ;;  %v2845_v37 = vrot.slane %v2831_v46, 1  ;;  %v2850_v44 = vrot.slane %v2835_v32, 1  ;;  %v2870_v46 = vmul.f32 %v2867_v45, %v7766_v17  ;;  %v2883_v32 = vrot.slane %v2869_v16, 1 }
 0x2d9   : > { %v2851_v7 = vsel %vm730_vm0, %v2846_v63, %v2850_v44 }
 0x2da   : > { %2820 = vrot.lane.b32.xlu1 %v2813_v31, %s6745_s9  ;;  %2818 = vrot.lane.b32.xlu0 %v2811_v30, %s6745_s9  ;;  %v2849_v31 = vsel %vm730_vm0, %v2843_v10, %v2848_v51  ;;  %v2847_v30 = vsel %vm730_vm0, %v2845_v37, %v2846_v63  ;;  %v2905_v51 = vstv %s6415_s24  ;;  %s6437_s24 = sld [smem:[#allocation3 + $0xb1]] }
 0x2db   : > { %2852 = vrot.lane.b32.xlu2 %v2844_v54, %s6745_s9  ;;  %v2872_v54 = vmul.f32 %v2867_v45, %v8024_v39  ;;  %v2908_v16 = vmul.f32 %v2905_v51, %v7766_v17 }
 0x2dc   : > { %v8059_v42 = vpop.permute.xlu1 %2426  ;;  %v8061_v1 = vpop.permute.xlu0 %2424 }
 0x2dd   : > { %12144 = vst [vmem:[#allocation204_spill] sm:$0xff] %v8059_v42  ;;  %v8063_v11 = vpop.permute.xlu2 %2478  ;;  %v2881_v42 = vrot.slane %v2870_v46, 1  ;;  %v2886_v50 = vrot.slane %v2872_v54, 1  ;;  %v2909_v46 = vmul.f32 %v2905_v51, %v7775_v9  ;;  %v2919_v54 = vrot.slane %v2908_v16, 1 }
 0x2de   : > { %12145 = vst [vmem:[#allocation205_spill] sm:$0xff] %v8061_v1  ;;  %v2880_v1 = vrot.slane %v2868_v0, 1  ;;  %v2907_v0 = vmul.f32 %v2905_v51, %v7758_v36  ;;  %v2943_v16 = vstv %s6416_s26  ;;  %s6438_s26 = sld [smem:[#allocation3 + $0xb2]] }
 0x2df   : > { %12146 = vst [vmem:[#allocation206_spill] sm:$0xff] %v8063_v11  ;;  %v2884_v11 = vrot.slane %v2871_v25, 1  ;;  %v2873_v25 = vmul.f32 %v2867_v45, %v8021_v47 }
 0x2e0   : > { %v2882_v44 = vsel %vm730_vm0, %v2880_v1, %v2881_v42  ;;  %v2921_v45 = vrot.slane %v2907_v0, 1 }
 0x2e1   : > { %v2885_v63 = vsel %vm730_vm0, %v2883_v32, %v2884_v11  ;;  %v2888_v1 = vrot.slane %v2873_v25, 1 }
 0x2e2   : > { %2856 = vrot.lane.b32.xlu1 %v2849_v31, %s6745_s9  ;;  %2854 = vrot.lane.b32.xlu0 %v2847_v30, %s6745_s9  ;;  %v2906_v31 = vmul.f32 %v2905_v51, %v7756_v8  ;;  %v2887_v30 = vsel %vm730_vm0, %v2881_v42, %v2886_v50  ;;  %v2911_v50 = vmul.f32 %v2905_v51, %v8021_v47  ;;  %v2922_v42 = vrot.slane %v2909_v46, 1 }
 0x2e3   : > { %2858 = vrot.lane.b32.xlu2 %v2851_v7, %s6745_s9 }
 0x2e4   : > { %v8076_v10 = vpop.permute.xlu1 %2448  ;;  %v8078_v37 = vpop.permute.xlu0 %2430  ;;  %v2918_v7 = vrot.slane %v2906_v31, 1  ;;  %v2910_v31 = vmul.f32 %v2905_v51, %v8024_v39  ;;  %v2923_v25 = vsel %vm730_vm0, %v2921_v45, %v2922_v42  ;;  %v2926_v0 = vrot.slane %v2911_v50, 1 }
 0x2e5   : > { %12147 = vst [vmem:[#allocation207_spill] sm:$0xff] %v8076_v10  ;;  %v8080_v60 = vpop.permute.xlu2 %2500  ;;  %v2948_v50 = vmul.f32 %v2943_v16, %v8024_v39 }
 0x2e6   : > { %12148 = vst [vmem:[#allocation208_spill] sm:$0xff] %v8078_v37 }
 0x2e7   : > { %12149 = vst [vmem:[#allocation209_spill] sm:$0xff] %v8080_v60 }
 0x2ea   : > { %2892 = vrot.lane.b32.xlu1 %v2885_v63, %s6745_s9  ;;  %2890 = vrot.lane.b32.xlu0 %v2882_v44, %s6745_s9  ;;  %v2920_v63 = vsel %vm730_vm0, %v2918_v7, %v2919_v54  ;;  %v2889_v44 = vsel %vm730_vm0, %v2884_v11, %v2888_v1  ;;  %v2927_v1 = vsel %vm730_vm0, %v2922_v42, %v2926_v0 }
 0x2eb   : > { %2894 = vrot.lane.b32.xlu2 %v2887_v30, %s6745_s9  ;;  %v2944_v30 = vmul.f32 %v2943_v16, %v7756_v8 }
 0x2ec   : > { %v8093_v32 = vpop.permute.xlu1 %2454  ;;  %v8095_v60 = vpop.permute.xlu0 %2452 }
 0x2ed   : > { %12150 = vst [vmem:[#allocation210_spill] sm:$0xff] %v8093_v32  ;;  %v8097_v37 = vpop.permute.xlu2 %2522  ;;  %v2956_v51 = vrot.slane %v2944_v30, 1  ;;  %v2962_v30 = vrot.slane %v2948_v50, 1 }
 0x2ee   : > { %12151 = vst [vmem:[#allocation211_spill] sm:$0xff] %v8095_v60  ;;  %v2924_v60 = vrot.slane %v2910_v31, 1  ;;  %v2947_v31 = vmul.f32 %v2943_v16, %v7775_v9 }
 0x2ef   : > { %12152 = vst [vmem:[#allocation212_spill] sm:$0xff] %v8097_v37  ;;  %v2946_v37 = vmul.f32 %v2943_v16, %v7766_v17 }
 0x2f0   : > { %v2960_v42 = vrot.slane %v2947_v31, 1 }
 0x2f1   : > { %v2957_v45 = vrot.slane %v2946_v37, 1  ;;  %v2981_v37 = vstv %s6417_s27  ;;  %s6439_s27 = sld [smem:[#allocation3 + $0xb3]] }
 0x2f2   : > { %2928 = vrot.lane.b32.xlu1 %v2920_v63, %s6745_s9  ;;  %2896 = vrot.lane.b32.xlu0 %v2889_v44, %s6745_s9  ;;  %v2925_v63 = vsel %vm730_vm0, %v2919_v54, %v2924_v60  ;;  %v2945_v44 = vmul.f32 %v2943_v16, %v7758_v36  ;;  %v2982_v50 = vmul.f32 %v2981_v37, %v7756_v8 }
 0x2f3   : > { %2930 = vrot.lane.b32.xlu2 %v2923_v25, %s6745_s9  ;;  %v2958_v25 = vsel %vm730_vm0, %v2956_v51, %v2957_v45  ;;  %v2985_v51 = vmul.f32 %v2981_v37, %v7775_v9 }
 0x2f4   : > { %v8109_v46 = vpop.permute.xlu1 %2476  ;;  %v8111_v11 = vpop.permute.xlu0 %2474 }
 0x2f5   : > { %12153 = vst [vmem:[#allocation213_spill] sm:$0xff] %v8109_v46  ;;  %v8113_v7 = vpop.permute.xlu2 %2544  ;;  %v2949_v46 = vmul.f32 %v2943_v16, %v8021_v47  ;;  %v2983_v16 = vmul.f32 %v2981_v37, %v7758_v36 }
 0x2f6   : > { %12154 = vst [vmem:[#allocation214_spill] sm:$0xff] %v8111_v11 }
 0x2f7   : > { %12155 = vst [vmem:[#allocation215_spill] sm:$0xff] %v8113_v7  ;;  %v2959_v7 = vrot.slane %v2945_v44, 1  ;;  %v2964_v0 = vrot.slane %v2949_v46, 1  ;;  %v2984_v44 = vmul.f32 %v2981_v37, %v7766_v17  ;;  %v2997_v46 = vrot.slane %v2983_v16, 1 }
 0x2f9   : > { %v2965_v31 = vsel %vm730_vm0, %v2960_v42, %v2964_v0 }
 0x2fa   : > { %2934 = vrot.lane.b32.xlu1 %v2927_v1, %s6745_s9  ;;  %2932 = vrot.lane.b32.xlu0 %v2925_v63, %s6745_s9  ;;  %v2963_v1 = vsel %vm730_vm0, %v2957_v45, %v2962_v30  ;;  %v2961_v63 = vsel %vm730_vm0, %v2959_v7, %v2960_v42  ;;  %v3019_v30 = vstv %s6418_s6  ;;  %s6440_s6 = sld [smem:[#allocation3 + $0xb4]] }
 0x2fb   : > { %2966 = vrot.lane.b32.xlu2 %v2958_v25, %s6745_s9  ;;  %v2986_v25 = vmul.f32 %v2981_v37, %v8024_v39  ;;  %v3022_v16 = vmul.f32 %v3019_v30, %v7766_v17 }
 0x2fc   : > { %v8125_v60 = vpop.permute.xlu1 %2498  ;;  %v8127_v54 = vpop.permute.xlu0 %2496 }
 0x2fd   : > { %12156 = vst [vmem:[#allocation216_spill] sm:$0xff] %v8125_v60  ;;  %v8129_v11 = vpop.permute.xlu2 %2550  ;;  %v2995_v60 = vrot.slane %v2984_v44, 1  ;;  %v3000_v32 = vrot.slane %v2986_v25, 1  ;;  %v3023_v44 = vmul.f32 %v3019_v30, %v7775_v9  ;;  %v3033_v25 = vrot.slane %v3022_v16, 1 }
 0x2fe   : > { %12157 = vst [vmem:[#allocation217_spill] sm:$0xff] %v8127_v54  ;;  %v2994_v54 = vrot.slane %v2982_v50, 1  ;;  %v3021_v50 = vmul.f32 %v3019_v30, %v7758_v36  ;;  %v3057_v16 = vstv %s6419_s7  ;;  %s6441_s7 = sld [smem:[#allocation3 + $0xb5]] }
 0x2ff   : > { %12158 = vst [vmem:[#allocation218_spill] sm:$0xff] %v8129_v11  ;;  %v2998_v11 = vrot.slane %v2985_v51, 1  ;;  %v2987_v51 = vmul.f32 %v2981_v37, %v8021_v47 }
 0x300   : > { %v2996_v0 = vsel %vm730_vm0, %v2994_v54, %v2995_v60  ;;  %v3035_v37 = vrot.slane %v3021_v50, 1 }
 0x301   : > { %v2999_v42 = vsel %vm730_vm0, %v2997_v46, %v2998_v11  ;;  %v3002_v54 = vrot.slane %v2987_v51, 1 }
 0x302   : > { %2970 = vrot.lane.b32.xlu1 %v2963_v1, %s6745_s9  ;;  %2968 = vrot.lane.b32.xlu0 %v2961_v63, %s6745_s9  ;;  %v3020_v1 = vmul.f32 %v3019_v30, %v7756_v8  ;;  %v3001_v63 = vsel %vm730_vm0, %v2995_v60, %v3000_v32  ;;  %v3025_v32 = vmul.f32 %v3019_v30, %v8021_v47  ;;  %v3036_v60 = vrot.slane %v3023_v44, 1 }
 0x303   : > { %2972 = vrot.lane.b32.xlu2 %v2965_v31, %s6745_s9 }
 0x304   : > { %v8142_v45 = vpop.permute.xlu1 %2520  ;;  %v8144_v7 = vpop.permute.xlu0 %2502  ;;  %v3032_v31 = vrot.slane %v3020_v1, 1  ;;  %v3024_v1 = vmul.f32 %v3019_v30, %v8024_v39  ;;  %v3037_v51 = vsel %vm730_vm0, %v3035_v37, %v3036_v60  ;;  %v3040_v50 = vrot.slane %v3025_v32, 1 }
 0x305   : > { %12159 = vst [vmem:[#allocation219_spill] sm:$0xff] %v8142_v45  ;;  %v8146_v10 = vpop.permute.xlu2 %2572  ;;  %v3062_v32 = vmul.f32 %v3057_v16, %v8024_v39 }
 0x306   : > { %12160 = vst [vmem:[#allocation220_spill] sm:$0xff] %v8144_v7 }
 0x307   : > { %12161 = vst [vmem:[#allocation221_spill] sm:$0xff] %v8146_v10 }
 0x30a   : > { %3006 = vrot.lane.b32.xlu1 %v2999_v42, %s6745_s9  ;;  %3004 = vrot.lane.b32.xlu0 %v2996_v0, %s6745_s9  ;;  %v3034_v42 = vsel %vm730_vm0, %v3032_v31, %v3033_v25  ;;  %v3003_v0 = vsel %vm730_vm0, %v2998_v11, %v3002_v54  ;;  %v3041_v54 = vsel %vm730_vm0, %v3036_v60, %v3040_v50 }
 0x30b   : > { %3008 = vrot.lane.b32.xlu2 %v3001_v63, %s6745_s9  ;;  %v3058_v63 = vmul.f32 %v3057_v16, %v7756_v8 }
 0x30c   : > { %v8159_v46 = vpop.permute.xlu1 %2526  ;;  %v8161_v10 = vpop.permute.xlu0 %2524 }
 0x30d   : > { %12162 = vst [vmem:[#allocation222_spill] sm:$0xff] %v8159_v46  ;;  %v8163_v7 = vpop.permute.xlu2 %2594  ;;  %v3070_v30 = vrot.slane %v3058_v63, 1  ;;  %v3076_v63 = vrot.slane %v3062_v32, 1 }
 0x30e   : > { %12163 = vst [vmem:[#allocation223_spill] sm:$0xff] %v8161_v10  ;;  %v3038_v10 = vrot.slane %v3024_v1, 1  ;;  %v3061_v1 = vmul.f32 %v3057_v16, %v7775_v9 }
 0x30f   : > { %12164 = vst [vmem:[#allocation224_spill] sm:$0xff] %v8163_v7  ;;  %v3060_v7 = vmul.f32 %v3057_v16, %v7766_v17 }
 0x310   : > { %v3074_v60 = vrot.slane %v3061_v1, 1 }
 0x311   : > { %v3071_v37 = vrot.slane %v3060_v7, 1  ;;  %v3095_v7 = vstv %s6420_s10  ;;  %s6442_s10 = sld [smem:[#allocation3 + $0xb6]] }
 0x312   : > { %3042 = vrot.lane.b32.xlu1 %v3034_v42, %s6745_s9  ;;  %3010 = vrot.lane.b32.xlu0 %v3003_v0, %s6745_s9  ;;  %v3039_v42 = vsel %vm730_vm0, %v3033_v25, %v3038_v10  ;;  %v3059_v0 = vmul.f32 %v3057_v16, %v7758_v36  ;;  %v3096_v32 = vmul.f32 %v3095_v7, %v7756_v8 }
 0x313   : > { %3044 = vrot.lane.b32.xlu2 %v3037_v51, %s6745_s9  ;;  %v3072_v51 = vsel %vm730_vm0, %v3070_v30, %v3071_v37  ;;  %v3099_v30 = vmul.f32 %v3095_v7, %v7775_v9 }
 0x314   : > { %v8175_v44 = vpop.permute.xlu1 %2548  ;;  %v8177_v11 = vpop.permute.xlu0 %2546 }
 0x315   : > { %12165 = vst [vmem:[#allocation225_spill] sm:$0xff] %v8175_v44  ;;  %v8179_v31 = vpop.permute.xlu2 %2616  ;;  %v3063_v44 = vmul.f32 %v3057_v16, %v8021_v47  ;;  %v3097_v16 = vmul.f32 %v3095_v7, %v7758_v36 }
 0x316   : > { %12166 = vst [vmem:[#allocation226_spill] sm:$0xff] %v8177_v11 }
 0x317   : > { %12167 = vst [vmem:[#allocation227_spill] sm:$0xff] %v8179_v31  ;;  %v3073_v31 = vrot.slane %v3059_v0, 1  ;;  %v3078_v50 = vrot.slane %v3063_v44, 1  ;;  %v3098_v0 = vmul.f32 %v3095_v7, %v7766_v17  ;;  %v3111_v44 = vrot.slane %v3097_v16, 1 }
 0x319   : > { %v3079_v1 = vsel %vm730_vm0, %v3074_v60, %v3078_v50 }
 0x31a   : > { %3048 = vrot.lane.b32.xlu1 %v3041_v54, %s6745_s9  ;;  %3046 = vrot.lane.b32.xlu0 %v3039_v42, %s6745_s9  ;;  %v3077_v54 = vsel %vm730_vm0, %v3071_v37, %v3076_v63  ;;  %v3075_v42 = vsel %vm730_vm0, %v3073_v31, %v3074_v60  ;;  %v3133_v63 = vstv %s6421_s11  ;;  %s6443_s11 = sld [smem:[#allocation3 + $0xb7]] }
 0x31b   : > { %3080 = vrot.lane.b32.xlu2 %v3072_v51, %s6745_s9  ;;  %v3100_v51 = vmul.f32 %v3095_v7, %v8024_v39  ;;  %v3136_v16 = vmul.f32 %v3133_v63, %v7766_v17 }
 0x31c   : > { %v8191_v10 = vpop.permute.xlu1 %2570  ;;  %v8193_v25 = vpop.permute.xlu0 %2568 }
 0x31d   : > { %12168 = vst [vmem:[#allocation228_spill] sm:$0xff] %v8191_v10  ;;  %v8195_v11 = vpop.permute.xlu2 %2622  ;;  %v3109_v10 = vrot.slane %v3098_v0, 1  ;;  %v3114_v46 = vrot.slane %v3100_v51, 1  ;;  %v3137_v0 = vmul.f32 %v3133_v63, %v7775_v9  ;;  %v3147_v51 = vrot.slane %v3136_v16, 1 }
 0x31e   : > { %12169 = vst [vmem:[#allocation229_spill] sm:$0xff] %v8193_v25  ;;  %v3108_v25 = vrot.slane %v3096_v32, 1  ;;  %v3135_v32 = vmul.f32 %v3133_v63, %v7758_v36  ;;  %v3171_v16 = vstv %s6422_s12  ;;  %s6444_s12 = sld [smem:[#allocation3 + $0xc8]] }
 0x31f   : > { %12170 = vst [vmem:[#allocation230_spill] sm:$0xff] %v8195_v11  ;;  %v3112_v11 = vrot.slane %v3099_v30, 1  ;;  %v3101_v30 = vmul.f32 %v3095_v7, %v8021_v47 }
 0x320   : > { %v3110_v50 = vsel %vm730_vm0, %v3108_v25, %v3109_v10  ;;  %v3149_v7 = vrot.slane %v3135_v32, 1 }
 0x321   : > { %v3113_v60 = vsel %vm730_vm0, %v3111_v44, %v3112_v11  ;;  %v3116_v25 = vrot.slane %v3101_v30, 1 }
 0x322   : > { %3084 = vrot.lane.b32.xlu1 %v3077_v54, %s6745_s9  ;;  %3082 = vrot.lane.b32.xlu0 %v3075_v42, %s6745_s9  ;;  %v3134_v54 = vmul.f32 %v3133_v63, %v7756_v8  ;;  %v3115_v42 = vsel %vm730_vm0, %v3109_v10, %v3114_v46  ;;  %v3139_v46 = vmul.f32 %v3133_v63, %v8021_v47  ;;  %v3150_v10 = vrot.slane %v3137_v0, 1 }
 0x323   : > { %3086 = vrot.lane.b32.xlu2 %v3079_v1, %s6745_s9 }
 0x324   : > { %v8208_v37 = vpop.permute.xlu1 %2592  ;;  %v8210_v31 = vpop.permute.xlu0 %2574  ;;  %v3146_v1 = vrot.slane %v3134_v54, 1  ;;  %v3138_v54 = vmul.f32 %v3133_v63, %v8024_v39  ;;  %v3151_v30 = vsel %vm730_vm0, %v3149_v7, %v3150_v10  ;;  %v3154_v32 = vrot.slane %v3139_v46, 1 }
 0x325   : > { %12171 = vst [vmem:[#allocation231_spill] sm:$0xff] %v8208_v37  ;;  %v8212_v45 = vpop.permute.xlu2 %2644  ;;  %v3176_v46 = vmul.f32 %v3171_v16, %v8024_v39 }
 0x326   : > { %12172 = vst [vmem:[#allocation232_spill] sm:$0xff] %v8210_v31 }
 0x327   : > { %12173 = vst [vmem:[#allocation233_spill] sm:$0xff] %v8212_v45 }
 0x32a   : > { %3120 = vrot.lane.b32.xlu1 %v3113_v60, %s6746_s18  ;;  %3118 = vrot.lane.b32.xlu0 %v3110_v50, %s6746_s18  ;;  %v3148_v60 = vsel %vm730_vm0, %v3146_v1, %v3147_v51  ;;  %v3117_v50 = vsel %vm730_vm0, %v3112_v11, %v3116_v25  ;;  %v3155_v25 = vsel %vm730_vm0, %v3150_v10, %v3154_v32 }
 0x32b   : > { %3122 = vrot.lane.b32.xlu2 %v3115_v42, %s6746_s18  ;;  %v3172_v42 = vmul.f32 %v3171_v16, %v7756_v8 }
 0x32c   : > { %v8225_v44 = vpop.permute.xlu1 %2598  ;;  %v8227_v45 = vpop.permute.xlu0 %2596 }
 0x32d   : > { %12174 = vst [vmem:[#allocation234_spill] sm:$0xff] %v8225_v44  ;;  %v8229_v31 = vpop.permute.xlu2 %2816  ;;  %v3184_v63 = vrot.slane %v3172_v42, 1  ;;  %v3190_v42 = vrot.slane %v3176_v46, 1 }
 0x32e   : > { %12175 = vst [vmem:[#allocation235_spill] sm:$0xff] %v8227_v45  ;;  %v3152_v45 = vrot.slane %v3138_v54, 1  ;;  %v3175_v54 = vmul.f32 %v3171_v16, %v7775_v9 }
 0x32f   : > { %12176 = vst [vmem:[#allocation236_spill] sm:$0xff] %v8229_v31  ;;  %v3174_v31 = vmul.f32 %v3171_v16, %v7766_v17 }
 0x330   : > { %v3188_v10 = vrot.slane %v3175_v54, 1 }
 0x331   : > { %v3185_v7 = vrot.slane %v3174_v31, 1  ;;  %v3209_v31 = vstv %s6423_s13  ;;  %s6445_s13 = sld [smem:[#allocation3 + $0xc9]] }
 0x332   : > { %3156 = vrot.lane.b32.xlu1 %v3148_v60, %s6746_s18  ;;  %3124 = vrot.lane.b32.xlu0 %v3117_v50, %s6746_s18  ;;  %v3153_v60 = vsel %vm730_vm0, %v3147_v51, %v3152_v45  ;;  %v3173_v50 = vmul.f32 %v3171_v16, %v7758_v36  ;;  %v3210_v46 = vmul.f32 %v3209_v31, %v7756_v8 }
 0x333   : > { %3158 = vrot.lane.b32.xlu2 %v3151_v30, %s6746_s18  ;;  %v3186_v30 = vsel %vm730_vm0, %v3184_v63, %v3185_v7  ;;  %v3213_v63 = vmul.f32 %v3209_v31, %v7775_v9 }
 0x334   : > { %v8241_v0 = vpop.permute.xlu1 %2620  ;;  %v8243_v11 = vpop.permute.xlu0 %2618 }
 0x335   : > { %12177 = vst [vmem:[#allocation237_spill] sm:$0xff] %v8241_v0  ;;  %v8245_v1 = vpop.permute.xlu2 %2852  ;;  %v3177_v0 = vmul.f32 %v3171_v16, %v8021_v47  ;;  %v3211_v16 = vmul.f32 %v3209_v31, %v7758_v36 }
 0x336   : > { %12178 = vst [vmem:[#allocation238_spill] sm:$0xff] %v8243_v11 }
 0x337   : > { %12179 = vst [vmem:[#allocation239_spill] sm:$0xff] %v8245_v1  ;;  %v3187_v1 = vrot.slane %v3173_v50, 1  ;;  %v3192_v32 = vrot.slane %v3177_v0, 1  ;;  %v3212_v50 = vmul.f32 %v3209_v31, %v7766_v17  ;;  %v3225_v0 = vrot.slane %v3211_v16, 1 }
 0x339   : > { %v3193_v54 = vsel %vm730_vm0, %v3188_v10, %v3192_v32 }
 0x33a   : > { %3162 = vrot.lane.b32.xlu1 %v3155_v25, %s6746_s18  ;;  %3160 = vrot.lane.b32.xlu0 %v3153_v60, %s6746_s18  ;;  %v3191_v25 = vsel %vm730_vm0, %v3185_v7, %v3190_v42  ;;  %v3189_v60 = vsel %vm730_vm0, %v3187_v1, %v3188_v10  ;;  %v3247_v42 = vstv %s6424_s14  ;;  %s6446_s14 = sld [smem:[#allocation3 + $0xca]] }
 0x33b   : > { %3194 = vrot.lane.b32.xlu2 %v3186_v30, %s6746_s18  ;;  %v3214_v30 = vmul.f32 %v3209_v31, %v8024_v39  ;;  %v3250_v16 = vmul.f32 %v3247_v42, %v7766_v17 }
 0x33c   : > { %v8257_v45 = vpop.permute.xlu1 %2642  ;;  %v8259_v51 = vpop.permute.xlu0 %2640 }
 0x33d   : > { %12180 = vst [vmem:[#allocation240_spill] sm:$0xff] %v8257_v45  ;;  %v8261_v11 = vpop.permute.xlu2 %2858  ;;  %v3223_v45 = vrot.slane %v3212_v50, 1  ;;  %v3228_v44 = vrot.slane %v3214_v30, 1  ;;  %v3251_v50 = vmul.f32 %v3247_v42, %v7775_v9  ;;  %v3261_v30 = vrot.slane %v3250_v16, 1 }
 0x33e   : > { %12181 = vst [vmem:[#allocation241_spill] sm:$0xff] %v8259_v51  ;;  %v3222_v51 = vrot.slane %v3210_v46, 1  ;;  %v3249_v46 = vmul.f32 %v3247_v42, %v7758_v36  ;;  %v3285_v16 = vstv %s6425_s15  ;;  %s6447_s15 = sld [smem:[#allocation3 + $0xcb]] }
 0x33f   : > { %12182 = vst [vmem:[#allocation242_spill] sm:$0xff] %v8261_v11  ;;  %v3226_v11 = vrot.slane %v3213_v63, 1  ;;  %v3215_v63 = vmul.f32 %v3209_v31, %v8021_v47 }
 0x340   : > { %v3224_v32 = vsel %vm730_vm0, %v3222_v51, %v3223_v45  ;;  %v3263_v31 = vrot.slane %v3249_v46, 1 }
 0x341   : > { %v3227_v10 = vsel %vm730_vm0, %v3225_v0, %v3226_v11  ;;  %v3230_v51 = vrot.slane %v3215_v63, 1 }
 0x342   : > { %3198 = vrot.lane.b32.xlu1 %v3191_v25, %s6746_s18  ;;  %3196 = vrot.lane.b32.xlu0 %v3189_v60, %s6746_s18  ;;  %v3248_v25 = vmul.f32 %v3247_v42, %v7756_v8  ;;  %v3229_v60 = vsel %vm730_vm0, %v3223_v45, %v3228_v44  ;;  %v3253_v44 = vmul.f32 %v3247_v42, %v8021_v47  ;;  %v3264_v45 = vrot.slane %v3251_v50, 1 }
 0x343   : > { %3200 = vrot.lane.b32.xlu2 %v3193_v54, %s6746_s18 }
 0x344   : > { %v8274_v7 = vpop.permute.xlu1 %2814  ;;  %v8276_v1 = vpop.permute.xlu0 %2646  ;;  %v3260_v54 = vrot.slane %v3248_v25, 1  ;;  %v3252_v25 = vmul.f32 %v3247_v42, %v8024_v39  ;;  %v3265_v63 = vsel %vm730_vm0, %v3263_v31, %v3264_v45  ;;  %v3268_v46 = vrot.slane %v3253_v44, 1 }
 0x345   : > { %12183 = vst [vmem:[#allocation243_spill] sm:$0xff] %v8274_v7  ;;  %v8278_v37 = vpop.permute.xlu2 %2894  ;;  %v3290_v44 = vmul.f32 %v3285_v16, %v8024_v39 }
 0x346   : > { %12184 = vst [vmem:[#allocation244_spill] sm:$0xff] %v8276_v1 }
 0x347   : > { %12185 = vst [vmem:[#allocation245_spill] sm:$0xff] %v8278_v37 }
 0x34a   : > { %3234 = vrot.lane.b32.xlu1 %v3227_v10, %s6746_s18  ;;  %3232 = vrot.lane.b32.xlu0 %v3224_v32, %s6746_s18  ;;  %v3262_v10 = vsel %vm730_vm0, %v3260_v54, %v3261_v30  ;;  %v3231_v32 = vsel %vm730_vm0, %v3226_v11, %v3230_v51  ;;  %v3269_v51 = vsel %vm730_vm0, %v3264_v45, %v3268_v46 }
 0x34b   : > { %3236 = vrot.lane.b32.xlu2 %v3229_v60, %s6746_s18  ;;  %v3286_v60 = vmul.f32 %v3285_v16, %v7756_v8 }
 0x34c   : > { %v8291_v0 = vpop.permute.xlu1 %2820  ;;  %v8293_v37 = vpop.permute.xlu0 %2818 }
 0x34d   : > { %12186 = vst [vmem:[#allocation246_spill] sm:$0xff] %v8291_v0  ;;  %v8295_v7 = vpop.permute.xlu2 %2930  ;;  %v3298_v42 = vrot.slane %v3286_v60, 1  ;;  %v3304_v60 = vrot.slane %v3290_v44, 1 }
 0x34e   : > { %12187 = vst [vmem:[#allocation247_spill] sm:$0xff] %v8293_v37  ;;  %v3266_v37 = vrot.slane %v3252_v25, 1  ;;  %v3289_v25 = vmul.f32 %v3285_v16, %v7775_v9 }
 0x34f   : > { %12188 = vst [vmem:[#allocation248_spill] sm:$0xff] %v8295_v7  ;;  %v3288_v7 = vmul.f32 %v3285_v16, %v7766_v17 }
 0x350   : > { %v3302_v45 = vrot.slane %v3289_v25, 1 }
 0x351   : > { %v3299_v31 = vrot.slane %v3288_v7, 1  ;;  %v3323_v7 = vstv %s6426_s16  ;;  %s6448_s16 = sld [smem:[#allocation3 + $0xcc]] }
 0x352   : > { %3270 = vrot.lane.b32.xlu1 %v3262_v10, %s6746_s18  ;;  %3238 = vrot.lane.b32.xlu0 %v3231_v32, %s6746_s18  ;;  %v3267_v10 = vsel %vm730_vm0, %v3261_v30, %v3266_v37  ;;  %v3287_v32 = vmul.f32 %v3285_v16, %v7758_v36  ;;  %v3324_v44 = vmul.f32 %v3323_v7, %v7756_v8 }
 0x353   : > { %3272 = vrot.lane.b32.xlu2 %v3265_v63, %s6746_s18  ;;  %v3300_v63 = vsel %vm730_vm0, %v3298_v42, %v3299_v31  ;;  %v3327_v42 = vmul.f32 %v3323_v7, %v7775_v9 }
 0x354   : > { %v8307_v50 = vpop.permute.xlu1 %2856  ;;  %v8309_v11 = vpop.permute.xlu0 %2854 }
 0x355   : > { %12189 = vst [vmem:[#allocation249_spill] sm:$0xff] %v8307_v50  ;;  %v8311_v54 = vpop.permute.xlu2 %2966  ;;  %v3291_v50 = vmul.f32 %v3285_v16, %v8021_v47  ;;  %v3325_v16 = vmul.f32 %v3323_v7, %v7758_v36 }
 0x356   : > { %12190 = vst [vmem:[#allocation250_spill] sm:$0xff] %v8309_v11 }
 0x357   : > { %12191 = vst [vmem:[#allocation251_spill] sm:$0xff] %v8311_v54  ;;  %v3301_v54 = vrot.slane %v3287_v32, 1  ;;  %v3306_v46 = vrot.slane %v3291_v50, 1  ;;  %v3326_v32 = vmul.f32 %v3323_v7, %v7766_v17  ;;  %v3339_v50 = vrot.slane %v3325_v16, 1 }
 0x359   : > { %v3307_v25 = vsel %vm730_vm0, %v3302_v45, %v3306_v46 }
 0x35a   : > { %3276 = vrot.lane.b32.xlu1 %v3269_v51, %s6746_s18  ;;  %3274 = vrot.lane.b32.xlu0 %v3267_v10, %s6746_s18  ;;  %v3305_v51 = vsel %vm730_vm0, %v3299_v31, %v3304_v60  ;;  %v3303_v10 = vsel %vm730_vm0, %v3301_v54, %v3302_v45  ;;  %v3361_v60 = vstv %s6427_s17  ;;  %s6449_s17 = sld [smem:[#allocation3 + $0xcd]] }
 0x35b   : > { %3308 = vrot.lane.b32.xlu2 %v3300_v63, %s6746_s18  ;;  %v3328_v63 = vmul.f32 %v3323_v7, %v8024_v39  ;;  %v3364_v16 = vmul.f32 %v3361_v60, %v7766_v17 }
 0x35c   : > { %v8323_v37 = vpop.permute.xlu1 %2892  ;;  %v8325_v30 = vpop.permute.xlu0 %2890 }
 0x35d   : > { %12192 = vst [vmem:[#allocation252_spill] sm:$0xff] %v8323_v37  ;;  %v8327_v11 = vpop.permute.xlu2 %2972  ;;  %v3337_v37 = vrot.slane %v3326_v32, 1  ;;  %v3342_v0 = vrot.slane %v3328_v63, 1  ;;  %v3365_v32 = vmul.f32 %v3361_v60, %v7775_v9  ;;  %v3375_v63 = vrot.slane %v3364_v16, 1 }
 0x35e   : > { %12193 = vst [vmem:[#allocation253_spill] sm:$0xff] %v8325_v30  ;;  %v3336_v30 = vrot.slane %v3324_v44, 1  ;;  %v3363_v44 = vmul.f32 %v3361_v60, %v7758_v36  ;;  %v3535_v16 = vstv %s6436_s19  ;;  %s6450_s19 = sld [smem:[#allocation3 + $0xce]] }
 0x35f   : > { %12194 = vst [vmem:[#allocation254_spill] sm:$0xff] %v8327_v11  ;;  %v3340_v11 = vrot.slane %v3327_v42, 1  ;;  %v3329_v42 = vmul.f32 %v3323_v7, %v8021_v47 }
 0x360   : > { %v3338_v46 = vsel %vm730_vm0, %v3336_v30, %v3337_v37  ;;  %v3377_v7 = vrot.slane %v3363_v44, 1 }
 0x361   : > { %v3341_v45 = vsel %vm730_vm0, %v3339_v50, %v3340_v11  ;;  %v3344_v30 = vrot.slane %v3329_v42, 1 }
 0x362   : > { %3312 = vrot.lane.b32.xlu1 %v3305_v51, %s6746_s18  ;;  %3310 = vrot.lane.b32.xlu0 %v3303_v10, %s6746_s18  ;;  %v3362_v51 = vmul.f32 %v3361_v60, %v7756_v8  ;;  %v3343_v10 = vsel %vm730_vm0, %v3337_v37, %v3342_v0  ;;  %v3367_v0 = vmul.f32 %v3361_v60, %v8021_v47  ;;  %v3378_v37 = vrot.slane %v3365_v32, 1 }
 0x363   : > { %3314 = vrot.lane.b32.xlu2 %v3307_v25, %s6746_s18 }
 0x364   : > { %v8340_v31 = vpop.permute.xlu1 %2928  ;;  %v8342_v54 = vpop.permute.xlu0 %2896  ;;  %v3374_v25 = vrot.slane %v3362_v51, 1  ;;  %v3366_v51 = vmul.f32 %v3361_v60, %v8024_v39  ;;  %v3379_v42 = vsel %vm730_vm0, %v3377_v7, %v3378_v37  ;;  %v3382_v44 = vrot.slane %v3367_v0, 1 }
 0x365   : > { %12195 = vst [vmem:[#allocation255_spill] sm:$0xff] %v8340_v31  ;;  %v8344_v1 = vpop.permute.xlu2 %3008  ;;  %v3540_v0 = vmul.f32 %v3535_v16, %v8024_v39 }
 0x366   : > { %12196 = vst [vmem:[#allocation256_spill] sm:$0xff] %v8342_v54 }
 0x367   : > { %12197 = vst [vmem:[#allocation257_spill] sm:$0xff] %v8344_v1 }
 0x36a   : > { %3348 = vrot.lane.b32.xlu1 %v3341_v45, %s6746_s18  ;;  %3346 = vrot.lane.b32.xlu0 %v3338_v46, %s6746_s18  ;;  %v3376_v45 = vsel %vm730_vm0, %v3374_v25, %v3375_v63  ;;  %v3345_v46 = vsel %vm730_vm0, %v3340_v11, %v3344_v30  ;;  %v3383_v30 = vsel %vm730_vm0, %v3378_v37, %v3382_v44 }
 0x36b   : > { %3350 = vrot.lane.b32.xlu2 %v3343_v10, %s6746_s18  ;;  %v3536_v10 = vmul.f32 %v3535_v16, %v7756_v8 }
 0x36c   : > { %v8357_v50 = vpop.permute.xlu1 %2934  ;;  %v8359_v1 = vpop.permute.xlu0 %2932 }
 0x36d   : > { %12198 = vst [vmem:[#allocation258_spill] sm:$0xff] %v8357_v50  ;;  %v8361_v54 = vpop.permute.xlu2 %3044  ;;  %v3548_v60 = vrot.slane %v3536_v10, 2  ;;  %v3554_v10 = vrot.slane %v3540_v0, 2 }
 0x36e   : > { %12199 = vst [vmem:[#allocation259_spill] sm:$0xff] %v8359_v1  ;;  %v3380_v1 = vrot.slane %v3366_v51, 1  ;;  %v3539_v51 = vmul.f32 %v3535_v16, %v7775_v9 }
 0x36f   : > { %12200 = vst [vmem:[#allocation260_spill] sm:$0xff] %v8361_v54  ;;  %v3538_v54 = vmul.f32 %v3535_v16, %v7766_v17 }
 0x370   : > { %v3552_v37 = vrot.slane %v3539_v51, 2 }
 0x371   : > { %v3549_v7 = vrot.slane %v3538_v54, 2  ;;  %v3573_v54 = vstv %s6437_s24  ;;  %s6451_s24 = sld [smem:[#allocation3 + $0xcf]] }
 0x372   : > { %3384 = vrot.lane.b32.xlu1 %v3376_v45, %s6746_s18  ;;  %3352 = vrot.lane.b32.xlu0 %v3345_v46, %s6746_s18  ;;  %v3381_v45 = vsel %vm730_vm0, %v3375_v63, %v3380_v1  ;;  %v3537_v46 = vmul.f32 %v3535_v16, %v7758_v36  ;;  %v3574_v0 = vmul.f32 %v3573_v54, %v7756_v8 }
 0x373   : > { %3386 = vrot.lane.b32.xlu2 %v3379_v42, %s6746_s18  ;;  %v3550_v42 = vsel %vm1475_vm1, %v3548_v60, %v3549_v7  ;;  %v3577_v60 = vmul.f32 %v3573_v54, %v7775_v9 }
 0x374   : > { %v8373_v32 = vpop.permute.xlu1 %2970  ;;  %v8375_v11 = vpop.permute.xlu0 %2968 }
 0x375   : > { %12201 = vst [vmem:[#allocation261_spill] sm:$0xff] %v8373_v32  ;;  %v8377_v25 = vpop.permute.xlu2 %3080  ;;  %v3541_v32 = vmul.f32 %v3535_v16, %v8021_v47  ;;  %v3575_v16 = vmul.f32 %v3573_v54, %v7758_v36 }
 0x376   : > { %12202 = vst [vmem:[#allocation262_spill] sm:$0xff] %v8375_v11 }
 0x377   : > { %12203 = vst [vmem:[#allocation263_spill] sm:$0xff] %v8377_v25  ;;  %v3551_v25 = vrot.slane %v3537_v46, 2  ;;  %v3556_v44 = vrot.slane %v3541_v32, 2  ;;  %v3576_v46 = vmul.f32 %v3573_v54, %v7766_v17  ;;  %v3589_v32 = vrot.slane %v3575_v16, 2 }
 0x379   : > { %v3557_v51 = vsel %vm1475_vm1, %v3552_v37, %v3556_v44 }
 0x37a   : > { %3390 = vrot.lane.b32.xlu1 %v3383_v30, %s6746_s18  ;;  %3388 = vrot.lane.b32.xlu0 %v3381_v45, %s6746_s18  ;;  %v3555_v30 = vsel %vm1475_vm1, %v3549_v7, %v3554_v10  ;;  %v3553_v45 = vsel %vm1475_vm1, %v3551_v25, %v3552_v37  ;;  %v3611_v10 = vstv %s6438_s26  ;;  %s6463_s26 = sld [smem:[#allocation3 + $0x28]] }
 0x37b   : > { %3558 = vrot.lane.b32.xlu2 %v3550_v42, %s6745_s9  ;;  %v3578_v42 = vmul.f32 %v3573_v54, %v8024_v39  ;;  %v3614_v16 = vmul.f32 %v3611_v10, %v7766_v17 }
 0x37c   : > { %v8389_v1 = vpop.permute.xlu1 %3006  ;;  %v8391_v63 = vpop.permute.xlu0 %3004 }
 0x37d   : > { %12204 = vst [vmem:[#allocation264_spill] sm:$0xff] %v8389_v1  ;;  %v8393_v11 = vpop.permute.xlu2 %3086  ;;  %v3587_v1 = vrot.slane %v3576_v46, 2  ;;  %v3592_v50 = vrot.slane %v3578_v42, 2  ;;  %v3615_v46 = vmul.f32 %v3611_v10, %v7775_v9  ;;  %v3625_v42 = vrot.slane %v3614_v16, 2 }
 0x37e   : > { %12205 = vst [vmem:[#allocation265_spill] sm:$0xff] %v8391_v63  ;;  %v3586_v63 = vrot.slane %v3574_v0, 2  ;;  %v3613_v0 = vmul.f32 %v3611_v10, %v7758_v36  ;;  %v3649_v16 = vstv %s6439_s27  ;;  %s6464_s27 = sld [smem:[#allocation3 + $0x29]] }
 0x37f   : > { %12206 = vst [vmem:[#allocation266_spill] sm:$0xff] %v8393_v11  ;;  %v3590_v11 = vrot.slane %v3577_v60, 2  ;;  %v3579_v60 = vmul.f32 %v3573_v54, %v8021_v47 }
 0x380   : > { %v3588_v44 = vsel %vm1475_vm1, %v3586_v63, %v3587_v1  ;;  %v3627_v54 = vrot.slane %v3613_v0, 2 }
 0x381   : > { %v3591_v37 = vsel %vm1475_vm1, %v3589_v32, %v3590_v11  ;;  %v3594_v63 = vrot.slane %v3579_v60, 2 }
 0x382   : > { %3562 = vrot.lane.b32.xlu1 %v3555_v30, %s6745_s9  ;;  %3560 = vrot.lane.b32.xlu0 %v3553_v45, %s6745_s9  ;;  %v3612_v30 = vmul.f32 %v3611_v10, %v7756_v8  ;;  %v3593_v45 = vsel %vm1475_vm1, %v3587_v1, %v3592_v50  ;;  %v3617_v50 = vmul.f32 %v3611_v10, %v8021_v47  ;;  %v3628_v1 = vrot.slane %v3615_v46, 2 }
 0x383   : > { %3564 = vrot.lane.b32.xlu2 %v3557_v51, %s6745_s9 }
 0x384   : > { %v8406_v7 = vpop.permute.xlu1 %3042  ;;  %v8408_v25 = vpop.permute.xlu0 %3010  ;;  %v3624_v51 = vrot.slane %v3612_v30, 2  ;;  %v3616_v30 = vmul.f32 %v3611_v10, %v8024_v39  ;;  %v3629_v60 = vsel %vm1475_vm1, %v3627_v54, %v3628_v1  ;;  %v3632_v0 = vrot.slane %v3617_v50, 2 }
 0x385   : > { %12207 = vst [vmem:[#allocation267_spill] sm:$0xff] %v8406_v7  ;;  %v8410_v31 = vpop.permute.xlu2 %3122  ;;  %v3654_v50 = vmul.f32 %v3649_v16, %v8024_v39 }
 0x386   : > { %12208 = vst [vmem:[#allocation268_spill] sm:$0xff] %v8408_v25 }
 0x387   : > { %12209 = vst [vmem:[#allocation269_spill] sm:$0xff] %v8410_v31 }
 0x38a   : > { %3598 = vrot.lane.b32.xlu1 %v3591_v37, %s6745_s9  ;;  %3596 = vrot.lane.b32.xlu0 %v3588_v44, %s6745_s9  ;;  %v3626_v37 = vsel %vm1475_vm1, %v3624_v51, %v3625_v42  ;;  %v3595_v44 = vsel %vm1475_vm1, %v3590_v11, %v3594_v63  ;;  %v3633_v63 = vsel %vm1475_vm1, %v3628_v1, %v3632_v0 }
 0x38b   : > { %3600 = vrot.lane.b32.xlu2 %v3593_v45, %s6745_s9  ;;  %v3650_v45 = vmul.f32 %v3649_v16, %v7756_v8 }
 0x38c   : > { %v8423_v32 = vpop.permute.xlu1 %3048  ;;  %v8425_v31 = vpop.permute.xlu0 %3046 }
 0x38d   : > { %12210 = vst [vmem:[#allocation270_spill] sm:$0xff] %v8423_v32  ;;  %v8427_v25 = vpop.permute.xlu2 %3158  ;;  %v3662_v10 = vrot.slane %v3650_v45, 2  ;;  %v3668_v45 = vrot.slane %v3654_v50, 2 }
 0x38e   : > { %12211 = vst [vmem:[#allocation271_spill] sm:$0xff] %v8425_v31  ;;  %v3630_v31 = vrot.slane %v3616_v30, 2  ;;  %v3653_v30 = vmul.f32 %v3649_v16, %v7775_v9 }
 0x38f   : > { %12212 = vst [vmem:[#allocation272_spill] sm:$0xff] %v8427_v25  ;;  %v3652_v25 = vmul.f32 %v3649_v16, %v7766_v17 }
 0x390   : > { %v3666_v1 = vrot.slane %v3653_v30, 2 }
 0x391   : > { %v3663_v54 = vrot.slane %v3652_v25, 2  ;;  %v3687_v25 = vstv %s6440_s6  ;;  %s8741_s6 = sld [smem:[#allocation3 + $0x1]] }
 0x392   : > { %3634 = vrot.lane.b32.xlu1 %v3626_v37, %s6745_s9  ;;  %3602 = vrot.lane.b32.xlu0 %v3595_v44, %s6745_s9  ;;  %v3631_v37 = vsel %vm1475_vm1, %v3625_v42, %v3630_v31  ;;  %v3651_v44 = vmul.f32 %v3649_v16, %v7758_v36  ;;  %v3688_v50 = vmul.f32 %v3687_v25, %v7756_v8 }
 0x393   : > { %3636 = vrot.lane.b32.xlu2 %v3629_v60, %s6745_s9  ;;  %v3664_v60 = vsel %vm1475_vm1, %v3662_v10, %v3663_v54  ;;  %v3691_v10 = vmul.f32 %v3687_v25, %v7775_v9 }
 0x394   : > { %v8439_v46 = vpop.permute.xlu1 %3084  ;;  %v8441_v11 = vpop.permute.xlu0 %3082 }
 0x395   : > { %12213 = vst [vmem:[#allocation273_spill] sm:$0xff] %v8439_v46  ;;  %v8443_v51 = vpop.permute.xlu2 %3194  ;;  %v3655_v46 = vmul.f32 %v3649_v16, %v8021_v47  ;;  %v3689_v16 = vmul.f32 %v3687_v25, %v7758_v36 }
 0x396   : > { %12214 = vst [vmem:[#allocation274_spill] sm:$0xff] %v8441_v11 }
 0x397   : > { %12215 = vst [vmem:[#allocation275_spill] sm:$0xff] %v8443_v51  ;;  %v3665_v51 = vrot.slane %v3651_v44, 2  ;;  %v3670_v0 = vrot.slane %v3655_v46, 2  ;;  %v3690_v44 = vmul.f32 %v3687_v25, %v7766_v17  ;;  %v3703_v46 = vrot.slane %v3689_v16, 2 }
 0x399   : > { %v3671_v30 = vsel %vm1475_vm1, %v3666_v1, %v3670_v0 }
 0x39a   : > { %3640 = vrot.lane.b32.xlu1 %v3633_v63, %s6745_s9  ;;  %3638 = vrot.lane.b32.xlu0 %v3631_v37, %s6745_s9  ;;  %v3669_v63 = vsel %vm1475_vm1, %v3663_v54, %v3668_v45  ;;  %v3667_v37 = vsel %vm1475_vm1, %v3665_v51, %v3666_v1  ;;  %v3725_v45 = vstv %s6441_s7  ;;  %s8750_s7 = sld [smem:[#allocation6 + $0x1]] }
 0x39b   : > { %3672 = vrot.lane.b32.xlu2 %v3664_v60, %s6745_s9  ;;  %v3692_v60 = vmul.f32 %v3687_v25, %v8024_v39  ;;  %v3728_v16 = vmul.f32 %v3725_v45, %v7766_v17 }
 0x39c   : > { %v8455_v31 = vpop.permute.xlu1 %3120  ;;  %v8457_v42 = vpop.permute.xlu0 %3118 }
 0x39d   : > { %12216 = vst [vmem:[#allocation276_spill] sm:$0xff] %v8455_v31  ;;  %v8459_v11 = vpop.permute.xlu2 %3200  ;;  %v3701_v31 = vrot.slane %v3690_v44, 2  ;;  %v3706_v32 = vrot.slane %v3692_v60, 2  ;;  %v3729_v44 = vmul.f32 %v3725_v45, %v7775_v9  ;;  %v3739_v60 = vrot.slane %v3728_v16, 2 }
 0x39e   : > { %12217 = vst [vmem:[#allocation277_spill] sm:$0xff] %v8457_v42  ;;  %v3700_v42 = vrot.slane %v3688_v50, 2  ;;  %v3727_v50 = vmul.f32 %v3725_v45, %v7758_v36  ;;  %v3763_v16 = vstv %s6442_s10  ;;  %s8752_s10 = sld [smem:[#allocation6]] }
 0x39f   : > { %12218 = vst [vmem:[#allocation278_spill] sm:$0xff] %v8459_v11  ;;  %v3704_v11 = vrot.slane %v3691_v10, 2  ;;  %v3693_v10 = vmul.f32 %v3687_v25, %v8021_v47 }
 0x3a0   : > { %v3702_v0 = vsel %vm1475_vm1, %v3700_v42, %v3701_v31  ;;  %v3741_v25 = vrot.slane %v3727_v50, 2 }
 0x3a1   : > { %v3705_v1 = vsel %vm1475_vm1, %v3703_v46, %v3704_v11  ;;  %v3708_v42 = vrot.slane %v3693_v10, 2 }
 0x3a2   : > { %3676 = vrot.lane.b32.xlu1 %v3669_v63, %s6745_s9  ;;  %3674 = vrot.lane.b32.xlu0 %v3667_v37, %s6745_s9  ;;  %v3726_v63 = vmul.f32 %v3725_v45, %v7756_v8  ;;  %v3707_v37 = vsel %vm1475_vm1, %v3701_v31, %v3706_v32  ;;  %v3731_v32 = vmul.f32 %v3725_v45, %v8021_v47  ;;  %v3742_v31 = vrot.slane %v3729_v44, 2 }
 0x3a3   : > { %3678 = vrot.lane.b32.xlu2 %v3671_v30, %s6745_s9 }
 0x3a4   : > { %v8472_v54 = vpop.permute.xlu1 %3156  ;;  %v8474_v51 = vpop.permute.xlu0 %3124  ;;  %v3738_v30 = vrot.slane %v3726_v63, 2  ;;  %v3730_v63 = vmul.f32 %v3725_v45, %v8024_v39  ;;  %v3743_v10 = vsel %vm1475_vm1, %v3741_v25, %v3742_v31  ;;  %v3746_v50 = vrot.slane %v3731_v32, 2 }
 0x3a5   : > { %12219 = vst [vmem:[#allocation279_spill] sm:$0xff] %v8472_v54  ;;  %v8476_v7 = vpop.permute.xlu2 %3236  ;;  %v3768_v32 = vmul.f32 %v3763_v16, %v8024_v39 }
 0x3a6   : > { %12220 = vst [vmem:[#allocation280_spill] sm:$0xff] %v8474_v51 }
 0x3a7   : > { %12221 = vst [vmem:[#allocation281_spill] sm:$0xff] %v8476_v7 }
 0x3aa   : > { %3712 = vrot.lane.b32.xlu1 %v3705_v1, %s6745_s9  ;;  %3710 = vrot.lane.b32.xlu0 %v3702_v0, %s6745_s9  ;;  %v3740_v1 = vsel %vm1475_vm1, %v3738_v30, %v3739_v60  ;;  %v3709_v0 = vsel %vm1475_vm1, %v3704_v11, %v3708_v42  ;;  %v3747_v42 = vsel %vm1475_vm1, %v3742_v31, %v3746_v50 }
 0x3ab   : > { %3714 = vrot.lane.b32.xlu2 %v3707_v37, %s6745_s9  ;;  %v3764_v37 = vmul.f32 %v3763_v16, %v7756_v8 }
 0x3ac   : > { %v8489_v46 = vpop.permute.xlu1 %3162  ;;  %v8491_v7 = vpop.permute.xlu0 %3160 }
 0x3ad   : > { %12222 = vst [vmem:[#allocation282_spill] sm:$0xff] %v8489_v46  ;;  %v8493_v51 = vpop.permute.xlu2 %3272  ;;  %v3776_v45 = vrot.slane %v3764_v37, 2  ;;  %v3782_v37 = vrot.slane %v3768_v32, 2 }
 0x3ae   : > { %12223 = vst [vmem:[#allocation283_spill] sm:$0xff] %v8491_v7  ;;  %v3744_v7 = vrot.slane %v3730_v63, 2  ;;  %v3767_v63 = vmul.f32 %v3763_v16, %v7775_v9 }
 0x3af   : > { %12224 = vst [vmem:[#allocation284_spill] sm:$0xff] %v8493_v51  ;;  %v3766_v51 = vmul.f32 %v3763_v16, %v7766_v17 }
 0x3b0   : > { %v3780_v31 = vrot.slane %v3767_v63, 2 }
 0x3b1   : > { %v3777_v25 = vrot.slane %v3766_v51, 2  ;;  %v3801_v51 = vstv %s6443_s11  ;;  %s8754_s11 = sld [smem:[#allocation3]] }
 0x3b2   : > { %3748 = vrot.lane.b32.xlu1 %v3740_v1, %s6745_s9  ;;  %3716 = vrot.lane.b32.xlu0 %v3709_v0, %s6745_s9  ;;  %v3745_v1 = vsel %vm1475_vm1, %v3739_v60, %v3744_v7  ;;  %v3765_v0 = vmul.f32 %v3763_v16, %v7758_v36  ;;  %v3802_v32 = vmul.f32 %v3801_v51, %v7756_v8 }
 0x3b3   : > { %3750 = vrot.lane.b32.xlu2 %v3743_v10, %s6745_s9  ;;  %v3778_v10 = vsel %vm1475_vm1, %v3776_v45, %v3777_v25  ;;  %v3805_v45 = vmul.f32 %v3801_v51, %v7775_v9 }
 0x3b4   : > { %v8505_v44 = vpop.permute.xlu1 %3198  ;;  %v8507_v11 = vpop.permute.xlu0 %3196 }
 0x3b5   : > { %12225 = vst [vmem:[#allocation285_spill] sm:$0xff] %v8505_v44  ;;  %v8509_v30 = vpop.permute.xlu2 %3308  ;;  %v3769_v44 = vmul.f32 %v3763_v16, %v8021_v47  ;;  %v3803_v16 = vmul.f32 %v3801_v51, %v7758_v36 }
 0x3b6   : > { %12226 = vst [vmem:[#allocation286_spill] sm:$0xff] %v8507_v11 }
 0x3b7   : > { %12227 = vst [vmem:[#allocation287_spill] sm:$0xff] %v8509_v30  ;;  %v3779_v30 = vrot.slane %v3765_v0, 2  ;;  %v3784_v50 = vrot.slane %v3769_v44, 2  ;;  %v3804_v0 = vmul.f32 %v3801_v51, %v7766_v17  ;;  %v3817_v44 = vrot.slane %v3803_v16, 2 }
 0x3b9   : > { %v3785_v63 = vsel %vm1475_vm1, %v3780_v31, %v3784_v50 }
 0x3ba   : > { %3754 = vrot.lane.b32.xlu1 %v3747_v42, %s6745_s9  ;;  %3752 = vrot.lane.b32.xlu0 %v3745_v1, %s6745_s9  ;;  %v3783_v42 = vsel %vm1475_vm1, %v3777_v25, %v3782_v37  ;;  %v3781_v1 = vsel %vm1475_vm1, %v3779_v30, %v3780_v31  ;;  %v3839_v37 = vstv %s6444_s12  ;;  %s8760_s12 = sld [smem:[#allocation3 + $0x2]] }
 0x3bb   : > { %3786 = vrot.lane.b32.xlu2 %v3778_v10, %s6745_s9  ;;  %v3806_v10 = vmul.f32 %v3801_v51, %v8024_v39  ;;  %v3842_v16 = vmul.f32 %v3839_v37, %v7766_v17 }
 0x3bc   : > { %v8521_v7 = vpop.permute.xlu1 %3234  ;;  %v8523_v60 = vpop.permute.xlu0 %3232 }
 0x3bd   : > { %12228 = vst [vmem:[#allocation288_spill] sm:$0xff] %v8521_v7  ;;  %v8525_v11 = vpop.permute.xlu2 %3314  ;;  %v3815_v7 = vrot.slane %v3804_v0, 2  ;;  %v3820_v46 = vrot.slane %v3806_v10, 2  ;;  %v3843_v0 = vmul.f32 %v3839_v37, %v7775_v9  ;;  %v3853_v10 = vrot.slane %v3842_v16, 2 }
 0x3be   : > { %12229 = vst [vmem:[#allocation289_spill] sm:$0xff] %v8523_v60  ;;  %v3814_v60 = vrot.slane %v3802_v32, 2  ;;  %v3841_v32 = vmul.f32 %v3839_v37, %v7758_v36  ;;  %v3877_v16 = vstv %s6445_s13  ;;  %s8763_s13 = sld [smem:[#allocation3 + $0x3]] }
 0x3bf   : > { %12230 = vst [vmem:[#allocation290_spill] sm:$0xff] %v8525_v11  ;;  %v3818_v11 = vrot.slane %v3805_v45, 2  ;;  %v3807_v45 = vmul.f32 %v3801_v51, %v8021_v47 }
 0x3c0   : > { %v3816_v50 = vsel %vm1475_vm1, %v3814_v60, %v3815_v7  ;;  %v3855_v51 = vrot.slane %v3841_v32, 2 }
 0x3c1   : > { %v3819_v31 = vsel %vm1475_vm1, %v3817_v44, %v3818_v11  ;;  %v3822_v60 = vrot.slane %v3807_v45, 2 }
 0x3c2   : > { %3790 = vrot.lane.b32.xlu1 %v3783_v42, %s6745_s9  ;;  %3788 = vrot.lane.b32.xlu0 %v3781_v1, %s6745_s9  ;;  %v3840_v42 = vmul.f32 %v3839_v37, %v7756_v8  ;;  %v3821_v1 = vsel %vm1475_vm1, %v3815_v7, %v3820_v46  ;;  %v3845_v46 = vmul.f32 %v3839_v37, %v8021_v47  ;;  %v3856_v7 = vrot.slane %v3843_v0, 2 }
 0x3c3   : > { %3792 = vrot.lane.b32.xlu2 %v3785_v63, %s6745_s9 }
 0x3c4   : > { %v8538_v25 = vpop.permute.xlu1 %3270  ;;  %v8540_v30 = vpop.permute.xlu0 %3238  ;;  %v3852_v63 = vrot.slane %v3840_v42, 2  ;;  %v3844_v42 = vmul.f32 %v3839_v37, %v8024_v39  ;;  %v3857_v45 = vsel %vm1475_vm1, %v3855_v51, %v3856_v7  ;;  %v3860_v32 = vrot.slane %v3845_v46, 2 }
 0x3c5   : > { %12231 = vst [vmem:[#allocation291_spill] sm:$0xff] %v8538_v25  ;;  %v8542_v54 = vpop.permute.xlu2 %3350  ;;  %v3882_v46 = vmul.f32 %v3877_v16, %v8024_v39 }
 0x3c6   : > { %12232 = vst [vmem:[#allocation292_spill] sm:$0xff] %v8540_v30 }
 0x3c7   : > { %12233 = vst [vmem:[#allocation293_spill] sm:$0xff] %v8542_v54 }
 0x3ca   : > { %3826 = vrot.lane.b32.xlu1 %v3819_v31, %s6745_s9  ;;  %3824 = vrot.lane.b32.xlu0 %v3816_v50, %s6745_s9  ;;  %v3854_v31 = vsel %vm1475_vm1, %v3852_v63, %v3853_v10  ;;  %v3823_v50 = vsel %vm1475_vm1, %v3818_v11, %v3822_v60  ;;  %v3861_v60 = vsel %vm1475_vm1, %v3856_v7, %v3860_v32 }
 0x3cb   : > { %3828 = vrot.lane.b32.xlu2 %v3821_v1, %s6745_s9  ;;  %v3878_v1 = vmul.f32 %v3877_v16, %v7756_v8 }
 0x3cc   : > { %v8555_v44 = vpop.permute.xlu1 %3276  ;;  %v8557_v54 = vpop.permute.xlu0 %3274 }
 0x3cd   : > { %12234 = vst [vmem:[#allocation294_spill] sm:$0xff] %v8555_v44  ;;  %v8559_v30 = vpop.permute.xlu2 %3386  ;;  %v3890_v37 = vrot.slane %v3878_v1, 2  ;;  %v3896_v1 = vrot.slane %v3882_v46, 2 }
 0x3ce   : > { %12235 = vst [vmem:[#allocation295_spill] sm:$0xff] %v8557_v54  ;;  %v3858_v54 = vrot.slane %v3844_v42, 2  ;;  %v3881_v42 = vmul.f32 %v3877_v16, %v7775_v9 }
 0x3cf   : > { %12236 = vst [vmem:[#allocation296_spill] sm:$0xff] %v8559_v30  ;;  %v3880_v30 = vmul.f32 %v3877_v16, %v7766_v17 }
 0x3d0   : > { %v3894_v7 = vrot.slane %v3881_v42, 2 }
 0x3d1   : > { %v3891_v51 = vrot.slane %v3880_v30, 2  ;;  %v3915_v30 = vstv %s6446_s14  ;;  %s8770_s14 = sld [smem:[#allocation3 + $0x4]] }
 0x3d2   : > { %3862 = vrot.lane.b32.xlu1 %v3854_v31, %s6746_s18  ;;  %3830 = vrot.lane.b32.xlu0 %v3823_v50, %s6745_s9  ;;  %v3859_v31 = vsel %vm1475_vm1, %v3853_v10, %v3858_v54  ;;  %v3879_v50 = vmul.f32 %v3877_v16, %v7758_v36  ;;  %v3916_v46 = vmul.f32 %v3915_v30, %v7756_v8 }
 0x3d3   : > { %3864 = vrot.lane.b32.xlu2 %v3857_v45, %s6746_s18  ;;  %v3892_v45 = vsel %vm1475_vm1, %v3890_v37, %v3891_v51  ;;  %v3919_v37 = vmul.f32 %v3915_v30, %v7775_v9 }
 0x3d4   : > { %v8571_v0 = vpop.permute.xlu1 %3312  ;;  %v8573_v11 = vpop.permute.xlu0 %3310 }
 0x3d5   : > { %12237 = vst [vmem:[#allocation297_spill] sm:$0xff] %v8571_v0  ;;  %v8575_v63 = vpop.permute.xlu2 %3558  ;;  %v3883_v0 = vmul.f32 %v3877_v16, %v8021_v47  ;;  %v3917_v16 = vmul.f32 %v3915_v30, %v7758_v36 }
 0x3d6   : > { %12238 = vst [vmem:[#allocation298_spill] sm:$0xff] %v8573_v11 }
 0x3d7   : > { %12239 = vst [vmem:[#allocation299_spill] sm:$0xff] %v8575_v63  ;;  %v3893_v63 = vrot.slane %v3879_v50, 2  ;;  %v3898_v32 = vrot.slane %v3883_v0, 2  ;;  %v3918_v50 = vmul.f32 %v3915_v30, %v7766_v17  ;;  %v3931_v0 = vrot.slane %v3917_v16, 2 }
 0x3d9   : > { %v3899_v42 = vsel %vm1475_vm1, %v3894_v7, %v3898_v32 }
 0x3da   : > { %3868 = vrot.lane.b32.xlu1 %v3861_v60, %s6746_s18  ;;  %3866 = vrot.lane.b32.xlu0 %v3859_v31, %s6746_s18  ;;  %v3897_v60 = vsel %vm1475_vm1, %v3891_v51, %v3896_v1  ;;  %v3895_v31 = vsel %vm1475_vm1, %v3893_v63, %v3894_v7  ;;  %v3953_v1 = vstv %s6447_s15  ;;  %s6465_s15 = sld [smem:[#allocation3 + $0x2a]] }
 0x3db   : > { %3900 = vrot.lane.b32.xlu2 %v3892_v45, %s6746_s18  ;;  %v3920_v45 = vmul.f32 %v3915_v30, %v8024_v39  ;;  %v3956_v16 = vmul.f32 %v3953_v1, %v7766_v17 }
 0x3dc   : > { %v8587_v54 = vpop.permute.xlu1 %3348  ;;  %v8589_v10 = vpop.permute.xlu0 %3346 }
 0x3dd   : > { %12240 = vst [vmem:[#allocation300_spill] sm:$0xff] %v8587_v54  ;;  %v8591_v11 = vpop.permute.xlu2 %3564  ;;  %v3929_v54 = vrot.slane %v3918_v50, 2  ;;  %v3934_v44 = vrot.slane %v3920_v45, 2  ;;  %v3957_v50 = vmul.f32 %v3953_v1, %v7775_v9  ;;  %v3967_v45 = vrot.slane %v3956_v16, 2 }
 0x3de   : > { %12241 = vst [vmem:[#allocation301_spill] sm:$0xff] %v8589_v10  ;;  %v3928_v10 = vrot.slane %v3916_v46, 2  ;;  %v3955_v46 = vmul.f32 %v3953_v1, %v7758_v36  ;;  %v3991_v16 = vstv %s6448_s16  ;;  %s8776_s16 = sld [smem:[#allocation6 + $0x2]] }
 0x3df   : > { %12242 = vst [vmem:[#allocation302_spill] sm:$0xff] %v8591_v11  ;;  %v3932_v11 = vrot.slane %v3919_v37, 2  ;;  %v3921_v37 = vmul.f32 %v3915_v30, %v8021_v47 }
 0x3e0   : > { %v3930_v32 = vsel %vm1475_vm1, %v3928_v10, %v3929_v54  ;;  %v3969_v30 = vrot.slane %v3955_v46, 2 }
 0x3e1   : > { %v3933_v7 = vsel %vm1475_vm1, %v3931_v0, %v3932_v11  ;;  %v3936_v10 = vrot.slane %v3921_v37, 2 }
 0x3e2   : > { %3904 = vrot.lane.b32.xlu1 %v3897_v60, %s6746_s18  ;;  %3902 = vrot.lane.b32.xlu0 %v3895_v31, %s6746_s18  ;;  %v3954_v60 = vmul.f32 %v3953_v1, %v7756_v8  ;;  %v3935_v31 = vsel %vm1475_vm1, %v3929_v54, %v3934_v44  ;;  %v3959_v44 = vmul.f32 %v3953_v1, %v8021_v47  ;;  %v3970_v54 = vrot.slane %v3957_v50, 2 }
 0x3e3   : > { %3906 = vrot.lane.b32.xlu2 %v3899_v42, %s6746_s18 }
 0x3e4   : > { %v8604_v51 = vpop.permute.xlu1 %3384  ;;  %v8606_v63 = vpop.permute.xlu0 %3352  ;;  %v3966_v42 = vrot.slane %v3954_v60, 2  ;;  %v3958_v60 = vmul.f32 %v3953_v1, %v8024_v39  ;;  %v3971_v37 = vsel %vm1475_vm1, %v3969_v30, %v3970_v54  ;;  %v3974_v46 = vrot.slane %v3959_v44, 2 }
 0x3e5   : > { %12243 = vst [vmem:[#allocation303_spill] sm:$0xff] %v8604_v51  ;;  %v8608_v25 = vpop.permute.xlu2 %3600  ;;  %v3996_v44 = vmul.f32 %v3991_v16, %v8024_v39 }
 0x3e6   : > { %12244 = vst [vmem:[#allocation304_spill] sm:$0xff] %v8606_v63 }
 0x3e7   : > { %12245 = vst [vmem:[#allocation305_spill] sm:$0xff] %v8608_v25 }
 0x3ea   : > { %3940 = vrot.lane.b32.xlu1 %v3933_v7, %s6746_s18  ;;  %3938 = vrot.lane.b32.xlu0 %v3930_v32, %s6746_s18  ;;  %v3968_v7 = vsel %vm1475_vm1, %v3966_v42, %v3967_v45  ;;  %v3937_v32 = vsel %vm1475_vm1, %v3932_v11, %v3936_v10  ;;  %v3975_v10 = vsel %vm1475_vm1, %v3970_v54, %v3974_v46 }
 0x3eb   : > { %3942 = vrot.lane.b32.xlu2 %v3935_v31, %s6746_s18  ;;  %v3992_v31 = vmul.f32 %v3991_v16, %v7756_v8 }
 0x3ec   : > { %v8621_v0 = vpop.permute.xlu1 %3390  ;;  %v8623_v25 = vpop.permute.xlu0 %3388 }
 0x3ed   : > { %12246 = vst [vmem:[#allocation306_spill] sm:$0xff] %v8621_v0  ;;  %v8625_v63 = vpop.permute.xlu2 %3636  ;;  %v4004_v1 = vrot.slane %v3992_v31, 2  ;;  %v4010_v31 = vrot.slane %v3996_v44, 2 }
 0x3ee   : > { %12247 = vst [vmem:[#allocation307_spill] sm:$0xff] %v8623_v25  ;;  %v3972_v25 = vrot.slane %v3958_v60, 2  ;;  %v3995_v60 = vmul.f32 %v3991_v16, %v7775_v9 }
 0x3ef   : > { %12248 = vst [vmem:[#allocation308_spill] sm:$0xff] %v8625_v63  ;;  %v3994_v63 = vmul.f32 %v3991_v16, %v7766_v17 }
 0x3f0   : > { %v4008_v54 = vrot.slane %v3995_v60, 2 }
 0x3f1   : > { %v4005_v30 = vrot.slane %v3994_v63, 2  ;;  %v4029_v63 = vstv %s6449_s17  ;;  %s8780_s17 = sld [smem:[#allocation6 + $0x3]] }
 0x3f2   : > { %3976 = vrot.lane.b32.xlu1 %v3968_v7, %s6746_s18  ;;  %3944 = vrot.lane.b32.xlu0 %v3937_v32, %s6746_s18  ;;  %v3973_v7 = vsel %vm1475_vm1, %v3967_v45, %v3972_v25  ;;  %v3993_v32 = vmul.f32 %v3991_v16, %v7758_v36  ;;  %v4030_v44 = vmul.f32 %v4029_v63, %v7756_v8 }
 0x3f3   : > { %3978 = vrot.lane.b32.xlu2 %v3971_v37, %s6746_s18  ;;  %v4006_v37 = vsel %vm1475_vm1, %v4004_v1, %v4005_v30  ;;  %v4033_v1 = vmul.f32 %v4029_v63, %v7775_v9 }
 0x3f4   : > { %v8637_v50 = vpop.permute.xlu1 %3562  ;;  %v8639_v11 = vpop.permute.xlu0 %3560 }
 0x3f5   : > { %12249 = vst [vmem:[#allocation309_spill] sm:$0xff] %v8637_v50  ;;  %v8641_v42 = vpop.permute.xlu2 %3672  ;;  %v3997_v50 = vmul.f32 %v3991_v16, %v8021_v47  ;;  %v4031_v16 = vmul.f32 %v4029_v63, %v7758_v36 }
 0x3f6   : > { %12250 = vst [vmem:[#allocation310_spill] sm:$0xff] %v8639_v11 }
 0x3f7   : > { %12251 = vst [vmem:[#allocation311_spill] sm:$0xff] %v8641_v42  ;;  %v4007_v42 = vrot.slane %v3993_v32, 2  ;;  %v4012_v46 = vrot.slane %v3997_v50, 2  ;;  %v4032_v32 = vmul.f32 %v4029_v63, %v7766_v17  ;;  %v4045_v50 = vrot.slane %v4031_v16, 2 }
 0x3f9   : > { %v4013_v60 = vsel %vm1475_vm1, %v4008_v54, %v4012_v46 }
 0x3fa   : > { %3982 = vrot.lane.b32.xlu1 %v3975_v10, %s6746_s18  ;;  %3980 = vrot.lane.b32.xlu0 %v3973_v7, %s6746_s18  ;;  %v4011_v10 = vsel %vm1475_vm1, %v4005_v30, %v4010_v31  ;;  %v4009_v7 = vsel %vm1475_vm1, %v4007_v42, %v4008_v54  ;;  %v4067_v31 = vstv %s6450_s19  ;;  %s8783_s19 = sld [smem:[#allocation6 + $0x4]] }
 0x3fb   : > { %4014 = vrot.lane.b32.xlu2 %v4006_v37, %s6746_s18  ;;  %v4034_v37 = vmul.f32 %v4029_v63, %v8024_v39  ;;  %v4070_v16 = vmul.f32 %v4067_v31, %v7766_v17 }
 0x3fc   : > { %v8653_v25 = vpop.permute.xlu1 %3598  ;;  %v8655_v45 = vpop.permute.xlu0 %3596 }
 0x3fd   : > { %12252 = vst [vmem:[#allocation312_spill] sm:$0xff] %v8653_v25  ;;  %v8657_v11 = vpop.permute.xlu2 %3678  ;;  %v4043_v25 = vrot.slane %v4032_v32, 2  ;;  %v4048_v0 = vrot.slane %v4034_v37, 2  ;;  %v4071_v32 = vmul.f32 %v4067_v31, %v7775_v9  ;;  %v4081_v37 = vrot.slane %v4070_v16, 2 }
 0x3fe   : > { %12253 = vst [vmem:[#allocation313_spill] sm:$0xff] %v8655_v45  ;;  %v4042_v45 = vrot.slane %v4030_v44, 2  ;;  %v4069_v44 = vmul.f32 %v4067_v31, %v7758_v36  ;;  %v4105_v16 = vstv %s6451_s24  ;;  %s8786_s24 = sld [smem:[#allocation3 + $0x5]] }
 0x3ff   : > { %12254 = vst [vmem:[#allocation314_spill] sm:$0xff] %v8657_v11  ;;  %v4046_v11 = vrot.slane %v4033_v1, 2  ;;  %v4035_v1 = vmul.f32 %v4029_v63, %v8021_v47 }
 0x400   : > { %v4044_v46 = vsel %vm1475_vm1, %v4042_v45, %v4043_v25  ;;  %v4083_v63 = vrot.slane %v4069_v44, 2 }
 0x401   : > { %v4047_v54 = vsel %vm1475_vm1, %v4045_v50, %v4046_v11  ;;  %v4050_v45 = vrot.slane %v4035_v1, 2 }
 0x402   : > { %4018 = vrot.lane.b32.xlu1 %v4011_v10, %s6746_s18  ;;  %4016 = vrot.lane.b32.xlu0 %v4009_v7, %s6746_s18  ;;  %v4068_v10 = vmul.f32 %v4067_v31, %v7756_v8  ;;  %v4049_v7 = vsel %vm1475_vm1, %v4043_v25, %v4048_v0  ;;  %v4073_v0 = vmul.f32 %v4067_v31, %v8021_v47  ;;  %v4084_v25 = vrot.slane %v4071_v32, 2 }
 0x403   : > { %4020 = vrot.lane.b32.xlu2 %v4013_v60, %s6746_s18 }
 0x404   : > { %v8670_v30 = vpop.permute.xlu1 %3634  ;;  %v8672_v42 = vpop.permute.xlu0 %3602  ;;  %v4080_v60 = vrot.slane %v4068_v10, 2  ;;  %v4072_v10 = vmul.f32 %v4067_v31, %v8024_v39  ;;  %v4085_v1 = vsel %vm1475_vm1, %v4083_v63, %v4084_v25  ;;  %v4088_v44 = vrot.slane %v4073_v0, 2 }
 0x405   : > { %12255 = vst [vmem:[#allocation315_spill] sm:$0xff] %v8670_v30  ;;  %v8674_v51 = vpop.permute.xlu2 %3714  ;;  %v4107_v0 = vmul.f32 %v4105_v16, %v7758_v36  ;;  %v319_v12 = vstv %s8786_s24  ;;  %s8971_s24 = sld [smem:[#allocation3 + $0x2d]] }
 0x406   : > { %12256 = vst [vmem:[#allocation316_spill] sm:$0xff] %v8672_v42 }
 0x407   : > { %12257 = vst [vmem:[#allocation317_spill] sm:$0xff] %v8674_v51 }
 0x40a   : > { %4054 = vrot.lane.b32.xlu1 %v4047_v54, %s6746_s18  ;;  %4052 = vrot.lane.b32.xlu0 %v4044_v46, %s6746_s18  ;;  %v4082_v54 = vsel %vm1475_vm1, %v4080_v60, %v4081_v37  ;;  %v4051_v46 = vsel %vm1475_vm1, %v4046_v11, %v4050_v45  ;;  %v4089_v45 = vsel %vm1475_vm1, %v4084_v25, %v4088_v44  ;;  %v4121_v25 = vrot.slane %v4107_v0, 2  ;;  %v6452_v44 = vld [vmem:[%s6863_s8 + $0x30] sm:$0xff]  ;;  %v6453_v0 = vld [vmem:[%s6863_s8 + $0x38] sm:$0xff] }
 0x40b   : > { %4056 = vrot.lane.b32.xlu2 %v4049_v7, %s6746_s18  ;;  %v4106_v7 = vmul.f32 %v4105_v16, %v7756_v8 }
 0x40c   : > { %v8687_v50 = vpop.permute.xlu1 %3640  ;;  %v8689_v51 = vpop.permute.xlu0 %3638 }
 0x40d   : > { %12258 = vst [vmem:[#allocation318_spill] sm:$0xff] %v8687_v50  ;;  %v8691_v42 = vpop.permute.xlu2 %3750  ;;  %v4118_v31 = vrot.slane %v4106_v7, 2 }
 0x40e   : > { %12259 = vst [vmem:[#allocation319_spill] sm:$0xff] %v8689_v51  ;;  %v4086_v51 = vrot.slane %v4072_v10, 2  ;;  %v4109_v10 = vmul.f32 %v4105_v16, %v7775_v9 }
 0x40f   : > { %12260 = vst [vmem:[#allocation320_spill] sm:$0xff] %v8691_v42  ;;  %v4108_v42 = vmul.f32 %v4105_v16, %v7766_v17 }
 0x411   : > { %v4119_v63 = vrot.slane %v4108_v42, 2  ;;  %v4122_v42 = vrot.slane %v4109_v10, 2  ;;  %v8743_v10 = vunpack.c.l.bf16 %v6453_v0 }
 0x412   : > { %4090 = vrot.lane.b32.xlu1 %v4082_v54, %s6746_s18  ;;  %4058 = vrot.lane.b32.xlu0 %v4051_v46, %s6746_s18  ;;  %v4087_v54 = vsel %vm1475_vm1, %v4081_v37, %v4086_v51  ;;  %v4110_v46 = vmul.f32 %v4105_v16, %v8024_v39  ;;  %v270_v39 = vstv %s8780_s17  ;;  %s8955_s17 = sld [smem:[#allocation3 + $0x4c]] }
 0x413   : > { %4092 = vrot.lane.b32.xlu2 %v4085_v1, %s6746_s18  ;;  %v4120_v1 = vsel %vm1475_vm1, %v4118_v31, %v4119_v63 }
 0x414   : > { %v8703_v32 = vpop.permute.xlu1 %3676  ;;  %v8705_v11 = vpop.permute.xlu0 %3674  ;;  %v4124_v7 = vrot.slane %v4110_v46, 2  ;;  %v4201_v46 = vstv %s6463_s26  ;;  %s8793_s26 = sld [smem:[#allocation6 + $0x5]] }
 0x415   : > { %12261 = vst [vmem:[#allocation321_spill] sm:$0xff] %v8703_v32  ;;  %v8707_v60 = vpop.permute.xlu2 %3786  ;;  %v4111_v32 = vmul.f32 %v4105_v16, %v8021_v47  ;;  %v4123_v16 = vsel %vm1475_vm1, %v4121_v25, %v4122_v42 }
 0x416   : > { %12262 = vst [vmem:[#allocation322_spill] sm:$0xff] %v8705_v11  ;;  %v4125_v47 = vsel %vm1475_vm1, %v4119_v63, %v4124_v7 }
 0x417   : > { %12263 = vst [vmem:[#allocation323_spill] sm:$0xff] %v8707_v60  ;;  %v4126_v9 = vrot.slane %v4111_v32, 2  ;;  %v266_v60 = vstv %s8750_s7  ;;  %s8822_s7 = sld [smem:[#allocation6 + $0x6]] }
 0x419   : > { %v4127_v31 = vsel %vm1475_vm1, %v4122_v42, %v4126_v9  ;;  %v4204_v42 = vmul.f32 %v4201_v46, %v8743_v10  ;;  %v8758_v9 = vunpack.c.h.bf16 %v6453_v0 }
 0x41a   : > { %4096 = vrot.lane.b32.xlu1 %v4089_v45, %s6746_s18  ;;  %4094 = vrot.lane.b32.xlu0 %v4087_v54, %s6746_s18  ;;  %v8731_v45 = vunpack.c.l.bf16 %v6452_v44  ;;  %v8733_v54 = vunpack.c.h.bf16 %v6452_v44 }
 0x41b   : > { %4128 = vrot.lane.b32.xlu2 %v4120_v1, %s6746_s18 }
 0x41c   : > { %v8719_v51 = vpop.permute.xlu1 %3712  ;;  %v8721_v36 = vpop.permute.xlu0 %3710  ;;  %v4203_v7 = vmul.f32 %v4201_v46, %v8733_v54  ;;  %v4202_v25 = vmul.f32 %v4201_v46, %v8731_v45 }
 0x41d   : > { %12264 = vst [vmem:[#allocation324_spill] sm:$0xff] %v8719_v51  ;;  %v8723_v37 = vpop.permute.xlu2 %3792  ;;  %v4249_v51 = vstv %s6465_s15  ;;  %s8894_s15 = sld [smem:[#allocation3 + $0x2c]] }
 0x41e   : > { %12265 = vst [vmem:[#allocation325_spill] sm:$0xff] %v8721_v36  ;;  %v4250_v30 = vmul.f32 %v4249_v51, %v8731_v45 }
 0x41f   : > { %12266 = vst [vmem:[#allocation326_spill] sm:$0xff] %v8723_v37  ;;  %v301_v37 = vstv %s8760_s12  ;;  %s8835_s12 = sld [smem:[#allocation3 + $0x2b]] }
 0x420   : > { %v303_v11 = vmul.f32 %v301_v37, %v6867_v3 }
 0x422   : > { %4132 = vrot.lane.b32.xlu1 %v4125_v47, %s6746_s18  ;;  %4130 = vrot.lane.b32.xlu0 %v4123_v16, %s6746_s18  ;;  %v4225_v47 = vstv %s6464_s27  ;;  %s8803_s27 = sld [smem:[#allocation3 + $0x6]] }
 0x423   : > { %4134 = vrot.lane.b32.xlu2 %v4127_v31, %s6746_s18  ;;  %v295_v31 = vstv %s8741_s6  ;;  %v4226_v0 = vmul.f32 %v4225_v47, %v8731_v45  ;;  %s8808_s6 = sld [smem:[#allocation3 + $0x7]] }
 0x424   : > { %v8736_v32 = vpop.permute.xlu1 %3748  ;;  %v8738_v63 = vpop.permute.xlu0 %3716 }
 0x425   : > { %12267 = vst [vmem:[#allocation327_spill] sm:$0xff] %v8736_v32  ;;  %v8745_v1 = vpop.permute.xlu2 %3828  ;;  %v264_v32 = vstv %s8752_s10  ;;  %s8826_s10 = sld [smem:[#allocation3 + $0x48]] }
 0x426   : > { %12268 = vst [vmem:[#allocation328_spill] sm:$0xff] %v8738_v63 }
 0x427   : > { %12269 = vst [vmem:[#allocation329_spill] sm:$0xff] %v8745_v1  ;;  %v296_v1 = vmul.f32 %v295_v31, %v6869_v4 }
 0x42a   : > { %4212 = vrot.lane.b32.xlu1 %v4203_v7, %s6745_s9  ;;  %4210 = vrot.lane.b32.xlu0 %v4202_v25, %s6745_s9  ;;  %v4205_v25 = vmul.f32 %v4201_v46, %v8758_v9  ;;  %v298_v46 = vadd.f32 %v296_v1, %v266_v60 }
 0x42b   : > { %4214 = vrot.lane.b32.xlu2 %v4204_v42, %s6745_s9  ;;  %v4227_v42 = vmul.f32 %v4225_v47, %v8733_v54 }
 0x42c   : > { %v8765_v16 = vpop.permute.xlu1 %3754  ;;  %v8767_v44 = vpop.permute.xlu0 %3752 }
 0x42d   : > { %12270 = vst [vmem:[#allocation330_spill] sm:$0xff] %v8765_v16  ;;  %v8772_v7 = vpop.permute.xlu2 %3864 }
 0x42e   : > { %12271 = vst [vmem:[#allocation331_spill] sm:$0xff] %v8767_v44  ;;  %v307_v44 = vstv %s8763_s13  ;;  %s8865_s13 = sld [smem:[#allocation3 + $0x49]] }
 0x42f   : > { %12272 = vst [vmem:[#allocation332_spill] sm:$0xff] %v8772_v7  ;;  %v289_v7 = vstv %s8754_s11  ;;  %v308_v50 = vmul.f32 %v307_v44, %v6869_v4  ;;  %v309_v8 = vmul.f32 %v307_v44, %v6867_v3  ;;  %s8829_s11 = sld [smem:[#allocation6 + $0x7]] }
 0x430   : > { %v291_v36 = vmul.f32 %v289_v7, %v6867_v3 }
 0x431   : > { %v310_v44 = vadd.f32 %v308_v50, %v270_v39  ;;  %v380_v50 = vsel %vm354_vm2, %v6997_v21, %v6995_v20  ;;  %v320_v20 = vmul.f32 %v319_v12, %v6869_v4  ;;  %v4253_v21 = vmul.f32 %v4249_v51, %v8758_v9 }
 0x432   : > { %4234 = vrot.lane.b32.xlu1 %v4226_v0, %s6745_s9  ;;  %4216 = vrot.lane.b32.xlu0 %v4205_v25, %s6745_s9  ;;  %v290_v0 = vmul.f32 %v289_v7, %v6869_v4  ;;  %v313_v25 = vstv %s8770_s14  ;;  %v302_v7 = vmul.f32 %v301_v37, %v6869_v4  ;;  %v293_v37 = vadd.f32 %v291_v36, %v264_v32  ;;  %s8885_s14 = sld [smem:[#allocation3 + $0x4a]] }
 0x433   : > { %4236 = vrot.lane.b32.xlu2 %v4227_v42, %s6745_s9  ;;  %v297_v42 = vmul.f32 %v295_v31, %v6867_v3  ;;  %v379_v31 = vsel %vm354_vm2, %v6947_v52, %v6955_v57  ;;  %v314_v17 = vmul.f32 %v313_v25, %v6869_v4  ;;  %v355_v36 = vsel %vm354_vm2, %v6973_v5, %v6985_v14 }
 0x434   : > { %v8795_v16 = vpop.permute.xlu1 %3790  ;;  %v8797_v63 = vpop.permute.xlu0 %3788  ;;  %v292_v55 = vadd.f32 %v290_v0, %v264_v32  ;;  %v8833_v52 = vadd.f32 %v379_v31, %v298_v46  ;;  %v274_v46 = vstv %s8793_s26  ;;  %v321_v0 = vmul.f32 %v319_v12, %v6867_v3  ;;  %s9004_s26 = sld [smem:[#allocation3 + $0x4e]] }
 0x435   : > { %12273 = vst [vmem:[#allocation333_spill] sm:$0xff] %v8795_v16  ;;  %v8805_v1 = vpop.permute.xlu2 %3900  ;;  %v4229_v16 = vmul.f32 %v4225_v47, %v8758_v9  ;;  %v299_v29 = vadd.f32 %v297_v42, %v266_v60  ;;  %v356_v60 = vsel %vm354_vm2, %v6971_v2, %v6983_v13  ;;  %v325_v13 = vstv %s8803_s27  ;;  %s9019_s27 = sld [smem:[#allocation3 + $0x4f]] }
 0x436   : > { %12274 = vst [vmem:[#allocation334_spill] sm:$0xff] %v8797_v63  ;;  %v4228_v63 = vmul.f32 %v4225_v47, %v8743_v10  ;;  %v272_v47 = vstv %s8783_s19  ;;  %v331_v5 = vstv %s8808_s6  ;;  %v4252_v14 = vmul.f32 %v4249_v51, %v8743_v10  ;;  %s8965_s19 = sld [smem:[#allocation3 + $0x4d]] }
 0x437   : > { %12275 = vst [vmem:[#allocation335_spill] sm:$0xff] %v8805_v1  ;;  %v268_v1 = vstv %s8776_s16  ;;  %v316_v32 = vadd.f32 %v314_v17, %v272_v47  ;;  %v4251_v17 = vmul.f32 %v4249_v51, %v8733_v54  ;;  %v403_v42 = vsel %vm354_vm2, %v6963_v61, %v7009_v27  ;;  %s8910_s16 = sld [smem:[#allocation3 + $0x4b]] }
 0x438   : > { %v305_v57 = vadd.f32 %v303_v11, %v268_v1  ;;  %v304_v38 = vadd.f32 %v302_v7, %v268_v1  ;;  %v8862_v1 = vadd.f32 %v355_v36, %v292_v55  ;;  %v323_v55 = vadd.f32 %v321_v0, %v274_v46  ;;  %s9057_s6 = sld [smem:[#allocation3 + $0x2e]] }
 0x439   : > { %v326_v31 = vmul.f32 %v325_v13, %v6869_v4  ;;  %v332_v12 = vmul.f32 %v331_v5, %v6869_v4  ;;  %v276_v51 = vstv %s8822_s7  ;;  %v322_v27 = vadd.f32 %v320_v20, %v274_v46  ;;  %s9103_s7 = sld [smem:[#allocation3 + $0x2f]] }
 0x43a   : > { %4240 = vrot.lane.b32.xlu1 %v4229_v16, %s6745_s9  ;;  %4238 = vrot.lane.b32.xlu0 %v4228_v63, %s6745_s9  ;;  %v315_v63 = vmul.f32 %v313_v25, %v6867_v3  ;;  %v8860_v25 = vadd.f32 %v356_v60, %v293_v37  ;;  %v723_v37 = vstv %s8826_s10  ;;  %v278_v60 = vstv %s8829_s11  ;;  %s9133_s10 = sld [smem:[#allocation3 + $0x90]] }
 0x43b   : > { %4258 = vrot.lane.b32.xlu2 %v4250_v30, %s6745_s9  ;;  %v311_v30 = vadd.f32 %v309_v8, %v270_v39  ;;  %v8868_v8 = vadd.f32 %v380_v50, %v299_v29  ;;  %v404_v39 = vsel %vm354_vm2, %v7007_v26, %v6975_v6  ;;  %v427_v29 = vsel %vm354_vm2, %v7021_v34, %v7019_v33  ;;  %s9150_s11 = sld [smem:[#allocation3 + $0x91]] }
 0x43c   : > { %v8845_v11 = vpop.permute.xlu1 %3826  ;;  %v8847_v16 = vpop.permute.xlu0 %3824  ;;  %v317_v7 = vadd.f32 %v315_v63, %v272_v47  ;;  %v327_v6 = vmul.f32 %v325_v13, %v6867_v3  ;;  %v8889_v61 = vadd.f32 %v404_v39, %v305_v57  ;;  %v8891_v26 = vadd.f32 %v403_v42, %v304_v38 }
 0x43d   : > { %v8854_v2 = vpop.permute.xlu2 %3906  ;;  %v4273_v47 = vstv %s8835_s12  ;;  %v451_v33 = vsel %vm354_vm2, %v7031_v40, %v6999_v22  ;;  %v724_v34 = vmul.f32 %v723_v37, %v6869_v4  ;;  %v725_v36 = vmul.f32 %v723_v37, %v6867_v3  ;;  %s9183_s12 = sld [smem:[#allocation3 + $0x92]] }
 0x43e   : > { %12276 = vst [vmem:[#allocation336_spill] sm:$0xff] %v8854_v2  ;;  %v726_v57 = vmul.f32 %v723_v37, %v7049_v56  ;;  %v8907_v50 = vadd.f32 %v427_v29, %v310_v44  ;;  %v328_v46 = vadd.f32 %v326_v31, %v276_v51  ;;  %v334_v0 = vadd.f32 %v332_v12, %v278_v60 }
 0x43f   : > { %v333_v13 = vmul.f32 %v331_v5, %v6867_v3  ;;  %v428_v40 = vsel %vm354_vm2, %v6987_v15, %v7033_v41  ;;  %v4274_v20 = vmul.f32 %v4273_v47, %v8731_v45  ;;  %v8919_v44 = vadd.f32 %v451_v33, %v316_v32 }
 0x440   : > { %v452_v5 = vsel %vm354_vm2, %v7054_v59, %v7052_v58  ;;  %v4276_v39 = vmul.f32 %v4273_v47, %v8743_v10  ;;  %v476_v42 = vsel %vm354_vm2, %v7068_v23, %v7023_v35  ;;  %v731_v15 = vrot.slane %v724_v34, 1 }
 0x441   : > { %v732_v41 = vrot.slane %v725_v36, 1  ;;  %v734_v31 = vrot.slane %v726_v57, 1  ;;  %v8929_v12 = vadd.f32 %v428_v40, %v311_v30  ;;  %v475_v32 = vsel %vm354_vm2, %v7011_v28, %v7070_v24 }
 0x442   : > { %4262 = vrot.lane.b32.xlu1 %v4252_v14, %s6745_s9  ;;  %4260 = vrot.lane.b32.xlu0 %v4251_v17, %s6745_s9  ;;  %v329_v14 = vadd.f32 %v327_v6, %v276_v51  ;;  %v4275_v17 = vmul.f32 %v4273_v47, %v8733_v54  ;;  %v499_v58 = vsel %vm354_vm2, %v7086_v49, %v7084_v48  ;;  %v758_v23 = vstv %s8885_s14  ;;  %s9216_s14 = sld [smem:[#allocation3 + $0x93]] }
 0x443   : > { %4264 = vrot.lane.b32.xlu2 %v4253_v21, %s6745_s9  ;;  %v741_v21 = vstv %s8865_s13  ;;  %v335_v59 = vadd.f32 %v333_v13, %v278_v60  ;;  %v8937_v37 = vadd.f32 %v452_v5, %v317_v7  ;;  %v8944_v30 = vadd.f32 %v476_v42, %v323_v55  ;;  %s9192_s13 = sld [smem:[#allocation3 + $0x40]] }
 0x444   : > { %v8903_v63 = vpop.permute.xlu1 %3862  ;;  %v8905_v38 = vpop.permute.xlu0 %3830  ;;  %v743_v29 = vmul.f32 %v741_v21, %v6867_v3  ;;  %v742_v35 = vmul.f32 %v741_v21, %v6869_v4  ;;  %v744_v28 = vmul.f32 %v741_v21, %v7049_v56  ;;  %v4297_v24 = vstv %s8894_s15  ;;  %s9263_s15 = sld [smem:[#allocation3 + $0x94]] }
 0x445   : > { %12277 = vst [vmem:[#allocation337_spill] sm:$0xff] %v8903_v63  ;;  %v8912_v22 = vpop.permute.xlu2 %3942  ;;  %v8949_v48 = vadd.f32 %v475_v32, %v322_v27  ;;  %v8951_v49 = vadd.f32 %v499_v58, %v328_v46  ;;  %v733_v7 = vsel %vm730_vm0, %v731_v15, %v732_v41  ;;  %v735_v51 = vsel %vm730_vm0, %v732_v41, %v734_v31  ;;  %v12284_v15 = vld [vmem:[#allocation19_spill] sm:$0xff]  ;;  %v12285_v41 = vld [vmem:[#allocation13_spill] sm:$0xff] }
 0x446   : > { %12278 = vst [vmem:[#allocation338_spill] sm:$0xff] %v8905_v38  ;;  %v759_v6 = vmul.f32 %v758_v23, %v6869_v4  ;;  %v760_v33 = vmul.f32 %v758_v23, %v6867_v3  ;;  %v775_v34 = vstv %s8910_s16  ;;  %v761_v27 = vmul.f32 %v758_v23, %v7049_v56  ;;  %s9300_s16 = sld [smem:[#allocation3 + $0x41]]  ;;  %v12551_v38 = vld [vmem:[#allocation229_spill] sm:$0xff] }
 0x447   : > { %12279 = vst [vmem:[#allocation339_spill] sm:$0xff] %v8912_v22  ;;  %v749_v57 = vrot.slane %v743_v29, 1  ;;  %v748_v46 = vrot.slane %v742_v35, 1  ;;  %v4298_v13 = vmul.f32 %v4297_v24, %v8731_v45  ;;  %v4277_v40 = vmul.f32 %v4273_v47, %v8758_v9  ;;  %v12286_v29 = vld [vmem:[#allocation15_spill] sm:$0xff]  ;;  %v12287_v35 = vld [vmem:[#allocation16_spill] sm:$0xff] }
 0x448   : > { %v751_v5 = vrot.slane %v744_v28, 1  ;;  %v4299_v21 = vmul.f32 %v4297_v24, %v8733_v54  ;;  %v548_v47 = vsel %vm547_vm3, %v12285_v41, %v12284_v15  ;;  %v776_v31 = vmul.f32 %v775_v34, %v6869_v4 }
 0x449   : > { %v777_v32 = vmul.f32 %v775_v34, %v6867_v3  ;;  %v768_v58 = vrot.slane %v761_v27, 1  ;;  %v750_v23 = vsel %vm730_vm0, %v748_v46, %v749_v57  ;;  %v12289_v27 = vld [vmem:[#allocation22_spill] sm:$0xff]  ;;  %v4300_v15 = vmul.f32 %v4297_v24, %v8743_v10 }
 0x44a   : > { %4284 = vrot.lane.b32.xlu1 %v4275_v17, %s6745_s9  ;;  %4282 = vrot.lane.b32.xlu0 %v4274_v20, %s6745_s9  ;;  %v523_v17 = vsel %vm354_vm2, %v7101_v18, %v7056_v62  ;;  %v500_v20 = vsel %vm354_vm2, %v7035_v43, %v7103_v19  ;;  %v765_v62 = vrot.slane %v759_v6, 1  ;;  %v766_v18 = vrot.slane %v760_v33, 1 }
 0x44b   : > { %4286 = vrot.lane.b32.xlu2 %v4276_v39, %s6745_s9  ;;  %v12283_v39 = vld [vmem:[#allocation18_spill] sm:$0xff]  ;;  %v778_v43 = vmul.f32 %v775_v34, %v7049_v56  ;;  %v8989_v19 = vadd.f32 %v523_v17, %v334_v0  ;;  %v8997_v28 = vadd.f32 %v500_v20, %v329_v14  ;;  %v552_v33 = vadd.f32 %v548_v47, %v8862_v1  ;;  %v12288_v34 = vld [vmem:[#allocation21_spill] sm:$0xff] }
 0x44c   : > { %v8957_v60 = vpop.permute.xlu1 %3868  ;;  %v8959_v55 = vpop.permute.xlu0 %3866  ;;  %v549_v42 = vsel %vm547_vm3, %v12283_v39, %v7088_v53  ;;  %v524_v53 = vsel %vm354_vm2, %v12287_v35, %v12286_v29  ;;  %v9002_v0 = vsel %vm730_vm0, %v749_v57, %v751_v5  ;;  %v572_v46 = vsel %vm547_vm3, %v12289_v27, %v12288_v34  ;;  %v12293_v29 = vld [vmem:[#allocation17_spill] sm:$0xff] }
 0x44d   : > { %12280 = vst [vmem:[#allocation340_spill] sm:$0xff] %v8957_v60  ;;  %v8967_v36 = vpop.permute.xlu2 %3978  ;;  %v553_v6 = vadd.f32 %v549_v42, %v8860_v25  ;;  %v783_v14 = vrot.slane %v777_v32, 1  ;;  %v9015_v1 = vadd.f32 %v524_v53, %v335_v59  ;;  %v767_v57 = vsel %vm730_vm0, %v765_v62, %v766_v18  ;;  %v12296_v53 = vld [vmem:[#allocation14_spill] sm:$0xff] }
 0x44e   : > { %12281 = vst [vmem:[#allocation341_spill] sm:$0xff] %v8959_v55  ;;  %v769_v20 = vsel %vm730_vm0, %v766_v18, %v768_v58  ;;  %v785_v5 = vrot.slane %v778_v43, 1  ;;  %v809_v39 = vstv %s8965_s19  ;;  %v4301_v42 = vmul.f32 %v4297_v24, %v8758_v9  ;;  %v12294_v24 = vld [vmem:[#allocation24_spill] sm:$0xff]  ;;  %s9327_s19 = sld [smem:[#allocation3 + $0x96]] }
 0x44f   : > { %12282 = vst [vmem:[#allocation342_spill] sm:$0xff] %v8967_v36  ;;  %v4321_v41 = vstv %s8971_s24  ;;  %v576_v47 = vadd.f32 %v572_v46, %v8833_v52  ;;  %v9031_v62 = vadd.f32 %v733_v7, %v552_v33  ;;  %v9033_v18 = vadd.f32 %v735_v51, %v553_v6  ;;  %v12295_v52 = vld [vmem:[#allocation25_spill] sm:$0xff]  ;;  %v12297_v33 = vld [vmem:[#allocation27_spill] sm:$0xff]  ;;  %v12298_v46 = vld [vmem:[#allocation28_spill] sm:$0xff]  ;;  %s9360_s24 = sld [smem:[#allocation3 + $0x42]] }
 0x450   : > { %v4322_v32 = vmul.f32 %v4321_v41, %v8731_v45  ;;  %v596_v35 = vsel %vm547_vm3, %v12294_v24, %v12293_v29  ;;  %v573_v34 = vsel %vm547_vm3, %v12296_v53, %v12295_v52  ;;  %v810_v27 = vmul.f32 %v809_v39, %v6869_v4 }
 0x451   : > { %v811_v7 = vmul.f32 %v809_v39, %v6867_v3  ;;  %v597_v51 = vsel %vm547_vm3, %v12298_v46, %v12297_v33  ;;  %v9049_v6 = vsel %vm730_vm0, %v783_v14, %v785_v5  ;;  %v826_v52 = vstv %s9004_s26  ;;  %v12299_v5 = vld [vmem:[#allocation31_spill] sm:$0xff]  ;;  %s9367_s26 = sld [smem:[#allocation3 + $0x97]] }
 0x452   : > { %4306 = vrot.lane.b32.xlu1 %v4298_v13, %s6745_s9  ;;  %4288 = vrot.lane.b32.xlu0 %v4277_v40, %s6745_s9  ;;  %v782_v13 = vrot.slane %v776_v31, 1  ;;  %v792_v40 = vstv %s8955_s17  ;;  %v600_v53 = vadd.f32 %v596_v35, %v8891_v26  ;;  %v843_v46 = vstv %s9019_s27  ;;  %s9311_s17 = sld [smem:[#allocation3 + $0x95]] }
 0x453   : > { %4308 = vrot.lane.b32.xlu2 %v4299_v21, %s6745_s9  ;;  %v794_v59 = vmul.f32 %v792_v40, %v6867_v3  ;;  %v793_v31 = vmul.f32 %v792_v40, %v6869_v4  ;;  %v795_v43 = vmul.f32 %v792_v40, %v7049_v56  ;;  %v9054_v40 = vadd.f32 %v750_v23, %v576_v47  ;;  %s9431_s27 = sld [smem:[#allocation3 + $0x43]] }
 0x454   : > { %v9011_v17 = vpop.permute.xlu1 %3904  ;;  %v9013_v25 = vpop.permute.xlu0 %3902  ;;  %v784_v58 = vsel %vm730_vm0, %v782_v13, %v783_v14  ;;  %v812_v13 = vmul.f32 %v809_v39, %v7049_v56  ;;  %v577_v14 = vadd.f32 %v573_v34, %v8868_v8  ;;  %v12300_v39 = vld [vmem:[#allocation20_spill] sm:$0xff]  ;;  %v601_v47 = vadd.f32 %v597_v51, %v8889_v61  ;;  %v12304_v34 = vld [vmem:[#allocation23_spill] sm:$0xff] }
 0x455   : > { %12290 = vst [vmem:[#allocation18_spill] sm:$0xff] %v9011_v17  ;;  %v9021_v21 = vpop.permute.xlu2 %4014  ;;  %v800_v29 = vrot.slane %v794_v59, 1  ;;  %v799_v24 = vrot.slane %v793_v31, 1  ;;  %v802_v33 = vrot.slane %v795_v43, 1  ;;  %v816_v59 = vrot.slane %v810_v27, 1  ;;  %v12305_v43 = vld [vmem:[#allocation30_spill] sm:$0xff] }
 0x456   : > { %12291 = vst [vmem:[#allocation19_spill] sm:$0xff] %v9013_v25  ;;  %v817_v31 = vrot.slane %v811_v7, 1  ;;  %v827_v26 = vmul.f32 %v826_v52, %v6869_v4  ;;  %v4324_v8 = vmul.f32 %v4321_v41, %v8743_v10  ;;  %v4323_v35 = vmul.f32 %v4321_v41, %v8733_v54  ;;  %v12532_v25 = vld [vmem:[#allocation217_spill] sm:$0xff] }
 0x457   : > { %12292 = vst [vmem:[#allocation13_spill] sm:$0xff] %v9021_v21  ;;  %v828_v61 = vmul.f32 %v826_v52, %v6867_v3  ;;  %v4325_v27 = vmul.f32 %v4321_v41, %v8758_v9  ;;  %v801_v7 = vsel %vm730_vm0, %v799_v24, %v800_v29  ;;  %v829_v51 = vmul.f32 %v826_v52, %v7049_v56 }
 0x458   : > { %v844_v21 = vmul.f32 %v843_v46, %v6869_v4  ;;  %v833_v24 = vrot.slane %v827_v26, 1  ;;  %v12311_v26 = vld [vmem:[#allocation36_spill] sm:$0xff] }
 0x45a   : > { %4312 = vrot.lane.b32.xlu1 %v4301_v42, %s6745_s9  ;;  %4310 = vrot.lane.b32.xlu0 %v4300_v15, %s6745_s9  ;;  %v620_v42 = vsel %vm547_vm3, %v12300_v39, %v12299_v5  ;;  %v621_v5 = vsel %vm547_vm3, %v12305_v43, %v12304_v34  ;;  %v9094_v34 = vadd.f32 %v769_v20, %v601_v47  ;;  %v12307_v20 = vld [vmem:[#allocation34_spill] sm:$0xff]  ;;  %v850_v47 = vrot.slane %v844_v21, 1 }
 0x45b   : > { %4330 = vrot.lane.b32.xlu2 %v4322_v32, %s6745_s9  ;;  %v819_v32 = vrot.slane %v812_v13, 1  ;;  %v624_v39 = vadd.f32 %v620_v42, %v8907_v50  ;;  %v845_v13 = vmul.f32 %v843_v46, %v6867_v3  ;;  %v803_v50 = vsel %vm730_vm0, %v800_v29, %v802_v33 }
 0x45c   : > { %v9065_v15 = vpop.permute.xlu1 %3940  ;;  %v9067_v23 = vpop.permute.xlu0 %3938  ;;  %v818_v42 = vsel %vm730_vm0, %v816_v59, %v817_v31  ;;  %v625_v41 = vadd.f32 %v621_v5, %v8929_v12  ;;  %v12306_v12 = vld [vmem:[#allocation33_spill] sm:$0xff]  ;;  %v12314_v5 = vld [vmem:[#allocation39_spill] sm:$0xff] }
 0x45d   : > { %12301 = vst [vmem:[#allocation15_spill] sm:$0xff] %v9065_v15  ;;  %v9071_v22 = vpop.permute.xlu2 %4020  ;;  %v820_v52 = vsel %vm730_vm0, %v817_v31, %v819_v32  ;;  %v9099_v43 = vadd.f32 %v784_v58, %v624_v39  ;;  %v644_v29 = vsel %vm547_vm3, %v12307_v20, %v12306_v12  ;;  %v851_v33 = vrot.slane %v845_v13, 1  ;;  %v12310_v58 = vld [vmem:[#allocation29_spill] sm:$0xff]  ;;  %v12315_v39 = vld [vmem:[#allocation40_spill] sm:$0xff]  ;;  %v12319_v12 = vld [vmem:[#allocation35_spill] sm:$0xff] }
 0x45e   : > { %12302 = vst [vmem:[#allocation16_spill] sm:$0xff] %v9067_v23  ;;  %v9089_v23 = vadd.f32 %v767_v57, %v600_v53  ;;  %v846_v57 = vmul.f32 %v843_v46, %v7049_v56  ;;  %v4345_v53 = vstv %s9057_s6  ;;  %v668_v46 = vsel %vm547_vm3, %v12311_v26, %v12310_v58  ;;  %v12312_v32 = vld [vmem:[#allocation37_spill] sm:$0xff]  ;;  %v12320_v20 = vld [vmem:[#allocation42_spill] sm:$0xff]  ;;  %s9488_s6 = sld [smem:[#allocation3 + $0x8]] }
 0x45f   : > { %12303 = vst [vmem:[#allocation21_spill] sm:$0xff] %v9071_v22  ;;  %v9087_v22 = vadd.f32 %v9002_v0, %v577_v14  ;;  %v834_v0 = vrot.slane %v828_v61, 1  ;;  %v836_v14 = vrot.slane %v829_v51, 1  ;;  %v669_v61 = vsel %vm547_vm3, %v12315_v39, %v12314_v5  ;;  %v12317_v51 = vld [vmem:[#allocation32_spill] sm:$0xff]  ;;  %v12321_v15 = vld [vmem:[#allocation45_spill] sm:$0xff]  ;;  %v12322_v58 = vld [vmem:[#allocation46_spill] sm:$0xff] }
 0x460   : > { %v716_v26 = vsel %vm547_vm3, %v12322_v58, %v12321_v15  ;;  %v648_v5 = vadd.f32 %v644_v29, %v8919_v44  ;;  %v12323_v39 = vld [vmem:[#allocation49_spill] sm:$0xff]  ;;  %v673_v15 = vadd.f32 %v669_v61, %v8944_v30  ;;  %v852_v30 = vsel %vm730_vm0, %v850_v47, %v851_v33 }
 0x461   : > { %v720_v44 = vadd.f32 %v716_v26, %v8989_v19  ;;  %v835_v29 = vsel %vm730_vm0, %v833_v24, %v834_v0  ;;  %v4369_v24 = vstv %s9103_s7  ;;  %v12334_v26 = vld [vmem:[#allocation55_spill] sm:$0xff]  ;;  %s9506_s7 = sld [smem:[#allocation3 + $0x9]] }
 0x462   : > { %4334 = vrot.lane.b32.xlu1 %v4324_v8, %s6745_s9  ;;  %4332 = vrot.lane.b32.xlu0 %v4323_v35, %s6745_s9  ;;  %v12313_v8 = vld [vmem:[#allocation26_spill] sm:$0xff]  ;;  %v806_v19 = vadd.f32 %v801_v7, %v648_v5  ;;  %v12329_v7 = vld [vmem:[#allocation51_spill] sm:$0xff]  ;;  %v4370_v61 = vmul.f32 %v4369_v24, %v8731_v45  ;;  %v12336_v5 = vld [vmem:[#allocation57_spill] sm:$0xff] }
 0x463   : > { %4336 = vrot.lane.b32.xlu2 %v4325_v27, %s6745_s9  ;;  %v645_v35 = vsel %vm547_vm3, %v12313_v8, %v12312_v32  ;;  %v12316_v27 = vld [vmem:[#allocation43_spill] sm:$0xff]  ;;  %v4347_v32 = vmul.f32 %v4345_v53, %v8733_v54  ;;  %v4346_v8 = vmul.f32 %v4345_v53, %v8731_v45 }
 0x464   : > { %v9109_v59 = vpop.permute.xlu1 %3976  ;;  %v9111_v31 = vpop.permute.xlu0 %3944  ;;  %v692_v21 = vsel %vm547_vm3, %v12317_v51, %v12316_v27  ;;  %v12324_v27 = vld [vmem:[#allocation38_spill] sm:$0xff] }
 0x465   : > { %12308 = vst [vmem:[#allocation22_spill] sm:$0xff] %v9109_v59  ;;  %v9125_v13 = vpop.permute.xlu2 %4056  ;;  %v717_v51 = vsel %vm547_vm3, %v12324_v27, %v12323_v39  ;;  %v4348_v59 = vmul.f32 %v4345_v53, %v8743_v10  ;;  %v696_v58 = vadd.f32 %v692_v21, %v8951_v49  ;;  %v837_v39 = vsel %vm730_vm0, %v834_v0, %v836_v14  ;;  %v12326_v27 = vld [vmem:[#allocation48_spill] sm:$0xff]  ;;  %v12332_v21 = vld [vmem:[#allocation47_spill] sm:$0xff] }
 0x466   : > { %12309 = vst [vmem:[#allocation17_spill] sm:$0xff] %v9111_v31  ;;  %v693_v31 = vsel %vm547_vm3, %v12320_v20, %v12319_v12  ;;  %v672_v12 = vadd.f32 %v668_v46, %v8949_v48  ;;  %v649_v20 = vadd.f32 %v645_v35, %v8937_v37  ;;  %v721_v37 = vadd.f32 %v717_v51, %v9015_v1  ;;  %v12337_v51 = vld [vmem:[#allocation58_spill] sm:$0xff] }
 0x467   : > { %12318 = vst [vmem:[#allocation24_spill] sm:$0xff] %v9125_v13  ;;  %v853_v13 = vrot.slane %v846_v57, 1  ;;  %v697_v36 = vadd.f32 %v693_v31, %v8997_v28  ;;  %v12325_v57 = vld [vmem:[#allocation41_spill] sm:$0xff]  ;;  %v790_v49 = vadd.f32 %v9049_v6, %v625_v41  ;;  %v9165_v31 = vadd.f32 %v835_v29, %v696_v58  ;;  %v12330_v41 = vld [vmem:[#allocation52_spill] sm:$0xff] }
 0x468   : > { %v891_v48 = vsel %vm354_vm2, %v12326_v27, %v12325_v57  ;;  %v807_v0 = vadd.f32 %v803_v50, %v649_v20  ;;  %v9163_v14 = vadd.f32 %v818_v42, %v672_v12  ;;  %v9167_v1 = vadd.f32 %v820_v52, %v673_v15  ;;  %v12339_v58 = vld [vmem:[#allocation60_spill] sm:$0xff]  ;;  %v12340_v29 = vld [vmem:[#allocation61_spill] sm:$0xff]  ;;  %v12342_v27 = vld [vmem:[#allocation63_spill] sm:$0xff] }
 0x469   : > { %v854_v28 = vsel %vm730_vm0, %v851_v33, %v853_v13  ;;  %v9174_v6 = vadd.f32 %v891_v48, %v9031_v62  ;;  %v892_v33 = vsel %vm354_vm2, %v12330_v41, %v12329_v7  ;;  %v9179_v35 = vadd.f32 %v837_v39, %v697_v36  ;;  %v12333_v13 = vld [vmem:[#allocation54_spill] sm:$0xff]  ;;  %v12343_v48 = vld [vmem:[#allocation64_spill] sm:$0xff] }
 0x46a   : > { %4356 = vrot.lane.b32.xlu1 %v4347_v32, %s6745_s9  ;;  %4354 = vrot.lane.b32.xlu0 %v4346_v8, %s6745_s9  ;;  %v9181_v50 = vadd.f32 %v852_v30, %v720_v44  ;;  %v9187_v52 = vadd.f32 %v854_v28, %v721_v37  ;;  %v4349_v62 = vmul.f32 %v4345_v53, %v8758_v9  ;;  %v12335_v32 = vld [vmem:[#allocation44_spill] sm:$0xff]  ;;  %v12338_v53 = vld [vmem:[#allocation53_spill] sm:$0xff]  ;;  %v12341_v39 = vld [vmem:[#allocation50_spill] sm:$0xff] }
 0x46b   : > { %4358 = vrot.lane.b32.xlu2 %v4348_v59, %s6745_s9  ;;  %v1468_v59 = vstv %s9133_s10  ;;  %v930_v36 = vsel %vm354_vm2, %v12333_v13, %v12332_v21  ;;  %v929_v8 = vsel %vm354_vm2, %v12335_v32, %v12334_v26  ;;  %v967_v12 = vsel %vm354_vm2, %v12337_v51, %v12336_v5  ;;  %v12344_v30 = vld [vmem:[#allocation59_spill] sm:$0xff]  ;;  %v12345_v28 = vld [vmem:[#allocation66_spill] sm:$0xff]  ;;  %s9518_s10 = sld [smem:[#allocation3 + $0x44]] }
 0x46c   : > { %v9169_v47 = vpop.permute.xlu1 %3982  ;;  %v9171_v46 = vpop.permute.xlu0 %3980  ;;  %v4371_v20 = vmul.f32 %v4369_v24, %v8733_v54  ;;  %v9205_v15 = vadd.f32 %v892_v33, %v9033_v18  ;;  %v1005_v44 = vsel %vm354_vm2, %v12339_v58, %v12338_v53  ;;  %v968_v57 = vsel %vm354_vm2, %v12341_v39, %v12340_v29 }
 0x46d   : > { %12327 = vst [vmem:[#allocation25_spill] sm:$0xff] %v9169_v47  ;;  %v9185_v42 = vpop.permute.xlu2 %4092  ;;  %v1006_v37 = vsel %vm354_vm2, %v12343_v48, %v12342_v27  ;;  %v1044_v7 = vsel %vm354_vm2, %v12345_v28, %v12344_v30  ;;  %v1470_v18 = vmul.f32 %v1468_v59, %v6867_v3  ;;  %v1469_v41 = vmul.f32 %v1468_v59, %v6869_v4  ;;  %v12353_v48 = vld [vmem:[#allocation65_spill] sm:$0xff] }
 0x46e   : > { %12328 = vst [vmem:[#allocation14_spill] sm:$0xff] %v9171_v46  ;;  %v1486_v33 = vstv %s9150_s11  ;;  %v9225_v21 = vadd.f32 %v930_v36, %v9087_v22  ;;  %v9228_v13 = vadd.f32 %v929_v8, %v9054_v40  ;;  %v9231_v26 = vadd.f32 %v967_v12, %v9089_v23  ;;  %v12346_v23 = vld [vmem:[#allocation67_spill] sm:$0xff]  ;;  %v12351_v12 = vld [vmem:[#allocation70_spill] sm:$0xff]  ;;  %v12395_v46 = vld [vmem:[#allocation92_spill] sm:$0xff]  ;;  %s9529_s11 = sld [smem:[#allocation3 + $0xa]] }
 0x46f   : > { %12331 = vst [vmem:[#allocation27_spill] sm:$0xff] %v9185_v42  ;;  %v9236_v32 = vadd.f32 %v1005_v44, %v9099_v43  ;;  %v9239_v5 = vadd.f32 %v968_v57, %v9094_v34  ;;  %v9241_v51 = vadd.f32 %v1006_v37, %v790_v49  ;;  %v1471_v22 = vmul.f32 %v1468_v59, %v7049_v56  ;;  %v12350_v49 = vld [vmem:[#allocation69_spill] sm:$0xff]  ;;  %v12354_v37 = vld [vmem:[#allocation72_spill] sm:$0xff] }
 0x470   : > { %v9245_v40 = vadd.f32 %v1044_v7, %v807_v0  ;;  %v1487_v43 = vmul.f32 %v1486_v33, %v6869_v4  ;;  %v1488_v36 = vmul.f32 %v1486_v33, %v6867_v3  ;;  %v1081_v59 = vsel %vm354_vm2, %v12351_v12, %v12350_v49 }
 0x471   : > { %v1476_v0 = vrot.slane %v1469_v41, 2  ;;  %v1489_v53 = vmul.f32 %v1486_v33, %v7049_v56  ;;  %v1503_v44 = vstv %s9183_s12  ;;  %v4373_v29 = vmul.f32 %v4369_v24, %v8758_v9  ;;  %v12356_v41 = vld [vmem:[#allocation62_spill] sm:$0xff]  ;;  %s9553_s12 = sld [smem:[#allocation3 + $0xb]] }
 0x472   : > { %4378 = vrot.lane.b32.xlu1 %v4370_v61, %s6745_s9  ;;  %4360 = vrot.lane.b32.xlu0 %v4349_v62, %s6745_s9  ;;  %v12347_v61 = vld [vmem:[#allocation56_spill] sm:$0xff]  ;;  %v4372_v39 = vmul.f32 %v4369_v24, %v8743_v10  ;;  %v4393_v57 = vstv %s9192_s13  ;;  %v1119_v30 = vsel %vm354_vm2, %v12354_v37, %v12353_v48  ;;  %v1479_v28 = vrot.slane %v1471_v22, 2  ;;  %v12357_v24 = vld [vmem:[#allocation75_spill] sm:$0xff]  ;;  %s9584_s13 = sld [smem:[#allocation3 + $0xc]] }
 0x473   : > { %4380 = vrot.lane.b32.xlu2 %v4371_v20, %s6745_s9  ;;  %v1043_v62 = vsel %vm354_vm2, %v12347_v61, %v12346_v23  ;;  %v1477_v20 = vrot.slane %v1470_v18, 2  ;;  %v4394_v7 = vmul.f32 %v4393_v57, %v8731_v45  ;;  %v12355_v18 = vld [vmem:[#allocation73_spill] sm:$0xff]  ;;  %v1493_v23 = vrot.slane %v1487_v43, 2 }
 0x474   : > { %v9252_v8 = vpop.permute.xlu1 %4018  ;;  %v9254_v34 = vpop.permute.xlu0 %4016  ;;  %v9268_v27 = vadd.f32 %v1043_v62, %v806_v19  ;;  %v1082_v33 = vsel %vm354_vm2, %v12356_v41, %v12355_v18  ;;  %v1494_v61 = vrot.slane %v1488_v36, 2  ;;  %v1520_v49 = vstv %s9216_s14  ;;  %v12358_v19 = vld [vmem:[#allocation76_spill] sm:$0xff]  ;;  %s9592_s14 = sld [smem:[#allocation3 + $0xd]] }
 0x475   : > { %12348 = vst [vmem:[#allocation28_spill] sm:$0xff] %v9252_v8  ;;  %v9260_v58 = vpop.permute.xlu2 %4128  ;;  %v9279_v12 = vadd.f32 %v1081_v59, %v9163_v14  ;;  %v1120_v62 = vsel %vm354_vm2, %v12358_v19, %v12357_v24  ;;  %v1496_v48 = vrot.slane %v1489_v53, 2  ;;  %v9286_v22 = vadd.f32 %v1119_v30, %v9165_v31  ;;  %v12360_v53 = vld [vmem:[#allocation82_spill] sm:$0xff]  ;;  %v12363_v30 = vld [vmem:[#allocation71_spill] sm:$0xff]  ;;  %v12366_v41 = vld [vmem:[#allocation68_spill] sm:$0xff] }
 0x476   : > { %12349 = vst [vmem:[#allocation31_spill] sm:$0xff] %v9254_v34  ;;  %v1478_v37 = vsel %vm1475_vm1, %v1476_v0, %v1477_v20  ;;  %v1505_v18 = vmul.f32 %v1503_v44, %v6867_v3  ;;  %v9293_v14 = vadd.f32 %v1082_v33, %v9167_v1  ;;  %v1480_v43 = vsel %vm1475_vm1, %v1477_v20, %v1479_v28  ;;  %v12359_v0 = vld [vmem:[#allocation81_spill] sm:$0xff]  ;;  %v12364_v28 = vld [vmem:[#allocation78_spill] sm:$0xff] }
 0x477   : > { %12352 = vst [vmem:[#allocation20_spill] sm:$0xff] %v9260_v58  ;;  %v1504_v58 = vmul.f32 %v1503_v44, %v6869_v4  ;;  %v1506_v36 = vmul.f32 %v1503_v44, %v7049_v56  ;;  %v9298_v59 = vmul.f32 %v1520_v49, %v6867_v3  ;;  %v9304_v31 = vadd.f32 %v1120_v62, %v9179_v35  ;;  %v12365_v35 = vld [vmem:[#allocation79_spill] sm:$0xff] }
 0x478   : > { %v1195_v1 = vsel %vm547_vm3, %v12360_v53, %v12359_v0  ;;  %v1521_v20 = vmul.f32 %v1520_v49, %v6869_v4  ;;  %v1157_v33 = vsel %vm354_vm2, %v12366_v41, %v12365_v35  ;;  %v1497_v19 = vsel %vm1475_vm1, %v1494_v61, %v1496_v48  ;;  %v12369_v41 = vld [vmem:[#allocation84_spill] sm:$0xff]  ;;  %v12370_v48 = vld [vmem:[#allocation85_spill] sm:$0xff] }
 0x479   : > { %v1510_v24 = vrot.slane %v1504_v58, 2  ;;  %v1511_v62 = vrot.slane %v1505_v18, 2  ;;  %v1537_v0 = vstv %s9263_s15  ;;  %v4396_v53 = vmul.f32 %v4393_v57, %v8743_v10  ;;  %v12368_v58 = vld [vmem:[#allocation77_spill] sm:$0xff]  ;;  %v12371_v18 = vld [vmem:[#allocation74_spill] sm:$0xff]  ;;  %s9602_s15 = sld [smem:[#allocation3 + $0x45]] }
 0x47a   : > { %4384 = vrot.lane.b32.xlu1 %v4373_v29, %s6745_s9  ;;  %4382 = vrot.lane.b32.xlu0 %v4372_v39, %s6745_s9  ;;  %v1495_v29 = vsel %vm1475_vm1, %v1493_v23, %v1494_v61  ;;  %v4395_v42 = vmul.f32 %v4393_v57, %v8733_v54  ;;  %v4397_v35 = vmul.f32 %v4393_v57, %v8758_v9  ;;  %v1527_v34 = vrot.slane %v1521_v20, 2 }
 0x47b   : > { %4402 = vrot.lane.b32.xlu2 %v4394_v7, %s6746_s18  ;;  %v1158_v7 = vsel %vm354_vm2, %v12364_v28, %v12363_v30  ;;  %v1513_v30 = vrot.slane %v1506_v36, 2  ;;  %v1528_v28 = vrot.slane %v9298_v59, 2  ;;  %v1233_v61 = vsel %vm547_vm3, %v12369_v41, %v12368_v58  ;;  %v12372_v59 = vld [vmem:[#allocation87_spill] sm:$0xff] }
 0x47c   : > { %v9313_v44 = vpop.permute.xlu1 %4054  ;;  %v9315_v39 = vpop.permute.xlu0 %4052  ;;  %v9342_v8 = vadd.f32 %v1158_v7, %v9187_v52  ;;  %v1538_v57 = vmul.f32 %v1537_v0, %v6869_v4  ;;  %v1539_v36 = vmul.f32 %v1537_v0, %v6867_v3  ;;  %v1512_v41 = vsel %vm1475_vm1, %v1510_v24, %v1511_v62 }
 0x47d   : > { %12361 = vst [vmem:[#allocation23_spill] sm:$0xff] %v9313_v44  ;;  %v9324_v23 = vpop.permute.xlu2 %4134  ;;  %v1523_v44 = vmul.f32 %v1520_v49, %v7049_v56  ;;  %v1540_v49 = vmul.f32 %v1537_v0, %v7049_v56  ;;  %v1514_v20 = vsel %vm1475_vm1, %v1511_v62, %v1513_v30  ;;  %v4417_v7 = vstv %s9300_s16  ;;  %v12377_v62 = vld [vmem:[#allocation80_spill] sm:$0xff]  ;;  %s9613_s16 = sld [smem:[#allocation3 + $0xe]] }
 0x47e   : > { %12362 = vst [vmem:[#allocation30_spill] sm:$0xff] %v9315_v39  ;;  %v1199_v39 = vadd.f32 %v1195_v1, %v9174_v6  ;;  %v9345_v6 = vadd.f32 %v1157_v33, %v9181_v50  ;;  %v12373_v1 = vld [vmem:[#allocation88_spill] sm:$0xff]  ;;  %v1237_v50 = vadd.f32 %v1233_v61, %v9228_v13  ;;  %v1529_v0 = vsel %vm1475_vm1, %v1527_v34, %v1528_v28 }
 0x47f   : > { %12367 = vst [vmem:[#allocation33_spill] sm:$0xff] %v9324_v23  ;;  %v1196_v23 = vsel %vm547_vm3, %v12371_v18, %v12370_v48  ;;  %v1234_v58 = vsel %vm547_vm3, %v12373_v1, %v12372_v59  ;;  %v1530_v24 = vrot.slane %v1523_v44, 2  ;;  %v1544_v61 = vrot.slane %v1538_v57, 2 }
 0x480   : > { %v1200_v52 = vadd.f32 %v1196_v23, %v9205_v15  ;;  %v9363_v33 = vadd.f32 %v1478_v37, %v1199_v39  ;;  %v1238_v15 = vadd.f32 %v1234_v58, %v9225_v21  ;;  %v12376_v23 = vld [vmem:[#allocation91_spill] sm:$0xff]  ;;  %v1547_v44 = vrot.slane %v1540_v49, 2 }
 0x481   : > { %v1271_v30 = vsel %vm547_vm3, %v12377_v62, %v12376_v23  ;;  %v1571_v39 = vstv %s9327_s19  ;;  %v4419_v34 = vmul.f32 %v4417_v7, %v8733_v54  ;;  %v4418_v48 = vmul.f32 %v4417_v7, %v8731_v45  ;;  %v12379_v58 = vld [vmem:[#allocation83_spill] sm:$0xff]  ;;  %v12380_v23 = vld [vmem:[#allocation90_spill] sm:$0xff]  ;;  %s9691_s19 = sld [smem:[#allocation3 + $0x46]] }
 0x482   : > { %4406 = vrot.lane.b32.xlu1 %v4396_v53, %s6746_s18  ;;  %4404 = vrot.lane.b32.xlu0 %v4395_v42, %s6746_s18  ;;  %v1554_v53 = vstv %s9311_s17  ;;  %v9382_v18 = vadd.f32 %v1480_v43, %v1200_v52  ;;  %v9384_v59 = vadd.f32 %v1495_v29, %v1237_v50  ;;  %v4420_v1 = vmul.f32 %v4417_v7, %v8743_v10  ;;  %s9650_s17 = sld [smem:[#allocation3 + $0xf]] }
 0x483   : > { %4408 = vrot.lane.b32.xlu2 %v4397_v35, %s6746_s18  ;;  %v1545_v35 = vrot.slane %v1539_v36, 2  ;;  %v1555_v21 = vmul.f32 %v1554_v53, %v6869_v4  ;;  %v1272_v57 = vsel %vm547_vm3, %v12380_v23, %v12379_v58  ;;  %v1275_v36 = vadd.f32 %v1271_v30, %v9231_v26 }
 0x484   : > { %v9369_v42 = vpop.permute.xlu1 %4090  ;;  %v9371_v13 = vpop.permute.xlu0 %4058  ;;  %v1556_v49 = vmul.f32 %v1554_v53, %v6867_v3  ;;  %v1557_v62 = vmul.f32 %v1554_v53, %v7049_v56  ;;  %v1531_v43 = vsel %vm1475_vm1, %v1528_v28, %v1530_v24  ;;  %v1573_v50 = vmul.f32 %v1571_v39, %v6867_v3  ;;  %v12383_v24 = vld [vmem:[#allocation97_spill] sm:$0xff]  ;;  %v12384_v53 = vld [vmem:[#allocation86_spill] sm:$0xff] }
 0x485   : > { %12374 = vst [vmem:[#allocation34_spill] sm:$0xff] %v9369_v42  ;;  %v9377_v37 = vpop.permute.xlu2 %4214  ;;  %v1546_v29 = vsel %vm1475_vm1, %v1544_v61, %v1545_v35  ;;  %v1572_v52 = vmul.f32 %v1571_v39, %v6869_v4  ;;  %v9401_v23 = vadd.f32 %v1497_v19, %v1238_v15  ;;  %v9404_v26 = vsel %vm1475_vm1, %v1545_v35, %v1547_v44 }
 0x486   : > { %12375 = vst [vmem:[#allocation29_spill] sm:$0xff] %v9371_v13  ;;  %v12382_v13 = vld [vmem:[#allocation94_spill] sm:$0xff]  ;;  %v1276_v28 = vadd.f32 %v1272_v57, %v9239_v5  ;;  %v1310_v30 = vsel %vm547_vm3, %v12384_v53, %v12383_v24  ;;  %v1561_v61 = vrot.slane %v1555_v21, 2  ;;  %v4441_v42 = vstv %s9360_s24  ;;  %v12388_v21 = vld [vmem:[#allocation89_spill] sm:$0xff]  ;;  %v12389_v53 = vld [vmem:[#allocation96_spill] sm:$0xff]  ;;  %s9712_s24 = sld [smem:[#allocation3 + $0x50]] }
 0x487   : > { %12378 = vst [vmem:[#allocation36_spill] sm:$0xff] %v9377_v37  ;;  %v12381_v37 = vld [vmem:[#allocation93_spill] sm:$0xff]  ;;  %v1562_v19 = vrot.slane %v1556_v49, 2  ;;  %v1564_v15 = vrot.slane %v1557_v62, 2  ;;  %v1588_v35 = vstv %s9367_s26  ;;  %v1574_v5 = vmul.f32 %v1571_v39, %v7049_v56  ;;  %s9744_s26 = sld [smem:[#allocation3 + $0x51]] }
 0x488   : > { %v1309_v58 = vsel %vm547_vm3, %v12382_v13, %v12381_v37  ;;  %v9414_v13 = vadd.f32 %v1512_v41, %v1275_v36  ;;  %v1578_v57 = vrot.slane %v1572_v52, 2  ;;  %v1347_v41 = vsel %vm547_vm3, %v12389_v53, %v12388_v21  ;;  %v12390_v52 = vld [vmem:[#allocation99_spill] sm:$0xff] }
 0x489   : > { %v4442_v36 = vmul.f32 %v4441_v42, %v8731_v45  ;;  %v4421_v49 = vmul.f32 %v4417_v7, %v8758_v9  ;;  %v9433_v62 = vadd.f32 %v1514_v20, %v1276_v28  ;;  %v1590_v39 = vmul.f32 %v1588_v35, %v6867_v3  ;;  %v12392_v3 = vld [vmem:[#allocation95_spill] sm:$0xff] }
 0x48a   : > { %4428 = vrot.lane.b32.xlu1 %v4419_v34, %s6746_s18  ;;  %4426 = vrot.lane.b32.xlu0 %v4418_v48, %s6746_s18  ;;  %v1313_v34 = vadd.f32 %v1309_v58, %v9236_v32  ;;  %v1579_v48 = vrot.slane %v1573_v50, 2  ;;  %v1589_v32 = vmul.f32 %v1588_v35, %v6869_v4  ;;  %v4443_v50 = vmul.f32 %v4441_v42, %v8733_v54  ;;  %v12391_v58 = vld [vmem:[#allocation100_spill] sm:$0xff] }
 0x48b   : > { %4430 = vrot.lane.b32.xlu2 %v4420_v1, %s6746_s18  ;;  %v1314_v1 = vadd.f32 %v1310_v30, %v9241_v51  ;;  %v1348_v21 = vsel %vm547_vm3, %v12391_v58, %v12390_v52  ;;  %v1563_v51 = vsel %vm1475_vm1, %v1561_v61, %v1562_v19  ;;  %v1565_v30 = vsel %vm1475_vm1, %v1562_v19, %v1564_v15 }
 0x48c   : > { %v9417_v37 = vpop.permute.xlu1 %4096  ;;  %v9419_v44 = vpop.permute.xlu0 %4094  ;;  %v1591_v7 = vmul.f32 %v1588_v35, %v7049_v56  ;;  %v1351_v53 = vadd.f32 %v1347_v41, %v9268_v27  ;;  %v9445_v20 = vadd.f32 %v1529_v0, %v1313_v34  ;;  %v1581_v28 = vrot.slane %v1574_v5, 2  ;;  %v12396_v27 = vld [vmem:[#allocation105_spill] sm:$0xff]  ;;  %v12397_v0 = vld [vmem:[#allocation106_spill] sm:$0xff]  ;;  %v12399_v5 = vld [vmem:[#allocation108_spill] sm:$0xff] }
 0x48d   : > { %12385 = vst [vmem:[#allocation37_spill] sm:$0xff] %v9417_v37  ;;  %v9423_v24 = vpop.permute.xlu2 %4236  ;;  %v1580_v4 = vsel %vm1475_vm1, %v1578_v57, %v1579_v48  ;;  %v12394_v37 = vld [vmem:[#allocation103_spill] sm:$0xff]  ;;  %v9454_v61 = vadd.f32 %v1531_v43, %v1314_v1  ;;  %v1352_v56 = vadd.f32 %v1348_v21, %v9245_v40  ;;  %v1423_v19 = vsel %vm547_vm3, %v12397_v0, %v12396_v27  ;;  %v12398_v34 = vld [vmem:[#allocation101_spill] sm:$0xff]  ;;  %v12403_v41 = vld [vmem:[#allocation112_spill] sm:$0xff] }
 0x48e   : > { %12386 = vst [vmem:[#allocation26_spill] sm:$0xff] %v9419_v44  ;;  %v1385_v52 = vsel %vm547_vm3, %v12395_v46, %v12394_v37  ;;  %v1595_v15 = vrot.slane %v1589_v32, 2  ;;  %v1596_v35 = vrot.slane %v1590_v39, 2  ;;  %v1461_v46 = vsel %vm547_vm3, %v12399_v5, %v12398_v34  ;;  %v12400_v43 = vld [vmem:[#allocation109_spill] sm:$0xff]  ;;  %v12401_v37 = vld [vmem:[#allocation98_spill] sm:$0xff] }
 0x48f   : > { %12387 = vst [vmem:[#allocation39_spill] sm:$0xff] %v9423_v24  ;;  %v12393_v24 = vld [vmem:[#allocation102_spill] sm:$0xff]  ;;  %v1424_v57 = vsel %vm547_vm3, %v12401_v37, %v12400_v43  ;;  %v1598_v1 = vrot.slane %v1591_v7, 2  ;;  %v1389_v39 = vadd.f32 %v1385_v52, %v9279_v12  ;;  %v1582_v58 = vsel %vm1475_vm1, %v1579_v48, %v1581_v28  ;;  %v12409_v28 = vld [vmem:[#allocation115_spill] sm:$0xff]  ;;  %v12411_v52 = vld [vmem:[#allocation117_spill] sm:$0xff] }
 0x490   : > { %v1386_v44 = vsel %vm547_vm3, %v12393_v24, %v12392_v3  ;;  %v12402_v24 = vld [vmem:[#allocation111_spill] sm:$0xff]  ;;  %v1427_v3 = vadd.f32 %v1423_v19, %v9286_v22  ;;  %v4445_v27 = vmul.f32 %v4441_v42, %v8758_v9  ;;  %v4444_v0 = vmul.f32 %v4441_v42, %v8743_v10  ;;  %v12414_v43 = vld [vmem:[#allocation120_spill] sm:$0xff] }
 0x491   : > { %v1462_v40 = vsel %vm547_vm3, %v12403_v41, %v12402_v24  ;;  %v1390_v32 = vadd.f32 %v1386_v44, %v9293_v14  ;;  %v4465_v7 = vstv %s9431_s27  ;;  %v1465_v34 = vadd.f32 %v1461_v46, %v9345_v6  ;;  %v12408_v44 = vld [vmem:[#allocation114_spill] sm:$0xff]  ;;  %v12410_v6 = vld [vmem:[#allocation104_spill] sm:$0xff]  ;;  %v12413_v46 = vld [vmem:[#allocation113_spill] sm:$0xff]  ;;  %s9752_s27 = sld [smem:[#allocation3 + $0x52]] }
 0x492   : > { %4450 = vrot.lane.b32.xlu1 %v4442_v36, %s6746_s18  ;;  %4432 = vrot.lane.b32.xlu0 %v4421_v49, %s6746_s18  ;;  %v1428_v5 = vadd.f32 %v1424_v57, %v9304_v31  ;;  %v1466_v14 = vadd.f32 %v1462_v40, %v9342_v8  ;;  %v4466_v12 = vmul.f32 %v4465_v7, %v8731_v45  ;;  %v12412_v8 = vld [vmem:[#allocation118_spill] sm:$0xff] }
 0x493   : > { %4452 = vrot.lane.b32.xlu2 %v4443_v50, %s6746_s18  ;;  %v1551_v50 = vadd.f32 %v1546_v29, %v1351_v53  ;;  %v12407_v29 = vld [vmem:[#allocation107_spill] sm:$0xff]  ;;  %v1552_v22 = vadd.f32 %v9404_v26, %v1352_v56  ;;  %v1597_v53 = vsel %vm1475_vm1, %v1595_v15, %v1596_v35  ;;  %v1599_v42 = vsel %vm1475_vm1, %v1596_v35, %v1598_v1  ;;  %v12415_v26 = vld [vmem:[#allocation121_spill] sm:$0xff]  ;;  %v12416_v56 = vld [vmem:[#allocation110_spill] sm:$0xff] }
 0x494   : > { %v9472_v36 = vpop.permute.xlu1 %4132  ;;  %v9474_v49 = vpop.permute.xlu0 %4130  ;;  %v1637_v48 = vsel %vm354_vm2, %v12408_v44, %v12407_v29  ;;  %v1636_v31 = vsel %vm354_vm2, %v12410_v6, %v12409_v28  ;;  %v1674_v19 = vsel %vm354_vm2, %v12412_v8, %v12411_v52  ;;  %v1712_v37 = vsel %vm354_vm2, %v12414_v43, %v12413_v46  ;;  %v12430_v6 = vld [vmem:[#allocation134_spill] sm:$0xff]  ;;  %v12432_v46 = vld [vmem:[#allocation137_spill] sm:$0xff] }
 0x495   : > { %12404 = vst [vmem:[#allocation40_spill] sm:$0xff] %v9472_v36  ;;  %v9479_v21 = vpop.permute.xlu2 %4258  ;;  %v1568_v57 = vadd.f32 %v1563_v51, %v1389_v39  ;;  %v1675_v15 = vsel %vm354_vm2, %v12416_v56, %v12415_v26  ;;  %v1569_v35 = vadd.f32 %v1565_v30, %v1390_v32  ;;  %v1585_v24 = vadd.f32 %v1580_v4, %v1427_v3  ;;  %v12417_v32 = vld [vmem:[#allocation123_spill] sm:$0xff]  ;;  %v12418_v39 = vld [vmem:[#allocation124_spill] sm:$0xff]  ;;  %v12433_v43 = vld [vmem:[#allocation138_spill] sm:$0xff] }
 0x496   : > { %12405 = vst [vmem:[#allocation43_spill] sm:$0xff] %v9474_v49  ;;  %v9514_v41 = vadd.f32 %v1637_v48, %v9382_v18  ;;  %v1586_v40 = vadd.f32 %v1582_v58, %v1428_v5  ;;  %v1602_v1 = vadd.f32 %v1597_v53, %v1465_v34  ;;  %v9516_v29 = vadd.f32 %v1599_v42, %v1466_v14  ;;  %v12423_v34 = vld [vmem:[#allocation127_spill] sm:$0xff]  ;;  %v12425_v14 = vld [vmem:[#allocation129_spill] sm:$0xff]  ;;  %v12477_v36 = vld [vmem:[#allocation174_spill] sm:$0xff] }
 0x497   : > { %12406 = vst [vmem:[#allocation32_spill] sm:$0xff] %v9479_v21  ;;  %v1640_v51 = vadd.f32 %v1636_v31, %v9363_v33  ;;  %v1678_v30 = vadd.f32 %v1674_v19, %v9384_v59  ;;  %v9524_v4 = vadd.f32 %v1712_v37, %v9414_v13  ;;  %v1713_v18 = vsel %vm354_vm2, %v12418_v39, %v12417_v32  ;;  %v12422_v33 = vld [vmem:[#allocation126_spill] sm:$0xff]  ;;  %v12424_v13 = vld [vmem:[#allocation116_spill] sm:$0xff]  ;;  %v12428_v53 = vld [vmem:[#allocation125_spill] sm:$0xff] }
 0x498   : > { %v1750_v5 = vsel %vm354_vm2, %v12424_v13, %v12423_v34  ;;  %v12429_v42 = vld [vmem:[#allocation133_spill] sm:$0xff]  ;;  %v4468_v52 = vmul.f32 %v4465_v7, %v8743_v10  ;;  %v4467_v8 = vmul.f32 %v4465_v7, %v8733_v54  ;;  %v9558_v19 = vadd.f32 %v1713_v18, %v9433_v62  ;;  %v12434_v39 = vld [vmem:[#allocation131_spill] sm:$0xff]  ;;  %v12437_v62 = vld [vmem:[#allocation128_spill] sm:$0xff] }
 0x499   : > { %v1826_v28 = vsel %vm354_vm2, %v12429_v42, %v12428_v53  ;;  %v1827_v37 = vsel %vm354_vm2, %v12433_v43, %v12432_v46  ;;  %v2223_v26 = vstv %s9488_s6  ;;  %v4469_v56 = vmul.f32 %v4465_v7, %v8758_v9  ;;  %v12436_v34 = vld [vmem:[#allocation141_spill] sm:$0xff]  ;;  %v12440_v53 = vld [vmem:[#allocation132_spill] sm:$0xff]  ;;  %s9796_s6 = sld [smem:[#allocation3 + $0x47]] }
 0x49a   : > { %4456 = vrot.lane.b32.xlu1 %v4445_v27, %s6746_s18  ;;  %4454 = vrot.lane.b32.xlu0 %v4444_v0, %s6746_s18  ;;  %v1679_v27 = vadd.f32 %v1675_v15, %v9401_v23  ;;  %v12421_v0 = vld [vmem:[#allocation119_spill] sm:$0xff]  ;;  %v12431_v23 = vld [vmem:[#allocation122_spill] sm:$0xff]  ;;  %v9569_v32 = vadd.f32 %v1750_v5, %v9445_v20  ;;  %v1864_v18 = vsel %vm354_vm2, %v12437_v62, %v12436_v34  ;;  %v12460_v21 = vld [vmem:[#allocation148_spill] sm:$0xff]  ;;  %v2265_v49 = vstv %s9650_s17  ;;  %s10135_s17 = sld [smem:[#allocation3 + $0x74]] }
 0x49b   : > { %4474 = vrot.lane.b32.xlu2 %v4466_v12, %s6746_s18  ;;  %v1751_v59 = vsel %vm354_vm2, %v12422_v33, %v12421_v0  ;;  %v12426_v12 = vld [vmem:[#allocation130_spill] sm:$0xff]  ;;  %v1789_v31 = vsel %vm354_vm2, %v12431_v23, %v12430_v6  ;;  %v12435_v0 = vld [vmem:[#allocation140_spill] sm:$0xff]  ;;  %v9586_v20 = vadd.f32 %v1827_v37, %v1569_v35  ;;  %v2224_v42 = vmul.f32 %v2223_v26, %v12440_v53 }
 0x49c   : > { %v9531_v58 = vpop.permute.xlu1 %4212  ;;  %v9533_v3 = vpop.permute.xlu0 %4210  ;;  %v1788_v44 = vsel %vm354_vm2, %v12426_v12, %v12425_v14  ;;  %v9566_v15 = vadd.f32 %v1751_v59, %v9454_v61  ;;  %v1865_v33 = vsel %vm354_vm2, %v12435_v0, %v12434_v39  ;;  %v9579_v14 = vadd.f32 %v1826_v28, %v1568_v57  ;;  %v12438_v59 = vld [vmem:[#allocation139_spill] sm:$0xff]  ;;  %v12439_v5 = vld [vmem:[#allocation146_spill] sm:$0xff]  ;;  %v12443_v6 = vld [vmem:[#allocation144_spill] sm:$0xff] }
 0x49d   : > { %12419 = vst [vmem:[#allocation35_spill] sm:$0xff] %v9531_v58  ;;  %v9545_v48 = vpop.permute.xlu2 %4264  ;;  %v9577_v13 = vadd.f32 %v1788_v44, %v1551_v50  ;;  %v9581_v7 = vadd.f32 %v1789_v31, %v1552_v22  ;;  %v2229_v61 = vstv %s9506_s7  ;;  %v1940_v12 = vsel %vm547_vm3, %v12439_v5, %v12438_v59  ;;  %v12441_v57 = vld [vmem:[#allocation135_spill] sm:$0xff]  ;;  %v12444_v31 = vld [vmem:[#allocation149_spill] sm:$0xff]  ;;  %v12454_v5 = vld [vmem:[#allocation152_spill] sm:$0xff]  ;;  %s9810_s7 = sld [smem:[#allocation3 + $0x70]] }
 0x49e   : > { %12420 = vst [vmem:[#allocation42_spill] sm:$0xff] %v9533_v3  ;;  %v9596_v50 = vadd.f32 %v1865_v33, %v1586_v40  ;;  %v9598_v22 = vadd.f32 %v1864_v18, %v1585_v24  ;;  %v2225_v44 = vmul.f32 %v2223_v26, %v12441_v57  ;;  %v4489_v35 = vstv %s9518_s10  ;;  %v12442_v28 = vld [vmem:[#allocation143_spill] sm:$0xff]  ;;  %v12450_v0 = vld [vmem:[#allocation153_spill] sm:$0xff]  ;;  %v12451_v33 = vld [vmem:[#allocation142_spill] sm:$0xff]  ;;  %s9846_s10 = sld [smem:[#allocation3 + $0x53]] }
 0x49f   : > { %12427 = vst [vmem:[#allocation45_spill] sm:$0xff] %v9545_v48  ;;  %v1902_v23 = vsel %vm354_vm2, %v12443_v6, %v12442_v28  ;;  %v2230_v40 = vmul.f32 %v2229_v61, %v12440_v53  ;;  %v2235_v24 = vstv %s9529_s11  ;;  %v1944_v37 = vadd.f32 %v1940_v12, %v1640_v51  ;;  %v12448_v26 = vld [vmem:[#allocation147_spill] sm:$0xff]  ;;  %v12453_v59 = vld [vmem:[#allocation145_spill] sm:$0xff]  ;;  %v12473_v3 = vld [vmem:[#allocation160_spill] sm:$0xff]  ;;  %s9887_s11 = sld [smem:[#allocation3 + $0x54]] }
 0x4a0   : > { %v1978_v34 = vsel %vm547_vm3, %v12451_v33, %v12450_v0  ;;  %v2231_v62 = vmul.f32 %v2229_v61, %v12441_v57  ;;  %v1979_v28 = vsel %vm547_vm3, %v12454_v5, %v12453_v59  ;;  %v2241_v6 = vstv %s9553_s12  ;;  %v12455_v33 = vld [vmem:[#allocation155_spill] sm:$0xff]  ;;  %v12456_v59 = vld [vmem:[#allocation156_spill] sm:$0xff]  ;;  %s9897_s12 = sld [smem:[#allocation3 + $0x71]] }
 0x4a1   : > { %v4491_v51 = vmul.f32 %v4489_v35, %v8733_v54  ;;  %v4490_v12 = vmul.f32 %v4489_v35, %v8731_v45  ;;  %v4492_v61 = vmul.f32 %v4489_v35, %v8743_v10  ;;  %v1982_v0 = vadd.f32 %v1978_v34, %v1678_v30  ;;  %v12459_v34 = vld [vmem:[#allocation159_spill] sm:$0xff] }
 0x4a2   : > { %4478 = vrot.lane.b32.xlu1 %v4468_v52, %s6746_s18  ;;  %4476 = vrot.lane.b32.xlu0 %v4467_v8, %s6746_s18  ;;  %v12445_v52 = vld [vmem:[#allocation150_spill] sm:$0xff]  ;;  %v2016_v5 = vsel %vm547_vm3, %v12456_v59, %v12455_v33  ;;  %v2237_v48 = vmul.f32 %v2235_v24, %v12441_v57  ;;  %v2243_v33 = vmul.f32 %v2241_v6, %v12441_v57 }
 0x4a3   : > { %4480 = vrot.lane.b32.xlu2 %v4469_v56, %s6746_s18  ;;  %v1941_v8 = vsel %vm547_vm3, %v12445_v52, %v12444_v31  ;;  %v12449_v56 = vld [vmem:[#allocation136_spill] sm:$0xff]  ;;  %v9634_v31 = vadd.f32 %v1902_v23, %v1602_v1  ;;  %v1983_v1 = vadd.f32 %v1979_v28, %v1679_v27  ;;  %v9646_v23 = vadd.f32 %v2224_v42, %v1944_v37 }
 0x4a4   : > { %v9615_v46 = vpop.permute.xlu1 %4234  ;;  %v9617_v43 = vpop.permute.xlu0 %4216  ;;  %v1903_v39 = vsel %vm354_vm2, %v12449_v56, %v12448_v26  ;;  %v1945_v52 = vadd.f32 %v1941_v8, %v9514_v41  ;;  %v2236_v26 = vmul.f32 %v2235_v24, %v12440_v53  ;;  %v2242_v41 = vmul.f32 %v2241_v6, %v12440_v53 }
 0x4a5   : > { %12446 = vst [vmem:[#allocation46_spill] sm:$0xff] %v9615_v46  ;;  %v9626_v18 = vpop.permute.xlu2 %4286  ;;  %v9640_v56 = vadd.f32 %v1903_v39, %v9516_v29  ;;  %v2247_v8 = vstv %s9584_s13  ;;  %v12457_v29 = vld [vmem:[#allocation151_spill] sm:$0xff]  ;;  %v12458_v39 = vld [vmem:[#allocation158_spill] sm:$0xff]  ;;  %v2020_v27 = vadd.f32 %v2016_v5, %v9524_v4  ;;  %v2253_v24 = vstv %s9592_s14  ;;  %s9977_s13 = sld [smem:[#allocation3 + $0x56]] }
 0x4a6   : > { %12447 = vst [vmem:[#allocation49_spill] sm:$0xff] %v9617_v43  ;;  %v2054_v30 = vsel %vm547_vm3, %v12458_v39, %v12457_v29  ;;  %v2017_v43 = vsel %vm547_vm3, %v12460_v21, %v12459_v34  ;;  %v9662_v42 = vadd.f32 %v2225_v44, %v1945_v52  ;;  %v4513_v37 = vstv %s9602_s15  ;;  %v12463_v44 = vld [vmem:[#allocation161_spill] sm:$0xff]  ;;  %v12464_v52 = vld [vmem:[#allocation162_spill] sm:$0xff]  ;;  %v12472_v46 = vld [vmem:[#allocation171_spill] sm:$0xff]  ;;  %s9993_s14 = sld [smem:[#allocation3 + $0x72]] }
 0x4a7   : > { %12452 = vst [vmem:[#allocation38_spill] sm:$0xff] %v9626_v18  ;;  %v9667_v28 = vadd.f32 %v2230_v40, %v1982_v0  ;;  %v2248_v59 = vmul.f32 %v2247_v8, %v12440_v53  ;;  %v2249_v21 = vmul.f32 %v2247_v8, %v12441_v57  ;;  %v2259_v29 = vstv %s9613_s16  ;;  %v12466_v0 = vld [vmem:[#allocation165_spill] sm:$0xff]  ;;  %v12467_v39 = vld [vmem:[#allocation154_spill] sm:$0xff]  ;;  %s10015_s15 = sld [smem:[#allocation3 + $0x57]] }
 0x4a8   : > { %v2021_v4 = vadd.f32 %v2017_v43, %v9558_v19  ;;  %v2055_v5 = vsel %vm547_vm3, %v12464_v52, %v12463_v44  ;;  %v2092_v8 = vsel %vm547_vm3, %v12467_v39, %v12466_v0  ;;  %v2254_v34 = vmul.f32 %v2253_v24, %v12440_v53  ;;  %v12468_v44 = vld [vmem:[#allocation157_spill] sm:$0xff]  ;;  %v12469_v52 = vld [vmem:[#allocation164_spill] sm:$0xff]  ;;  %v12470_v39 = vld [vmem:[#allocation167_spill] sm:$0xff]  ;;  %s10062_s16 = sld [smem:[#allocation3 + $0x73]] }
 0x4a9   : > { %v9693_v19 = vadd.f32 %v2236_v26, %v2020_v27  ;;  %v2255_v43 = vmul.f32 %v2253_v24, %v12441_v57  ;;  %v2093_v0 = vsel %vm547_vm3, %v12469_v52, %v12468_v44  ;;  %v2131_v26 = vsel %vm547_vm3, %v12473_v3, %v12472_v46  ;;  %v12476_v52 = vld [vmem:[#allocation173_spill] sm:$0xff]  ;;  %v12522_v18 = vld [vmem:[#allocation210_spill] sm:$0xff] }
 0x4aa   : > { %4500 = vrot.lane.b32.xlu1 %v4491_v51, %s6746_s18  ;;  %4498 = vrot.lane.b32.xlu0 %v4490_v12, %s6746_s18  ;;  %v2058_v12 = vadd.f32 %v2054_v30, %v9569_v32  ;;  %v4493_v32 = vmul.f32 %v4489_v35, %v8758_v9  ;;  %v2059_v30 = vadd.f32 %v2055_v5, %v9566_v15  ;;  %v12474_v15 = vld [vmem:[#allocation163_spill] sm:$0xff]  ;;  %v12475_v5 = vld [vmem:[#allocation170_spill] sm:$0xff] }
 0x4ab   : > { %4502 = vrot.lane.b32.xlu2 %v4492_v61, %s6746_s18  ;;  %v9681_v61 = vadd.f32 %v2231_v62, %v1983_v1  ;;  %v2260_v62 = vmul.f32 %v2259_v29, %v12440_v53  ;;  %v4515_v1 = vmul.f32 %v4513_v37, %v8733_v54  ;;  %v2096_v27 = vadd.f32 %v2092_v8, %v9577_v13 }
 0x4ac   : > { %v9672_v6 = vpop.permute.xlu1 %4240  ;;  %v9674_v51 = vpop.permute.xlu0 %4238  ;;  %v2239_v24 = vadd.f32 %v2237_v48, %v2021_v4  ;;  %v9709_v58 = vadd.f32 %v2242_v41, %v2058_v12  ;;  %v2168_v44 = vsel %vm547_vm3, %v12475_v5, %v12474_v15  ;;  %v2097_v48 = vadd.f32 %v2093_v0, %v9581_v7  ;;  %v12480_v41 = vld [vmem:[#allocation177_spill] sm:$0xff]  ;;  %v12481_v12 = vld [vmem:[#allocation166_spill] sm:$0xff]  ;;  %v12487_v5 = vld [vmem:[#allocation175_spill] sm:$0xff] }
 0x4ad   : > { %12461 = vst [vmem:[#allocation41_spill] sm:$0xff] %v9672_v6  ;;  %v9683_v40 = vpop.permute.xlu2 %4308  ;;  %v12471_v6 = vld [vmem:[#allocation168_spill] sm:$0xff]  ;;  %v2135_v46 = vadd.f32 %v2131_v26, %v9586_v20  ;;  %v2206_v4 = vsel %vm547_vm3, %v12481_v12, %v12480_v41  ;;  %v2267_v8 = vmul.f32 %v2265_v49, %v12441_v57  ;;  %v2172_v20 = vadd.f32 %v2168_v44, %v9598_v22  ;;  %v12488_v44 = vld [vmem:[#allocation182_spill] sm:$0xff] }
 0x4ae   : > { %12462 = vst [vmem:[#allocation48_spill] sm:$0xff] %v9674_v51  ;;  %v4514_v51 = vmul.f32 %v4513_v37, %v8731_v45  ;;  %v2130_v35 = vsel %vm547_vm3, %v12471_v6, %v12470_v39  ;;  %v2169_v6 = vsel %vm547_vm3, %v12477_v36, %v12476_v52  ;;  %v12478_v39 = vld [vmem:[#allocation169_spill] sm:$0xff]  ;;  %v9732_v36 = vadd.f32 %v2243_v33, %v2059_v30  ;;  %v12489_v52 = vld [vmem:[#allocation183_spill] sm:$0xff] }
 0x4af   : > { %12465 = vst [vmem:[#allocation51_spill] sm:$0xff] %v9683_v40  ;;  %v12479_v40 = vld [vmem:[#allocation176_spill] sm:$0xff]  ;;  %v2134_v13 = vadd.f32 %v2130_v35, %v9579_v14  ;;  %v2210_v30 = vadd.f32 %v2206_v4, %v9634_v31  ;;  %v4537_v35 = vstv %s9691_s19  ;;  %v2251_v26 = vadd.f32 %v2249_v21, %v2097_v48  ;;  %v12492_v21 = vld [vmem:[#allocation186_spill] sm:$0xff]  ;;  %s10182_s19 = sld [smem:[#allocation3 + $0x98]] }
 0x4b0   : > { %v2207_v3 = vsel %vm547_vm3, %v12479_v40, %v12478_v39  ;;  %v2266_v40 = vmul.f32 %v2265_v49, %v12440_v53  ;;  %v4517_v49 = vmul.f32 %v4513_v37, %v8758_v9  ;;  %v2257_v15 = vadd.f32 %v2255_v43, %v2135_v46  ;;  %v12491_v39 = vld [vmem:[#allocation185_spill] sm:$0xff]  ;;  %v12496_v46 = vld [vmem:[#allocation178_spill] sm:$0xff] }
 0x4b1   : > { %v2211_v0 = vadd.f32 %v2207_v3, %v9640_v56  ;;  %v2256_v22 = vadd.f32 %v2254_v34, %v2134_v13  ;;  %v12485_v56 = vld [vmem:[#allocation179_spill] sm:$0xff]  ;;  %v2312_v31 = vsel %vm354_vm2, %v12488_v44, %v12487_v5  ;;  %v2313_v34 = vsel %vm354_vm2, %v12492_v21, %v12491_v39  ;;  %v12493_v43 = vld [vmem:[#allocation181_spill] sm:$0xff]  ;;  %v12494_v3 = vld [vmem:[#allocation188_spill] sm:$0xff] }
 0x4b2   : > { %4522 = vrot.lane.b32.xlu1 %v4514_v51, %s6746_s18  ;;  %4504 = vrot.lane.b32.xlu0 %v4493_v32, %s6746_s18  ;;  %v2261_v51 = vmul.f32 %v2259_v29, %v12441_v57  ;;  %v2173_v32 = vadd.f32 %v2169_v6, %v9596_v50  ;;  %v4516_v29 = vmul.f32 %v4513_v37, %v8743_v10  ;;  %v12490_v6 = vld [vmem:[#allocation172_spill] sm:$0xff]  ;;  %v12495_v13 = vld [vmem:[#allocation189_spill] sm:$0xff]  ;;  %v2655_v4 = vstv %s9712_s24  ;;  %v12507_v39 = vld [vmem:[#allocation198_spill] sm:$0xff]  ;;  %s10208_s24 = sld [smem:[#allocation3 + $0x99]] }
 0x4b3   : > { %4524 = vrot.lane.b32.xlu2 %v4515_v1, %s6746_s18  ;;  %v2250_v1 = vadd.f32 %v2248_v59, %v2096_v27  ;;  %v4538_v50 = vmul.f32 %v4537_v35, %v8731_v45  ;;  %v12486_v59 = vld [vmem:[#allocation180_spill] sm:$0xff]  ;;  %v2289_v37 = vsel %vm354_vm2, %v12490_v6, %v12489_v52  ;;  %v2337_v48 = vsel %vm354_vm2, %v12494_v3, %v12493_v43  ;;  %v12508_v21 = vld [vmem:[#allocation199_spill] sm:$0xff] }
 0x4b4   : > { %v9737_v7 = vpop.permute.xlu1 %4262  ;;  %v9739_v14 = vpop.permute.xlu0 %4260  ;;  %v2288_v27 = vsel %vm354_vm2, %v12486_v59, %v12485_v56  ;;  %v2336_v41 = vsel %vm354_vm2, %v12496_v46, %v12495_v13  ;;  %v9773_v12 = vadd.f32 %v2260_v62, %v2172_v20  ;;  %v9776_v56 = vadd.f32 %v2266_v40, %v2210_v30  ;;  %v12502_v30 = vld [vmem:[#allocation194_spill] sm:$0xff]  ;;  %v12506_v6 = vld [vmem:[#allocation184_spill] sm:$0xff]  ;;  %v12510_v13 = vld [vmem:[#allocation201_spill] sm:$0xff] }
 0x4b5   : > { %12482 = vst [vmem:[#allocation52_spill] sm:$0xff] %v9737_v7  ;;  %v9746_v33 = vpop.permute.xlu2 %4330  ;;  %v9778_v59 = vadd.f32 %v2261_v51, %v2173_v32  ;;  %v9780_v5 = vadd.f32 %v2267_v8, %v2211_v0  ;;  %v9785_v44 = vadd.f32 %v2288_v27, %v9646_v23  ;;  %v9788_v52 = vadd.f32 %v2312_v31, %v9667_v28  ;;  %v12500_v32 = vld [vmem:[#allocation192_spill] sm:$0xff]  ;;  %v12505_v31 = vld [vmem:[#allocation195_spill] sm:$0xff] }
 0x4b6   : > { %12483 = vst [vmem:[#allocation47_spill] sm:$0xff] %v9739_v14  ;;  %v9791_v62 = vadd.f32 %v2289_v37, %v9662_v42  ;;  %v9794_v40 = vadd.f32 %v2313_v34, %v9681_v61  ;;  %v9799_v51 = vadd.f32 %v2337_v48, %v2239_v24  ;;  %v9802_v8 = vadd.f32 %v2336_v41, %v9693_v19  ;;  %v12499_v61 = vld [vmem:[#allocation191_spill] sm:$0xff]  ;;  %v12509_v48 = vld [vmem:[#allocation193_spill] sm:$0xff]  ;;  %v12511_v41 = vld [vmem:[#allocation202_spill] sm:$0xff] }
 0x4b7   : > { %12484 = vst [vmem:[#allocation54_spill] sm:$0xff] %v9746_v33  ;;  %v2656_v23 = vmul.f32 %v2655_v4, %v12440_v53  ;;  %v2657_v28 = vmul.f32 %v2655_v4, %v12441_v57  ;;  %v2360_v0 = vsel %vm354_vm2, %v12500_v32, %v12499_v61  ;;  %v12501_v24 = vld [vmem:[#allocation187_spill] sm:$0xff]  ;;  %v2361_v37 = vsel %vm354_vm2, %v12506_v6, %v12505_v31 }
 0x4b8   : > { %v2384_v19 = vsel %vm354_vm2, %v12502_v30, %v12501_v24  ;;  %v2385_v34 = vsel %vm354_vm2, %v12508_v21, %v12507_v39  ;;  %v4540_v43 = vmul.f32 %v4537_v35, %v8743_v10  ;;  %v4539_v3 = vmul.f32 %v4537_v35, %v8733_v54 }
 0x4b9   : > { %v2409_v46 = vsel %vm354_vm2, %v12510_v13, %v12509_v48  ;;  %v2689_v32 = vstv %s9752_s27  ;;  %v4541_v24 = vmul.f32 %v4537_v35, %v8758_v9  ;;  %v2662_v30 = vrot.slane %v2656_v23, 1  ;;  %s10288_s27 = sld [smem:[#allocation3 + $0x9a]] }
 0x4ba   : > { %4528 = vrot.lane.b32.xlu1 %v4517_v49, %s6746_s18  ;;  %4526 = vrot.lane.b32.xlu0 %v4516_v29, %s6746_s18  ;;  %v12503_v49 = vld [vmem:[#allocation197_spill] sm:$0xff]  ;;  %v2663_v31 = vrot.slane %v2657_v28, 1  ;;  %v9841_v21 = vadd.f32 %v2360_v0, %v9709_v58  ;;  %v9843_v7 = vadd.f32 %v2384_v19, %v2250_v1  ;;  %v9849_v35 = vadd.f32 %v2361_v37, %v9732_v36 }
 0x4bb   : > { %4546 = vrot.lane.b32.xlu2 %v4538_v50, %s6746_s18  ;;  %v2658_v29 = vmul.f32 %v2655_v4, %v12503_v49  ;;  %v2672_v50 = vstv %s9744_s26  ;;  %v12512_v4 = vld [vmem:[#allocation190_spill] sm:$0xff]  ;;  %v9851_v23 = vadd.f32 %v2385_v34, %v2251_v26  ;;  %v2690_v28 = vmul.f32 %v2689_v32, %v12440_v53  ;;  %v12515_v34 = vld [vmem:[#allocation204_spill] sm:$0xff]  ;;  %s10221_s26 = sld [smem:[#allocation3 + $0x75]] }
 0x4bc   : > { %v9806_v20 = vpop.permute.xlu1 %4284  ;;  %v9808_v42 = vpop.permute.xlu0 %4282  ;;  %v2408_v61 = vsel %vm354_vm2, %v12512_v4, %v12511_v41  ;;  %v2674_v6 = vmul.f32 %v2672_v50, %v12441_v57  ;;  %v2673_v39 = vmul.f32 %v2672_v50, %v12440_v53  ;;  %v2675_v13 = vmul.f32 %v2672_v50, %v12503_v49 }
 0x4bd   : > { %12497 = vst [vmem:[#allocation55_spill] sm:$0xff] %v9806_v20  ;;  %v9820_v27 = vpop.permute.xlu2 %4336  ;;  %v2665_v48 = vrot.slane %v2658_v29, 1  ;;  %v9856_v58 = vadd.f32 %v2409_v46, %v2257_v15  ;;  %v9858_v1 = vadd.f32 %v2408_v61, %v2256_v22  ;;  %v9861_v0 = vmul.f32 %v2689_v32, %v12441_v57  ;;  %v12516_v22 = vld [vmem:[#allocation205_spill] sm:$0xff]  ;;  %v12518_v46 = vld [vmem:[#allocation207_spill] sm:$0xff] }
 0x4be   : > { %12498 = vst [vmem:[#allocation44_spill] sm:$0xff] %v9808_v42  ;;  %v4561_v19 = vstv %s9796_s6  ;;  %v9866_v36 = vsel %vm730_vm0, %v2662_v30, %v2663_v31  ;;  %v2680_v26 = vrot.slane %v2674_v6, 1  ;;  %v2679_v29 = vrot.slane %v2673_v39, 1  ;;  %v12520_v30 = vld [vmem:[#allocation208_spill] sm:$0xff]  ;;  %s10304_s6 = sld [smem:[#allocation3 + $0x76]] }
 0x4bf   : > { %12504 = vst [vmem:[#allocation57_spill] sm:$0xff] %v9820_v27  ;;  %v4721_v15 = vstv %s9810_s7  ;;  %v9880_v4 = vsel %vm730_vm0, %v2663_v31, %v2665_v48  ;;  %v2682_v61 = vrot.slane %v2675_v13, 1  ;;  %v12521_v6 = vld [vmem:[#allocation196_spill] sm:$0xff]  ;;  %v2696_v14 = vrot.slane %v2690_v28, 1  ;;  %v6454_v13 = vld [vmem:[%s6863_s8 + $0x40] sm:$0x11] }
 0x4c0   : > { %v2433_v39 = vsel %vm354_vm2, %v12521_v6, %v12520_v30  ;;  %v4722_v31 = vmul.f32 %v4721_v15, %v8731_v45  ;;  %v9894_v48 = vmul.f32 %v4721_v15, %v8743_v10  ;;  %v9907_v6 = vsel %vm730_vm0, %v2679_v29, %v2680_v26  ;;  %s9924_s8 = sld [smem:[#allocation3 + $0x55]] }
 0x4c1   : > { %v9914_v27 = vsel %vm730_vm0, %v2680_v26, %v2682_v61  ;;  %v2706_v33 = vstv %s9846_s10  ;;  %v4725_v26 = vmul.f32 %v4721_v15, %v8758_v9  ;;  %s10314_s7 = sld [smem:[#allocation3 + $0x9b]] }
 0x4c2   : > { %4550 = vrot.lane.b32.xlu1 %v4540_v43, %s6746_s18  ;;  %4548 = vrot.lane.b32.xlu0 %v4539_v3, %s6746_s18  ;;  %v2432_v43 = vsel %vm354_vm2, %v12516_v22, %v12515_v34  ;;  %v12517_v3 = vld [vmem:[#allocation200_spill] sm:$0xff]  ;;  %v4563_v34 = vmul.f32 %v4561_v19, %v8733_v54  ;;  %v4562_v22 = vmul.f32 %v4561_v19, %v8731_v45  ;;  %v4734_v61 = vrot.slane %v4722_v31, 1  ;;  %s10346_s10 = sld [smem:[#allocation3 + $0x9c]] }
 0x4c3   : > { %4552 = vrot.lane.b32.xlu2 %v4541_v24, %s6746_s18  ;;  %v2456_v41 = vsel %vm354_vm2, %v12518_v46, %v12517_v3  ;;  %v2697_v3 = vrot.slane %v9861_v0, 1  ;;  %v4564_v46 = vmul.f32 %v4561_v19, %v8743_v10  ;;  %v9901_v28 = vadd.f32 %v2432_v43, %v9773_v12  ;;  %v12523_v12 = vld [vmem:[#allocation211_spill] sm:$0xff] }
 0x4c4   : > { %v9868_v50 = vpop.permute.xlu1 %4306  ;;  %v9870_v37 = vpop.permute.xlu0 %4288  ;;  %v9904_v30 = vadd.f32 %v2456_v41, %v9776_v56  ;;  %v4723_v0 = vmul.f32 %v4721_v15, %v8733_v54  ;;  %v2457_v43 = vsel %vm354_vm2, %v12523_v12, %v12522_v18  ;;  %v12524_v56 = vld [vmem:[#allocation214_spill] sm:$0xff]  ;;  %v12525_v41 = vld [vmem:[#allocation203_spill] sm:$0xff]  ;;  %v4735_v18 = vrot.slane %v9894_v48, 1 }
 0x4c5   : > { %12513 = vst [vmem:[#allocation58_spill] sm:$0xff] %v9868_v50  ;;  %v9882_v24 = vpop.permute.xlu2 %4358  ;;  %v2692_v50 = vmul.f32 %v2689_v32, %v12503_v49  ;;  %v2480_v29 = vsel %vm547_vm3, %v12525_v41, %v12524_v56  ;;  %v9932_v32 = vsel %vm730_vm0, %v2696_v14, %v2697_v3  ;;  %v12526_v12 = vld [vmem:[#allocation206_spill] sm:$0xff]  ;;  %v12527_v56 = vld [vmem:[#allocation213_spill] sm:$0xff]  ;;  %v2708_v41 = vmul.f32 %v2706_v33, %v12441_v57 }
 0x4c6   : > { %12514 = vst [vmem:[#allocation53_spill] sm:$0xff] %v9870_v37  ;;  %v4737_v31 = vrot.slane %v4723_v0, 1  ;;  %v9948_v48 = vadd.f32 %v2457_v43, %v9780_v5  ;;  %v2709_v42 = vmul.f32 %v2706_v33, %v12503_v49  ;;  %v4736_v0 = vsel %vm730_vm0, %v4734_v61, %v4735_v18 }
 0x4c7   : > { %12519 = vst [vmem:[#allocation60_spill] sm:$0xff] %v9882_v24  ;;  %v9911_v24 = vadd.f32 %v2433_v39, %v9778_v59  ;;  %v9928_v59 = vunpack.c.h.bf16 %v6454_v13  ;;  %v9935_v39 = vunpack.c.l.bf16 %v6454_v13  ;;  %v2484_v13 = vadd.f32 %v2480_v29, %v9785_v44 }
 0x4c8   : > { %v4759_v43 = vstv %s9897_s12  ;;  %v2740_v61 = vstv %s9924_s8  ;;  %s10425_s12 = sld [smem:[#allocation3 + $0x9d]] }
 0x4c9   : > { %v4727_v47 = vmul.f32 %v4721_v15, %v9928_v59  ;;  %v4726_v5 = vmul.f32 %v4721_v15, %v9935_v39  ;;  %v4760_v29 = vmul.f32 %v4759_v43, %v8731_v45  ;;  %v9974_v15 = vadd.f32 %v9866_v36, %v2484_v13  ;;  %s10456_s8 = sld [smem:[#allocation3 + $0x9e]] }
 0x4ca   : > { %4572 = vrot.lane.b32.xlu1 %v4563_v34, %s6746_s18  ;;  %4570 = vrot.lane.b32.xlu0 %v4562_v22, %s6746_s18  ;;  %v2481_v34 = vsel %vm547_vm3, %v12527_v56, %v12526_v12  ;;  %v2707_v22 = vmul.f32 %v2706_v33, %v12440_v53  ;;  %v2723_v12 = vstv %s9887_s11  ;;  %v4565_v56 = vmul.f32 %v4561_v19, %v8758_v9  ;;  %s10385_s11 = sld [smem:[#allocation3 + $0x77]] }
 0x4cb   : > { %4574 = vrot.lane.b32.xlu2 %v4564_v46, %s6746_s18  ;;  %v2699_v46 = vrot.slane %v2692_v50, 1  ;;  %v2714_v50 = vrot.slane %v2708_v41, 1  ;;  %v12535_v41 = vld [vmem:[#allocation220_spill] sm:$0xff] }
 0x4cc   : > { %v9943_v37 = vpop.permute.xlu1 %4312  ;;  %v9945_v14 = vpop.permute.xlu0 %4310  ;;  %v2713_v44 = vrot.slane %v2707_v22, 1 }
 0x4cd   : > { %12528 = vst [vmem:[#allocation61_spill] sm:$0xff] %v9943_v37  ;;  %v9952_v20 = vpop.permute.xlu2 %4380  ;;  %v4738_v37 = vrot.slane %v4725_v26, 1  ;;  %v9967_v17 = vsel %vm730_vm0, %v2697_v3, %v2699_v46  ;;  %v2724_v26 = vmul.f32 %v2723_v12, %v12440_v53  ;;  %v12534_v3 = vld [vmem:[#allocation219_spill] sm:$0xff]  ;;  %v4740_v46 = vrot.slane %v4726_v5, 1 }
 0x4ce   : > { %12529 = vst [vmem:[#allocation50_spill] sm:$0xff] %v9945_v14  ;;  %v2485_v14 = vadd.f32 %v2481_v34, %v9791_v62  ;;  %v9970_v62 = vmul.f32 %v2723_v12, %v12441_v57  ;;  %v4742_v34 = vrot.slane %v4727_v47, 1  ;;  %v10009_v5 = vmul.f32 %v2740_v61, %v12440_v53 }
 0x4cf   : > { %12530 = vst [vmem:[#allocation63_spill] sm:$0xff] %v9952_v20  ;;  %v4739_v33 = vsel %vm730_vm0, %v4737_v31, %v4738_v37  ;;  %v12531_v20 = vld [vmem:[#allocation216_spill] sm:$0xff]  ;;  %v12536_v31 = vld [vmem:[#allocation209_spill] sm:$0xff] }
 0x4d0   : > { %v2504_v19 = vsel %vm547_vm3, %v12532_v25, %v12531_v20  ;;  %v9982_v25 = vmul.f32 %v4759_v43, %v8743_v10  ;;  %v12533_v20 = vld [vmem:[#allocation212_spill] sm:$0xff]  ;;  %v2505_v36 = vsel %vm547_vm3, %v12536_v31, %v12535_v41  ;;  %v9991_v13 = vadd.f32 %v9880_v4, %v2485_v14 }
 0x4d1   : > { %v2528_v22 = vsel %vm547_vm3, %v12534_v3, %v12533_v20  ;;  %v2508_v47 = vadd.f32 %v2504_v19, %v9788_v52  ;;  %v4772_v3 = vrot.slane %v4760_v29, 1  ;;  %v10005_v41 = vmul.f32 %v2723_v12, %v12503_v49 }
 0x4d2   : > { %4744 = vrot.lane.b32.xlu1 %v4736_v0, %s6745_s9  ;;  %4576 = vrot.lane.b32.xlu0 %v4565_v56, %s6746_s18  ;;  %v9998_v56 = vsel %vm730_vm0, %v2713_v44, %v2714_v50  ;;  %v2716_v0 = vrot.slane %v2709_v42, 1  ;;  %v2730_v14 = vrot.slane %v2724_v26, 1  ;;  %v2532_v52 = vadd.f32 %v2528_v22, %v9802_v8 }
 0x4d3   : > { %4746 = vrot.lane.b32.xlu2 %v4739_v33, %s6745_s9  ;;  %v2509_v42 = vadd.f32 %v2505_v36, %v9794_v40  ;;  %v4743_v44 = vsel %vm730_vm0, %v4738_v37, %v4742_v34  ;;  %v4773_v29 = vrot.slane %v9982_v25, 1  ;;  %v4741_v12 = vsel %vm730_vm0, %v4735_v18, %v4740_v46  ;;  %v12540_v34 = vld [vmem:[#allocation222_spill] sm:$0xff]  ;;  %v12541_v25 = vld [vmem:[#allocation223_spill] sm:$0xff] }
 0x4d4   : > { %v10000_v2 = vpop.permute.xlu1 %4334  ;;  %v10002_v20 = vpop.permute.xlu0 %4332  ;;  %v4764_v19 = vmul.f32 %v4759_v43, %v9935_v39  ;;  %v4761_v26 = vmul.f32 %v4759_v43, %v8733_v54  ;;  %v4763_v31 = vmul.f32 %v4759_v43, %v8758_v9  ;;  %v10024_v4 = vsel %vm730_vm0, %v2714_v50, %v2716_v0 }
 0x4d5   : > { %12537 = vst [vmem:[#allocation64_spill] sm:$0xff] %v10000_v2  ;;  %v10011_v33 = vpop.permute.xlu2 %4402  ;;  %v10027_v40 = vmul.f32 %v2740_v61, %v12441_v57  ;;  %v4774_v8 = vsel %vm730_vm0, %v4772_v3, %v4773_v29  ;;  %v4765_v37 = vmul.f32 %v4759_v43, %v9928_v59  ;;  %v2529_v18 = vsel %vm547_vm3, %v12541_v25, %v12540_v34 }
 0x4d6   : > { %12538 = vst [vmem:[#allocation59_spill] sm:$0xff] %v10002_v20  ;;  %v10035_v22 = vadd.f32 %v9907_v6, %v2508_v47  ;;  %v2733_v36 = vrot.slane %v10005_v41, 1  ;;  %v12542_v50 = vrot.slane %v9970_v62, 1  ;;  %v10044_v0 = vadd.f32 %v9914_v27, %v2509_v42  ;;  %v12550_v20 = vld [vmem:[#allocation228_spill] sm:$0xff] }
 0x4d7   : > { %12539 = vst [vmem:[#allocation66_spill] sm:$0xff] %v10011_v33  ;;  %v10047_v3 = vadd.f32 %v9932_v32, %v2532_v52  ;;  %v2747_v43 = vrot.slane %v10009_v5, 1  ;;  %v2757_v33 = vstv %s9977_s13  ;;  %v4778_v6 = vrot.slane %v4764_v19, 1  ;;  %s10469_s13 = sld [smem:[#allocation3 + $0x88]] }
 0x4d8   : > { %v10041_v46 = vsel %vm730_vm0, %v2730_v14, %v12542_v50  ;;  %v4775_v47 = vrot.slane %v4761_v26, 1  ;;  %v4776_v41 = vrot.slane %v4763_v31, 1  ;;  %v4797_v34 = vstv %s9993_s14  ;;  %s10519_s14 = sld [smem:[#allocation3 + $0x9f]] }
 0x4d9   : > { %v2533_v27 = vadd.f32 %v2529_v18, %v9799_v51  ;;  %v2748_v14 = vrot.slane %v10027_v40, 1  ;;  %v2743_v32 = vmul.f32 %v2740_v61, %v12503_v49  ;;  %v4780_v42 = vrot.slane %v4765_v37, 1  ;;  %v12548_v61 = vld [vmem:[#allocation226_spill] sm:$0xff] }
 0x4da   : > { %4750 = vrot.lane.b32.xlu1 %v4743_v44, %s6745_s9  ;;  %4748 = vrot.lane.b32.xlu0 %v4741_v12, %s6745_s9  ;;  %v12545_v44 = vld [vmem:[#allocation218_spill] sm:$0xff]  ;;  %v12546_v12 = vld [vmem:[#allocation225_spill] sm:$0xff]  ;;  %v2758_v26 = vmul.f32 %v2757_v33, %v12440_v53  ;;  %v2759_v31 = vmul.f32 %v2757_v33, %v12441_v57  ;;  %v2760_v51 = vmul.f32 %v2757_v33, %v12503_v49  ;;  %v2774_v18 = vstv %s10015_s15  ;;  %s10526_s15 = sld [smem:[#allocation3 + $0x89]] }
 0x4db   : > { %4782 = vrot.lane.b32.xlu2 %v4774_v8, %s6745_s9  ;;  %v2553_v19 = vsel %vm547_vm3, %v12546_v12, %v12545_v44  ;;  %v12549_v8 = vld [vmem:[#allocation215_spill] sm:$0xff]  ;;  %v4799_v50 = vmul.f32 %v4797_v34, %v8733_v54  ;;  %v10078_v37 = vmul.f32 %v4797_v34, %v8758_v9  ;;  %v4779_v44 = vsel %vm730_vm0, %v4773_v29, %v4778_v6 }
 0x4dc   : > { %v10058_v52 = vpop.permute.xlu1 %4356  ;;  %v10060_v5 = vpop.permute.xlu0 %4354  ;;  %v2552_v25 = vsel %vm547_vm3, %v12549_v8, %v12548_v61  ;;  %v4777_v12 = vsel %vm730_vm0, %v4775_v47, %v4776_v41  ;;  %v4800_v33 = vmul.f32 %v4797_v34, %v8743_v10  ;;  %v4781_v2 = vsel %vm730_vm0, %v4776_v41, %v4780_v42 }
 0x4dd   : > { %12543 = vst [vmem:[#allocation67_spill] sm:$0xff] %v10058_v52  ;;  %v10070_v40 = vpop.permute.xlu2 %4408  ;;  %v2750_v52 = vrot.slane %v2743_v32, 1  ;;  %v4802_v61 = vmul.f32 %v4797_v34, %v9935_v39  ;;  %v2556_v8 = vadd.f32 %v2552_v25, %v9841_v21  ;;  %v2576_v55 = vsel %vm547_vm3, %v12551_v38, %v12550_v20 }
 0x4de   : > { %12544 = vst [vmem:[#allocation56_spill] sm:$0xff] %v10060_v5  ;;  %v4798_v5 = vmul.f32 %v4797_v34, %v8731_v45  ;;  %v2764_v29 = vrot.slane %v2758_v26, 1  ;;  %v2765_v6 = vrot.slane %v2759_v31, 1  ;;  %v2767_v47 = vrot.slane %v2760_v51, 1 }
 0x4df   : > { %12547 = vst [vmem:[#allocation69_spill] sm:$0xff] %v10070_v40  ;;  %v2557_v40 = vadd.f32 %v2553_v19, %v9849_v35  ;;  %v10092_v60 = vmul.f32 %v2774_v18, %v12441_v57  ;;  %v4813_v35 = vrot.slane %v4799_v50, 1  ;;  %v4814_v41 = vrot.slane %v10078_v37, 1 }
 0x4e0   : > { %v12552_v21 = vrot.slane %v9970_v62, 1  ;;  %v10103_v38 = vsel %vm730_vm0, %v2747_v43, %v2748_v14  ;;  %v4810_v20 = vrot.slane %v4798_v5, 1  ;;  %v4811_v42 = vrot.slane %v4800_v33, 1  ;;  %v12557_v33 = vld [vmem:[#allocation231_spill] sm:$0xff] }
 0x4e1   : > { %v2580_v19 = vadd.f32 %v2576_v55, %v9843_v7  ;;  %v2775_v26 = vmul.f32 %v2774_v18, %v12440_v53  ;;  %v4835_v25 = vstv %s10062_s16  ;;  %v4816_v62 = vrot.slane %v4802_v61, 1  ;;  %s10601_s16 = sld [smem:[#allocation3 + $0x8a]] }
 0x4e2   : > { %4786 = vrot.lane.b32.xlu1 %v4779_v44, %s6745_s9  ;;  %4784 = vrot.lane.b32.xlu0 %v4777_v12, %s6745_s9  ;;  %v10100_v32 = vsel %vm730_vm0, %v12552_v21, %v2733_v36  ;;  %v10114_v36 = vadd.f32 %v9998_v56, %v2556_v8  ;;  %v10117_v43 = vadd.f32 %v9967_v17, %v2533_v27  ;;  %v2782_v37 = vrot.slane %v10092_v60, 1  ;;  %v12556_v12 = vld [vmem:[#allocation224_spill] sm:$0xff]  ;;  %v12562_v21 = vld [vmem:[#allocation230_spill] sm:$0xff] }
 0x4e3   : > { %4788 = vrot.lane.b32.xlu2 %v4781_v2, %s6745_s9  ;;  %v10120_v5 = vadd.f32 %v10024_v4, %v2557_v40  ;;  %v2751_v2 = vsel %vm730_vm0, %v2748_v14, %v2750_v52  ;;  %v2766_v7 = vsel %vm730_vm0, %v2764_v29, %v2765_v6  ;;  %v2768_v50 = vsel %vm730_vm0, %v2765_v6, %v2767_v47  ;;  %v12558_v8 = vld [vmem:[#allocation232_spill] sm:$0xff]  ;;  %v12559_v29 = vld [vmem:[#allocation221_spill] sm:$0xff]  ;;  %v12560_v47 = vld [vmem:[#allocation234_spill] sm:$0xff] }
 0x4e4   : > { %v10108_v31 = vpop.permute.xlu1 %4378  ;;  %v10110_v51 = vpop.permute.xlu0 %4360  ;;  %v4815_v44 = vsel %vm730_vm0, %v4813_v35, %v4814_v41  ;;  %v4812_v56 = vsel %vm730_vm0, %v4810_v20, %v4811_v42  ;;  %v4836_v17 = vmul.f32 %v4835_v25, %v8731_v45  ;;  %v10132_v27 = vmul.f32 %v4835_v25, %v8743_v10  ;;  %v12563_v20 = vld [vmem:[#allocation237_spill] sm:$0xff] }
 0x4e5   : > { %12553 = vst [vmem:[#allocation70_spill] sm:$0xff] %v10108_v31  ;;  %v10123_v55 = vpop.permute.xlu2 %4430  ;;  %v4803_v4 = vmul.f32 %v4797_v34, %v9928_v59  ;;  %v10138_v14 = vadd.f32 %v10041_v46, %v2580_v19  ;;  %v2781_v52 = vrot.slane %v2775_v26, 1  ;;  %v4817_v40 = vsel %vm730_vm0, %v4811_v42, %v4816_v62  ;;  %v12561_v34 = vld [vmem:[#allocation235_spill] sm:$0xff]  ;;  %v12564_v19 = vld [vmem:[#allocation238_spill] sm:$0xff] }
 0x4e6   : > { %12554 = vst [vmem:[#allocation65_spill] sm:$0xff] %v10110_v51  ;;  %v4837_v60 = vmul.f32 %v4835_v25, %v8733_v54  ;;  %v2600_v61 = vsel %vm547_vm3, %v12557_v33, %v12556_v12  ;;  %v2577_v6 = vsel %vm547_vm3, %v12559_v29, %v12558_v8  ;;  %v2601_v35 = vsel %vm547_vm3, %v12561_v34, %v12560_v47  ;;  %v12565_v26 = vld [vmem:[#allocation227_spill] sm:$0xff]  ;;  %v12566_v33 = vld [vmem:[#allocation240_spill] sm:$0xff]  ;;  %v12567_v8 = vld [vmem:[#allocation241_spill] sm:$0xff] }
 0x4e7   : > { %12555 = vst [vmem:[#allocation72_spill] sm:$0xff] %v10123_v55  ;;  %v2777_v46 = vmul.f32 %v2774_v18, %v12503_v49  ;;  %v2625_v42 = vsel %vm547_vm3, %v12563_v20, %v12562_v21  ;;  %v2624_v62 = vsel %vm547_vm3, %v12565_v26, %v12564_v19  ;;  %v4839_v12 = vmul.f32 %v4835_v25, %v8758_v9 }
 0x4e8   : > { %v2648_v29 = vsel %vm547_vm3, %v12567_v8, %v12566_v33  ;;  %v4848_v47 = vrot.slane %v4836_v17, 1  ;;  %v4849_v18 = vrot.slane %v10132_v27, 1  ;;  %v4818_v34 = vrot.slane %v4803_v4, 1  ;;  %v12570_v27 = vld [vmem:[#allocation244_spill] sm:$0xff]  ;;  %v12571_v4 = vld [vmem:[#allocation233_spill] sm:$0xff] }
 0x4e9   : > { %v2604_v21 = vadd.f32 %v2600_v61, %v9858_v1  ;;  %v2581_v20 = vadd.f32 %v2577_v6, %v9851_v23  ;;  %v4851_v26 = vrot.slane %v4837_v60, 1  ;;  %v2605_v33 = vadd.f32 %v2601_v35, %v9856_v58 }
 0x4ea   : > { %4822 = vrot.lane.b32.xlu1 %v4815_v44, %s6745_s9  ;;  %4820 = vrot.lane.b32.xlu0 %v4812_v56, %s6745_s9  ;;  %v2783_v44 = vsel %vm730_vm0, %v2781_v52, %v2782_v37  ;;  %v2629_v17 = vadd.f32 %v2625_v42, %v9911_v24  ;;  %v2784_v8 = vrot.slane %v2777_v46, 1  ;;  %v2628_v23 = vadd.f32 %v2624_v62, %v9901_v28  ;;  %v12573_v62 = vld [vmem:[#allocation236_spill] sm:$0xff] }
 0x4eb   : > { %4824 = vrot.lane.b32.xlu2 %v4817_v40, %s6745_s9  ;;  %v2649_v40 = vsel %vm547_vm3, %v12571_v4, %v12570_v27  ;;  %v2652_v52 = vadd.f32 %v2648_v29, %v9904_v30  ;;  %v4841_v61 = vmul.f32 %v4835_v25, %v9928_v59  ;;  %v4852_v60 = vrot.slane %v4839_v12, 1  ;;  %v12574_v29 = vld [vmem:[#allocation243_spill] sm:$0xff]  ;;  %v12575_v12 = vld [vmem:[#allocation246_spill] sm:$0xff] }
 0x4ec   : > { %v10169_v19 = vpop.permute.xlu1 %4384  ;;  %v10171_v56 = vpop.permute.xlu0 %4382  ;;  %v4850_v58 = vsel %vm730_vm0, %v4848_v47, %v4849_v18  ;;  %v4819_v24 = vsel %vm730_vm0, %v4814_v41, %v4818_v34  ;;  %v4840_v6 = vmul.f32 %v4835_v25, %v9935_v39  ;;  %v4873_v35 = vstv %s10135_s17  ;;  %v12576_v4 = vld [vmem:[#allocation247_spill] sm:$0xff]  ;;  %v12578_v34 = vld [vmem:[#allocation249_spill] sm:$0xff]  ;;  %s10677_s17 = sld [smem:[#allocation3 + $0x8b]] }
 0x4ed   : > { %12568 = vst [vmem:[#allocation73_spill] sm:$0xff] %v10169_v19  ;;  %v10178_v1 = vpop.permute.xlu2 %4452  ;;  %v2653_v46 = vadd.f32 %v2649_v40, %v9948_v48  ;;  %v2738_v42 = vadd.f32 %v10100_v32, %v2581_v20  ;;  %v4853_v28 = vsel %vm730_vm0, %v4851_v26, %v4852_v60  ;;  %v4874_v30 = vmul.f32 %v4873_v35, %v8731_v45  ;;  %v12577_v48 = vld [vmem:[#allocation242_spill] sm:$0xff] }
 0x4ee   : > { %12569 = vst [vmem:[#allocation62_spill] sm:$0xff] %v10171_v56  ;;  %v2822_v27 = vsel %vm354_vm2, %v12574_v29, %v12573_v62  ;;  %v2823_v47 = vsel %vm354_vm2, %v12576_v4, %v12575_v12  ;;  %v10200_v41 = vadd.f32 %v10103_v38, %v2604_v21  ;;  %v2785_v25 = vsel %vm730_vm0, %v2782_v37, %v2784_v8  ;;  %v12588_v29 = vld [vmem:[#allocation256_spill] sm:$0xff]  ;;  %v12605_v56 = vld [vmem:[#allocation271_spill] sm:$0xff] }
 0x4ef   : > { %12572 = vst [vmem:[#allocation75_spill] sm:$0xff] %v10178_v1  ;;  %v2861_v32 = vsel %vm354_vm2, %v12578_v34, %v12577_v48  ;;  %v10206_v20 = vadd.f32 %v2751_v2, %v2605_v33  ;;  %v4856_v26 = vrot.slane %v4841_v61, 1  ;;  %v10213_v40 = vmul.f32 %v4873_v35, %v8743_v10 }
 0x4f0   : > { %v10215_v38 = vadd.f32 %v2766_v7, %v2628_v23  ;;  %v10217_v21 = vadd.f32 %v2768_v50, %v2629_v17  ;;  %v10219_v37 = vadd.f32 %v2783_v44, %v2652_v52  ;;  %v4854_v8 = vrot.slane %v4840_v6, 1  ;;  %v12581_v23 = vld [vmem:[#allocation250_spill] sm:$0xff]  ;;  %v12582_v52 = vld [vmem:[#allocation239_spill] sm:$0xff] }
 0x4f1   : > { %v10225_v2 = vadd.f32 %v2822_v27, %v9974_v15  ;;  %v10228_v33 = vadd.f32 %v2823_v47, %v9991_v13  ;;  %v10230_v61 = vadd.f32 %v2785_v25, %v2653_v46  ;;  %v4886_v44 = vrot.slane %v4874_v30, 1  ;;  %v12584_v15 = vld [vmem:[#allocation253_spill] sm:$0xff]  ;;  %v12585_v13 = vld [vmem:[#allocation248_spill] sm:$0xff] }
 0x4f2   : > { %4858 = vrot.lane.b32.xlu1 %v4850_v58, %s6745_s9  ;;  %4826 = vrot.lane.b32.xlu0 %v4819_v24, %s6745_s9  ;;  %v10237_v17 = vadd.f32 %v2861_v32, %v10044_v0  ;;  %v2860_v58 = vsel %vm354_vm2, %v12582_v52, %v12581_v23  ;;  %v12583_v24 = vld [vmem:[#allocation252_spill] sm:$0xff]  ;;  %v12589_v27 = vld [vmem:[#allocation245_spill] sm:$0xff]  ;;  %v3399_v0 = vstv %s10182_s19  ;;  %v4857_v12 = vsel %vm730_vm0, %v4852_v60, %v4856_v26  ;;  %s10694_s19 = sld [smem:[#allocation3 + $0x10]] }
 0x4f3   : > { %4860 = vrot.lane.b32.xlu2 %v4853_v28, %s6745_s9  ;;  %v2898_v6 = vsel %vm354_vm2, %v12584_v15, %v12583_v24  ;;  %v12586_v28 = vld [vmem:[#allocation255_spill] sm:$0xff]  ;;  %v2899_v30 = vsel %vm354_vm2, %v12589_v27, %v12588_v29  ;;  %v4887_v4 = vrot.slane %v10213_v40, 1  ;;  %v4855_v47 = vsel %vm730_vm0, %v4849_v18, %v4854_v8  ;;  %v12590_v18 = vld [vmem:[#allocation258_spill] sm:$0xff]  ;;  %v12593_v15 = vld [vmem:[#allocation261_spill] sm:$0xff] }
 0x4f4   : > { %v10232_v7 = vpop.permute.xlu1 %4406  ;;  %v10234_v50 = vpop.permute.xlu0 %4404  ;;  %v2936_v46 = vsel %vm354_vm2, %v12586_v28, %v12585_v13  ;;  %v4878_v25 = vmul.f32 %v4873_v35, %v9935_v39  ;;  %v4875_v48 = vmul.f32 %v4873_v35, %v8733_v54  ;;  %v4877_v34 = vmul.f32 %v4873_v35, %v8758_v9  ;;  %v12591_v40 = vld [vmem:[#allocation259_spill] sm:$0xff]  ;;  %v12592_v24 = vld [vmem:[#allocation254_spill] sm:$0xff] }
 0x4f5   : > { %12579 = vst [vmem:[#allocation76_spill] sm:$0xff] %v10232_v7  ;;  %v10248_v62 = vpop.permute.xlu2 %4474  ;;  %v10261_v32 = vadd.f32 %v2860_v58, %v10035_v22  ;;  %v10264_v23 = vadd.f32 %v2898_v6, %v10047_v3  ;;  %v4888_v52 = vsel %vm730_vm0, %v4886_v44, %v4887_v4  ;;  %v4879_v60 = vmul.f32 %v4873_v35, %v9928_v59  ;;  %v12594_v58 = vld [vmem:[#allocation262_spill] sm:$0xff]  ;;  %v12595_v13 = vld [vmem:[#allocation251_spill] sm:$0xff] }
 0x4f6   : > { %12580 = vst [vmem:[#allocation81_spill] sm:$0xff] %v10234_v50  ;;  %v10269_v26 = vadd.f32 %v2936_v46, %v10114_v36  ;;  %v2937_v8 = vsel %vm354_vm2, %v12591_v40, %v12590_v18  ;;  %v2975_v22 = vsel %vm354_vm2, %v12593_v15, %v12592_v24  ;;  %v2974_v3 = vsel %vm354_vm2, %v12595_v13, %v12594_v58  ;;  %v12604_v50 = vld [vmem:[#allocation270_spill] sm:$0xff] }
 0x4f7   : > { %12587 = vst [vmem:[#allocation82_spill] sm:$0xff] %v10248_v62  ;;  %v10281_v44 = vadd.f32 %v2899_v30, %v10117_v43  ;;  %v3401_v35 = vmul.f32 %v3399_v0, %v12441_v57  ;;  %v3400_v36 = vmul.f32 %v3399_v0, %v12440_v53  ;;  %v3416_v6 = vstv %s10208_s24  ;;  %v12619_v62 = vld [vmem:[#allocation269_spill] sm:$0xff]  ;;  %s10724_s24 = sld [smem:[#allocation3 + $0x11]] }
 0x4f8   : > { %v4892_v28 = vrot.slane %v4878_v25, 1  ;;  %v4889_v46 = vrot.slane %v4875_v48, 1  ;;  %v4890_v29 = vrot.slane %v4877_v34, 1  ;;  %v4911_v27 = vstv %s10221_s26  ;;  %v12598_v25 = vld [vmem:[#allocation264_spill] sm:$0xff]  ;;  %v12599_v48 = vld [vmem:[#allocation265_spill] sm:$0xff]  ;;  %s10760_s26 = sld [smem:[#allocation3 + $0x8c]] }
 0x4f9   : > { %v10293_v43 = vadd.f32 %v2937_v8, %v10120_v5  ;;  %v10295_v30 = vadd.f32 %v2975_v22, %v2738_v42  ;;  %v10298_v18 = vadd.f32 %v2974_v3, %v10138_v14  ;;  %v3012_v34 = vsel %vm354_vm2, %v12599_v48, %v12598_v25  ;;  %v12600_v3 = vld [vmem:[#allocation260_spill] sm:$0xff]  ;;  %v12601_v25 = vld [vmem:[#allocation267_spill] sm:$0xff]  ;;  %v12603_v48 = vld [vmem:[#allocation257_spill] sm:$0xff] }
 0x4fa   : > { %4864 = vrot.lane.b32.xlu1 %v4857_v12, %s6745_s9  ;;  %4862 = vrot.lane.b32.xlu0 %v4855_v47, %s6745_s9  ;;  %v4894_v47 = vrot.slane %v4879_v60, 1  ;;  %v3417_v5 = vmul.f32 %v3416_v6, %v12440_v53  ;;  %v3418_v42 = vmul.f32 %v3416_v6, %v12441_v57  ;;  %v3407_v14 = vrot.slane %v3401_v35, 2 }
 0x4fb   : > { %4896 = vrot.lane.b32.xlu2 %v4888_v52, %s6745_s9  ;;  %v3402_v52 = vmul.f32 %v3399_v0, %v12503_v49  ;;  %v3406_v24 = vrot.slane %v3400_v36, 2  ;;  %v4913_v15 = vmul.f32 %v4911_v27, %v8733_v54  ;;  %v10318_v60 = vmul.f32 %v4911_v27, %v8758_v9  ;;  %v12602_v36 = vld [vmem:[#allocation268_spill] sm:$0xff] }
 0x4fc   : > { %v10300_v40 = vpop.permute.xlu1 %4428  ;;  %v10302_v12 = vpop.permute.xlu0 %4426  ;;  %v4893_v22 = vsel %vm730_vm0, %v4887_v4, %v4892_v28  ;;  %v4891_v58 = vsel %vm730_vm0, %v4889_v46, %v4890_v29  ;;  %v4912_v0 = vmul.f32 %v4911_v27, %v8731_v45  ;;  %v4914_v13 = vmul.f32 %v4911_v27, %v8743_v10 }
 0x4fd   : > { %12596 = vst [vmem:[#allocation71_spill] sm:$0xff] %v10300_v40  ;;  %v10312_v8 = vpop.permute.xlu2 %4480  ;;  %v3050_v35 = vsel %vm354_vm2, %v12601_v25, %v12600_v3  ;;  %v3013_v1 = vsel %vm354_vm2, %v12603_v48, %v12602_v36  ;;  %v4895_v55 = vsel %vm730_vm0, %v4890_v29, %v4894_v47  ;;  %v3409_v4 = vrot.slane %v3402_v52, 2 }
 0x4fe   : > { %12597 = vst [vmem:[#allocation78_spill] sm:$0xff] %v10302_v12  ;;  %v4916_v12 = vmul.f32 %v4911_v27, %v9935_v39  ;;  %v3423_v28 = vrot.slane %v3417_v5, 2  ;;  %v3424_v46 = vrot.slane %v3418_v42, 2  ;;  %v3419_v40 = vmul.f32 %v3416_v6, %v12503_v49 }
 0x4ff   : > { %v10334_v7 = vadd.f32 %v3012_v34, %v10200_v41  ;;  %v3051_v3 = vsel %vm354_vm2, %v12605_v56, %v12604_v50  ;;  %v4927_v29 = vrot.slane %v4913_v15, 1  ;;  %v11949_v47 = vrot.slane %v10318_v60, 1 }
 0x500   : > { %v10343_v52 = vsel %vm1475_vm1, %v3406_v24, %v3407_v14  ;;  %v3433_v5 = vstv %s10288_s27  ;;  %v4924_v41 = vrot.slane %v4912_v0, 1  ;;  %v4925_v6 = vrot.slane %v4914_v13, 1  ;;  %s10769_s27 = sld [smem:[#allocation3 + $0x12]] }
 0x501   : > { %v10350_v56 = vadd.f32 %v3050_v35, %v10215_v38  ;;  %v10353_v50 = vadd.f32 %v3013_v1, %v10206_v20  ;;  %v4949_v24 = vstv %s10304_s6  ;;  %v4930_v15 = vrot.slane %v4916_v12, 1  ;;  %v12608_v1 = vld [vmem:[#allocation266_spill] sm:$0xff]  ;;  %v12609_v20 = vld [vmem:[#allocation273_spill] sm:$0xff]  ;;  %s10782_s6 = sld [smem:[#allocation3 + $0x13]] }
 0x502   : > { %4900 = vrot.lane.b32.xlu1 %v4893_v22, %s6745_s9  ;;  %4898 = vrot.lane.b32.xlu0 %v4891_v58, %s6745_s9  ;;  %v10361_v22 = vadd.f32 %v3051_v3, %v10217_v21  ;;  %v10364_v58 = vsel %vm1475_vm1, %v3407_v14, %v3409_v4  ;;  %v3426_v38 = vrot.slane %v3419_v40, 2  ;;  %v3089_v13 = vsel %vm354_vm2, %v12609_v20, %v12608_v1 }
 0x503   : > { %4902 = vrot.lane.b32.xlu2 %v4895_v55, %s6745_s9  ;;  %v10367_v55 = vsel %vm1475_vm1, %v3423_v28, %v3424_v46  ;;  %v3434_v25 = vmul.f32 %v3433_v5, %v12440_v53  ;;  %v3450_v35 = vstv %s10314_s7  ;;  %v4929_v21 = vsel %vm730_vm0, %v4927_v29, %v11949_v47  ;;  %v12610_v29 = vld [vmem:[#allocation276_spill] sm:$0xff]  ;;  %s10835_s7 = sld [smem:[#allocation3 + $0x14]] }
 0x504   : > { %v10355_v34 = vpop.permute.xlu1 %4450  ;;  %v10357_v42 = vpop.permute.xlu0 %4432  ;;  %v4926_v12 = vsel %vm730_vm0, %v4924_v41, %v4925_v6  ;;  %v4950_v14 = vmul.f32 %v4949_v24, %v8731_v45  ;;  %v10382_v36 = vmul.f32 %v4949_v24, %v8743_v10  ;;  %v4917_v40 = vmul.f32 %v4911_v27, %v9928_v59  ;;  %v12611_v41 = vld [vmem:[#allocation277_spill] sm:$0xff] }
 0x505   : > { %12606 = vst [vmem:[#allocation79_spill] sm:$0xff] %v10355_v34  ;;  %v10369_v0 = vpop.permute.xlu2 %4502  ;;  %v3435_v48 = vmul.f32 %v3433_v5, %v12441_v57  ;;  %v3436_v4 = vmul.f32 %v3433_v5, %v12503_v49  ;;  %v4931_v28 = vsel %vm730_vm0, %v4925_v6, %v4930_v15  ;;  %v4951_v3 = vmul.f32 %v4949_v24, %v8733_v54  ;;  %v12612_v5 = vld [vmem:[#allocation274_spill] sm:$0xff] }
 0x506   : > { %12607 = vst [vmem:[#allocation68_spill] sm:$0xff] %v10357_v42  ;;  %v3126_v1 = vsel %vm547_vm3, %v12611_v41, %v12610_v29  ;;  %v10395_v20 = vsel %vm1475_vm1, %v3424_v46, %v3426_v38  ;;  %v10398_v27 = vmul.f32 %v3450_v35, %v12441_v57  ;;  %v3451_v47 = vmul.f32 %v3450_v35, %v12440_v53  ;;  %v12613_v42 = vld [vmem:[#allocation263_spill] sm:$0xff] }
 0x507   : > { %v10402_v34 = vadd.f32 %v3089_v13, %v10230_v61  ;;  %v3088_v6 = vsel %vm354_vm2, %v12613_v42, %v12612_v5  ;;  %v3440_v15 = vrot.slane %v3434_v25, 2  ;;  %v4953_v46 = vmul.f32 %v4949_v24, %v8758_v9 }
 0x508   : > { %v3467_v38 = vstv %s10346_s10  ;;  %v4962_v29 = vrot.slane %v4950_v14, 1  ;;  %v4963_v41 = vrot.slane %v10382_v36, 1  ;;  %v4932_v19 = vrot.slane %v4917_v40, 1  ;;  %v12618_v14 = vld [vmem:[#allocation280_spill] sm:$0xff]  ;;  %s10861_s10 = sld [smem:[#allocation3 + $0x8d]] }
 0x509   : > { %v3130_v61 = vadd.f32 %v3126_v1, %v10225_v2  ;;  %v3441_v13 = vrot.slane %v3435_v48, 2  ;;  %v3443_v31 = vrot.slane %v3436_v4, 2  ;;  %v4965_v25 = vrot.slane %v4951_v3, 1 }
 0x50a   : > { %4936 = vrot.lane.b32.xlu1 %v4929_v21, %s6745_s9  ;;  %4934 = vrot.lane.b32.xlu0 %v4926_v12, %s6745_s9  ;;  %v12616_v21 = vld [vmem:[#allocation272_spill] sm:$0xff]  ;;  %v12617_v12 = vld [vmem:[#allocation279_spill] sm:$0xff]  ;;  %v3127_v36 = vsel %vm547_vm3, %v12619_v62, %v12618_v14  ;;  %v3458_v40 = vrot.slane %v10398_v27, 2  ;;  %v3453_v48 = vmul.f32 %v3450_v35, %v12503_v49  ;;  %v3468_v4 = vmul.f32 %v3467_v38, %v12440_v53 }
 0x50b   : > { %4938 = vrot.lane.b32.xlu2 %v4931_v28, %s6745_s9  ;;  %v3164_v5 = vsel %vm547_vm3, %v12617_v12, %v12616_v21  ;;  %v3457_v28 = vrot.slane %v3451_v47, 2  ;;  %v4955_v3 = vmul.f32 %v4949_v24, %v9928_v59  ;;  %v4966_v1 = vrot.slane %v4953_v46, 1 }
 0x50c   : > { %v10414_v51 = vpop.permute.xlu1 %4456  ;;  %v10416_v42 = vpop.permute.xlu0 %4454  ;;  %v4964_v21 = vsel %vm730_vm0, %v4962_v29, %v4963_v41  ;;  %v12620_v12 = vrot.slane %v10318_v60, 1  ;;  %v4954_v27 = vmul.f32 %v4949_v24, %v9935_v39  ;;  %v4987_v47 = vstv %s10385_s11  ;;  %v12621_v24 = vld [vmem:[#allocation282_spill] sm:$0xff]  ;;  %v12622_v29 = vld [vmem:[#allocation283_spill] sm:$0xff]  ;;  %s10865_s11 = sld [smem:[#allocation3 + $0x15]] }
 0x50d   : > { %12614 = vst [vmem:[#allocation77_spill] sm:$0xff] %v10414_v51  ;;  %v10427_v2 = vpop.permute.xlu2 %4524  ;;  %v3168_v14 = vadd.f32 %v3164_v5, %v10261_v32  ;;  %v4967_v35 = vsel %vm730_vm0, %v4965_v25, %v4966_v1  ;;  %v4988_v51 = vmul.f32 %v4987_v47, %v8731_v45  ;;  %v10443_v63 = vadd.f32 %v3088_v6, %v10219_v37 }
 0x50e   : > { %12615 = vst [vmem:[#allocation84_spill] sm:$0xff] %v10416_v42  ;;  %v4933_v62 = vsel %vm730_vm0, %v12620_v12, %v4932_v19  ;;  %v3131_v42 = vadd.f32 %v3127_v36, %v10228_v33  ;;  %v10446_v46 = vsel %vm1475_vm1, %v3440_v15, %v3441_v13  ;;  %v10449_v60 = vsel %vm1475_vm1, %v3441_v13, %v3443_v31 }
 0x50f   : > { %v3469_v19 = vmul.f32 %v3467_v38, %v12441_v57  ;;  %v3165_v32 = vsel %vm547_vm3, %v12622_v29, %v12621_v24  ;;  %v3470_v33 = vmul.f32 %v3467_v38, %v12503_v49  ;;  %v4970_v37 = vrot.slane %v4955_v3, 1 }
 0x510   : > { %v10461_v6 = vmul.f32 %v4987_v47, %v8743_v10  ;;  %v10464_v31 = vadd.f32 %v10343_v52, %v3130_v61  ;;  %v3460_v15 = vrot.slane %v3453_v48, 2  ;;  %v10467_v13 = vsel %vm1475_vm1, %v3457_v28, %v3458_v40 }
 0x511   : > { %v4968_v25 = vrot.slane %v4954_v27, 1  ;;  %v10473_v38 = vadd.f32 %v10364_v58, %v3131_v42  ;;  %v10476_v5 = vadd.f32 %v10367_v55, %v3168_v14  ;;  %v3474_v36 = vrot.slane %v3468_v4, 2  ;;  %v12625_v58 = vld [vmem:[#allocation286_spill] sm:$0xff]  ;;  %v12626_v42 = vld [vmem:[#allocation275_spill] sm:$0xff] }
 0x512   : > { %4972 = vrot.lane.b32.xlu1 %v4964_v21, %s6745_s9  ;;  %4940 = vrot.lane.b32.xlu0 %v4933_v62, %s6745_s9  ;;  %v5000_v52 = vrot.slane %v4988_v51, 1  ;;  %v3169_v61 = vadd.f32 %v3165_v32, %v10237_v17  ;;  %v3475_v28 = vrot.slane %v3469_v19, 2  ;;  %v3484_v48 = vstv %s10425_s12  ;;  %v12627_v32 = vld [vmem:[#allocation278_spill] sm:$0xff]  ;;  %s10881_s12 = sld [smem:[#allocation3 + $0x16]] }
 0x513   : > { %4974 = vrot.lane.b32.xlu2 %v4967_v35, %s6745_s9  ;;  %v3202_v55 = vsel %vm547_vm3, %v12626_v42, %v12625_v58  ;;  %v3477_v27 = vrot.slane %v3470_v33, 2  ;;  %v4971_v4 = vsel %vm730_vm0, %v4966_v1, %v4970_v37  ;;  %v5001_v14 = vrot.slane %v10461_v6, 1  ;;  %v12628_v33 = vld [vmem:[#allocation285_spill] sm:$0xff] }
 0x514   : > { %v4479_v3 = vpop.permute.xlu1 %4478  ;;  %v10478_v21 = vpop.permute.xlu0 %4476  ;;  %v4969_v51 = vsel %vm730_vm0, %v4963_v41, %v4968_v25  ;;  %v4992_v17 = vmul.f32 %v4987_v47, %v9935_v39  ;;  %v4989_v35 = vmul.f32 %v4987_v47, %v8733_v54  ;;  %v3485_v19 = vmul.f32 %v3484_v48, %v12440_v53 }
 0x515   : > { %12623 = vst [vmem:[#allocation85_spill] sm:$0xff] %v10478_v21  ;;  %v10484_v12 = vsel %vm547_vm3, %v4479_v3, %v10312_v8  ;;  %v10486_v62 = vpop.permute.xlu2 %4546  ;;  %v4991_v8 = vmul.f32 %v4987_v47, %v8758_v9  ;;  %v3486_v24 = vmul.f32 %v3484_v48, %v12441_v57  ;;  %v5002_v29 = vsel %vm730_vm0, %v5000_v52, %v5001_v14 }
 0x516   : > { %12624 = vst [vmem:[#allocation74_spill] sm:$0xff] %v10484_v12  ;;  %v4993_v1 = vmul.f32 %v4987_v47, %v9928_v59  ;;  %v3203_v37 = vsel %vm547_vm3, %v12628_v33, %v12627_v32  ;;  %v10505_v41 = vadd.f32 %v10395_v20, %v3169_v61  ;;  %v10508_v6 = vsel %vm1475_vm1, %v3458_v40, %v3460_v15  ;;  %v12630_v32 = vld [vmem:[#allocation289_spill] sm:$0xff] }
 0x517   : > { %v10511_v25 = vsel %vm1475_vm1, %v3474_v36, %v3475_v28  ;;  %v3206_v3 = vadd.f32 %v3202_v55, %v10264_v23  ;;  %v10515_v52 = vsel %vm1475_vm1, %v3475_v28, %v3477_v27  ;;  %v3487_v47 = vmul.f32 %v3484_v48, %v12503_v49  ;;  %v12629_v27 = vld [vmem:[#allocation288_spill] sm:$0xff] }
 0x518   : > { %v3501_v58 = vstv %s10456_s8  ;;  %v5006_v20 = vrot.slane %v4992_v17, 1  ;;  %v5003_v40 = vrot.slane %v4989_v35, 1  ;;  %v5004_v15 = vrot.slane %v4991_v8, 1  ;;  %s10907_s8 = sld [smem:[#allocation3 + $0x17]] }
 0x519   : > { %v5025_v61 = vstv %s10469_s13  ;;  %v3207_v23 = vadd.f32 %v3203_v37, %v10281_v44  ;;  %v3491_v36 = vrot.slane %v3485_v19, 2  ;;  %v3492_v28 = vrot.slane %v3486_v24, 2  ;;  %s10919_s13 = sld [smem:[#allocation3 + $0x5b]] }
 0x51a   : > { %4978 = vrot.lane.b32.xlu1 %v4971_v4, %s6745_s9  ;;  %4976 = vrot.lane.b32.xlu0 %v4969_v51, %s6745_s9  ;;  %v5008_v48 = vrot.slane %v4993_v1, 1  ;;  %v3240_v4 = vsel %vm547_vm3, %v12630_v32, %v12629_v27  ;;  %v3503_v51 = vmul.f32 %v3501_v58, %v12441_v57  ;;  %v3502_v17 = vmul.f32 %v3501_v58, %v12440_v53 }
 0x51b   : > { %5010 = vrot.lane.b32.xlu2 %v5002_v29, %s6745_s9  ;;  %v10539_v44 = vadd.f32 %v10446_v46, %v3206_v3  ;;  %v3494_v19 = vrot.slane %v3487_v47, 2  ;;  %v5027_v24 = vmul.f32 %v5025_v61, %v8733_v54  ;;  %v10543_v29 = vmul.f32 %v5025_v61, %v8758_v9 }
 0x51c   : > { %v4501_v42 = vpop.permute.xlu1 %4500  ;;  %v4499_v55 = vpop.permute.xlu0 %4498  ;;  %v5007_v1 = vsel %vm730_vm0, %v5001_v14, %v5006_v20  ;;  %v5005_v33 = vsel %vm730_vm0, %v5003_v40, %v5004_v15  ;;  %v5026_v37 = vmul.f32 %v5025_v61, %v8731_v45  ;;  %v3504_v46 = vmul.f32 %v3501_v58, %v12503_v49 }
 0x51d   : > { %v10534_v35 = vsel %vm547_vm3, %v4499_v55, %v4501_v42  ;;  %v10536_v8 = vpop.permute.xlu2 %4552  ;;  %v5028_v42 = vmul.f32 %v5025_v61, %v8743_v10  ;;  %v3244_v55 = vadd.f32 %v3240_v4, %v10269_v26  ;;  %v5009_v3 = vsel %vm730_vm0, %v5004_v15, %v5008_v48  ;;  %v12632_v15 = vld [vmem:[#allocation284_spill] sm:$0xff]  ;;  %v12635_v48 = vld [vmem:[#allocation281_spill] sm:$0xff] }
 0x51e   : > { %12631 = vst [vmem:[#allocation87_spill] sm:$0xff] %v10534_v35  ;;  %v5030_v47 = vmul.f32 %v5025_v61, %v9935_v39  ;;  %v10554_v27 = vadd.f32 %v10449_v60, %v3207_v23  ;;  %v10557_v32 = vsel %vm1475_vm1, %v3491_v36, %v3492_v28  ;;  %v3509_v14 = vrot.slane %v3503_v51, 2  ;;  %v12633_v60 = vld [vmem:[#allocation291_spill] sm:$0xff]  ;;  %v12634_v36 = vld [vmem:[#allocation292_spill] sm:$0xff] }
 0x51f   : > { %v3508_v20 = vrot.slane %v3502_v17, 2  ;;  %v10560_v40 = vsel %vm1475_vm1, %v3492_v28, %v3494_v19  ;;  %v3518_v35 = vstv %s10519_s14  ;;  %v5041_v26 = vrot.slane %v5027_v24, 1  ;;  %s10959_s14 = sld [smem:[#allocation3 + $0x8e]] }
 0x520   : > { %v5042_v58 = vrot.slane %v10543_v29, 1  ;;  %v3278_v23 = vsel %vm547_vm3, %v12633_v60, %v12632_v15  ;;  %v3241_v4 = vsel %vm547_vm3, %v12635_v48, %v12634_v36  ;;  %v5038_v51 = vrot.slane %v5026_v37, 1  ;;  %v12640_v48 = vld [vmem:[#allocation290_spill] sm:$0xff] }
 0x521   : > { %v5039_v17 = vrot.slane %v5028_v42, 1  ;;  %v10574_v28 = vadd.f32 %v10467_v13, %v3244_v55  ;;  %v3511_v19 = vrot.slane %v3504_v46, 2  ;;  %v5044_v29 = vrot.slane %v5030_v47, 1 }
 0x522   : > { %5014 = vrot.lane.b32.xlu1 %v5007_v1, %s6745_s9  ;;  %5012 = vrot.lane.b32.xlu0 %v5005_v33, %s6745_s9  ;;  %v5063_v33 = vstv %s10526_s15  ;;  %v10578_v12 = vsel %vm1475_vm1, %v3508_v20, %v3509_v14  ;;  %v3519_v15 = vmul.f32 %v3518_v35, %v12440_v53  ;;  %v3282_v42 = vadd.f32 %v3278_v23, %v10298_v18  ;;  %v12639_v23 = vld [vmem:[#allocation295_spill] sm:$0xff]  ;;  %s11023_s15 = sld [smem:[#allocation3 + $0x8f]] }
 0x523   : > { %5016 = vrot.lane.b32.xlu2 %v5009_v3, %s6745_s9  ;;  %v3245_v55 = vadd.f32 %v3241_v4, %v10293_v43  ;;  %v3520_v46 = vmul.f32 %v3518_v35, %v12441_v57  ;;  %v5043_v3 = vsel %vm730_vm0, %v5041_v26, %v5042_v58  ;;  %v5040_v53 = vsel %vm730_vm0, %v5038_v51, %v5039_v17  ;;  %v12638_v26 = vld [vmem:[#allocation294_spill] sm:$0xff]  ;;  %v12641_v4 = vld [vmem:[#allocation297_spill] sm:$0xff] }
 0x524   : > { %v4523_v1 = vpop.permute.xlu1 %4522  ;;  %v4505_v24 = vpop.permute.xlu0 %4504  ;;  %v5064_v47 = vmul.f32 %v5063_v33, %v8731_v45  ;;  %v3512_v20 = vsel %vm1475_vm1, %v3509_v14, %v3511_v19  ;;  %v3521_v18 = vmul.f32 %v3518_v35, %v12503_v49  ;;  %v5045_v43 = vsel %vm730_vm0, %v5039_v17, %v5044_v29  ;;  %v12644_v14 = vld [vmem:[#allocation300_spill] sm:$0xff]  ;;  %v12645_v19 = vld [vmem:[#allocation301_spill] sm:$0xff]  ;;  %v12647_v17 = vld [vmem:[#allocation303_spill] sm:$0xff] }
 0x525   : > { %v10583_v60 = vsel %vm547_vm3, %v4523_v1, %v10427_v2  ;;  %v10587_v37 = vsel %vm547_vm3, %v10369_v0, %v4505_v24  ;;  %v10589_v13 = vpop.permute.xlu2 %4574  ;;  %v10598_v2 = vmul.f32 %v5063_v33, %v8743_v10  ;;  %v5031_v0 = vmul.f32 %v5025_v61, %v9928_v59  ;;  %v12642_v1 = vld [vmem:[#allocation298_spill] sm:$0xff]  ;;  %v12643_v61 = vld [vmem:[#allocation287_spill] sm:$0xff]  ;;  %v12646_v35 = vld [vmem:[#allocation296_spill] sm:$0xff] }
 0x526   : > { %12636 = vst [vmem:[#allocation88_spill] sm:$0xff] %v10583_v60  ;;  %v5065_v57 = vmul.f32 %v5063_v33, %v8733_v54  ;;  %v3279_v36 = vsel %vm547_vm3, %v12639_v23, %v12638_v26  ;;  %v3317_v51 = vsel %vm547_vm3, %v12641_v4, %v12640_v48  ;;  %v3316_v24 = vsel %vm547_vm3, %v12643_v61, %v12642_v1  ;;  %v12648_v23 = vld [vmem:[#allocation304_spill] sm:$0xff]  ;;  %v12649_v48 = vld [vmem:[#allocation293_spill] sm:$0xff] }
 0x527   : > { %12637 = vst [vmem:[#allocation91_spill] sm:$0xff] %v10587_v37  ;;  %v3525_v60 = vrot.slane %v3519_v15, 2  ;;  %v3354_v49 = vsel %vm547_vm3, %v12645_v19, %v12644_v14  ;;  %v3392_v29 = vsel %vm547_vm3, %v12647_v17, %v12646_v35  ;;  %v3526_v37 = vrot.slane %v3520_v46, 2 }
 0x528   : > { %v5067_v26 = vmul.f32 %v5063_v33, %v8758_v9  ;;  %v3355_v4 = vsel %vm547_vm3, %v12649_v48, %v12648_v23  ;;  %v5076_v15 = vrot.slane %v5064_v47, 1  ;;  %v5077_v1 = vrot.slane %v10598_v2, 1  ;;  %v12650_v23 = vld [vmem:[#allocation306_spill] sm:$0xff]  ;;  %v12651_v47 = vld [vmem:[#allocation307_spill] sm:$0xff] }
 0x529   : > { %v5046_v61 = vrot.slane %v5031_v0, 1  ;;  %v3283_v14 = vadd.f32 %v3279_v36, %v10295_v30  ;;  %v3321_v46 = vadd.f32 %v3317_v51, %v10353_v50  ;;  %v3528_v19 = vrot.slane %v3521_v18, 2 }
 0x52a   : > { %5050 = vrot.lane.b32.xlu1 %v5043_v3, %s6746_s18  ;;  %5048 = vrot.lane.b32.xlu0 %v5040_v53, %s6746_s18  ;;  %v5079_v35 = vrot.slane %v5065_v57, 1  ;;  %v3320_v17 = vadd.f32 %v3316_v24, %v10334_v7  ;;  %v3358_v21 = vadd.f32 %v3354_v49, %v10350_v56  ;;  %v3393_v2 = vsel %vm547_vm3, %v12651_v47, %v12650_v23 }
 0x52b   : > { %5052 = vrot.lane.b32.xlu2 %v5045_v43, %s6746_s18  ;;  %v3396_v30 = vadd.f32 %v3392_v29, %v10443_v63  ;;  %v3359_v50 = vadd.f32 %v3355_v4, %v10361_v22  ;;  %v5069_v18 = vmul.f32 %v5063_v33, %v9928_v59  ;;  %v5080_v57 = vrot.slane %v5067_v26, 1  ;;  %v12654_v4 = vld [vmem:[#allocation310_spill] sm:$0xff] }
 0x52c   : > { %v4529_v3 = vpop.permute.xlu1 %4528  ;;  %v4527_v53 = vpop.permute.xlu0 %4526  ;;  %v5078_v7 = vsel %vm730_vm0, %v5076_v15, %v5077_v1  ;;  %v5047_v56 = vsel %vm730_vm0, %v5042_v58, %v5046_v61  ;;  %v5068_v36 = vmul.f32 %v5063_v33, %v9935_v39  ;;  %v5101_v51 = vstv %s10601_s16  ;;  %v12655_v15 = vld [vmem:[#allocation299_spill] sm:$0xff]  ;;  %s11041_s16 = sld [smem:[#allocation3 + $0x5c]] }
 0x52d   : > { %v10638_v0 = vsel %vm547_vm3, %v4527_v53, %v4529_v3  ;;  %v10640_v43 = vpop.permute.xlu2 %4746  ;;  %v3397_v24 = vadd.f32 %v3393_v2, %v10402_v34  ;;  %v3527_v49 = vsel %vm1475_vm1, %v3525_v60, %v3526_v37  ;;  %v5081_v48 = vsel %vm730_vm0, %v5079_v35, %v5080_v57  ;;  %v12658_v53 = vld [vmem:[#allocation308_spill] sm:$0xff]  ;;  %v12659_v35 = vld [vmem:[#allocation315_spill] sm:$0xff] }
 0x52e   : > { %v5102_v63 = vmul.f32 %v5101_v51, %v8731_v45  ;;  %v3465_v22 = vadd.f32 %v10508_v6, %v3245_v55  ;;  %v3481_v29 = vadd.f32 %v10511_v25, %v3282_v42  ;;  %v10656_v26 = vadd.f32 %v10515_v52, %v3283_v14  ;;  %v12653_v42 = vld [vmem:[#allocation309_spill] sm:$0xff] }
 0x52f   : > { %v3529_v58 = vsel %vm1475_vm1, %v3526_v37, %v3528_v19  ;;  %v10660_v33 = vadd.f32 %v10557_v32, %v3320_v17  ;;  %v10663_v34 = vadd.f32 %v10560_v40, %v3321_v46  ;;  %v5084_v60 = vrot.slane %v5069_v18, 1  ;;  %v12652_v40 = vld [vmem:[#allocation302_spill] sm:$0xff]  ;;  %v12656_v46 = vld [vmem:[#allocation312_spill] sm:$0xff]  ;;  %v12657_v19 = vld [vmem:[#allocation313_spill] sm:$0xff] }
 0x530   : > { %v10668_v6 = vmul.f32 %v5101_v51, %v8743_v10  ;;  %v10670_v25 = vadd.f32 %v3512_v20, %v3359_v50  ;;  %v10673_v52 = vadd.f32 %v10578_v12, %v3358_v21  ;;  %v10675_v37 = vadd.f32 %v3527_v49, %v3396_v30  ;;  %v12660_v30 = vld [vmem:[#allocation316_spill] sm:$0xff]  ;;  %v12661_v50 = vld [vmem:[#allocation305_spill] sm:$0xff] }
 0x531   : > { %v5082_v32 = vrot.slane %v5068_v36, 1  ;;  %v3567_v55 = vsel %vm354_vm2, %v12653_v42, %v12652_v40  ;;  %v3566_v61 = vsel %vm354_vm2, %v12655_v15, %v12654_v4  ;;  %v10686_v20 = vadd.f32 %v3529_v58, %v3397_v24  ;;  %v12666_v4 = vld [vmem:[#allocation322_spill] sm:$0xff]  ;;  %v12669_v15 = vld [vmem:[#allocation325_spill] sm:$0xff] }
 0x532   : > { %5086 = vrot.lane.b32.xlu1 %v5078_v7, %s6746_s18  ;;  %5054 = vrot.lane.b32.xlu0 %v5047_v56, %s6746_s18  ;;  %v5114_v12 = vrot.slane %v5102_v63, 1  ;;  %v3604_v3 = vsel %vm354_vm2, %v12657_v19, %v12656_v46  ;;  %v3642_v17 = vsel %vm354_vm2, %v12659_v35, %v12658_v53  ;;  %v3605_v18 = vsel %vm354_vm2, %v12661_v50, %v12660_v30  ;;  %v12662_v7 = vld [vmem:[#allocation318_spill] sm:$0xff]  ;;  %v12663_v56 = vld [vmem:[#allocation319_spill] sm:$0xff] }
 0x533   : > { %5088 = vrot.lane.b32.xlu2 %v5081_v48, %s6746_s18  ;;  %v3643_v36 = vsel %vm354_vm2, %v12663_v56, %v12662_v7  ;;  %v5085_v24 = vsel %vm730_vm0, %v5080_v57, %v5084_v60  ;;  %v5115_v49 = vrot.slane %v10668_v6, 1  ;;  %v5106_v48 = vmul.f32 %v5101_v51, %v9935_v39  ;;  %v12664_v6 = vld [vmem:[#allocation314_spill] sm:$0xff]  ;;  %v12671_v30 = vld [vmem:[#allocation327_spill] sm:$0xff]  ;;  %v12673_v7 = vld [vmem:[#allocation317_spill] sm:$0xff] }
 0x534   : > { %v4551_v14 = vpop.permute.xlu1 %4550  ;;  %v4549_v21 = vpop.permute.xlu0 %4548  ;;  %v5105_v63 = vmul.f32 %v5101_v51, %v8758_v9  ;;  %v10719_v58 = vadd.f32 %v3567_v55, %v10473_v38  ;;  %v10722_v40 = vadd.f32 %v3566_v61, %v10464_v31  ;;  %v5107_v60 = vmul.f32 %v5101_v51, %v9928_v59  ;;  %v12667_v38 = vld [vmem:[#allocation311_spill] sm:$0xff]  ;;  %v12668_v31 = vld [vmem:[#allocation324_spill] sm:$0xff] }
 0x535   : > { %v10698_v23 = vsel %vm547_vm3, %v4551_v14, %v10536_v8  ;;  %v10702_v47 = vsel %vm547_vm3, %v10486_v62, %v4549_v21  ;;  %v10704_v2 = vpop.permute.xlu2 %4782  ;;  %v5083_v8 = vsel %vm730_vm0, %v5077_v1, %v5082_v32  ;;  %v5103_v62 = vmul.f32 %v5101_v51, %v8733_v54  ;;  %v12665_v32 = vld [vmem:[#allocation321_spill] sm:$0xff] }
 0x536   : > { %v5116_v57 = vsel %vm730_vm0, %v5114_v12, %v5115_v49  ;;  %v10729_v1 = vadd.f32 %v3604_v3, %v10476_v5  ;;  %v3681_v42 = vsel %vm354_vm2, %v12665_v32, %v12664_v6  ;;  %v3680_v55 = vsel %vm354_vm2, %v12667_v38, %v12666_v4  ;;  %v12678_v38 = vld [vmem:[#allocation334_spill] sm:$0xff] }
 0x537   : > { %v3718_v61 = vsel %vm354_vm2, %v12669_v15, %v12668_v31  ;;  %v10741_v14 = vadd.f32 %v3642_v17, %v10539_v44  ;;  %v10744_v51 = vadd.f32 %v3605_v18, %v10505_v41  ;;  %v10747_v5 = vadd.f32 %v3643_v36, %v10554_v27  ;;  %v12670_v17 = vld [vmem:[#allocation320_spill] sm:$0xff]  ;;  %v12674_v36 = vld [vmem:[#allocation330_spill] sm:$0xff] }
 0x538   : > { %v5120_v21 = vrot.slane %v5106_v48, 1  ;;  %v5117_v12 = vrot.slane %v5103_v62, 1  ;;  %v5118_v46 = vrot.slane %v5105_v63, 1  ;;  %v5139_v19 = vstv %s10677_s17  ;;  %v12672_v18 = vld [vmem:[#allocation328_spill] sm:$0xff]  ;;  %v12676_v48 = vld [vmem:[#allocation326_spill] sm:$0xff]  ;;  %v12677_v62 = vld [vmem:[#allocation333_spill] sm:$0xff] }
 0x539   : > { %v10753_v3 = vadd.f32 %v3681_v42, %v3465_v22  ;;  %v10756_v44 = vadd.f32 %v3680_v55, %v10574_v28  ;;  %v10758_v41 = vadd.f32 %v3718_v61, %v3481_v29  ;;  %v5122_v35 = vrot.slane %v5107_v60, 1  ;;  %v12679_v55 = vld [vmem:[#allocation323_spill] sm:$0xff]  ;;  %s11074_s17 = sld [smem:[#allocation3 + $0x5d]] }
 0x53a   : > { %5092 = vrot.lane.b32.xlu1 %v5085_v24, %s6746_s18  ;;  %5090 = vrot.lane.b32.xlu0 %v5083_v8, %s6746_s18  ;;  %v3756_v50 = vsel %vm354_vm2, %v12671_v30, %v12670_v17  ;;  %v3719_v22 = vsel %vm354_vm2, %v12673_v7, %v12672_v18  ;;  %v4153_v56 = vstv %s10694_s19  ;;  %v12675_v24 = vld [vmem:[#allocation331_spill] sm:$0xff]  ;;  %v3795_v63 = vsel %vm354_vm2, %v12677_v62, %v12676_v48  ;;  %v12682_v48 = vld [vmem:[#allocation340_spill] sm:$0xff]  ;;  %v12683_v62 = vld [vmem:[#allocation341_spill] sm:$0xff]  ;;  %s11104_s19 = sld [smem:[#allocation3 + $0xb8]] }
 0x53b   : > { %5124 = vrot.lane.b32.xlu2 %v5116_v57, %s6746_s18  ;;  %v3757_v8 = vsel %vm354_vm2, %v12675_v24, %v12674_v36  ;;  %v5141_v57 = vmul.f32 %v5139_v19, %v8733_v54  ;;  %v10786_v60 = vmul.f32 %v5139_v19, %v8758_v9  ;;  %v5121_v6 = vsel %vm730_vm0, %v5115_v49, %v5120_v21  ;;  %v12680_v36 = vld [vmem:[#allocation332_spill] sm:$0xff]  ;;  %v12681_v24 = vld [vmem:[#allocation337_spill] sm:$0xff] }
 0x53c   : > { %v4573_v27 = vpop.permute.xlu1 %4572  ;;  %v4571_v53 = vpop.permute.xlu0 %4570  ;;  %v5119_v32 = vsel %vm730_vm0, %v5117_v12, %v5118_v46  ;;  %v5140_v42 = vmul.f32 %v5139_v19, %v8731_v45  ;;  %v5142_v4 = vmul.f32 %v5139_v19, %v8743_v10  ;;  %v3794_v31 = vsel %vm354_vm2, %v12679_v55, %v12678_v38 }
 0x53d   : > { %v10772_v28 = vsel %vm547_vm3, %v4571_v53, %v4573_v27  ;;  %v10774_v29 = vpop.permute.xlu2 %4788  ;;  %v4159_v15 = vstv %s10724_s24  ;;  %v5123_v61 = vsel %vm730_vm0, %v5118_v46, %v5122_v35  ;;  %v5144_v27 = vmul.f32 %v5139_v19, %v9935_v39  ;;  %s11132_s24 = sld [smem:[#allocation3 + $0x5e]] }
 0x53e   : > { %v10799_v53 = vadd.f32 %v3756_v50, %v10660_v33  ;;  %v10802_v49 = vadd.f32 %v3719_v22, %v10656_v26  ;;  %v10805_v21 = vadd.f32 %v3757_v8, %v10663_v34  ;;  %v4154_v12 = vmul.f32 %v4153_v56, %v8731_v45 }
 0x53f   : > { %v10809_v17 = vadd.f32 %v3795_v63, %v10670_v25  ;;  %v4155_v30 = vmul.f32 %v4153_v56, %v8743_v10  ;;  %v5155_v33 = vrot.slane %v5141_v57, 1  ;;  %v5156_v46 = vrot.slane %v10786_v60, 1 }
 0x540   : > { %v10816_v26 = vadd.f32 %v3794_v31, %v10673_v52  ;;  %v10819_v34 = vmul.f32 %v4159_v15, %v8731_v45  ;;  %v5152_v35 = vrot.slane %v5140_v42, 1  ;;  %v5153_v50 = vrot.slane %v5142_v4, 1 }
 0x541   : > { %v3832_v25 = vsel %vm354_vm2, %v8847_v16, %v8845_v11  ;;  %v10826_v18 = vmul.f32 %v4159_v15, %v8743_v10  ;;  %v5177_v52 = vstv %s10760_s26  ;;  %v5158_v56 = vrot.slane %v5144_v27, 1  ;;  %s11177_s26 = sld [smem:[#allocation3 + $0xb9]] }
 0x542   : > { %5128 = vrot.lane.b32.xlu1 %v5121_v6, %s6746_s18  ;;  %5126 = vrot.lane.b32.xlu0 %v5119_v32, %s6746_s18  ;;  %v3870_v8 = vsel %vm547_vm3, %v12681_v24, %v12680_v36  ;;  %v3871_v63 = vsel %vm547_vm3, %v12683_v62, %v12682_v48  ;;  %v12684_v6 = vld [vmem:[#allocation338_spill] sm:$0xff]  ;;  %v12685_v32 = vld [vmem:[#allocation329_spill] sm:$0xff]  ;;  %v4165_v4 = vstv %s10769_s27  ;;  %v4171_v38 = vstv %s10782_s6  ;;  %s11180_s27 = sld [smem:[#allocation3 + $0x58]] }
 0x543   : > { %5130 = vrot.lane.b32.xlu2 %v5123_v61, %s6746_s18  ;;  %v3833_v42 = vsel %vm354_vm2, %v12685_v32, %v12684_v6  ;;  %v5157_v55 = vsel %vm730_vm0, %v5155_v33, %v5156_v46  ;;  %v5154_v31 = vsel %vm730_vm0, %v5152_v35, %v5153_v50  ;;  %v10858_v15 = vmul.f32 %v5177_v52, %v8743_v10  ;;  %s11227_s6 = sld [smem:[#allocation3 + $0xba]] }
 0x544   : > { %v4745_v7 = vpop.permute.xlu1 %4744  ;;  %v4577_v22 = vpop.permute.xlu0 %4576  ;;  %v3874_v61 = vadd.f32 %v3870_v8, %v10722_v40  ;;  %v3875_v27 = vadd.f32 %v3871_v63, %v10719_v58  ;;  %v5179_v33 = vmul.f32 %v5177_v52, %v8733_v54  ;;  %v10870_v35 = vadd.f32 %v3832_v25, %v10675_v37  ;;  %v12688_v58 = vld [vmem:[#allocation336_spill] sm:$0xff]  ;;  %v12689_v40 = vld [vmem:[#allocation18_spill] sm:$0xff]  ;;  %v12691_v25 = vld [vmem:[#allocation335_spill] sm:$0xff] }
 0x545   : > { %v10839_v11 = vsel %vm354_vm2, %v4745_v7, %v10640_v43  ;;  %v10843_v16 = vsel %vm547_vm3, %v10589_v13, %v4577_v22  ;;  %v10845_v57 = vpop.permute.xlu2 %4824  ;;  %v5178_v43 = vmul.f32 %v5177_v52, %v8731_v45  ;;  %v5145_v13 = vmul.f32 %v5139_v19, %v9928_v59 }
 0x546   : > { %v5159_v7 = vsel %vm730_vm0, %v5153_v50, %v5158_v56  ;;  %v10873_v22 = vadd.f32 %v3833_v42, %v10686_v20  ;;  %v10876_v19 = vmul.f32 %v4165_v4, %v8743_v10  ;;  %v10879_v36 = vmul.f32 %v4165_v4, %v8731_v45  ;;  %v12690_v20 = vld [vmem:[#allocation19_spill] sm:$0xff] }
 0x547   : > { %v3909_v50 = vsel %vm547_vm3, %v12689_v40, %v12688_v58  ;;  %v4172_v56 = vmul.f32 %v4171_v38, %v8731_v45  ;;  %v5181_v37 = vmul.f32 %v5177_v52, %v8758_v9  ;;  %v3908_v24 = vsel %vm547_vm3, %v12691_v25, %v12690_v20  ;;  %v12692_v58 = vld [vmem:[#allocation342_spill] sm:$0xff] }
 0x548   : > { %12686 = vst [vmem:[#allocation80_spill] sm:$0xff] %v10876_v19  ;;  %v5190_v8 = vrot.slane %v5178_v43, 1  ;;  %v5191_v48 = vrot.slane %v10858_v15, 1  ;;  %v5160_v62 = vrot.slane %v5145_v13, 1  ;;  %v10895_v63 = vadd.f32 %v4154_v12, %v3874_v61  ;;  %v12693_v43 = vld [vmem:[#allocation22_spill] sm:$0xff]  ;;  %v12695_v61 = vld [vmem:[#allocation15_spill] sm:$0xff] }
 0x549   : > { %12687 = vst [vmem:[#allocation83_spill] sm:$0xff] %v10879_v36  ;;  %v10897_v6 = vadd.f32 %v4155_v30, %v3875_v27  ;;  %v10900_v32 = vmul.f32 %v4171_v38, %v8743_v10  ;;  %v3984_v15 = vsel %vm547_vm3, %v12693_v43, %v12692_v58  ;;  %v4177_v13 = vstv %s10835_s7  ;;  %v12696_v27 = vld [vmem:[#allocation16_spill] sm:$0xff]  ;;  %v12697_v58 = vld [vmem:[#allocation25_spill] sm:$0xff]  ;;  %s11239_s7 = sld [smem:[#allocation3 + $0x5f]] }
 0x54a   : > { %5164 = vrot.lane.b32.xlu1 %v5157_v55, %s6746_s18  ;;  %5162 = vrot.lane.b32.xlu0 %v5154_v31, %s6746_s18  ;;  %v5193_v55 = vrot.slane %v5179_v33, 1  ;;  %v3913_v31 = vadd.f32 %v3909_v50, %v10744_v51  ;;  %v3912_v38 = vadd.f32 %v3908_v24, %v10729_v1  ;;  %v3946_v51 = vsel %vm547_vm3, %v12696_v27, %v12695_v61 }
 0x54b   : > { %5166 = vrot.lane.b32.xlu2 %v5159_v7, %s6746_s18  ;;  %v5183_v7 = vmul.f32 %v5177_v52, %v9928_v59  ;;  %v5194_v33 = vrot.slane %v5181_v37, 1  ;;  %v5192_v40 = vsel %vm730_vm0, %v5190_v8, %v5191_v48  ;;  %v5161_v50 = vsel %vm730_vm0, %v5156_v46, %v5160_v62  ;;  %v12698_v37 = vld [vmem:[#allocation14_spill] sm:$0xff] }
 0x54c   : > { %v4751_v42 = vpop.permute.xlu1 %4750  ;;  %v4749_v4 = vpop.permute.xlu0 %4748  ;;  %v5182_v20 = vmul.f32 %v5177_v52, %v9935_v39  ;;  %v5215_v25 = vstv %s10861_s10  ;;  %v3988_v1 = vadd.f32 %v3984_v15, %v10756_v44  ;;  %v4183_v24 = vstv %s10865_s11  ;;  %s11269_s10 = sld [smem:[#allocation3 + $0x59]] }
 0x54d   : > { %v10910_v12 = vsel %vm354_vm2, %v4749_v4, %v4751_v42  ;;  %v10912_v30 = vpop.permute.xlu2 %4860  ;;  %v5195_v42 = vsel %vm730_vm0, %v5193_v55, %v5194_v33  ;;  %v5216_v4 = vmul.f32 %v5215_v25, %v8731_v45  ;;  %v3985_v43 = vsel %vm547_vm3, %v12698_v37, %v12697_v58  ;;  %s11291_s11 = sld [smem:[#allocation3 + $0xbb]] }
 0x54e   : > { %12694 = vst [vmem:[#allocation90_spill] sm:$0xff] %v10910_v12  ;;  %v4178_v8 = vmul.f32 %v4177_v13, %v8731_v45  ;;  %v10936_v60 = vmul.f32 %v4177_v13, %v8743_v10  ;;  %v4189_v46 = vstv %s10881_s12  ;;  %v10940_v52 = vadd.f32 %v10819_v34, %v3912_v38  ;;  %s11359_s12 = sld [smem:[#allocation3 + $0xbc]] }
 0x54f   : > { %v10943_v44 = vadd.f32 %v10826_v18, %v3913_v31  ;;  %v5198_v62 = vrot.slane %v5183_v7, 1  ;;  %v10948_v55 = vmul.f32 %v5215_v25, %v8743_v10  ;;  %v10951_v15 = vadd.f32 %v3946_v51, %v10741_v14  ;;  %v12701_v7 = vld [vmem:[#allocation21_spill] sm:$0xff] }
 0x550   : > { %v10954_v13 = vmul.f32 %v4183_v24, %v8743_v10  ;;  %v10957_v34 = vmul.f32 %v4183_v24, %v8731_v45  ;;  %v5196_v18 = vrot.slane %v5182_v20, 1  ;;  %v3989_v31 = vadd.f32 %v3985_v43, %v10753_v3  ;;  %v12703_v24 = vld [vmem:[#allocation31_spill] sm:$0xff]  ;;  %v12704_v20 = vld [vmem:[#allocation13_spill] sm:$0xff] }
 0x551   : > { %12699 = vst [vmem:[#allocation93_spill] sm:$0xff] %v10943_v44  ;;  %v4174_v38 = vadd.f32 %v4172_v56, %v3988_v1  ;;  %v10964_v61 = vmul.f32 %v4189_v46, %v8731_v45  ;;  %v5228_v51 = vrot.slane %v5216_v4, 1  ;;  %v4022_v58 = vsel %vm547_vm3, %v12704_v20, %v12703_v24  ;;  %v12719_v44 = vld [vmem:[#allocation26_spill] sm:$0xff] }
 0x552   : > { %5200 = vrot.lane.b32.xlu1 %v5192_v40, %s6746_s18  ;;  %5168 = vrot.lane.b32.xlu0 %v5161_v50, %s6746_s18  ;;  %12700 = vst [vmem:[#allocation94_spill] sm:$0xff] %v10951_v15  ;;  %v12702_v40 = vld [vmem:[#allocation28_spill] sm:$0xff]  ;;  %v4195_v1 = vstv %s10907_s8  ;;  %v5199_v4 = vsel %vm730_vm0, %v5194_v33, %v5198_v62  ;;  %v5229_v37 = vrot.slane %v10948_v55, 1  ;;  %v4636_v43 = vstv %s10919_s13  ;;  %v12707_v62 = vld [vmem:[#allocation23_spill] sm:$0xff]  ;;  %v12708_v55 = vld [vmem:[#allocation30_spill] sm:$0xff]  ;;  %s11366_s8 = sld [smem:[#allocation3 + $0x5a]] }
 0x553   : > { %5202 = vrot.lane.b32.xlu2 %v5195_v42, %s6746_s18  ;;  %v4023_v50 = vsel %vm547_vm3, %v12702_v40, %v12701_v7  ;;  %v5197_v7 = vsel %vm730_vm0, %v5191_v48, %v5196_v18  ;;  %v5220_v40 = vmul.f32 %v5215_v25, %v9935_v39  ;;  %v5217_v24 = vmul.f32 %v5215_v25, %v8733_v54  ;;  %s11410_s13 = sld [smem:[#allocation3 + $0xbd]] }
 0x554   : > { %v4787_v14 = vpop.permute.xlu1 %4786  ;;  %v4785_v27 = vpop.permute.xlu0 %4784  ;;  %v5221_v33 = vmul.f32 %v5215_v25, %v9928_v59  ;;  %v4060_v48 = vsel %vm547_vm3, %v12708_v55, %v12707_v62  ;;  %v11000_v18 = vadd.f32 %v10900_v32, %v3989_v31  ;;  %v4637_v20 = vmul.f32 %v4636_v43, %v8731_v45 }
 0x555   : > { %v10974_v42 = vsel %vm354_vm2, %v4787_v14, %v10774_v29  ;;  %v10978_v3 = vsel %vm354_vm2, %v10704_v2, %v4785_v27  ;;  %v10980_v56 = vpop.permute.xlu2 %4896  ;;  %v5219_v29 = vmul.f32 %v5215_v25, %v8758_v9  ;;  %v4026_v14 = vadd.f32 %v4022_v58, %v10758_v41  ;;  %v12710_v58 = vld [vmem:[#allocation44_spill] sm:$0xff] }
 0x556   : > { %12705 = vst [vmem:[#allocation97_spill] sm:$0xff] %v10974_v42  ;;  %v10992_v2 = vmul.f32 %v4189_v46, %v8743_v10  ;;  %v5230_v27 = vsel %vm730_vm0, %v5228_v51, %v5229_v37  ;;  %v11004_v42 = vmul.f32 %v4636_v43, %v8743_v10  ;;  %v4027_v41 = vadd.f32 %v4023_v50, %v10802_v49  ;;  %v12709_v46 = vld [vmem:[#allocation55_spill] sm:$0xff] }
 0x557   : > { %12706 = vst [vmem:[#allocation86_spill] sm:$0xff] %v10978_v3  ;;  %v4290_v51 = vsel %vm354_vm2, %v12710_v58, %v12709_v46  ;;  %v11011_v25 = vmul.f32 %v4195_v1, %v8731_v45  ;;  %v5234_v32 = vrot.slane %v5220_v40, 1  ;;  %v5231_v31 = vrot.slane %v5217_v24, 1  ;;  %v12711_v3 = vld [vmem:[#allocation85_spill] sm:$0xff] }
 0x558   : > { %v5232_v62 = vrot.slane %v5219_v29, 1  ;;  %v5253_v55 = vstv %s10959_s14  ;;  %v4064_v19 = vadd.f32 %v4060_v48, %v10799_v53  ;;  %v11018_v49 = vadd.f32 %v4178_v8, %v4026_v14  ;;  %v12714_v14 = vld [vmem:[#allocation27_spill] sm:$0xff]  ;;  %s11470_s14 = sld [smem:[#allocation3 + $0xbe]] }
 0x559   : > { %v11021_v50 = vmul.f32 %v4195_v1, %v8743_v10  ;;  %v4643_v29 = vrot.slane %v4637_v20, 1  ;;  %v4644_v53 = vrot.slane %v11004_v42, 1  ;;  %v12715_v1 = vld [vmem:[#allocation34_spill] sm:$0xff]  ;;  %v4294_v48 = vadd.f32 %v4290_v51, %v4174_v38 }
 0x55a   : > { %5206 = vrot.lane.b32.xlu1 %v5199_v4, %s6746_s18  ;;  %5204 = vrot.lane.b32.xlu0 %v5197_v7, %s6746_s18  ;;  %v5236_v4 = vrot.slane %v5221_v33, 1  ;;  %v12712_v7 = vld [vmem:[#allocation82_spill] sm:$0xff]  ;;  %v5255_v12 = vmul.f32 %v5253_v55, %v8733_v54  ;;  %v11039_v33 = vmul.f32 %v5253_v55, %v8758_v9  ;;  %v5233_v20 = vsel %vm730_vm0, %v5231_v31, %v5232_v62 }
 0x55b   : > { %5238 = vrot.lane.b32.xlu2 %v5230_v27, %s6746_s18  ;;  %v4482_v40 = vsel %vm547_vm3, %v12712_v7, %v12711_v3  ;;  %v4098_v27 = vsel %vm547_vm3, %v12715_v1, %v12714_v14  ;;  %v5235_v3 = vsel %vm730_vm0, %v5229_v37, %v5234_v32  ;;  %v5254_v42 = vmul.f32 %v5253_v55, %v8731_v45  ;;  %v12717_v7 = vld [vmem:[#allocation24_spill] sm:$0xff] }
 0x55c   : > { %v4823_v46 = vpop.permute.xlu1 %4822  ;;  %v4821_v58 = vpop.permute.xlu0 %4820  ;;  %v4486_v38 = vadd.f32 %v4482_v40, %v4294_v48  ;;  %v5237_v51 = vsel %vm730_vm0, %v5232_v62, %v5236_v4  ;;  %v5258_v1 = vmul.f32 %v5253_v55, %v9935_v39  ;;  %v4181_v37 = vadd.f32 %v10936_v60, %v4027_v41  ;;  %v12720_v41 = vld [vmem:[#allocation53_spill] sm:$0xff]  ;;  %v12721_v4 = vld [vmem:[#allocation38_spill] sm:$0xff]  ;;  %v12722_v48 = vld [vmem:[#allocation51_spill] sm:$0xff] }
 0x55d   : > { %v11029_v24 = vsel %vm354_vm2, %v4821_v58, %v4823_v46  ;;  %v11032_v8 = vpop.permute.xlu2 %4902  ;;  %v5256_v46 = vmul.f32 %v5253_v55, %v8743_v10  ;;  %v12716_v58 = vld [vmem:[#allocation29_spill] sm:$0xff]  ;;  %v4645_v32 = vsel %vm730_vm0, %v4643_v29, %v4644_v53  ;;  %v4639_v31 = vmul.f32 %v4636_v43, %v9935_v39 }
 0x55e   : > { %12713 = vst [vmem:[#allocation89_spill] sm:$0xff] %v11029_v24  ;;  %v4061_v14 = vsel %vm547_vm3, %v12717_v7, %v12716_v58  ;;  %v12718_v24 = vld [vmem:[#allocation37_spill] sm:$0xff]  ;;  %v11059_v15 = vadd.f32 %v4098_v27, %v10816_v26  ;;  %v11062_v40 = vadd.f32 %v10957_v34, %v4064_v19  ;;  %v5269_v62 = vrot.slane %v5255_v12, 1 }
 0x55f   : > { %v4099_v36 = vsel %vm547_vm3, %v12719_v44, %v12718_v24  ;;  %v5270_v44 = vrot.slane %v11039_v33, 1  ;;  %v11068_v60 = vadd.f32 %v4061_v14, %v10805_v21  ;;  %v4291_v43 = vsel %vm354_vm2, %v12721_v4, %v12720_v41  ;;  %v12726_v41 = vld [vmem:[#allocation74_spill] sm:$0xff] }
 0x560   : > { %v5266_v26 = vrot.slane %v5254_v42, 1  ;;  %v5267_v24 = vrot.slane %v5256_v46, 1  ;;  %v11077_v19 = vadd.f32 %v4099_v36, %v10809_v17  ;;  %v4650_v34 = vadd.f32 %v4645_v32, %v4486_v38  ;;  %v12724_v32 = vld [vmem:[#allocation61_spill] sm:$0xff] }
 0x561   : > { %v5291_v27 = vstv %s11023_s15  ;;  %v5272_v21 = vrot.slane %v5258_v1, 1  ;;  %v4646_v58 = vrot.slane %v4639_v31, 1  ;;  %v4295_v17 = vadd.f32 %v4291_v43, %v11000_v18  ;;  %v12725_v18 = vld [vmem:[#allocation50_spill] sm:$0xff]  ;;  %s6518_s15 = sld [smem:[#allocation3 + $0xbf]] }
 0x562   : > { %5242 = vrot.lane.b32.xlu1 %v5235_v3, %s6746_s18  ;;  %5240 = vrot.lane.b32.xlu0 %v5233_v20, %s6746_s18  ;;  %v12723_v3 = vld [vmem:[#allocation58_spill] sm:$0xff]  ;;  %v5271_v14 = vsel %vm730_vm0, %v5269_v62, %v5270_v44  ;;  %v4653_v38 = vstv %s11041_s16  ;;  %v11101_v1 = vmul.f32 %v5291_v27, %v8743_v10  ;;  %v4315_v31 = vsel %vm354_vm2, %v12725_v18, %v12724_v32  ;;  %v12729_v32 = vld [vmem:[#allocation59_spill] sm:$0xff]  ;;  %s6519_s16 = sld [smem:[#allocation3 + $0xd0]] }
 0x563   : > { %5244 = vrot.lane.b32.xlu2 %v5237_v51, %s6746_s18  ;;  %v4314_v20 = vsel %vm354_vm2, %v12723_v3, %v12722_v48  ;;  %v5268_v51 = vsel %vm730_vm0, %v5266_v26, %v5267_v24  ;;  %v4487_v4 = vadd.f32 %v12726_v41, %v4295_v17  ;;  %v5273_v62 = vsel %vm730_vm0, %v5267_v24, %v5272_v21  ;;  %v12728_v48 = vld [vmem:[#allocation40_spill] sm:$0xff]  ;;  %v12730_v18 = vld [vmem:[#allocation54_spill] sm:$0xff] }
 0x564   : > { %v4859_v12 = vpop.permute.xlu1 %4858  ;;  %v4827_v29 = vpop.permute.xlu0 %4826  ;;  %v5293_v43 = vmul.f32 %v5291_v27, %v8733_v54  ;;  %v4647_v26 = vsel %vm730_vm0, %v4644_v53, %v4646_v58  ;;  %v5295_v24 = vmul.f32 %v5291_v27, %v8758_v9  ;;  %v5305_v53 = vrot.slane %v11101_v1, 1 }
 0x565   : > { %v4866_v42 = vsel %vm354_vm2, %v4859_v12, %v10912_v30  ;;  %v11087_v46 = vsel %vm354_vm2, %v10845_v57, %v4827_v29  ;;  %v11089_v7 = vpop.permute.xlu2 %4938  ;;  %v5292_v30 = vmul.f32 %v5291_v27, %v8731_v45  ;;  %v5259_v57 = vmul.f32 %v5253_v55, %v9928_v59  ;;  %v12727_v29 = vld [vmem:[#allocation33_spill] sm:$0xff] }
 0x566   : > { %v11092_v36 = vadd.f32 %v4866_v42, %v4650_v34  ;;  %v4655_v12 = vmul.f32 %v4653_v38, %v8743_v10  ;;  %v4656_v34 = vmul.f32 %v4653_v38, %v9935_v39  ;;  %v4654_v55 = vmul.f32 %v4653_v38, %v8731_v45 }
 0x567   : > { %v4137_v3 = vsel %vm547_vm3, %v12728_v48, %v12727_v29  ;;  %v4318_v42 = vadd.f32 %v4314_v20, %v11018_v49  ;;  %v5304_v21 = vrot.slane %v5292_v30, 1  ;;  %v5274_v58 = vrot.slane %v5259_v57, 1 }
 0x568   : > { %v11125_v17 = vstv %s11074_s17  ;;  %v4319_v38 = vadd.f32 %v4315_v31, %v4181_v37  ;;  %v4338_v41 = vsel %vm354_vm2, %v12730_v18, %v12729_v32  ;;  %v4651_v20 = vadd.f32 %v4647_v26, %v4487_v4  ;;  %v12732_v18 = vld [vmem:[#allocation91_spill] sm:$0xff]  ;;  %s6520_s17 = sld [smem:[#allocation3 + $0xd1]] }
 0x569   : > { %v4661_v30 = vrot.slane %v4655_v12, 1  ;;  %v4663_v48 = vrot.slane %v4656_v34, 1  ;;  %v4660_v1 = vrot.slane %v4654_v55, 1  ;;  %v5297_v37 = vmul.f32 %v5291_v27, %v9928_v59  ;;  %v12731_v55 = vld [vmem:[#allocation87_spill] sm:$0xff] }
 0x56a   : > { %5278 = vrot.lane.b32.xlu1 %v5271_v14, %s6746_s18  ;;  %5276 = vrot.lane.b32.xlu0 %v5268_v51, %s6746_s18  ;;  %v5307_v51 = vrot.slane %v5293_v43, 1  ;;  %v5308_v31 = vrot.slane %v5295_v24, 1  ;;  %v4671_v4 = vmul.f32 %v11125_v17, %v8731_v45  ;;  %v5306_v26 = vsel %vm730_vm0, %v5304_v21, %v5305_v53 }
 0x56b   : > { %5280 = vrot.lane.b32.xlu2 %v5273_v62, %s6746_s18  ;;  %v5275_v43 = vsel %vm730_vm0, %v5270_v44, %v5274_v58  ;;  %v5296_v12 = vmul.f32 %v5291_v27, %v9935_v39  ;;  %v5465_v34 = vstv %s11104_s19  ;;  %v4510_v32 = vadd.f32 %v12731_v55, %v4318_v42  ;;  %s6521_s19 = sld [smem:[#allocation3 + $0xd2]] }
 0x56c   : > { %v4865_v49 = vpop.permute.xlu1 %4864  ;;  %v4863_v14 = vpop.permute.xlu0 %4862  ;;  %v5466_v24 = vmul.f32 %v5465_v34, %v8731_v45  ;;  %v4664_v21 = vsel %vm730_vm0, %v4661_v30, %v4663_v48  ;;  %v4662_v33 = vsel %vm730_vm0, %v4660_v1, %v4661_v30  ;;  %v11157_v44 = vmul.f32 %v11125_v17, %v8743_v10 }
 0x56d   : > { %v4867_v29 = vsel %vm354_vm2, %v4863_v14, %v4865_v49  ;;  %v11134_v57 = vpop.permute.xlu2 %4974  ;;  %v4511_v49 = vadd.f32 %v12732_v18, %v4319_v38  ;;  %v4187_v14 = vadd.f32 %v10954_v13, %v11068_v60  ;;  %v4192_v27 = vadd.f32 %v10964_v61, %v11059_v15  ;;  %v12733_v38 = vld [vmem:[#allocation43_spill] sm:$0xff] }
 0x56e   : > { %v11136_v62 = vadd.f32 %v4867_v29, %v4651_v20  ;;  %v5309_v20 = vsel %vm730_vm0, %v5307_v51, %v5308_v31  ;;  %v11163_v42 = vadd.f32 %v10992_v2, %v11077_v19  ;;  %v5312_v13 = vrot.slane %v5297_v37, 1  ;;  %v12734_v51 = vld [vmem:[#allocation20_spill] sm:$0xff] }
 0x56f   : > { %v11168_v60 = vmul.f32 %v5465_v34, %v8743_v10  ;;  %v11171_v58 = vadd.f32 %v4137_v3, %v10873_v22  ;;  %v4136_v15 = vsel %vm547_vm3, %v12734_v51, %v12733_v38  ;;  %v4342_v61 = vadd.f32 %v4338_v41, %v11062_v40 }
 0x570   : > { %v5310_v2 = vrot.slane %v5296_v12, 1  ;;  %v4668_v29 = vadd.f32 %v4664_v21, %v4511_v49  ;;  %v4667_v48 = vadd.f32 %v4662_v33, %v4510_v32  ;;  %v4677_v22 = vrot.slane %v4671_v4, 1  ;;  %v12735_v49 = vld [vmem:[#allocation57_spill] sm:$0xff]  ;;  %v12737_v21 = vld [vmem:[#allocation88_spill] sm:$0xff] }
 0x571   : > { %v5478_v3 = vrot.slane %v5466_v24, 2  ;;  %v4678_v40 = vrot.slane %v11157_v44, 1  ;;  %v4687_v41 = vstv %s11132_s24  ;;  %v5313_v55 = vsel %vm730_vm0, %v5308_v31, %v5312_v13  ;;  %s6503_s24 = sld [smem:[#allocation3 + $0xa0]] }
 0x572   : > { %5314 = vrot.lane.b32.xlu1 %v5306_v26, %s6746_s18  ;;  %5282 = vrot.lane.b32.xlu0 %v5275_v43, %s6746_s18  ;;  %v5479_v4 = vrot.slane %v11168_v60, 2  ;;  %v5311_v32 = vsel %vm730_vm0, %v5305_v53, %v5310_v2  ;;  %v5467_v18 = vmul.f32 %v5465_v34, %v8733_v54  ;;  %v4534_v33 = vadd.f32 %v12737_v21, %v4342_v61  ;;  %v12738_v2 = vld [vmem:[#allocation35_spill] sm:$0xff] }
 0x573   : > { %5316 = vrot.lane.b32.xlu2 %v5309_v20, %s6746_s18  ;;  %v12736_v20 = vld [vmem:[#allocation64_spill] sm:$0xff]  ;;  %v5471_v31 = vmul.f32 %v5465_v34, %v9928_v59  ;;  %v4679_v53 = vsel %vm730_vm0, %v4677_v22, %v4678_v40  ;;  %v4688_v13 = vmul.f32 %v4687_v41, %v8731_v45  ;;  %v11209_v60 = vmul.f32 %v4687_v41, %v8743_v10 }
 0x574   : > { %v4901_v19 = vpop.permute.xlu1 %4900  ;;  %v4899_v30 = vpop.permute.xlu0 %4898  ;;  %v4339_v24 = vsel %vm354_vm2, %v12736_v20, %v12735_v49  ;;  %v5480_v44 = vsel %vm1475_vm1, %v5478_v3, %v5479_v4  ;;  %v4673_v38 = vmul.f32 %v11125_v17, %v9935_v39  ;;  %v4140_v51 = vadd.f32 %v4136_v15, %v10870_v35 }
 0x575   : > { %v4905_v1 = vsel %vm354_vm2, %v4901_v19, %v11032_v8  ;;  %v4904_v37 = vsel %vm354_vm2, %v10980_v56, %v4899_v30  ;;  %v11188_v26 = vpop.permute.xlu2 %5010  ;;  %v5470_v8 = vmul.f32 %v5465_v34, %v9935_v39  ;;  %v5469_v56 = vmul.f32 %v5465_v34, %v8758_v9  ;;  %v12739_v19 = vld [vmem:[#allocation42_spill] sm:$0xff]  ;;  %v12741_v30 = vld [vmem:[#allocation56_spill] sm:$0xff] }
 0x576   : > { %v11190_v43 = vadd.f32 %v4905_v1, %v4668_v29  ;;  %v11192_v12 = vadd.f32 %v4904_v37, %v4667_v48  ;;  %v4218_v61 = vsel %vm354_vm2, %v12739_v19, %v12738_v2  ;;  %v12740_v29 = vld [vmem:[#allocation67_spill] sm:$0xff]  ;;  %v5481_v22 = vrot.slane %v5467_v18, 2 }
 0x577   : > { %v4362_v34 = vsel %vm354_vm2, %v12741_v30, %v12740_v29  ;;  %v5484_v48 = vrot.slane %v5470_v8, 2  ;;  %v5482_v3 = vrot.slane %v5469_v56, 2  ;;  %v5503_v1 = vstv %s11177_s26  ;;  %s6504_s26 = sld [smem:[#allocation3 + $0xa1]] }
 0x578   : > { %v4343_v17 = vadd.f32 %v4339_v24, %v4187_v14  ;;  %v11225_v35 = vstv %s11180_s27  ;;  %v4684_v49 = vadd.f32 %v4679_v53, %v4534_v33  ;;  %v5486_v20 = vrot.slane %v5471_v31, 2  ;;  %s6523_s27 = sld [smem:[#allocation3 + $0xd4]] }
 0x579   : > { %v4680_v8 = vrot.slane %v4673_v38, 1  ;;  %v4366_v56 = vadd.f32 %v4362_v34, %v4192_v27  ;;  %v5505_v14 = vmul.f32 %v5503_v1, %v8733_v54  ;;  %v11237_v24 = vmul.f32 %v5503_v1, %v8758_v9  ;;  %v12742_v34 = vld [vmem:[#allocation65_spill] sm:$0xff] }
 0x57a   : > { %5320 = vrot.lane.b32.xlu1 %v5313_v55, %s6746_s18  ;;  %5318 = vrot.lane.b32.xlu0 %v5311_v32, %s6746_s18  ;;  %v4694_v55 = vrot.slane %v4688_v13, 1  ;;  %v4695_v32 = vrot.slane %v11209_v60, 1  ;;  %v5485_v33 = vsel %vm1475_vm1, %v5479_v4, %v5484_v48  ;;  %v5504_v31 = vmul.f32 %v5503_v1, %v8731_v45  ;;  %v12743_v48 = vld [vmem:[#allocation60_spill] sm:$0xff] }
 0x57b   : > { %5488 = vrot.lane.b32.xlu2 %v5480_v44, %s6745_s9  ;;  %v5483_v44 = vsel %vm1475_vm1, %v5481_v22, %v5482_v3  ;;  %v5506_v53 = vmul.f32 %v5503_v1, %v8743_v10  ;;  %v4535_v13 = vadd.f32 %v10638_v0, %v4343_v17  ;;  %v4558_v27 = vadd.f32 %v10702_v47, %v4366_v56 }
 0x57c   : > { %v4937_v15 = vpop.permute.xlu1 %4936  ;;  %v4935_v37 = vpop.permute.xlu0 %4934  ;;  %v5487_v60 = vsel %vm1475_vm1, %v5482_v3, %v5486_v20  ;;  %v5508_v38 = vmul.f32 %v5503_v1, %v9935_v39  ;;  %v4198_v19 = vadd.f32 %v11011_v25, %v4140_v51  ;;  %v4696_v29 = vsel %vm730_vm0, %v4694_v55, %v4695_v32 }
 0x57d   : > { %v4942_v21 = vsel %vm354_vm2, %v4935_v37, %v4937_v15  ;;  %v11231_v18 = vpop.permute.xlu2 %5016  ;;  %v4681_v4 = vsel %vm730_vm0, %v4678_v40, %v4680_v8  ;;  %v4690_v30 = vmul.f32 %v4687_v41, %v9935_v39  ;;  %v4363_v22 = vsel %vm354_vm2, %v12743_v48, %v12742_v34  ;;  %v12746_v34 = vld [vmem:[#allocation73_spill] sm:$0xff]  ;;  %v12747_v48 = vld [vmem:[#allocation62_spill] sm:$0xff] }
 0x57e   : > { %v11233_v2 = vadd.f32 %v4942_v21, %v4684_v49  ;;  %v4199_v0 = vadd.f32 %v11021_v50, %v11171_v58  ;;  %v5519_v47 = vrot.slane %v5505_v14, 2  ;;  %v5520_v25 = vrot.slane %v11237_v24, 2 }
 0x57f   : > { %v11262_v51 = vadd.f32 %v4218_v61, %v10895_v63  ;;  %v11266_v40 = vmul.f32 %v11225_v35, %v8731_v45  ;;  %v5516_v41 = vrot.slane %v5504_v31, 2  ;;  %v5517_v3 = vrot.slane %v5506_v53, 2  ;;  %v12745_v31 = vld [vmem:[#allocation70_spill] sm:$0xff] }
 0x580   : > { %v4701_v58 = vadd.f32 %v4696_v29, %v4558_v27  ;;  %v4685_v17 = vadd.f32 %v4681_v4, %v4535_v13  ;;  %v5541_v37 = vstv %s11227_s6  ;;  %v5522_v49 = vrot.slane %v5508_v38, 2  ;;  %s11652_s6 = sld [smem:[#allocation3 + $0xa2]] }
 0x581   : > { %v4367_v63 = vadd.f32 %v4363_v22, %v11163_v42  ;;  %v4697_v21 = vrot.slane %v4690_v30, 1  ;;  %v5521_v14 = vsel %vm1475_vm1, %v5519_v47, %v5520_v25  ;;  %v4704_v24 = vstv %s11239_s7  ;;  %s11674_s7 = sld [smem:[#allocation3 + $0xd5]] }
 0x582   : > { %5492 = vrot.lane.b32.xlu1 %v5485_v33, %s6745_s9  ;;  %5490 = vrot.lane.b32.xlu0 %v5483_v44, %s6745_s9  ;;  %v5518_v33 = vsel %vm1475_vm1, %v5516_v41, %v5517_v3  ;;  %v5542_v42 = vmul.f32 %v5541_v37, %v8731_v45  ;;  %v11288_v44 = vmul.f32 %v5541_v37, %v8743_v10 }
 0x583   : > { %5494 = vrot.lane.b32.xlu2 %v5487_v60, %s6745_s9  ;;  %v4559_v13 = vadd.f32 %v10698_v23, %v4367_v63  ;;  %v5523_v27 = vsel %vm1475_vm1, %v5517_v3, %v5522_v49  ;;  %v5543_v60 = vmul.f32 %v5541_v37, %v8733_v54  ;;  %v4698_v38 = vsel %vm730_vm0, %v4695_v32, %v4697_v21 }
 0x584   : > { %v4973_v50 = vpop.permute.xlu1 %4972  ;;  %v4941_v15 = vpop.permute.xlu0 %4940  ;;  %v4706_v29 = vmul.f32 %v4704_v24, %v8743_v10  ;;  %v4707_v4 = vmul.f32 %v4704_v24, %v9935_v39  ;;  %v11305_v30 = vmul.f32 %v11225_v35, %v8743_v10  ;;  %v11309_v23 = vmul.f32 %v11225_v35, %v9935_v39 }
 0x585   : > { %v4980_v61 = vsel %vm354_vm2, %v4973_v50, %v11134_v57  ;;  %v4943_v20 = vsel %vm354_vm2, %v11089_v7, %v4941_v15  ;;  %v11277_v55 = vpop.permute.xlu2 %5052  ;;  %v5509_v57 = vmul.f32 %v5503_v1, %v9928_v59  ;;  %v12744_v7 = vld [vmem:[#allocation63_spill] sm:$0xff]  ;;  %v4705_v1 = vmul.f32 %v4704_v24, %v8731_v45 }
 0x586   : > { %v11279_v8 = vadd.f32 %v4980_v61, %v4701_v58  ;;  %v11281_v56 = vadd.f32 %v4943_v20, %v4685_v17  ;;  %v4386_v53 = vsel %vm354_vm2, %v12745_v31, %v12744_v7  ;;  %v5545_v32 = vmul.f32 %v5541_v37, %v8758_v9 }
 0x587   : > { %v4387_v22 = vsel %vm354_vm2, %v12747_v48, %v12746_v34  ;;  %v5554_v47 = vrot.slane %v5542_v42, 2  ;;  %v5555_v41 = vrot.slane %v11288_v44, 2  ;;  %v5524_v3 = vrot.slane %v5509_v57, 2  ;;  %v12753_v48 = vld [vmem:[#allocation36_spill] sm:$0xff] }
 0x588   : > { %v4390_v50 = vadd.f32 %v4386_v53, %v4198_v19  ;;  %v11320_v58 = vstv %s11269_s10  ;;  %v4702_v17 = vadd.f32 %v4698_v38, %v4559_v13  ;;  %v5557_v49 = vrot.slane %v5543_v60, 2  ;;  %s11709_s10 = sld [smem:[#allocation3 + $0xd6]] }
 0x589   : > { %v4712_v61 = vrot.slane %v4706_v29, 1  ;;  %v4714_v20 = vrot.slane %v4707_v4, 1  ;;  %v4711_v21 = vrot.slane %v4705_v1, 1  ;;  %v4391_v24 = vadd.f32 %v4387_v22, %v4199_v0  ;;  %v12749_v1 = vld [vmem:[#allocation46_spill] sm:$0xff] }
 0x58a   : > { %5528 = vrot.lane.b32.xlu1 %v5521_v14, %s6745_s9  ;;  %5526 = vrot.lane.b32.xlu0 %v5518_v33, %s6745_s9  ;;  %v5547_v42 = vmul.f32 %v5541_v37, %v9928_v59  ;;  %v5558_v19 = vrot.slane %v5545_v32, 2  ;;  %v5556_v44 = vsel %vm1475_vm1, %v5554_v47, %v5555_v41  ;;  %v5525_v57 = vsel %vm1475_vm1, %v5520_v25, %v5524_v3  ;;  %v12748_v25 = vld [vmem:[#allocation39_spill] sm:$0xff]  ;;  %v12750_v32 = vld [vmem:[#allocation81_spill] sm:$0xff] }
 0x58b   : > { %5530 = vrot.lane.b32.xlu2 %v5523_v27, %s6745_s9  ;;  %v5546_v7 = vmul.f32 %v5541_v37, %v9935_v39  ;;  %v5579_v31 = vstv %s11291_s11  ;;  %v4582_v53 = vadd.f32 %v10772_v28, %v4390_v50  ;;  %v4583_v13 = vadd.f32 %v10843_v16, %v4391_v24  ;;  %v12751_v28 = vld [vmem:[#allocation66_spill] sm:$0xff]  ;;  %s6506_s11 = sld [smem:[#allocation3 + $0xa3]] }
 0x58c   : > { %v4979_v35 = vpop.permute.xlu1 %4978  ;;  %v4977_v15 = vpop.permute.xlu0 %4976  ;;  %v5559_v27 = vsel %vm1475_vm1, %v5557_v49, %v5558_v19  ;;  %v5580_v0 = vmul.f32 %v5579_v31, %v8731_v45  ;;  %v4592_v60 = vrot.slane %v11266_v40, 1  ;;  %v4593_v38 = vrot.slane %v11305_v30, 1  ;;  %v12752_v30 = vld [vmem:[#allocation49_spill] sm:$0xff] }
 0x58d   : > { %v4981_v63 = vsel %vm354_vm2, %v4977_v15, %v4979_v35  ;;  %v11323_v14 = vpop.permute.xlu2 %5088  ;;  %v4715_v29 = vsel %vm730_vm0, %v4712_v61, %v4714_v20  ;;  %v4713_v4 = vsel %vm730_vm0, %v4711_v21, %v4712_v61  ;;  %v4242_v37 = vsel %vm354_vm2, %v12749_v1, %v12748_v25 }
 0x58e   : > { %v11325_v33 = vadd.f32 %v4981_v63, %v4702_v17  ;;  %v4410_v16 = vsel %vm547_vm3, %v12751_v28, %v12750_v32  ;;  %v5562_v34 = vrot.slane %v5547_v42, 2  ;;  %v11349_v40 = vmul.f32 %v5579_v31, %v8743_v10  ;;  %v12756_v32 = vld [vmem:[#allocation41_spill] sm:$0xff]  ;;  %v12757_v28 = vld [vmem:[#allocation48_spill] sm:$0xff] }
 0x58f   : > { %v4219_v22 = vsel %vm354_vm2, %v12753_v48, %v12752_v30  ;;  %v4595_v47 = vrot.slane %v11309_v23, 1  ;;  %v11357_v3 = vmul.f32 %v11320_v58, %v8743_v10  ;;  %v5560_v50 = vrot.slane %v5546_v7, 2  ;;  %v12760_v48 = vld [vmem:[#allocation71_spill] sm:$0xff] }
 0x590   : > { %v4603_v35 = vmul.f32 %v11320_v58, %v8731_v45  ;;  %v4719_v15 = vadd.f32 %v4715_v29, %v4583_v13  ;;  %v4718_v63 = vadd.f32 %v4713_v4, %v4582_v53  ;;  %v5592_v61 = vrot.slane %v5580_v0, 2  ;;  %v12754_v4 = vld [vmem:[#allocation17_spill] sm:$0xff] }
 0x591   : > { %v4414_v20 = vadd.f32 %v4410_v16, %v11262_v51  ;;  %v4594_v23 = vsel %vm730_vm0, %v4592_v60, %v4593_v38  ;;  %v5563_v7 = vsel %vm1475_vm1, %v5558_v19, %v5562_v34  ;;  %v5593_v51 = vrot.slane %v11349_v40, 2  ;;  %v12755_v19 = vld [vmem:[#allocation339_spill] sm:$0xff]  ;;  %v12758_v34 = vld [vmem:[#allocation69_spill] sm:$0xff]  ;;  %v12759_v40 = vld [vmem:[#allocation76_spill] sm:$0xff] }
 0x592   : > { %5564 = vrot.lane.b32.xlu1 %v5556_v44, %s6745_s9  ;;  %5532 = vrot.lane.b32.xlu0 %v5525_v57, %s6745_s9  ;;  %v5561_v53 = vsel %vm1475_vm1, %v5555_v41, %v5560_v50  ;;  %v5584_v13 = vmul.f32 %v5579_v31, %v9935_v39  ;;  %v4609_v0 = vrot.slane %v4603_v35, 1  ;;  %v5585_v29 = vmul.f32 %v5579_v31, %v9928_v59  ;;  %v12761_v50 = vld [vmem:[#allocation78_spill] sm:$0xff] }
 0x593   : > { %5566 = vrot.lane.b32.xlu2 %v5559_v27, %s6745_s9  ;;  %v5581_v27 = vmul.f32 %v5579_v31, %v8733_v54  ;;  %v5594_v60 = vsel %vm1475_vm1, %v5592_v61, %v5593_v51  ;;  %v3947_v25 = vsel %vm547_vm3, %v12755_v19, %v12754_v4  ;;  %v4246_v41 = vadd.f32 %v4242_v37, %v10940_v52  ;;  %v12763_v4 = vld [vmem:[#allocation83_spill] sm:$0xff] }
 0x594   : > { %v5015_v17 = vpop.permute.xlu1 %5014  ;;  %v5013_v49 = vpop.permute.xlu0 %5012  ;;  %v4223_v1 = vadd.f32 %v4219_v22, %v10897_v6  ;;  %v4243_v16 = vsel %vm354_vm2, %v12757_v28, %v12756_v32  ;;  %v4411_v30 = vsel %vm547_vm3, %v12759_v40, %v12758_v34  ;;  %v4599_v35 = vadd.f32 %v4594_v23, %v4414_v20  ;;  %v12764_v32 = vld [vmem:[#allocation93_spill] sm:$0xff]  ;;  %v12765_v34 = vld [vmem:[#allocation47_spill] sm:$0xff]  ;;  %v12766_v40 = vld [vmem:[#allocation32_spill] sm:$0xff] }
 0x595   : > { %v5019_v21 = vsel %vm354_vm2, %v5015_v17, %v11231_v18  ;;  %v5018_v24 = vsel %vm354_vm2, %v11188_v26, %v5013_v49  ;;  %v11372_v42 = vpop.permute.xlu2 %5124  ;;  %v5583_v18 = vmul.f32 %v5579_v31, %v8758_v9  ;;  %v4610_v26 = vrot.slane %v11357_v3, 1 }
 0x596   : > { %v11374_v44 = vadd.f32 %v5019_v21, %v4719_v15  ;;  %v11376_v57 = vadd.f32 %v5018_v24, %v4718_v63  ;;  %v4434_v31 = vsel %vm547_vm3, %v12761_v50, %v12760_v48  ;;  %v5598_v52 = vrot.slane %v5584_v13, 2 }
 0x597   : > { %v5595_v6 = vrot.slane %v5581_v27, 2  ;;  %v5596_v37 = vrot.slane %v5583_v18, 2  ;;  %v5617_v22 = vstv %s11359_s12  ;;  %v4756_v17 = vadd.f32 %v10839_v11, %v4599_v35  ;;  %v12767_v35 = vld [vmem:[#allocation68_spill] sm:$0xff]  ;;  %s6507_s12 = sld [smem:[#allocation3 + $0xa4]] }
 0x598   : > { %v4596_v15 = vsel %vm730_vm0, %v4593_v38, %v4595_v47  ;;  %v4611_v49 = vsel %vm730_vm0, %v4609_v0, %v4610_v26  ;;  %v5600_v20 = vrot.slane %v5585_v29, 2  ;;  %v4415_v23 = vadd.f32 %v4411_v30, %v4223_v1  ;;  %v12762_v29 = vld [vmem:[#allocation94_spill] sm:$0xff] }
 0x599   : > { %v4605_v21 = vmul.f32 %v11320_v58, %v9935_v39  ;;  %v4619_v24 = vstv %s11366_s8  ;;  %v4438_v11 = vadd.f32 %v4434_v31, %v4246_v41  ;;  %v5619_v47 = vmul.f32 %v5617_v22, %v8733_v54  ;;  %s11754_s8 = sld [smem:[#allocation3 + $0xd7]] }
 0x59a   : > { %5570 = vrot.lane.b32.xlu1 %v5563_v7, %s6745_s9  ;;  %5568 = vrot.lane.b32.xlu0 %v5561_v53, %s6745_s9  ;;  %v11422_v13 = vmul.f32 %v5617_v22, %v8758_v9  ;;  %v5599_v27 = vsel %vm1475_vm1, %v5593_v51, %v5598_v52  ;;  %v5597_v18 = vsel %vm1475_vm1, %v5595_v6, %v5596_v37  ;;  %v12768_v52 = vld [vmem:[#allocation72_spill] sm:$0xff] }
 0x59b   : > { %5602 = vrot.lane.b32.xlu2 %v5594_v60, %s6745_s9  ;;  %v5618_v0 = vmul.f32 %v5617_v22, %v8731_v45  ;;  %v5620_v58 = vmul.f32 %v5617_v22, %v8743_v10  ;;  %v3951_v60 = vadd.f32 %v3947_v25, %v10747_v5  ;;  %v4168_v19 = vadd.f32 %v12763_v4, %v12762_v29 }
 0x59c   : > { %v5051_v63 = vpop.permute.xlu1 %5050  ;;  %v5049_v61 = vpop.permute.xlu0 %5048  ;;  %v5601_v41 = vsel %vm1475_vm1, %v5596_v37, %v5600_v20  ;;  %v5622_v1 = vmul.f32 %v5617_v22, %v9935_v39  ;;  %v4247_v28 = vadd.f32 %v4243_v16, %v12764_v32  ;;  %v4266_v51 = vsel %vm354_vm2, %v12766_v40, %v12765_v34  ;;  %v12773_v32 = vld [vmem:[#allocation52_spill] sm:$0xff] }
 0x59d   : > { %v5056_v7 = vsel %vm547_vm3, %v5049_v61, %v5051_v63  ;;  %v11416_v53 = vpop.permute.xlu2 %5130  ;;  %v4612_v30 = vrot.slane %v4605_v21, 1  ;;  %v4620_v48 = vmul.f32 %v4619_v24, %v8731_v45  ;;  %v4600_v50 = vadd.f32 %v4596_v15, %v4415_v23  ;;  %v12769_v63 = vld [vmem:[#allocation90_spill] sm:$0xff] }
 0x59e   : > { %v11418_v38 = vadd.f32 %v5056_v7, %v4756_v17  ;;  %v4616_v31 = vadd.f32 %v4611_v49, %v4438_v11  ;;  %v5633_v5 = vrot.slane %v5619_v47, 2  ;;  %v5634_v25 = vrot.slane %v11422_v13, 2  ;;  %v12770_v49 = vld [vmem:[#allocation86_spill] sm:$0xff] }
 0x59f   : > { %v4435_v16 = vsel %vm547_vm3, %v12768_v52, %v12767_v35  ;;  %v4621_v6 = vmul.f32 %v4619_v24, %v8743_v10  ;;  %v5630_v37 = vrot.slane %v5618_v0, 2  ;;  %v5631_v17 = vrot.slane %v5620_v58, 2  ;;  %v12774_v35 = vld [vmem:[#allocation75_spill] sm:$0xff] }
 0x5a0   : > { %v4757_v15 = vadd.f32 %v12769_v63, %v4600_v50  ;;  %v4794_v61 = vadd.f32 %v12770_v49, %v4616_v31  ;;  %v5655_v21 = vstv %s11410_s13  ;;  %v5636_v7 = vrot.slane %v5622_v1, 2  ;;  %v12772_v1 = vld [vmem:[#allocation45_spill] sm:$0xff]  ;;  %v12775_v52 = vld [vmem:[#allocation79_spill] sm:$0xff]  ;;  %v12777_v63 = vld [vmem:[#allocation84_spill] sm:$0xff]  ;;  %s6508_s13 = sld [smem:[#allocation3 + $0xa5]] }
 0x5a1   : > { %v4613_v11 = vsel %vm730_vm0, %v4610_v26, %v4612_v30  ;;  %v4622_v47 = vmul.f32 %v4619_v24, %v9935_v39  ;;  %v4439_v0 = vadd.f32 %v4435_v16, %v4247_v28  ;;  %v5635_v4 = vsel %vm1475_vm1, %v5633_v5, %v5634_v25 }
 0x5a2   : > { %5606 = vrot.lane.b32.xlu1 %v5599_v27, %s6745_s9  ;;  %5604 = vrot.lane.b32.xlu0 %v5597_v18, %s6745_s9  ;;  %v5632_v3 = vsel %vm1475_vm1, %v5630_v37, %v5631_v17  ;;  %v5656_v26 = vmul.f32 %v5655_v21, %v8731_v45  ;;  %v11467_v24 = vmul.f32 %v5655_v21, %v8743_v10  ;;  %v4626_v50 = vrot.slane %v4620_v48, 1  ;;  %v12776_v37 = vld [vmem:[#allocation77_spill] sm:$0xff] }
 0x5a3   : > { %5608 = vrot.lane.b32.xlu2 %v5601_v41, %s6745_s9  ;;  %v4267_v28 = vsel %vm354_vm2, %v12773_v32, %v12772_v1  ;;  %v5637_v34 = vsel %vm1475_vm1, %v5631_v17, %v5636_v7  ;;  %v5657_v40 = vmul.f32 %v5655_v21, %v8733_v54  ;;  %v4270_v30 = vadd.f32 %v4266_v51, %v4168_v19 }
 0x5a4   : > { %v5087_v20 = vpop.permute.xlu1 %5086  ;;  %v5055_v23 = vpop.permute.xlu0 %5054  ;;  %v4627_v31 = vrot.slane %v4621_v6, 1  ;;  %v4629_v5 = vrot.slane %v4622_v47, 1  ;;  %v4617_v16 = vadd.f32 %v4613_v11, %v4439_v0  ;;  %v4459_v17 = vsel %vm547_vm3, %v12777_v63, %v12776_v37  ;;  %v12778_v6 = vld [vmem:[#allocation97_spill] sm:$0xff] }
 0x5a5   : > { %v5094_v13 = vsel %vm547_vm3, %v5087_v20, %v11323_v14  ;;  %v5057_v27 = vsel %vm547_vm3, %v11277_v55, %v5055_v23  ;;  %v11457_v18 = vpop.permute.xlu2 %5166  ;;  %v5623_v14 = vmul.f32 %v5617_v22, %v9928_v59  ;;  %v12771_v55 = vld [vmem:[#allocation80_spill] sm:$0xff]  ;;  %v4458_v22 = vsel %vm547_vm3, %v12775_v52, %v12774_v35 }
 0x5a6   : > { %v11459_v58 = vadd.f32 %v5094_v13, %v4794_v61  ;;  %v11461_v29 = vadd.f32 %v5057_v27, %v4757_v15  ;;  %v4169_v41 = vadd.f32 %v12771_v55, %v3951_v60  ;;  %v5659_v60 = vmul.f32 %v5655_v21, %v8758_v9 }
 0x5a7   : > { %v5668_v15 = vrot.slane %v5656_v26, 2  ;;  %v5669_v19 = vrot.slane %v11467_v24, 2  ;;  %v5638_v51 = vrot.slane %v5623_v14, 2  ;;  %v4795_v49 = vadd.f32 %v12778_v6, %v4617_v16 }
 0x5a8   : > { %v4271_v48 = vadd.f32 %v4267_v28, %v4169_v41  ;;  %v5671_v23 = vrot.slane %v5657_v40, 2  ;;  %v4462_v7 = vadd.f32 %v4458_v22, %v4270_v30  ;;  %v4628_v11 = vsel %vm730_vm0, %v4626_v50, %v4627_v31 }
 0x5a9   : > { %v4630_v47 = vsel %vm730_vm0, %v4627_v31, %v4629_v5  ;;  %v5672_v26 = vrot.slane %v5659_v60, 2  ;;  %v5670_v24 = vsel %vm1475_vm1, %v5668_v15, %v5669_v19  ;;  %v5639_v14 = vsel %vm1475_vm1, %v5634_v25, %v5638_v51  ;;  %v12779_v25 = vld [vmem:[#allocation89_spill] sm:$0xff] }
 0x5aa   : > { %5642 = vrot.lane.b32.xlu1 %v5635_v4, %s6745_s9  ;;  %5640 = vrot.lane.b32.xlu0 %v5632_v3, %s6745_s9  ;;  %v4463_v0 = vadd.f32 %v4459_v17, %v4271_v48  ;;  %v5661_v3 = vmul.f32 %v5655_v21, %v9928_v59  ;;  %v5660_v55 = vmul.f32 %v5655_v21, %v9935_v39  ;;  %v5693_v41 = vstv %s11470_s14  ;;  %s6509_s14 = sld [smem:[#allocation3 + $0xa6]] }
 0x5ab   : > { %5644 = vrot.lane.b32.xlu2 %v5637_v34, %s6745_s9  ;;  %v5673_v1 = vsel %vm1475_vm1, %v5671_v23, %v5672_v26  ;;  %v5694_v32 = vmul.f32 %v5693_v41, %v8731_v45  ;;  %v4633_v28 = vadd.f32 %v4628_v11, %v4462_v7  ;;  %v5696_v30 = vmul.f32 %v5693_v41, %v8743_v10 }
 0x5ac   : > { %v5093_v61 = vpop.permute.xlu1 %5092  ;;  %v5091_v20 = vpop.permute.xlu0 %5090  ;;  %v4634_v34 = vadd.f32 %v4630_v47, %v4463_v0  ;;  %v5676_v40 = vrot.slane %v5661_v3, 2  ;;  %v5674_v50 = vrot.slane %v5660_v55, 2  ;;  %v5698_v51 = vmul.f32 %v5693_v41, %v9935_v39 }
 0x5ad   : > { %v5095_v13 = vsel %vm547_vm3, %v5091_v20, %v5093_v61  ;;  %v11493_v27 = vpop.permute.xlu2 %5202  ;;  %v4832_v21 = vadd.f32 %v12779_v25, %v4633_v28  ;;  %v5706_v52 = vrot.slane %v5694_v32, 2  ;;  %v5707_v15 = vrot.slane %v5696_v30, 2 }
 0x5ae   : > { %v11495_v4 = vadd.f32 %v5095_v13, %v4795_v49  ;;  %v4833_v31 = vadd.f32 %v11087_v46, %v4634_v34  ;;  %v5677_v17 = vsel %vm1475_vm1, %v5672_v26, %v5676_v40  ;;  %v5675_v46 = vsel %vm1475_vm1, %v5669_v19, %v5674_v50 }
 0x5af   : > { %v5695_v48 = vmul.f32 %v5693_v41, %v8733_v54  ;;  %v5708_v6 = vsel %vm1475_vm1, %v5706_v52, %v5707_v15  ;;  %v5712_v49 = vrot.slane %v5698_v51, 2  ;;  %v5731_v23 = vstv %s6518_s15  ;;  %s6074_s15 = sld [smem:[#allocation8]] }
 0x5b0   : > { %v5733_v3 = vmul.f32 %v5731_v23, %v8733_v54  ;;  %v5735_v26 = vmul.f32 %v5731_v23, %v8758_v9  ;;  %v5732_v55 = vmul.f32 %v5731_v23, %v8731_v45  ;;  %v5736_v32 = vmul.f32 %v5731_v23, %v9935_v39 }
 0x5b1   : > { %v5709_v61 = vrot.slane %v5695_v48, 2  ;;  %v5769_v25 = vstv %s6519_s16  ;;  %s6072_s16 = sld [smem:[#allocation2]] }
 0x5b2   : > { %5678 = vrot.lane.b32.xlu1 %v5670_v24, %s6745_s9  ;;  %5646 = vrot.lane.b32.xlu0 %v5639_v14, %s6745_s9  ;;  %v5713_v24 = vsel %vm1475_vm1, %v5707_v15, %v5712_v49  ;;  %v5748_v28 = vrot.slane %v5735_v26, 2  ;;  %v5744_v34 = vrot.slane %v5732_v55, 2  ;;  %v5770_v15 = vmul.f32 %v5769_v25, %v8731_v45 }
 0x5b3   : > { %5680 = vrot.lane.b32.xlu2 %v5673_v1, %s6745_s9  ;;  %v5771_v51 = vmul.f32 %v5769_v25, %v8733_v54  ;;  %v5807_v26 = vstv %s6520_s17  ;;  %s6527_s17 = sld [smem:[#allocation8 + $0x1]] }
 0x5b4   : > { %v5129_v5 = vpop.permute.xlu1 %5128  ;;  %v5127_v35 = vpop.permute.xlu0 %5126  ;;  %v5810_v55 = vmul.f32 %v5807_v26, %v8743_v10 }
 0x5b5   : > { %v5133_v22 = vsel %vm547_vm3, %v5129_v5, %v11416_v53  ;;  %v5132_v16 = vsel %vm547_vm3, %v11372_v42, %v5127_v35  ;;  %v11514_v60 = vpop.permute.xlu2 %5238  ;;  %v5697_v53 = vmul.f32 %v5693_v41, %v8758_v9  ;;  %v5699_v42 = vmul.f32 %v5693_v41, %v9928_v59 }
 0x5b6   : > { %v11516_v37 = vadd.f32 %v5133_v22, %v4833_v31  ;;  %v11518_v63 = vadd.f32 %v5132_v16, %v4832_v21  ;;  %v5734_v41 = vmul.f32 %v5731_v23, %v8743_v10  ;;  %v5750_v21 = vrot.slane %v5736_v32, 2 }
 0x5b7   : > { %v5710_v20 = vrot.slane %v5697_v53, 2  ;;  %v5714_v11 = vrot.slane %v5699_v42, 2  ;;  %v5785_v49 = vrot.slane %v5771_v51, 2 }
 0x5b8   : > { %v5745_v40 = vrot.slane %v5734_v41, 2 }
 0x5b9   : > { %v5711_v14 = vsel %vm1475_vm1, %v5709_v61, %v5710_v20  ;;  %v5715_v1 = vsel %vm1475_vm1, %v5710_v20, %v5714_v11 }
 0x5ba   : > { %5684 = vrot.lane.b32.xlu1 %v5677_v17, %s6745_s9  ;;  %5682 = vrot.lane.b32.xlu0 %v5675_v46, %s6745_s9  ;;  %v5746_v17 = vsel %vm1475_vm1, %v5744_v34, %v5745_v40  ;;  %v5772_v46 = vmul.f32 %v5769_v25, %v8743_v10 }
 0x5bb   : > { %5716 = vrot.lane.b32.xlu2 %v5708_v6, %s6745_s9 }
 0x5bc   : > { %v5165_v19 = vpop.permute.xlu1 %5164  ;;  %v5163_v7 = vpop.permute.xlu0 %5162  ;;  %v5783_v48 = vrot.slane %v5772_v46, 2  ;;  %v5845_v46 = vstv %s6521_s19  ;;  %s6528_s19 = sld [smem:[#allocation8 + $0x2]] }
 0x5bd   : > { %v5170_v47 = vsel %vm547_vm3, %v5163_v7, %v5165_v19  ;;  %v11531_v13 = vpop.permute.xlu2 %5244  ;;  %v5775_v19 = vmul.f32 %v5769_v25, %v9928_v59 }
 0x5be   : > { %v11534_v0 = vadd.f32 %v5170_v47, %v11092_v36  ;;  %v5747_v36 = vrot.slane %v5733_v3, 2  ;;  %v5774_v3 = vmul.f32 %v5769_v25, %v9935_v39 }
 0x5c0   : > { %v5749_v16 = vsel %vm1475_vm1, %v5747_v36, %v5748_v28  ;;  %v5788_v41 = vrot.slane %v5774_v3, 2 }
 0x5c2   : > { %5720 = vrot.lane.b32.xlu1 %v5713_v24, %s6745_s9  ;;  %5718 = vrot.lane.b32.xlu0 %v5711_v14, %s6745_s9  ;;  %v5808_v14 = vmul.f32 %v5807_v26, %v8731_v45 }
 0x5c3   : > { %5722 = vrot.lane.b32.xlu2 %v5715_v1, %s6745_s9 }
 0x5c4   : > { %v5201_v30 = vpop.permute.xlu1 %5200  ;;  %v5169_v50 = vpop.permute.xlu0 %5168  ;;  %v5820_v36 = vrot.slane %v5808_v14, 2 }
 0x5c5   : > { %v5208_v31 = vsel %vm547_vm3, %v5201_v30, %v11493_v27  ;;  %v5171_v5 = vsel %vm547_vm3, %v11457_v18, %v5169_v50  ;;  %v11551_v35 = vpop.permute.xlu2 %5280  ;;  %v5737_v27 = vmul.f32 %v5731_v23, %v9928_v59  ;;  %v5751_v18 = vsel %vm1475_vm1, %v5745_v40, %v5750_v21 }
 0x5c6   : > { %v11554_v52 = vadd.f32 %v5208_v31, %v11192_v12  ;;  %v11557_v22 = vadd.f32 %v5171_v5, %v11136_v62  ;;  %v5773_v62 = vmul.f32 %v5769_v25, %v8758_v9  ;;  %v5782_v12 = vrot.slane %v5770_v15, 2 }
 0x5c7   : > { %v5752_v53 = vrot.slane %v5737_v27, 2  ;;  %v5821_v21 = vrot.slane %v5810_v55, 2  ;;  %v5789_v31 = vsel %vm1475_vm1, %v5783_v48, %v5788_v41  ;;  %v5812_v5 = vmul.f32 %v5807_v26, %v9935_v39 }
 0x5c8   : > { %v5786_v7 = vrot.slane %v5773_v62, 2  ;;  %v5784_v11 = vsel %vm1475_vm1, %v5782_v12, %v5783_v48 }
 0x5c9   : > { %v5753_v47 = vsel %vm1475_vm1, %v5748_v28, %v5752_v53  ;;  %v5847_v53 = vmul.f32 %v5845_v46, %v8733_v54 }
 0x5ca   : > { %5756 = vrot.lane.b32.xlu1 %v5749_v16, %s6745_s9  ;;  %5754 = vrot.lane.b32.xlu0 %v5746_v17, %s6745_s9  ;;  %v5787_v24 = vsel %vm1475_vm1, %v5785_v49, %v5786_v7  ;;  %v5811_v16 = vmul.f32 %v5807_v26, %v8758_v9  ;;  %v5813_v17 = vmul.f32 %v5807_v26, %v9928_v59 }
 0x5cb   : > { %5758 = vrot.lane.b32.xlu2 %v5751_v18, %s6745_s9 }
 0x5cc   : > { %v5207_v6 = vpop.permute.xlu1 %5206  ;;  %v5205_v42 = vpop.permute.xlu0 %5204  ;;  %v5824_v15 = vrot.slane %v5811_v16, 2  ;;  %v5828_v51 = vrot.slane %v5813_v17, 2 }
 0x5cd   : > { %v5209_v61 = vsel %vm547_vm3, %v5205_v42, %v5207_v6  ;;  %v11571_v20 = vpop.permute.xlu2 %5316  ;;  %v5849_v6 = vmul.f32 %v5845_v46, %v8758_v9 }
 0x5ce   : > { %v11574_v23 = vadd.f32 %v5209_v61, %v11190_v43  ;;  %v5790_v43 = vrot.slane %v5775_v19, 2  ;;  %v5846_v61 = vmul.f32 %v5845_v46, %v8731_v45  ;;  %v5848_v19 = vmul.f32 %v5845_v46, %v8743_v10 }
 0x5d0   : > { %v5791_v25 = vsel %vm1475_vm1, %v5786_v7, %v5790_v43  ;;  %v5829_v7 = vsel %vm1475_vm1, %v5824_v15, %v5828_v51  ;;  %v5858_v3 = vrot.slane %v5846_v61, 2 }
 0x5d2   : > { %5792 = vrot.lane.b32.xlu1 %v5784_v11, %s6746_s18  ;;  %5760 = vrot.lane.b32.xlu0 %v5753_v47, %s6745_s9  ;;  %s6522_s9 = sld [smem:[#allocation3 + $0xd3]]  ;;  %v5850_v11 = vmul.f32 %v5845_v46, %v9935_v39  ;;  %v5862_v47 = vrot.slane %v5849_v6, 2  ;;  %v5346_v6 = vstv %s6504_s26 }
 0x5d3   : > { %5794 = vrot.lane.b32.xlu2 %v5787_v24, %s6746_s18  ;;  %s6531_s26 = sld [smem:[#allocation8 + $0x5]] }
 0x5d4   : > { %v5243_v1 = vpop.permute.xlu1 %5242  ;;  %v5241_v32 = vpop.permute.xlu0 %5240  ;;  %v5864_v55 = vrot.slane %v5850_v11, 2 }
 0x5d5   : > { %v5247_v28 = vsel %vm547_vm3, %v5243_v1, %v11531_v13  ;;  %v5246_v34 = vsel %vm547_vm3, %v11514_v60, %v5241_v32  ;;  %v11590_v40 = vpop.permute.xlu2 %5488  ;;  %v5809_v13 = vmul.f32 %v5807_v26, %v8733_v54  ;;  %v5822_v60 = vsel %vm1475_vm1, %v5820_v36, %v5821_v21 }
 0x5d6   : > { %v11593_v30 = vadd.f32 %v5247_v28, %v11281_v56  ;;  %v11596_v50 = vadd.f32 %v5246_v34, %v11233_v2  ;;  %v5826_v2 = vrot.slane %v5812_v5, 2  ;;  %v5859_v26 = vrot.slane %v5848_v19, 2 }
 0x5d7   : > { %v5823_v56 = vrot.slane %v5809_v13, 2  ;;  %v5329_v32 = vstv %s6503_s24  ;;  %s6530_s24 = sld [smem:[#allocation8 + $0x4]] }
 0x5d8   : > { %v5827_v42 = vsel %vm1475_vm1, %v5821_v21, %v5826_v2  ;;  %v5883_v43 = vstv %s6522_s9  ;;  %v5860_v21 = vsel %vm1475_vm1, %v5858_v3, %v5859_v26  ;;  %v5331_v5 = vmul.f32 %v5329_v32, %v8743_v10  ;;  %s6529_s9 = sld [smem:[#allocation8 + $0x3]] }
 0x5d9   : > { %v5825_v49 = vsel %vm1475_vm1, %v5823_v56, %v5824_v15  ;;  %v5865_v13 = vsel %vm1475_vm1, %v5859_v26, %v5864_v55  ;;  %v5330_v16 = vmul.f32 %v5329_v32, %v8731_v45  ;;  %v5889_v61 = vmul.f32 %v5883_v43, %v9928_v59 }
 0x5da   : > { %5798 = vrot.lane.b32.xlu1 %v5791_v25, %s6746_s18  ;;  %5796 = vrot.lane.b32.xlu0 %v5789_v31, %s6746_s18  ;;  %v5884_v31 = vmul.f32 %v5883_v43, %v8731_v45  ;;  %v5921_v3 = vstv %s6523_s27  ;;  %v5347_v26 = vmul.f32 %v5346_v6, %v8731_v45  ;;  %s6532_s27 = sld [smem:[#allocation8 + $0x6]] }
 0x5db   : > { %5830 = vrot.lane.b32.xlu2 %v5822_v60, %s6746_s18  ;;  %v5887_v60 = vmul.f32 %v5883_v43, %v8758_v9 }
 0x5dc   : > { %v5279_v27 = vpop.permute.xlu1 %5278  ;;  %v5277_v18 = vpop.permute.xlu0 %5276  ;;  %v5896_v17 = vrot.slane %v5884_v31, 2 }
 0x5dd   : > { %v5284_v62 = vsel %vm547_vm3, %v5277_v18, %v5279_v27  ;;  %v11609_v12 = vpop.permute.xlu2 %5494  ;;  %v5337_v27 = vrot.slane %v5331_v5, 2  ;;  %v5900_v19 = vrot.slane %v5887_v60, 2 }
 0x5de   : > { %v11612_v48 = vadd.f32 %v5284_v62, %v11279_v8  ;;  %v5861_v8 = vrot.slane %v5847_v53, 2  ;;  %v5336_v53 = vrot.slane %v5330_v16, 2 }
 0x5e0   : > { %v5863_v25 = vsel %vm1475_vm1, %v5861_v8, %v5862_v47  ;;  %v5888_v8 = vmul.f32 %v5883_v43, %v9935_v39 }
 0x5e2   : > { %5834 = vrot.lane.b32.xlu1 %v5827_v42, %s6746_s18  ;;  %5832 = vrot.lane.b32.xlu0 %v5825_v49, %s6746_s18 }
 0x5e3   : > { %5836 = vrot.lane.b32.xlu2 %v5829_v7, %s6746_s18 }
 0x5e4   : > { %v5315_v24 = vpop.permute.xlu1 %5314  ;;  %v5283_v14 = vpop.permute.xlu0 %5282 }
 0x5e5   : > { %v5322_v41 = vsel %vm547_vm3, %v5315_v24, %v11571_v20  ;;  %v5285_v1 = vsel %vm547_vm3, %v11551_v35, %v5283_v14  ;;  %v11629_v36 = vpop.permute.xlu2 %5530  ;;  %v5886_v20 = vmul.f32 %v5883_v43, %v8743_v10  ;;  %v5851_v35 = vmul.f32 %v5845_v46, %v9928_v59 }
 0x5e6   : > { %v11632_v28 = vadd.f32 %v5322_v41, %v11376_v57  ;;  %v11635_v34 = vadd.f32 %v5285_v1, %v11325_v33  ;;  %v5885_v57 = vmul.f32 %v5883_v43, %v8733_v54  ;;  %v5332_v33 = vmul.f32 %v5329_v32, %v9935_v39 }
 0x5e7   : > { %v5897_v2 = vrot.slane %v5886_v20, 2  ;;  %v5866_v56 = vrot.slane %v5851_v35, 2  ;;  %v5922_v14 = vmul.f32 %v5921_v3, %v8731_v45  ;;  %v11669_v41 = vmul.f32 %v5346_v6, %v8743_v10 }
 0x5e8   : > { %v5899_v18 = vrot.slane %v5885_v57, 2  ;;  %v5339_v62 = vrot.slane %v5332_v33, 2  ;;  %v5924_v43 = vmul.f32 %v5921_v3, %v8743_v10  ;;  %v5902_v1 = vrot.slane %v5888_v8, 2 }
 0x5e9   : > { %v5898_v7 = vsel %vm1475_vm1, %v5896_v17, %v5897_v2  ;;  %v5867_v11 = vsel %vm1475_vm1, %v5862_v47, %v5866_v56  ;;  %v5904_v47 = vrot.slane %v5889_v61, 2  ;;  %v5353_v20 = vrot.slane %v5347_v26, 2 }
 0x5ea   : > { %5870 = vrot.lane.b32.xlu1 %v5863_v25, %s6746_s18  ;;  %5868 = vrot.lane.b32.xlu0 %v5860_v21, %s6746_s18  ;;  %v5901_v24 = vsel %vm1475_vm1, %v5899_v18, %v5900_v19  ;;  %v5340_v55 = vsel %vm1475_vm1, %v5337_v27, %v5339_v62  ;;  %v5934_v35 = vrot.slane %v5922_v14, 2  ;;  %v5354_v57 = vrot.slane %v11669_v41, 2 }
 0x5eb   : > { %5872 = vrot.lane.b32.xlu2 %v5865_v13, %s6746_s18  ;;  %v5344_v25 = vadd.f32 %v5340_v55, %v11461_v29  ;;  %v5363_v33 = vstv %s11652_s6  ;;  %v5905_v29 = vsel %vm1475_vm1, %v5900_v19, %v5904_v47  ;;  %v5903_v56 = vsel %vm1475_vm1, %v5897_v2, %v5902_v1  ;;  %s6533_s6 = sld [smem:[#allocation8 + $0x7]] }
 0x5ec   : > { %v5321_v15 = vpop.permute.xlu1 %5320  ;;  %v5319_v46 = vpop.permute.xlu0 %5318  ;;  %v5355_v18 = vsel %vm1475_vm1, %v5353_v20, %v5354_v57  ;;  %v11701_v62 = vmul.f32 %v5363_v33, %v8743_v10 }
 0x5ed   : > { %v5323_v51 = vsel %vm547_vm3, %v5319_v46, %v5321_v15  ;;  %v11654_v42 = vpop.permute.xlu2 %5566  ;;  %v5923_v15 = vmul.f32 %v5921_v3, %v8733_v54 }
 0x5ee   : > { %v11657_v49 = vadd.f32 %v5323_v51, %v11374_v44  ;;  %v5338_v44 = vsel %vm1475_vm1, %v5336_v53, %v5337_v27  ;;  %v5927_v27 = vmul.f32 %v5921_v3, %v9928_v59  ;;  %v5364_v51 = vmul.f32 %v5363_v33, %v8731_v45 }
 0x5ef   : > { %v5343_v31 = vadd.f32 %v5338_v44, %v11418_v38  ;;  %v5935_v38 = vrot.slane %v5924_v43, 2  ;;  %v5349_v53 = vmul.f32 %v5346_v6, %v9935_v39  ;;  %v5937_v61 = vrot.slane %v5923_v15, 2 }
 0x5f0   : > { %v5942_v26 = vrot.slane %v5927_v27, 2  ;;  %v5370_v6 = vrot.slane %v5364_v51, 2  ;;  %v5371_v14 = vrot.slane %v11701_v62, 2  ;;  %v5380_v62 = vstv %s6506_s11  ;;  %s6541_s11 = sshll.u32 %s6803_s4, 4 }
 0x5f1   : > { %v5936_v46 = vsel %vm1475_vm1, %v5934_v35, %v5935_v38  ;;  %v5356_v55 = vrot.slane %v5349_v53, 2 }
 0x5f2   : > { %5906 = vrot.lane.b32.xlu1 %v5898_v7, %s6746_s18  ;;  %5874 = vrot.lane.b32.xlu0 %v5867_v11, %s6746_s18  ;;  %v5959_v7 = vstv %s11674_s7  ;;  %v5372_v20 = vsel %vm1475_vm1, %v5370_v6, %v5371_v14  ;;  %v5381_v6 = vmul.f32 %v5380_v62, %v8731_v45  ;;  %s255_s7 = sand.u32 1, %s6732_s21  }
 0x5f3   : > { %5908 = vrot.lane.b32.xlu2 %v5901_v24, %s6746_s18  ;;  %v5961_v47 = vmul.f32 %v5959_v7, %v8733_v54  ;;  %v11719_v43 = vmul.f32 %v5959_v7, %v8758_v9  ;;  %v5357_v35 = vsel %vm1475_vm1, %v5354_v57, %v5356_v55  ;;  %v5377_v15 = vadd.f32 %v5372_v20, %v11518_v63 }
 0x5f4   : > { %v5493_v32 = vpop.permute.xlu1 %5492  ;;  %v5491_v21 = vpop.permute.xlu0 %5490  ;;  %v5997_v57 = vstv %s11709_s10  ;;  %v5387_v20 = vrot.slane %v5381_v6, 2  ;;  %v5414_v6 = vstv %s6508_s13  ;;  %s6297_s10 = sshll.u32 %s255_s7, 4  ;;  %s6190_s13 = scalar_lea.hbm %s11942_s5, %s6541_s11 }
 0x5f5   : > { %v5497_v5 = vsel %vm354_vm2, %v5493_v32, %v11609_v12  ;;  %v5496_v13 = vsel %vm354_vm2, %v11590_v40, %v5491_v21  ;;  %v11685_v16 = vpop.permute.xlu2 %5602  ;;  %v5926_v12 = vmul.f32 %v5921_v3, %v9935_v39  ;;  %v5925_v40 = vmul.f32 %v5921_v3, %v8758_v9  ;;  %s6193_s4 = sshll.u32 %s6190_s13, 4  ;;  %s6194_s4 = int_to_ptr.hbm [resolvable:$true] %s6193_s4 }
 0x5f6   : > { %v11687_v60 = vadd.f32 %v5497_v5, %v5344_v25  ;;  %v11689_v17 = vadd.f32 %v5496_v13, %v5343_v31  ;;  %v5360_v3 = vadd.f32 %v5355_v18, %v11459_v58  ;;  %v5960_v32 = vmul.f32 %v5959_v7, %v8731_v45 }
 0x5f7   : > { %v5940_v2 = vrot.slane %v5926_v12, 2  ;;  %v5938_v19 = vrot.slane %v5925_v40, 2  ;;  %v5962_v25 = vmul.f32 %v5959_v7, %v8743_v10  ;;  %v5964_v31 = vmul.f32 %v5959_v7, %v9935_v39 }
 0x5f8   : > { %v5366_v5 = vmul.f32 %v5363_v33, %v9935_v39  ;;  %v5975_v13 = vrot.slane %v5961_v47, 2  ;;  %v5361_v40 = vadd.f32 %v5357_v35, %v11495_v4  ;;  %v5397_v35 = vstv %s6507_s12 }
 0x5f9   : > { %v5941_v58 = vsel %vm1475_vm1, %v5935_v38, %v5940_v2  ;;  %v5939_v1 = vsel %vm1475_vm1, %v5937_v61, %v5938_v19  ;;  %v5943_v21 = vsel %vm1475_vm1, %v5938_v19, %v5942_v26  ;;  %v5972_v38 = vrot.slane %v5960_v32, 2 }
 0x5fa   : > { %5912 = vrot.lane.b32.xlu1 %v5905_v29, %s6746_s18  ;;  %5910 = vrot.lane.b32.xlu0 %v5903_v56, %s6746_s18  ;;  %v5976_v29 = vrot.slane %v11719_v43, 2  ;;  %v5973_v56 = vrot.slane %v5962_v25, 2  ;;  %v5978_v27 = vrot.slane %v5964_v31, 2  ;;  %v5373_v51 = vrot.slane %v5366_v5, 2 }
 0x5fb   : > { %5944 = vrot.lane.b32.xlu2 %v5936_v46, %s6746_s18  ;;  %v5998_v19 = vmul.f32 %v5997_v57, %v8731_v45 }
 0x5fc   : > { %v5529_v11 = vpop.permute.xlu1 %5528  ;;  %v5527_v8 = vpop.permute.xlu0 %5526  ;;  %v5977_v4 = vsel %vm1475_vm1, %v5975_v13, %v5976_v29  ;;  %v5974_v63 = vsel %vm1475_vm1, %v5972_v38, %v5973_v56  ;;  %v5374_v26 = vsel %vm1475_vm1, %v5371_v14, %v5373_v51  ;;  %v6003_v38 = vmul.f32 %v5997_v57, %v9928_v59 }
 0x5fd   : > { %v5534_v24 = vsel %vm354_vm2, %v5527_v8, %v5529_v11  ;;  %v11713_v44 = vpop.permute.xlu2 %5608  ;;  %v5382_v11 = vmul.f32 %v5380_v62, %v8743_v10  ;;  %v5979_v8 = vsel %vm1475_vm1, %v5973_v56, %v5978_v27  ;;  %v6010_v55 = vrot.slane %v5998_v19, 2 }
 0x5fe   : > { %v11715_v41 = vadd.f32 %v5534_v24, %v5360_v3  ;;  %v5999_v3 = vmul.f32 %v5997_v57, %v8733_v54  ;;  %v5383_v24 = vmul.f32 %v5380_v62, %v9935_v39  ;;  %v5399_v62 = vmul.f32 %v5397_v35, %v8743_v10 }
 0x5ff   : > { %v5388_v32 = vrot.slane %v5382_v11, 2 }
 0x600   : > { %v6013_v25 = vrot.slane %v5999_v3, 2  ;;  %v5390_v31 = vrot.slane %v5383_v24, 2  ;;  %v5405_v24 = vrot.slane %v5399_v62, 2 }
 0x601   : > { %v5389_v51 = vsel %vm1475_vm1, %v5387_v20, %v5388_v32  ;;  %v5400_v20 = vmul.f32 %v5397_v35, %v9935_v39 }
 0x602   : > { %5948 = vrot.lane.b32.xlu1 %v5941_v58, %s6746_s18  ;;  %5946 = vrot.lane.b32.xlu0 %v5939_v1, %s6746_s18  ;;  %v5378_v1 = vadd.f32 %v5374_v26, %v11516_v37 }
 0x603   : > { %5950 = vrot.lane.b32.xlu2 %v5943_v21, %s6746_s18 }
 0x604   : > { %v5565_v12 = vpop.permute.xlu1 %5564  ;;  %v5533_v46 = vpop.permute.xlu0 %5532 }
 0x605   : > { %v5572_v33 = vsel %vm354_vm2, %v5565_v12, %v11654_v42  ;;  %v5535_v18 = vsel %vm354_vm2, %v11629_v36, %v5533_v46  ;;  %v11741_v53 = vpop.permute.xlu2 %5644  ;;  %v11751_v42 = vmul.f32 %v5997_v57, %v8743_v10  ;;  %v5965_v36 = vmul.f32 %v5959_v7, %v9928_v59 }
 0x606   : > { %v11743_v2 = vadd.f32 %v5572_v33, %v5377_v15  ;;  %v11745_v61 = vadd.f32 %v5535_v18, %v5361_v40  ;;  %v6001_v7 = vmul.f32 %v5997_v57, %v8758_v9  ;;  %v6002_v15 = vmul.f32 %v5997_v57, %v9935_v39 }
 0x607   : > { %v6011_v47 = vrot.slane %v11751_v42, 2  ;;  %v5980_v43 = vrot.slane %v5965_v36, 2  ;;  %v6035_v40 = vstv %s11754_s8  ;;  %v5398_v46 = vmul.f32 %v5397_v35, %v8731_v45 }
 0x608   : > { %v6014_v56 = vrot.slane %v6001_v7, 2  ;;  %v6036_v33 = vmul.f32 %v6035_v40, %v8731_v45  ;;  %v5391_v18 = vsel %vm1475_vm1, %v5388_v32, %v5390_v31  ;;  %v6038_v57 = vmul.f32 %v6035_v40, %v8743_v10 }
 0x609   : > { %v6012_v12 = vsel %vm1475_vm1, %v6010_v55, %v6011_v47  ;;  %v5981_v37 = vsel %vm1475_vm1, %v5976_v29, %v5980_v43  ;;  %v6018_v29 = vrot.slane %v6003_v38, 2  ;;  %v5395_v19 = vadd.f32 %v5391_v18, %v11557_v22 }
 0x60a   : > { %5984 = vrot.lane.b32.xlu1 %v5977_v4, %s6746_s18  ;;  %5982 = vrot.lane.b32.xlu0 %v5974_v63, %s6746_s18  ;;  %v6015_v27 = vsel %vm1475_vm1, %v6013_v25, %v6014_v56  ;;  %v6016_v4 = vrot.slane %v6002_v15, 2  ;;  %v5394_v36 = vadd.f32 %v5389_v51, %v11534_v0  ;;  %v5404_v11 = vrot.slane %v5398_v46, 2 }
 0x60b   : > { %5986 = vrot.lane.b32.xlu2 %v5979_v8, %s6746_s18  ;;  %v6048_v8 = vrot.slane %v6036_v33, 2  ;;  %v6019_v22 = vsel %vm1475_vm1, %v6014_v56, %v6018_v29  ;;  %v6041_v32 = vmul.f32 %v6035_v40, %v9928_v59  ;;  %v5416_v31 = vmul.f32 %v5414_v6, %v8743_v10 }
 0x60c   : > { %v5571_v58 = vpop.permute.xlu1 %5570  ;;  %v5569_v14 = vpop.permute.xlu0 %5568  ;;  %v6017_v0 = vsel %vm1475_vm1, %v6011_v47, %v6016_v4  ;;  %v5406_v25 = vsel %vm1475_vm1, %v5404_v11, %v5405_v24  ;;  %v5407_v46 = vrot.slane %v5400_v20, 2  ;;  %v5417_v29 = vmul.f32 %v5414_v6, %v9935_v39 }
 0x60d   : > { %v5573_v21 = vsel %vm354_vm2, %v5569_v14, %v5571_v58  ;;  %v11769_v5 = vpop.permute.xlu2 %5680  ;;  %v6049_v58 = vrot.slane %v6038_v57, 2  ;;  %v6039_v14 = vmul.f32 %v6035_v40, %v8758_v9  ;;  %v5411_v59 = vadd.f32 %v5406_v25, %v11554_v52 }
 0x60e   : > { %v11771_v13 = vadd.f32 %v5573_v21, %v5378_v1  ;;  %v6040_v1 = vmul.f32 %v6035_v40, %v9935_v39  ;;  %v5415_v21 = vmul.f32 %v5414_v6, %v8731_v45  ;;  %v5408_v52 = vsel %vm1475_vm1, %v5405_v24, %v5407_v46 }
 0x60f   : > { %v6052_v38 = vrot.slane %v6039_v14, 2  ;;  %v5424_v11 = vrot.slane %v5417_v29, 2  ;;  %v5431_v24 = vstv %s6509_s14  ;;  %s257_s14 = scalar_lea.vmem [#allocation9], %s6297_s10 }
 0x610   : > { %v6054_v47 = vrot.slane %v6040_v1, 2  ;;  %v5421_v15 = vrot.slane %v5415_v21, 2 }
 0x612   : > { %6020 = vrot.lane.b32.xlu1 %v6012_v12, %s6746_s18  ;;  %5988 = vrot.lane.b32.xlu0 %v5981_v37, %s6746_s18  ;;  %v6056_v12 = vrot.slane %v6041_v32, 2  ;;  %v6055_v33 = vsel %vm1475_vm1, %v6049_v58, %v6054_v47 }
 0x613   : > { %6022 = vrot.lane.b32.xlu2 %v6015_v27, %s6746_s18 }
 0x614   : > { %v5607_v63 = vpop.permute.xlu1 %5606  ;;  %v5605_v42 = vpop.permute.xlu0 %5604  ;;  %v6057_v51 = vsel %vm1475_vm1, %v6052_v38, %v6056_v12 }
 0x615   : > { %v5611_v3 = vsel %vm354_vm2, %v5607_v63, %v11713_v44  ;;  %v5610_v26 = vsel %vm354_vm2, %v11685_v16, %v5605_v42  ;;  %v11794_v7 = vpop.permute.xlu2 %5716  ;;  %v6037_v44 = vmul.f32 %v6035_v40, %v8733_v54  ;;  %v6050_v16 = vsel %vm1475_vm1, %v6048_v8, %v6049_v58 }
 0x616   : > { %v11796_v55 = vadd.f32 %v5611_v3, %v5395_v19  ;;  %v11798_v43 = vadd.f32 %v5610_v26, %v5394_v36  ;;  %v5422_v40 = vrot.slane %v5416_v31, 2  ;;  %v5412_v63 = vadd.f32 %v5408_v52, %v11574_v23 }
 0x617   : > { %v6051_v54 = vrot.slane %v6037_v44, 2  ;;  %v5434_v23 = vmul.f32 %v5431_v24, %v9935_v39 }
 0x618   : > { %v5423_v62 = vsel %vm1475_vm1, %v5421_v15, %v5422_v40  ;;  %v5425_v6 = vsel %vm1475_vm1, %v5422_v40, %v5424_v11 }
 0x619   : > { %v6053_v18 = vsel %vm1475_vm1, %v6051_v54, %v6052_v38  ;;  %v5428_v4 = vadd.f32 %v5423_v62, %v11596_v50  ;;  %v5433_v50 = vmul.f32 %v5431_v24, %v8743_v10  ;;  %v5429_v58 = vadd.f32 %v5425_v6, %v11593_v30 }
 0x61a   : > { %6026 = vrot.lane.b32.xlu1 %v6019_v22, %s6746_s18  ;;  %6024 = vrot.lane.b32.xlu0 %v6017_v0, %s6746_s18  ;;  %v5432_v22 = vmul.f32 %v5431_v24, %v8731_v45  ;;  %v5441_v44 = vrot.slane %v5434_v23, 2 }
 0x61b   : > { %6058 = vrot.lane.b32.xlu2 %v6050_v16, %s6746_s18  ;;  %v5439_v1 = vrot.slane %v5433_v50, 2  ;;  %v6077_v50 = vstv %s6074_s15  ;;  %s6179_s15 = scalar_lea.sflag [#allocation4], %s255_s7 }
 0x61c   : > { %v5643_v9 = vpop.permute.xlu1 %5642  ;;  %v5641_v56 = vpop.permute.xlu0 %5640  ;;  %v5438_v14 = vrot.slane %v5432_v22, 2 }
 0x61d   : > { %v5648_v37 = vsel %vm354_vm2, %v5641_v56, %v5643_v9  ;;  %v5723_v35 = vpop.permute.xlu2 %5722  ;;  %v5442_v21 = vsel %vm1475_vm1, %v5439_v1, %v5441_v44  ;;  %v6073_v44 = vstv %s6072_s16  ;;  %s6684_s16 = sshra.s32 %s6194_s4, 4  ;;  %s6685_s16 = int_to_ptr.hbm [resolvable:$true] %s6684_s16 }
 0x61e   : > { %v11816_v27 = vadd.f32 %v5648_v37, %v5411_v59  ;;  %v5440_v31 = vsel %vm1475_vm1, %v5438_v14, %v5439_v1  ;;  %v5446_v30 = vadd.f32 %v5442_v21, %v11635_v34  ;;  %v6085_v14 = vstv %s6527_s17  ;;  %s6686_s17 = scalar_lea.hbm %s6685_s16, 16  ;;  %p6691_p3 = scmp.lt.s32.totalorder %s6685_s16, %s11942_s5 }
 0x61f   : > { %v5445_v9 = vadd.f32 %v5440_v31, %v11612_v48  ;;  %p6687_p0 = scmp.ne.s32.totalorder %s6685_s16, %s6686_s17 }
 0x621   : > { %p6688_p1 = pnand %p6687_p0, %p6820_p5 }
 0x622   : > { %6062 = vrot.lane.b32.xlu1 %v6055_v33, %s6746_s18  ;;  %6060 = vrot.lane.b32.xlu0 %v6053_v18, %s6746_s18 }
 0x623   : > { %6064 = vrot.lane.b32.xlu2 %v6057_v51, %s6746_s18  ;;  %s6510_s18 = sld [smem:[#allocation3 + $0xa7]]  ;;  %p6689_p2 = pneg %p6688_p1 }
 0x624   : > { %v5679_v57 = vpop.permute.xlu1 %5678  ;;  %v5647_v19 = vpop.permute.xlu0 %5646 }
 0x625   : > { %v5686_v42 = vsel %vm354_vm2, %v5679_v57, %v11769_v5  ;;  %v5649_v36 = vsel %vm354_vm2, %v11741_v53, %v5647_v19  ;;  %v5759_v8 = vpop.permute.xlu2 %5758 }
 0x626   : > { %v11833_v3 = vadd.f32 %v5686_v42, %v5428_v4  ;;  %v11835_v26 = vadd.f32 %v5649_v36, %v5412_v63 }
 0x629   : > { %v5448_v25 = vstv %s6510_s18  ;;  %s6191_s18 = sshll.u32 %s257_s14, 4  ;;  %s6192_s18 = int_to_ptr.vmem [resolvable:$true] %s6191_s18 }
 0x62a   : > { %v5449_v20 = vmul.f32 %v5448_v25, %v8731_v45  ;;  %v5450_v47 = vmul.f32 %v5448_v25, %v8743_v10  ;;  %v5451_v46 = vmul.f32 %v5448_v25, %v9935_v39 }
 0x62c   : > { %v5685_v5 = vpop.permute.xlu1 %5684  ;;  %v5683_v53 = vpop.permute.xlu0 %5682  ;;  %v5455_v12 = vrot.slane %v5449_v20, 2  ;;  %v5456_v37 = vrot.slane %v5450_v47, 2  ;;  %v5458_v18 = vrot.slane %v5451_v46, 2 }
 0x62d   : > { %v5687_v0 = vsel %vm354_vm2, %v5683_v53, %v5685_v5  ;;  %v5795_v16 = vpop.permute.xlu2 %5794 }
 0x62e   : > { %v11843_v32 = vadd.f32 %v5687_v0, %v5429_v58  ;;  %v5457_v10 = vsel %vm1475_vm1, %v5455_v12, %v5456_v37 }
 0x62f   : > { %v5462_v48 = vadd.f32 %v5457_v10, %v11632_v28 }
 0x634   : > { %v5721_v54 = vpop.permute.xlu1 %5720  ;;  %v5719_v38 = vpop.permute.xlu0 %5718 }
 0x635   : > { %v5725_v56 = vsel %vm354_vm2, %v5721_v54, %v5723_v35  ;;  %v5724_v59 = vsel %vm354_vm2, %v11794_v7, %v5719_v38  ;;  %v5831_v45 = vpop.permute.xlu2 %5830  ;;  %v5459_v7 = vsel %vm1475_vm1, %v5456_v37, %v5458_v18 }
 0x636   : > { %v11854_v15 = vadd.f32 %v5725_v56, %v5446_v30  ;;  %v11856_v40 = vadd.f32 %v5724_v59, %v5445_v9  ;;  %v5463_v29 = vadd.f32 %v5459_v7, %v11657_v49 }
 0x63c   : > { %v5757_v34 = vpop.permute.xlu1 %5756  ;;  %v5755_v33 = vpop.permute.xlu0 %5754 }
 0x63d   : > { %v5762_v35 = vsel %vm354_vm2, %v5755_v33, %v5757_v34  ;;  %v5837_v62 = vpop.permute.xlu2 %5836 }
 0x63e   : > { %v11862_v51 = vadd.f32 %v5762_v35, %v5462_v48  ;;  %v6101_v35 = vstv %s6529_s9 }
 0x644   : > { %v5793_v52 = vpop.permute.xlu1 %5792  ;;  %v5761_v57 = vpop.permute.xlu0 %5760 }
 0x645   : > { %v5800_v4 = vsel %vm547_vm3, %v5793_v52, %v5795_v16  ;;  %v5763_v39 = vsel %vm354_vm2, %v5759_v8, %v5761_v57  ;;  %v5873_v28 = vpop.permute.xlu2 %5872 }
 0x646   : > { %v5804_v63 = vadd.f32 %v5800_v4, %v11689_v17  ;;  %v11869_v19 = vadd.f32 %v5763_v39, %v5463_v29 }
 0x648   : > { %v6075_v49 = vmax.f32 %v5804_v63, 0.0 }
 0x64a   : > { %v6078_v58 = vmul.f32 %v6077_v50, %v6075_v49 }
 0x64c   : > { %v5799_v42 = vpop.permute.xlu1 %5798  ;;  %v5797_v36 = vpop.permute.xlu0 %5796  ;;  %v6080_v25 = vadd.f32 %v6078_v58, %v6073_v44 }
 0x64d   : > { %v5801_v11 = vsel %vm547_vm3, %v5797_v36, %v5799_v42  ;;  %v5909_v5 = vpop.permute.xlu2 %5908 }
 0x64e   : > { %v5805_v24 = vadd.f32 %v5801_v11, %v11687_v60 }
 0x650   : > { %v6076_v6 = vmax.f32 %v5805_v24, 0.0 }
 0x652   : > { %v6079_v53 = vmul.f32 %v6077_v50, %v6076_v6 }
 0x654   : > { %v5835_v23 = vpop.permute.xlu1 %5834  ;;  %v5833_v22 = vpop.permute.xlu0 %5832  ;;  %v6081_v21 = vadd.f32 %v6079_v53, %v6073_v44 }
 0x655   : > { %v5839_v8 = vsel %vm547_vm3, %v5835_v23, %v5837_v62  ;;  %v5838_v17 = vsel %vm547_vm3, %v5831_v45, %v5833_v22  ;;  %v6109_v22 = vstv %s6530_s24  ;;  %s6690_s24 = scalar_lea.hbm %s11942_s5, 32 }
 0x656   : > { %v5843_v0 = vadd.f32 %v5839_v8, %v11745_v61  ;;  %v5842_v1 = vadd.f32 %v5838_v17, %v11715_v41  ;;  %v6093_v61 = vstv %s6528_s19  ;;  %v5945_v41 = vpop.permute.xlu2 %5944  ;;  %p6692_p4 = scmp.lt.s32.totalorder %s6690_s24, %s6686_s17 }
 0x658   : > { %v6084_v60 = vmax.f32 %v5843_v0, 0.0  ;;  %v6083_v16 = vmax.f32 %v5842_v1, 0.0  ;;  %p6693_p7 = por %p6692_p4, %p6691_p3 }
 0x65a   : > { %v6087_v31 = vmul.f32 %v6085_v14, %v6084_v60  ;;  %v6086_v20 = vmul.f32 %v6085_v14, %v6083_v16  ;;  %v6117_v16 = vstv %s6531_s26  ;;  %p6694_p8 = pnand %p6693_p7, %p6689_p2 }
 0x65c   : > { %v6089_v47 = vadd.f32 %v6087_v31, %v6081_v21  ;;  %v6088_v54 = vadd.f32 %v6086_v20, %v6080_v25  ;;  %v5871_v30 = vpop.permute.xlu1 %5870  ;;  %v5869_v38 = vpop.permute.xlu0 %5868 }
 0x65d   : > { %v5876_v9 = vsel %vm547_vm3, %v5869_v38, %v5871_v30  ;;  %v6125_v38 = vstv %s6532_s27 }
 0x65e   : > { %v5880_v56 = vadd.f32 %v5876_v9, %v11743_v2  ;;  %v5951_v2 = vpop.permute.xlu2 %5950 }
 0x660   : > { %v6091_v59 = vmax.f32 %v5880_v56, 0.0 }
 0x662   : > { %v6094_v12 = vmul.f32 %v6093_v61, %v6091_v59 }
 0x664   : > { %v6096_v37 = vadd.f32 %v6094_v12, %v6088_v54  ;;  %v5907_v45 = vpop.permute.xlu1 %5906  ;;  %v5875_v10 = vpop.permute.xlu0 %5874 }
 0x665   : > { %v5914_v46 = vsel %vm547_vm3, %v5907_v45, %v5909_v5  ;;  %v5877_v34 = vsel %vm547_vm3, %v5873_v28, %v5875_v10 }
 0x666   : > { %v5918_v33 = vadd.f32 %v5914_v46, %v11798_v43  ;;  %v5881_v48 = vadd.f32 %v5877_v34, %v11771_v13  ;;  %v5987_v43 = vpop.permute.xlu2 %5986 }
 0x668   : > { %v6099_v18 = vmax.f32 %v5918_v33, 0.0  ;;  %v6092_v7 = vmax.f32 %v5881_v48, 0.0 }
 0x66a   : > { %v6102_v62 = vmul.f32 %v6101_v35, %v6099_v18  ;;  %v6095_v52 = vmul.f32 %v6093_v61, %v6092_v7 }
 0x66c   : > { %v6104_v29 = vadd.f32 %v6102_v62, %v6096_v37  ;;  %v6097_v57 = vadd.f32 %v6095_v52, %v6089_v47  ;;  %v5913_v4 = vpop.permute.xlu1 %5912  ;;  %v5911_v39 = vpop.permute.xlu0 %5910  ;;  %v6133_v52 = vstv %s6533_s6 }
 0x66d   : > { %v5915_v63 = vsel %vm547_vm3, %v5911_v39, %v5913_v4 }
 0x66e   : > { %v5919_v42 = vadd.f32 %v5915_v63, %v11796_v55  ;;  %v6023_v60 = vpop.permute.xlu2 %6022 }
 0x670   : > { %v6100_v28 = vmax.f32 %v5919_v42, 0.0 }
 0x672   : > { %v6103_v36 = vmul.f32 %v6101_v35, %v6100_v28 }
 0x674   : > { %v6105_v11 = vadd.f32 %v6103_v36, %v6097_v57  ;;  %v5949_v13 = vpop.permute.xlu1 %5948  ;;  %v5947_v24 = vpop.permute.xlu0 %5946 }
 0x675   : > { %v5953_v49 = vsel %vm547_vm3, %v5949_v13, %v5951_v2  ;;  %v5952_v6 = vsel %vm547_vm3, %v5945_v41, %v5947_v24 }
 0x676   : > { %v5957_v50 = vadd.f32 %v5953_v49, %v11835_v26  ;;  %v5956_v23 = vadd.f32 %v5952_v6, %v11816_v27 }
 0x678   : > { %v6108_v8 = vmax.f32 %v5957_v50, 0.0  ;;  %v6107_v17 = vmax.f32 %v5956_v23, 0.0 }
 0x67a   : > { %v6111_v55 = vmul.f32 %v6109_v22, %v6108_v8  ;;  %v6110_v5 = vmul.f32 %v6109_v22, %v6107_v17 }
 0x67c   : > { %v6113_v58 = vadd.f32 %v6111_v55, %v6105_v11  ;;  %v6112_v53 = vadd.f32 %v6110_v5, %v6104_v29  ;;  %v5985_v0 = vpop.permute.xlu1 %5984  ;;  %v5983_v1 = vpop.permute.xlu0 %5982 }
 0x67d   : > { %v5990_v44 = vsel %vm547_vm3, %v5983_v1, %v5985_v0 }
 0x67e   : > { %v5994_v14 = vadd.f32 %v5990_v44, %v11833_v3  ;;  %v6059_v3 = vpop.permute.xlu2 %6058 }
 0x680   : > { %v6115_v26 = vmax.f32 %v5994_v14, 0.0 }
 0x682   : > { %v6118_v25 = vmul.f32 %v6117_v16, %v6115_v26 }
 0x684   : > { %v6120_v27 = vadd.f32 %v6118_v25, %v6112_v53  ;;  %v6021_v21 = vpop.permute.xlu1 %6020  ;;  %v5989_v31 = vpop.permute.xlu0 %5988 }
 0x685   : > { %v6028_v20 = vsel %vm547_vm3, %v6021_v21, %v6023_v60  ;;  %v5991_v47 = vsel %vm547_vm3, %v5987_v43, %v5989_v31 }
 0x686   : > { %v6032_v54 = vadd.f32 %v6028_v20, %v11856_v40  ;;  %v5995_v30 = vadd.f32 %v5991_v47, %v11843_v32  ;;  %v6065_v40 = vpop.permute.xlu2 %6064 }
 0x688   : > { %v6123_v9 = vmax.f32 %v6032_v54, 0.0  ;;  %v6116_v56 = vmax.f32 %v5995_v30, 0.0 }
 0x68a   : > { %v6126_v61 = vmul.f32 %v6125_v38, %v6123_v9  ;;  %v6119_v41 = vmul.f32 %v6117_v16, %v6116_v56 }
 0x68c   : > { %v6128_v59 = vadd.f32 %v6126_v61, %v6120_v27  ;;  %v6121_v12 = vadd.f32 %v6119_v41, %v6113_v58  ;;  %v6027_v37 = vpop.permute.xlu1 %6026  ;;  %v6025_v45 = vpop.permute.xlu0 %6024 }
 0x68d   : > { %v6029_v10 = vsel %vm547_vm3, %v6025_v45, %v6027_v37 }
 0x68e   : > { %v6033_v46 = vadd.f32 %v6029_v10, %v11854_v15 }
 0x690   : > { %v6124_v34 = vmax.f32 %v6033_v46, 0.0 }
 0x692   : > { %v6127_v33 = vmul.f32 %v6125_v38, %v6124_v34 }
 0x694   : > { %v6129_v48 = vadd.f32 %v6127_v33, %v6121_v12  ;;  %v6063_v32 = vpop.permute.xlu1 %6062  ;;  %v6061_v35 = vpop.permute.xlu0 %6060 }
 0x695   : > { %v6067_v18 = vsel %vm547_vm3, %v6063_v32, %v6065_v40  ;;  %v6066_v7 = vsel %vm547_vm3, %v6059_v3, %v6061_v35 }
 0x696   : > { %v6071_v2 = vadd.f32 %v6067_v18, %v11869_v19  ;;  %v6070_v62 = vadd.f32 %v6066_v7, %v11862_v51 }
 0x698   : > { %v6132_v29 = vmax.f32 %v6071_v2, 0.0  ;;  %v6131_v57 = vmax.f32 %v6070_v62, 0.0 }
 0x69a   : > { %v6135_v15 = vmul.f32 %v6133_v52, %v6132_v29  ;;  %v6134_v4 = vmul.f32 %v6133_v52, %v6131_v57 }
 0x69c   : > { %v6137_v39 = vadd.f32 %v6135_v15, %v6129_v48  ;;  %v6136_v63 = vadd.f32 %v6134_v4, %v6128_v59 }
 0x69e   : > { %v6535_v42 = vmul.f32 -1.442695, %v6137_v39  ;;  %v6534_v28 = vmul.f32 -1.442695, %v6136_v63 }
 0x6a0   : > { %6617 = vpow2.f32 %v6535_v42 }
 0x6a1   : > { %6619 = vpow2.f32 %v6534_v28 }
 0x6a6   : > { %v6618_v36 = vpop.eup %6617 }
 0x6a7   : > { %v6620_v43 = vpop.eup %6619  ;;  %v6145_v11 = vadd.f32 1.0, %v6618_v36 }
 0x6a8   : > { %v6144_v19 = vadd.f32 1.0, %v6620_v43 }
 0x6a9   : > { %6621 = vrcp.f32 %v6145_v11  ;;  %v6172_v23 = vand.u32 2147483648, %v6145_v11  ;;  %v6170_v17 = vand.u32 2147483647, %v6145_v11  ;;  %vm6166_vm6 = vweird.f32 %v6145_v11 }
 0x6aa   : > { %6623 = vrcp.f32 %v6144_v19  ;;  %v6157_v22 = vand.u32 2147483648, %v6144_v19  ;;  %v6155_v5 = vand.u32 2147483647, %v6144_v19  ;;  %vm6151_vm7 = vweird.f32 %v6144_v19 }
 0x6ab   : > { %v6173_v0 = vor.u32 1.1754944e-38, %v6172_v23  ;;  %vm6171_vm10 = vcmp.eq.f32.partialorder %v6170_v17, 8.507059e+37 }
 0x6ac   : > { %v6158_v1 = vor.u32 1.1754944e-38, %v6157_v22  ;;  %vm6156_vm11 = vcmp.eq.f32.partialorder %v6155_v5, 8.507059e+37 }
 0x6af   : > { %v6622_v51 = vpop.eup %6621 }
 0x6b0   : > { %v6624_v13 = vpop.eup %6623  ;;  %v6162_v24 = vmul.f32 %v6622_v51, %v6145_v11  ;;  %vm6167_vm4 = vweird.f32 %v6622_v51 }
 0x6b1   : > { %v6147_v49 = vmul.f32 %v6624_v13, %v6144_v19  ;;  %vm6152_vm5 = vweird.f32 %v6624_v13  ;;  %vm6168_vm8 = vmor %vm6166_vm6, %vm6167_vm4 }
 0x6b2   : > { %v6163_v6 = vsub.f32 1.0, %v6162_v24  ;;  %vm6153_vm9 = vmor %vm6151_vm7, %vm6152_vm5 }
 0x6b3   : > { %v6148_v50 = vsub.f32 1.0, %v6147_v49 }
 0x6b4   : > { %v6164_v8 = vmul.f32 %v6622_v51, %v6163_v6 }
 0x6b5   : > { %v6149_v55 = vmul.f32 %v6624_v13, %v6148_v50 }
 0x6b6   : > { %v6165_v58 = vadd.f32 %v6622_v51, %v6164_v8 }
 0x6b7   : > { %v6150_v53 = vadd.f32 %v6624_v13, %v6149_v55 }
 0x6b8   : > { %v6169_v44 = vsel %vm6168_vm8, %v6622_v51, %v6165_v58 }
 0x6b9   : > { %v6154_v14 = vsel %vm6153_vm9, %v6624_v13, %v6150_v53  ;;  %v6174_v60 = vsel %vm6171_vm10, %v6173_v0, %v6169_v44 }
 0x6ba   : > { %v6159_v16 = vsel %vm6156_vm11, %v6158_v1, %v6154_v14  ;;  %6177 = vst [vmem:[%s257_s14 + $0x8] sm:$0xff] %v6174_v60 }
 0x6bb   : > { %6176 = vst [vmem:[%s257_s14] sm:$0xff] %v6159_v16 }
 0x6bc   : > { %6697 = shalt.err (!%p6694_p8)
}
 0x6bd   : > { %s6747_s6 = smov 128   ;;  %s6748_s7 = smov 8  }
 0x6be   : > { %6555 = dma.vmem_to_hbm [thread:$0]  (%p6820_p5), %s6192_s18, 256, %s6194_s4, %s6179_s15, %s6747_s6, %s6747_s6, %s6748_s7  }
 0x6bf PF: > { %p6577_p9 = scmp.ge.s32.totalorder %s6740_s23, 2  ;;  %s6208_s10 = sand.u32 1, %s6728_s20  }
 0x6c0   : > { %s6209_s11 = scalar_lea.sflag [#allocation4], %s6208_s10 }
 0x6c1   : > { %p6568_p10 = pnand %p6577_p9, %p6824_p6 }
 0x6c3   : > { %p6569_p11 = pneg %p6568_p10 }
 0x6c5   : > { %6723 = dma.done.wait (%p6569_p11), %s6209_s11, 256  }
 0x6c6   : > { %6725 = vsyncadd (%p6569_p11), %s6209_s11, 4294967040  ;;  %p18_p12 = scmp.ge.s32.totalorder %s6807_s25, 4   ;;  %s12780_s20 = smov %s6732_s21 }
 0x6c7   : > { %s12781_s21 = smov %s6736_s22  ;;  %s12782_s22 = smov %s6818_s28 }
 0x6c8   : > { %s12783_s23 = smov %s6807_s25  ;;  %20 = sbr.rel (!%p18_p12) target bundleno = 7 (0x7), region = 90 }
 0x6cd   :  { %6215 = vsyncpa [#allocation4], 1 }
 0x6ce   :  { %6217 = vsyncpa [#allocation4 + $0x1], 1 }
 0x6cf   :  { %6218 = vsyncpa [#allocation5], 1 }
 0x6d0   :  { %6220 = vsyncpa [#allocation5 + $0x1], 1 }
 0x6d1   :  { %6221 = vsyncpa [#allocation7], 1 }

</bundles_post_ra>
